<compile_context>
chip_gen: v7x
topology: tpu7x:2x2x1
jax: 0.10.0
libtpu: 0.0.40
codegen_flags: <defaults>
</compile_context>

<pallas_src>
import functools

import jax
import jax.numpy as jnp
from jax.experimental import pallas as pl
from jax.experimental.pallas import tpu as pltpu


# ----------------------------------------------------------------------------
# Pallas kernel: out = maybe_relu(x @ w + b), bf16 inputs, f32 accumulation
# ----------------------------------------------------------------------------
def _mm_bias_kernel(x_ref, w_ref, b_ref, o_ref, *, apply_relu):
    acc = jnp.dot(x_ref[...], w_ref[...], preferred_element_type=jnp.float32)
    acc = acc + b_ref[...]                      # (1, N) f32 broadcasts over rows
    if apply_relu:
        acc = jnp.maximum(acc, 0.0)
    o_ref[...] = acc.astype(o_ref.dtype)


def matmul_bias(x, w, b, *, relu, out_dtype, tm=256):
    """x: (M, K) bf16, w: (K, N) bf16 (pre-packed), b: (1, N) f32 -> (M, N)."""
    M, K = x.shape
    K2, N = w.shape
    assert K == K2, (K, K2)

    tm = M if M <= tm else tm                   # small M -> single full block
    grid_m = pl.cdiv(M, tm)

    flops = 2 * M * K * N
    bytes_accessed = ((M * K + K * N) * x.dtype.itemsize
                      + N * 4
                      + M * N * jnp.dtype(out_dtype).itemsize)

    return pl.pallas_call(
        functools.partial(_mm_bias_kernel, apply_relu=relu),
        out_shape=jax.ShapeDtypeStruct((M, N), out_dtype),
        grid_spec=pl.GridSpec(
            grid=(grid_m,),
            in_specs=[
                pl.BlockSpec((tm, K), lambda i: (i, 0)),   # full-K row tile
                pl.BlockSpec((K, N), lambda i: (0, 0)),    # weight, VMEM-resident
                pl.BlockSpec((1, N), lambda i: (0, 0)),    # bias, VMEM-resident
            ],
            out_specs=pl.BlockSpec((tm, N), lambda i: (i, 0)),
        ),
        compiler_params=pltpu.CompilerParams(dimension_semantics=("parallel",)),
        cost_estimate=pl.CostEstimate(
            flops=flops, transcendentals=0, bytes_accessed=bytes_accessed),
    )(x, w, b)


# ----------------------------------------------------------------------------
# Pallas kernel: fused fc1 (+ReLU) + merged actor/critic head
# ----------------------------------------------------------------------------
def _fc_head_kernel(x_ref, w1_ref, b1_ref, wh_ref, bh_ref,
                    logits_ref, value_ref, *, n_actions):
    h = jnp.dot(x_ref[...], w1_ref[...], preferred_element_type=jnp.float32)
    h = jnp.maximum(h + b1_ref[...], 0.0)                       # (tb, 512) f32
    o = jnp.dot(h.astype(wh_ref.dtype), wh_ref[...],
                preferred_element_type=jnp.float32)
    o = o + bh_ref[...]                                         # (tb, 13) f32
    logits_ref[...] = o[:, :n_actions].astype(logits_ref.dtype)
    value_ref[...] = o[:, n_actions:n_actions + 1].astype(value_ref.dtype)


def fc_heads(x, w1, b1, wh, bh, *, n_actions):
    """x:(B,1152) bf16, w1:(1152,512) bf16, wh:(512,13) bf16 -> ((B,12),(B,1)) f32."""
    B, K = x.shape
    K1, H = w1.shape
    H2, NH = wh.shape
    assert K == K1 and H == H2 and NH == n_actions + 1

    tb = B if B <= 256 else 256
    grid_b = pl.cdiv(B, tb)

    flops = 2 * B * K * H + 2 * B * H * NH
    bytes_accessed = ((B * K + K * H + H * NH) * x.dtype.itemsize
                      + (H + NH) * 4 + B * NH * 4)

    return pl.pallas_call(
        functools.partial(_fc_head_kernel, n_actions=n_actions),
        out_shape=(jax.ShapeDtypeStruct((B, n_actions), jnp.float32),
                   jax.ShapeDtypeStruct((B, 1), jnp.float32)),
        grid_spec=pl.GridSpec(
            grid=(grid_b,),
            in_specs=[
                pl.BlockSpec((tb, K), lambda i: (i, 0)),
                pl.BlockSpec((K, H), lambda i: (0, 0)),
                pl.BlockSpec((1, H), lambda i: (0, 0)),
                pl.BlockSpec((H, NH), lambda i: (0, 0)),
                pl.BlockSpec((1, NH), lambda i: (0, 0)),
            ],
            out_specs=[pl.BlockSpec((tb, n_actions), lambda i: (i, 0)),
                       pl.BlockSpec((tb, 1), lambda i: (i, 0))],
        ),
        compiler_params=pltpu.CompilerParams(dimension_semantics=("parallel",)),
        cost_estimate=pl.CostEstimate(
            flops=flops, transcendentals=0, bytes_accessed=bytes_accessed),
    )(x, w1, b1, wh, bh)


# ----------------------------------------------------------------------------
# im2col glue (pure indexing / layout plumbing in bf16; compute is in kernels)
# ----------------------------------------------------------------------------
def im2col(x_nhwc, *, k=3, stride=2, pad=1):
    B, H, W, C = x_nhwc.shape
    Ho = (H + 2 * pad - k) // stride + 1
    Wo = (W + 2 * pad - k) // stride + 1
    xp = jnp.pad(x_nhwc, ((0, 0), (pad, pad), (pad, pad), (0, 0)))
    cols = []
    for ky in range(k):
        for kx in range(k):
            cols.append(
                xp[:,
                   ky: ky + stride * (Ho - 1) + 1: stride,
                   kx: kx + stride * (Wo - 1) + 1: stride,
                   :]
            )
    patches = jnp.concatenate(cols, axis=-1)          # (B, Ho, Wo, k*k*C)
    return patches.reshape(B * Ho * Wo, k * k * C), (B, Ho, Wo)


def conv2d_relu(x_nhwc, w_packed, b, *, tm):
    """Conv(k=3, s=2, p=1) + bias + ReLU via im2col + fused Pallas GEMM."""
    patches, (B, Ho, Wo) = im2col(x_nhwc)
    OC = w_packed.shape[1]
    out = matmul_bias(patches, w_packed, b, relu=True,
                      out_dtype=jnp.bfloat16, tm=tm)   # (B*Ho*Wo, OC)
    return out.reshape(B, Ho, Wo, OC)


# ----------------------------------------------------------------------------
# Parameter init (PyTorch-equivalent distributions) + one-time packing
# ----------------------------------------------------------------------------
def init_params(key):
    ks = jax.random.split(key, 7)

    def kaiming_conv(k, oc, ic, kk=3):
        std = (2.0 / (ic * kk * kk)) ** 0.5
        return std * jax.random.normal(k, (oc, ic, kk, kk), jnp.float32)

    def kaiming_lin(k, out_f, in_f):
        std = (2.0 / in_f) ** 0.5
        return std * jax.random.normal(k, (out_f, in_f), jnp.float32)

    def xavier_lin(k, out_f, in_f):
        std = (2.0 / (in_f + out_f)) ** 0.5
        return std * jax.random.normal(k, (out_f, in_f), jnp.float32)

    return {
        "conv1_w": kaiming_conv(ks[0], 32, 4),  "conv1_b": jnp.zeros((32,), jnp.float32),
        "conv2_w": kaiming_conv(ks[1], 64, 32), "conv2_b": jnp.zeros((64,), jnp.float32),
        "conv3_w": kaiming_conv(ks[2], 64, 64), "conv3_b": jnp.zeros((64,), jnp.float32),
        "conv4_w": kaiming_conv(ks[3], 32, 64), "conv4_b": jnp.zeros((32,), jnp.float32),
        "fc1_w":   kaiming_lin(ks[4], 512, 6 * 6 * 32), "fc1_b": jnp.zeros((512,), jnp.float32),
        "actor_w": xavier_lin(ks[5], 12, 512),  "actor_b": jnp.zeros((12,), jnp.float32),
        "critic_w": xavier_lin(ks[6], 1, 512),  "critic_b": jnp.zeros((1,), jnp.float32),
    }


def pack_params(p):
    """One-time repack of PyTorch-layout params into kernel-friendly bf16 layout."""
    def pack_conv(w):  # (OC, IC, kH, kW) -> (kH*kW*IC, OC), matches im2col col order
        oc, ic, kh, kw = w.shape
        return jnp.transpose(w, (2, 3, 1, 0)).reshape(kh * kw * ic, oc).astype(jnp.bfloat16)

    # fc1 consumes PyTorch's NCHW flatten (c, h, w).  We feed the NHWC flatten
    # (h, w, c) instead and fold the permutation into the packed weight.
    fc1_w = p["fc1_w"].reshape(512, 32, 6, 6)                               # (out, c, h, w)
    fc1_w = jnp.transpose(fc1_w, (2, 3, 1, 0)).reshape(6 * 6 * 32, 512)     # (h*w*c, out)

    head_w = jnp.concatenate([p["actor_w"], p["critic_w"]], axis=0)         # (13, 512)
    head_b = jnp.concatenate([p["actor_b"], p["critic_b"]], axis=0)         # (13,)

    return {
        "c1_w": pack_conv(p["conv1_w"]), "c1_b": p["conv1_b"].reshape(1, -1),
        "c2_w": pack_conv(p["conv2_w"]), "c2_b": p["conv2_b"].reshape(1, -1),
        "c3_w": pack_conv(p["conv3_w"]), "c3_b": p["conv3_b"].reshape(1, -1),
        "c4_w": pack_conv(p["conv4_w"]), "c4_b": p["conv4_b"].reshape(1, -1),
        "fc1_w": fc1_w.astype(jnp.bfloat16), "fc1_b": p["fc1_b"].reshape(1, -1),
        "head_w": jnp.transpose(head_w).astype(jnp.bfloat16),               # (512, 13)
        "head_b": head_b.reshape(1, -1),                                    # (1, 13)
    }


# ----------------------------------------------------------------------------
# Forward pass (matches MarioModel.forward semantics)
# ----------------------------------------------------------------------------
def mario_forward(packed, x_nchw):
    B = x_nchw.shape[0]
    x = jnp.transpose(x_nchw, (0, 2, 3, 1)).astype(jnp.bfloat16)   # NCHW -> NHWC

    x = conv2d_relu(x, packed["c1_w"], packed["c1_b"], tm=1024)    # (B, 42, 42, 32)
    x = conv2d_relu(x, packed["c2_w"], packed["c2_b"], tm=512)     # (B, 21, 21, 64)
    x = conv2d_relu(x, packed["c3_w"], packed["c3_b"], tm=256)     # (B, 11, 11, 64)
    x = conv2d_relu(x, packed["c4_w"], packed["c4_b"], tm=128)     # (B,  6,  6, 32)

    # NHWC flatten; the (c,h,w)->(h,w,c) permutation lives in the packed fc1 weight.
    flat = x.reshape(B, 6 * 6 * 32)                                # (B, 1152) bf16

    logits, value = fc_heads(flat, packed["fc1_w"], packed["fc1_b"],
                             packed["head_w"], packed["head_b"], n_actions=12)
    return {"logits": logits, "value": value.reshape(-1)}


# ----------------------------------------------------------------------------
if __name__ == "__main__":
    key = jax.random.PRNGKey(0)
    pkey, xkey = jax.random.split(key)

    packed = pack_params(init_params(pkey))
    # fc1 expects 6*6*32 features => input spatial must be 84x84 (4 stride-2 convs).
    x = jax.random.normal(xkey, (2, 4, 84, 84), jnp.float32)

    fwd = jax.jit(mario_forward)
    out = jax.block_until_ready(fwd(packed, x))

    assert out["logits"].shape == (2, 12)
    assert out["value"].shape == (2,)
    print("KERNEL_OK")
</pallas_src>

<mosaic_0001>
module attributes {stable_mosaic.version = 11 : i64} {
  func.func @_mm_bias_kernel(%arg0: i32, %arg1: memref<1024x36xbf16, #tpu.memory_space<vmem>>, %arg2: memref<36x32xbf16, #tpu.memory_space<vmem>>, %arg3: memref<1x32xf32, #tpu.memory_space<vmem>>, %arg4: memref<1024x32xbf16, #tpu.memory_space<vmem>>) attributes {dimension_semantics = [#tpu.dimension_semantics<parallel>], iteration_bounds = array<i64: 4>, scalar_prefetch = 0 : i64, scratch_operands = 0 : i64, tpu.core_type = #tpu.core_type<tc>, window_params = [{transform_indices = @transform_0, window_bounds = array<i64: 1024, 36>}, {pipeline_mode = #tpu.pipeline_mode<synchronous>, transform_indices = @transform_1, window_bounds = array<i64: 36, 32>}, {pipeline_mode = #tpu.pipeline_mode<synchronous>, transform_indices = @transform_2, window_bounds = array<i64: 1, 32>}, {transform_indices = @transform_3, window_bounds = array<i64: 1024, 32>}]} {
    %c0 = arith.constant 0 : index
    %c0_0 = arith.constant 0 : index
    %0 = vector.load %arg1[%c0, %c0_0] : memref<1024x36xbf16, #tpu.memory_space<vmem>>, vector<1024x36xbf16>
    %c0_1 = arith.constant 0 : index
    %c0_2 = arith.constant 0 : index
    %1 = vector.load %arg2[%c0_1, %c0_2] : memref<36x32xbf16, #tpu.memory_space<vmem>>, vector<36x32xbf16>
    %cst = arith.constant dense<0.000000e+00> : vector<1024x32xf32>
    %2 = tpu.matmul %0, %1, %cst {dimension_numbers = #tpu.dot_dimension_numbers<[1], [0], [0], [1], [0, 0, 1, 1], [], []>} : vector<1024x36xbf16>, vector<36x32xbf16>, vector<1024x32xf32> -> vector<1024x32xf32>
    %c0_3 = arith.constant 0 : index
    %c0_4 = arith.constant 0 : index
    %3 = vector.load %arg3[%c0_3, %c0_4] : memref<1x32xf32, #tpu.memory_space<vmem>>, vector<1x32xf32>
    %4 = vector.broadcast %3 : vector<1x32xf32> to vector<1024x32xf32>
    %5 = arith.addf %2, %4 : vector<1024x32xf32>
    %cst_5 = arith.constant 0.000000e+00 : f32
    %6 = vector.broadcast %cst_5 : f32 to vector<1024x32xf32>
    %7 = arith.maximumf %5, %6 : vector<1024x32xf32>
    %8 = arith.truncf %7 : vector<1024x32xf32> to vector<1024x32xbf16>
    %c0_6 = arith.constant 0 : index
    %c0_7 = arith.constant 0 : index
    %9 = vector.load %arg4[%c0_6, %c0_7] : memref<1024x32xbf16, #tpu.memory_space<vmem>>, vector<1024x32xbf16>
    tpu.vector_store %arg4[%c0_6, %c0_7], %8 {strides = array<i32>} : memref<1024x32xbf16, #tpu.memory_space<vmem>>, vector<1024x32xbf16>,
    return
  }
  func.func @transform_0(%arg0: i32) -> (i32, i32) {
    %c0_i32 = arith.constant 0 : i32
    %c0_i32_0 = arith.constant 0 : i32
    return %arg0, %c0_i32 : i32, i32
  }
  func.func @transform_1(%arg0: i32) -> (i32, i32) {
    %c0_i32 = arith.constant 0 : i32
    %c0_i32_0 = arith.constant 0 : i32
    %c0_i32_1 = arith.constant 0 : i32
    return %c0_i32, %c0_i32_0 : i32, i32
  }
  func.func @transform_2(%arg0: i32) -> (i32, i32) {
    %c0_i32 = arith.constant 0 : i32
    %c0_i32_0 = arith.constant 0 : i32
    %c0_i32_1 = arith.constant 0 : i32
    return %c0_i32, %c0_i32_0 : i32, i32
  }
  func.func @transform_3(%arg0: i32) -> (i32, i32) {
    %c0_i32 = arith.constant 0 : i32
    %c0_i32_0 = arith.constant 0 : i32
    return %arg0, %c0_i32 : i32, i32
  }
}

module attributes {stable_mosaic.version = 11 : i64} {
  func.func @_mm_bias_kernel(%arg0: i32, %arg1: memref<512x288xbf16, #tpu.memory_space<vmem>>, %arg2: memref<288x64xbf16, #tpu.memory_space<vmem>>, %arg3: memref<1x64xf32, #tpu.memory_space<vmem>>, %arg4: memref<512x64xbf16, #tpu.memory_space<vmem>>) attributes {dimension_semantics = [#tpu.dimension_semantics<parallel>], iteration_bounds = array<i64: 2>, scalar_prefetch = 0 : i64, scratch_operands = 0 : i64, tpu.core_type = #tpu.core_type<tc>, window_params = [{transform_indices = @transform_0, window_bounds = array<i64: 512, 288>}, {pipeline_mode = #tpu.pipeline_mode<synchronous>, transform_indices = @transform_1, window_bounds = array<i64: 288, 64>}, {pipeline_mode = #tpu.pipeline_mode<synchronous>, transform_indices = @transform_2, window_bounds = array<i64: 1, 64>}, {transform_indices = @transform_3, window_bounds = array<i64: 512, 64>}]} {
    %c0 = arith.constant 0 : index
    %c0_0 = arith.constant 0 : index
    %0 = vector.load %arg1[%c0, %c0_0] : memref<512x288xbf16, #tpu.memory_space<vmem>>, vector<512x288xbf16>
    %c0_1 = arith.constant 0 : index
    %c0_2 = arith.constant 0 : index
    %1 = vector.load %arg2[%c0_1, %c0_2] : memref<288x64xbf16, #tpu.memory_space<vmem>>, vector<288x64xbf16>
    %cst = arith.constant dense<0.000000e+00> : vector<512x64xf32>
    %2 = tpu.matmul %0, %1, %cst {dimension_numbers = #tpu.dot_dimension_numbers<[1], [0], [0], [1], [0, 0, 1, 1], [], []>} : vector<512x288xbf16>, vector<288x64xbf16>, vector<512x64xf32> -> vector<512x64xf32>
    %c0_3 = arith.constant 0 : index
    %c0_4 = arith.constant 0 : index
    %3 = vector.load %arg3[%c0_3, %c0_4] : memref<1x64xf32, #tpu.memory_space<vmem>>, vector<1x64xf32>
    %4 = vector.broadcast %3 : vector<1x64xf32> to vector<512x64xf32>
    %5 = arith.addf %2, %4 : vector<512x64xf32>
    %cst_5 = arith.constant 0.000000e+00 : f32
    %6 = vector.broadcast %cst_5 : f32 to vector<512x64xf32>
    %7 = arith.maximumf %5, %6 : vector<512x64xf32>
    %8 = arith.truncf %7 : vector<512x64xf32> to vector<512x64xbf16>
    %c0_6 = arith.constant 0 : index
    %c0_7 = arith.constant 0 : index
    %9 = vector.load %arg4[%c0_6, %c0_7] : memref<512x64xbf16, #tpu.memory_space<vmem>>, vector<512x64xbf16>
    tpu.vector_store %arg4[%c0_6, %c0_7], %8 {strides = array<i32>} : memref<512x64xbf16, #tpu.memory_space<vmem>>, vector<512x64xbf16>,
    return
  }
  func.func @transform_0(%arg0: i32) -> (i32, i32) {
    %c0_i32 = arith.constant 0 : i32
    %c0_i32_0 = arith.constant 0 : i32
    return %arg0, %c0_i32 : i32, i32
  }
  func.func @transform_1(%arg0: i32) -> (i32, i32) {
    %c0_i32 = arith.constant 0 : i32
    %c0_i32_0 = arith.constant 0 : i32
    %c0_i32_1 = arith.constant 0 : i32
    return %c0_i32, %c0_i32_0 : i32, i32
  }
  func.func @transform_2(%arg0: i32) -> (i32, i32) {
    %c0_i32 = arith.constant 0 : i32
    %c0_i32_0 = arith.constant 0 : i32
    %c0_i32_1 = arith.constant 0 : i32
    return %c0_i32, %c0_i32_0 : i32, i32
  }
  func.func @transform_3(%arg0: i32) -> (i32, i32) {
    %c0_i32 = arith.constant 0 : i32
    %c0_i32_0 = arith.constant 0 : i32
    return %arg0, %c0_i32 : i32, i32
  }
}

module attributes {stable_mosaic.version = 11 : i64} {
  func.func @_mm_bias_kernel(%arg0: i32, %arg1: memref<242x576xbf16, #tpu.memory_space<vmem>>, %arg2: memref<576x64xbf16, #tpu.memory_space<vmem>>, %arg3: memref<1x64xf32, #tpu.memory_space<vmem>>, %arg4: memref<242x64xbf16, #tpu.memory_space<vmem>>) attributes {dimension_semantics = [#tpu.dimension_semantics<parallel>], iteration_bounds = array<i64: 1>, scalar_prefetch = 0 : i64, scratch_operands = 0 : i64, tpu.core_type = #tpu.core_type<tc>, window_params = [{transform_indices = @transform_0, window_bounds = array<i64: 242, 576>}, {pipeline_mode = #tpu.pipeline_mode<synchronous>, transform_indices = @transform_1, window_bounds = array<i64: 576, 64>}, {pipeline_mode = #tpu.pipeline_mode<synchronous>, transform_indices = @transform_2, window_bounds = array<i64: 1, 64>}, {transform_indices = @transform_3, window_bounds = array<i64: 242, 64>}]} {
    %c0 = arith.constant 0 : index
    %c0_0 = arith.constant 0 : index
    %0 = vector.load %arg1[%c0, %c0_0] : memref<242x576xbf16, #tpu.memory_space<vmem>>, vector<242x576xbf16>
    %c0_1 = arith.constant 0 : index
    %c0_2 = arith.constant 0 : index
    %1 = vector.load %arg2[%c0_1, %c0_2] : memref<576x64xbf16, #tpu.memory_space<vmem>>, vector<576x64xbf16>
    %cst = arith.constant dense<0.000000e+00> : vector<242x64xf32>
    %2 = tpu.matmul %0, %1, %cst {dimension_numbers = #tpu.dot_dimension_numbers<[1], [0], [0], [1], [0, 0, 1, 1], [], []>} : vector<242x576xbf16>, vector<576x64xbf16>, vector<242x64xf32> -> vector<242x64xf32>
    %c0_3 = arith.constant 0 : index
    %c0_4 = arith.constant 0 : index
    %3 = vector.load %arg3[%c0_3, %c0_4] : memref<1x64xf32, #tpu.memory_space<vmem>>, vector<1x64xf32>
    %4 = vector.broadcast %3 : vector<1x64xf32> to vector<242x64xf32>
    %5 = arith.addf %2, %4 : vector<242x64xf32>
    %cst_5 = arith.constant 0.000000e+00 : f32
    %6 = vector.broadcast %cst_5 : f32 to vector<242x64xf32>
    %7 = arith.maximumf %5, %6 : vector<242x64xf32>
    %8 = arith.truncf %7 : vector<242x64xf32> to vector<242x64xbf16>
    %c0_6 = arith.constant 0 : index
    %c0_7 = arith.constant 0 : index
    %9 = vector.load %arg4[%c0_6, %c0_7] : memref<242x64xbf16, #tpu.memory_space<vmem>>, vector<242x64xbf16>
    tpu.vector_store %arg4[%c0_6, %c0_7], %8 {strides = array<i32>} : memref<242x64xbf16, #tpu.memory_space<vmem>>, vector<242x64xbf16>,
    return
  }
  func.func @transform_0(%arg0: i32) -> (i32, i32) {
    %c0_i32 = arith.constant 0 : i32
    %c0_i32_0 = arith.constant 0 : i32
    return %arg0, %c0_i32 : i32, i32
  }
  func.func @transform_1(%arg0: i32) -> (i32, i32) {
    %c0_i32 = arith.constant 0 : i32
    %c0_i32_0 = arith.constant 0 : i32
    %c0_i32_1 = arith.constant 0 : i32
    return %c0_i32, %c0_i32_0 : i32, i32
  }
  func.func @transform_2(%arg0: i32) -> (i32, i32) {
    %c0_i32 = arith.constant 0 : i32
    %c0_i32_0 = arith.constant 0 : i32
    %c0_i32_1 = arith.constant 0 : i32
    return %c0_i32, %c0_i32_0 : i32, i32
  }
  func.func @transform_3(%arg0: i32) -> (i32, i32) {
    %c0_i32 = arith.constant 0 : i32
    %c0_i32_0 = arith.constant 0 : i32
    return %arg0, %c0_i32 : i32, i32
  }
}

module attributes {stable_mosaic.version = 11 : i64} {
  func.func @_mm_bias_kernel(%arg0: i32, %arg1: memref<72x576xbf16, #tpu.memory_space<vmem>>, %arg2: memref<576x32xbf16, #tpu.memory_space<vmem>>, %arg3: memref<1x32xf32, #tpu.memory_space<vmem>>, %arg4: memref<72x32xbf16, #tpu.memory_space<vmem>>) attributes {dimension_semantics = [#tpu.dimension_semantics<parallel>], iteration_bounds = array<i64: 1>, scalar_prefetch = 0 : i64, scratch_operands = 0 : i64, tpu.core_type = #tpu.core_type<tc>, window_params = [{transform_indices = @transform_0, window_bounds = array<i64: 72, 576>}, {pipeline_mode = #tpu.pipeline_mode<synchronous>, transform_indices = @transform_1, window_bounds = array<i64: 576, 32>}, {pipeline_mode = #tpu.pipeline_mode<synchronous>, transform_indices = @transform_2, window_bounds = array<i64: 1, 32>}, {transform_indices = @transform_3, window_bounds = array<i64: 72, 32>}]} {
    %c0 = arith.constant 0 : index
    %c0_0 = arith.constant 0 : index
    %0 = vector.load %arg1[%c0, %c0_0] : memref<72x576xbf16, #tpu.memory_space<vmem>>, vector<72x576xbf16>
    %c0_1 = arith.constant 0 : index
    %c0_2 = arith.constant 0 : index
    %1 = vector.load %arg2[%c0_1, %c0_2] : memref<576x32xbf16, #tpu.memory_space<vmem>>, vector<576x32xbf16>
    %cst = arith.constant dense<0.000000e+00> : vector<72x32xf32>
    %2 = tpu.matmul %0, %1, %cst {dimension_numbers = #tpu.dot_dimension_numbers<[1], [0], [0], [1], [0, 0, 1, 1], [], []>} : vector<72x576xbf16>, vector<576x32xbf16>, vector<72x32xf32> -> vector<72x32xf32>
    %c0_3 = arith.constant 0 : index
    %c0_4 = arith.constant 0 : index
    %3 = vector.load %arg3[%c0_3, %c0_4] : memref<1x32xf32, #tpu.memory_space<vmem>>, vector<1x32xf32>
    %4 = vector.broadcast %3 : vector<1x32xf32> to vector<72x32xf32>
    %5 = arith.addf %2, %4 : vector<72x32xf32>
    %cst_5 = arith.constant 0.000000e+00 : f32
    %6 = vector.broadcast %cst_5 : f32 to vector<72x32xf32>
    %7 = arith.maximumf %5, %6 : vector<72x32xf32>
    %8 = arith.truncf %7 : vector<72x32xf32> to vector<72x32xbf16>
    %c0_6 = arith.constant 0 : index
    %c0_7 = arith.constant 0 : index
    %9 = vector.load %arg4[%c0_6, %c0_7] : memref<72x32xbf16, #tpu.memory_space<vmem>>, vector<72x32xbf16>
    tpu.vector_store %arg4[%c0_6, %c0_7], %8 {strides = array<i32>} : memref<72x32xbf16, #tpu.memory_space<vmem>>, vector<72x32xbf16>,
    return
  }
  func.func @transform_0(%arg0: i32) -> (i32, i32) {
    %c0_i32 = arith.constant 0 : i32
    %c0_i32_0 = arith.constant 0 : i32
    return %arg0, %c0_i32 : i32, i32
  }
  func.func @transform_1(%arg0: i32) -> (i32, i32) {
    %c0_i32 = arith.constant 0 : i32
    %c0_i32_0 = arith.constant 0 : i32
    %c0_i32_1 = arith.constant 0 : i32
    return %c0_i32, %c0_i32_0 : i32, i32
  }
  func.func @transform_2(%arg0: i32) -> (i32, i32) {
    %c0_i32 = arith.constant 0 : i32
    %c0_i32_0 = arith.constant 0 : i32
    %c0_i32_1 = arith.constant 0 : i32
    return %c0_i32, %c0_i32_0 : i32, i32
  }
  func.func @transform_3(%arg0: i32) -> (i32, i32) {
    %c0_i32 = arith.constant 0 : i32
    %c0_i32_0 = arith.constant 0 : i32
    return %arg0, %c0_i32 : i32, i32
  }
}

module attributes {stable_mosaic.version = 11 : i64} {
  func.func @_fc_head_kernel(%arg0: i32, %arg1: memref<2x1152xbf16, #tpu.memory_space<vmem>>, %arg2: memref<1152x512xbf16, #tpu.memory_space<vmem>>, %arg3: memref<1x512xf32, #tpu.memory_space<vmem>>, %arg4: memref<512x13xbf16, #tpu.memory_space<vmem>>, %arg5: memref<1x13xf32, #tpu.memory_space<vmem>>, %arg6: memref<2x12xf32, #tpu.memory_space<vmem>>, %arg7: memref<2x1xf32, #tpu.memory_space<vmem>>) attributes {dimension_semantics = [#tpu.dimension_semantics<parallel>], iteration_bounds = array<i64: 1>, scalar_prefetch = 0 : i64, scratch_operands = 0 : i64, tpu.core_type = #tpu.core_type<tc>, window_params = [{transform_indices = @transform_0, window_bounds = array<i64: 2, 1152>}, {pipeline_mode = #tpu.pipeline_mode<synchronous>, transform_indices = @transform_1, window_bounds = array<i64: 1152, 512>}, {pipeline_mode = #tpu.pipeline_mode<synchronous>, transform_indices = @transform_2, window_bounds = array<i64: 1, 512>}, {pipeline_mode = #tpu.pipeline_mode<synchronous>, transform_indices = @transform_3, window_bounds = array<i64: 512, 13>}, {pipeline_mode = #tpu.pipeline_mode<synchronous>, transform_indices = @transform_4, window_bounds = array<i64: 1, 13>}, {transform_indices = @transform_5, window_bounds = array<i64: 2, 12>}, {transform_indices = @transform_6, window_bounds = array<i64: 2, 1>}]} {
    %c0 = arith.constant 0 : index
    %c0_0 = arith.constant 0 : index
    %0 = vector.load %arg1[%c0, %c0_0] : memref<2x1152xbf16, #tpu.memory_space<vmem>>, vector<2x1152xbf16>
    %c0_1 = arith.constant 0 : index
    %c0_2 = arith.constant 0 : index
    %1 = vector.load %arg2[%c0_1, %c0_2] : memref<1152x512xbf16, #tpu.memory_space<vmem>>, vector<1152x512xbf16>
    %cst = arith.constant dense<0.000000e+00> : vector<2x512xf32>
    %2 = tpu.matmul %0, %1, %cst {dimension_numbers = #tpu.dot_dimension_numbers<[1], [0], [0], [1], [0, 0, 1, 1], [], []>} : vector<2x1152xbf16>, vector<1152x512xbf16>, vector<2x512xf32> -> vector<2x512xf32>
    %c0_3 = arith.constant 0 : index
    %c0_4 = arith.constant 0 : index
    %3 = vector.load %arg3[%c0_3, %c0_4] : memref<1x512xf32, #tpu.memory_space<vmem>>, vector<1x512xf32>
    %4 = vector.broadcast %3 : vector<1x512xf32> to vector<2x512xf32>
    %5 = arith.addf %2, %4 : vector<2x512xf32>
    %cst_5 = arith.constant 0.000000e+00 : f32
    %6 = vector.broadcast %cst_5 : f32 to vector<2x512xf32>
    %7 = arith.maximumf %5, %6 : vector<2x512xf32>
    %8 = arith.truncf %7 : vector<2x512xf32> to vector<2x512xbf16>
    %c0_6 = arith.constant 0 : index
    %c0_7 = arith.constant 0 : index
    %9 = vector.load %arg4[%c0_6, %c0_7] : memref<512x13xbf16, #tpu.memory_space<vmem>>, vector<512x13xbf16>
    %cst_8 = arith.constant dense<0.000000e+00> : vector<2x13xf32>
    %10 = tpu.matmul %8, %9, %cst_8 {dimension_numbers = #tpu.dot_dimension_numbers<[1], [0], [0], [1], [0, 0, 1, 1], [], []>} : vector<2x512xbf16>, vector<512x13xbf16>, vector<2x13xf32> -> vector<2x13xf32>
    %c0_9 = arith.constant 0 : index
    %c0_10 = arith.constant 0 : index
    %11 = vector.load %arg5[%c0_9, %c0_10] : memref<1x13xf32, #tpu.memory_space<vmem>>, vector<1x13xf32>
    %12 = vector.broadcast %11 : vector<1x13xf32> to vector<2x13xf32>
    %13 = arith.addf %10, %12 : vector<2x13xf32>
    %14 = vector.extract_strided_slice %13 {offsets = [0, 0], sizes = [2, 12], strides = [1, 1]} : vector<2x13xf32> to vector<2x12xf32>
    %c0_11 = arith.constant 0 : index
    %c0_12 = arith.constant 0 : index
    %15 = vector.load %arg6[%c0_11, %c0_12] : memref<2x12xf32, #tpu.memory_space<vmem>>, vector<2x12xf32>
    tpu.vector_store %arg6[%c0_11, %c0_12], %14 {strides = array<i32>} : memref<2x12xf32, #tpu.memory_space<vmem>>, vector<2x12xf32>,
    %16 = vector.extract_strided_slice %13 {offsets = [0, 12], sizes = [2, 1], strides = [1, 1]} : vector<2x13xf32> to vector<2x1xf32>
    %c0_13 = arith.constant 0 : index
    %c0_14 = arith.constant 0 : index
    %17 = vector.load %arg7[%c0_13, %c0_14] : memref<2x1xf32, #tpu.memory_space<vmem>>, vector<2x1xf32>
    tpu.vector_store %arg7[%c0_13, %c0_14], %16 {strides = array<i32>} : memref<2x1xf32, #tpu.memory_space<vmem>>, vector<2x1xf32>,
    return
  }
  func.func @transform_0(%arg0: i32) -> (i32, i32) {
    %c0_i32 = arith.constant 0 : i32
    %c0_i32_0 = arith.constant 0 : i32
    return %arg0, %c0_i32 : i32, i32
  }
  func.func @transform_1(%arg0: i32) -> (i32, i32) {
    %c0_i32 = arith.constant 0 : i32
    %c0_i32_0 = arith.constant 0 : i32
    %c0_i32_1 = arith.constant 0 : i32
    return %c0_i32, %c0_i32_0 : i32, i32
  }
  func.func @transform_2(%arg0: i32) -> (i32, i32) {
    %c0_i32 = arith.constant 0 : i32
    %c0_i32_0 = arith.constant 0 : i32
    %c0_i32_1 = arith.constant 0 : i32
    return %c0_i32, %c0_i32_0 : i32, i32
  }
  func.func @transform_3(%arg0: i32) -> (i32, i32) {
    %c0_i32 = arith.constant 0 : i32
    %c0_i32_0 = arith.constant 0 : i32
    %c0_i32_1 = arith.constant 0 : i32
    return %c0_i32, %c0_i32_0 : i32, i32
  }
  func.func @transform_4(%arg0: i32) -> (i32, i32) {
    %c0_i32 = arith.constant 0 : i32
    %c0_i32_0 = arith.constant 0 : i32
    %c0_i32_1 = arith.constant 0 : i32
    return %c0_i32, %c0_i32_0 : i32, i32
  }
  func.func @transform_5(%arg0: i32) -> (i32, i32) {
    %c0_i32 = arith.constant 0 : i32
    %c0_i32_0 = arith.constant 0 : i32
    return %arg0, %c0_i32 : i32, i32
  }
  func.func @transform_6(%arg0: i32) -> (i32, i32) {
    %c0_i32 = arith.constant 0 : i32
    %c0_i32_0 = arith.constant 0 : i32
    return %arg0, %c0_i32 : i32, i32
  }
}

</mosaic_0001>

<bundles_post_ra>
// kernel: mario_forward.5
= control target key start
LH: loop header
LB: loop body
LE: loop exit
PB: predicated region body
PF: predicated region fallthrough
CT: control target
= control target key end

     0   :  { %s3533_s12 = smov 0   ;;  %s3535_s13 = smov 0   ;;  %s4305_s0 = inlined_call_operand.vmem [shape: bf16[3528,36], index: 0, kind: input, shape index: {}]   ;;  %s4306_s1 = inlined_call_operand.vmem [shape: bf16[36,32], index: 1, kind: input, shape index: {}]   ;;  %s4307_s2 = inlined_call_operand.vmem [shape: f32[1,32], index: 2, kind: input, shape index: {}]   ;;  %s4308_s3 = inlined_call_operand.vmem [shape: bf16[3528,32], index: 3, kind: output, shape index: {}]  }
   0x1   :  { %s3537_s14 = smov 0  }
   0x2 LB: > { %s3546_s15 = sadd.s32 4294967295, %s3479_s14   ;;  %s3548_s16 = sadd.s32 1, %s3479_s14   ;;  %s3479_s14 = sphi %s3537_s14, %s4315_s14   ;;  %s3475_s13 = sphi %s3535_s13, %s4314_s13   ;;  %s3471_s12 = sphi %s3533_s12, %s4313_s12  }
   0x3   : > { %s85_s17 = ssub.s32 %s3479_s14, %s3548_s16  ;;  %s88_s18 = sadd.s32 1, %s3475_s13 }
   0x4   : > { %p86_p0 = scmp.eq.s32.totalorder %s85_s17, 0  ;;  %p98_p1 = scmp.ne.s32.totalorder %s3475_s13, %s3471_s12 }
   0x5   : > { %p99_p2 = scmp.eq.s32.totalorder %s3546_s15, 3  ;;  %p2648_p3 = scmp.ge.s32.totalorder %s3479_s14, 1 }
   0x6   : > { %s3556_s19 = scalar_select %p86_p0, %s3475_s13, %s88_s18  }
   0x7   : > { %p3558_p4 = por %p99_p2, %p98_p1  ;;  %p146_p5 = scmp.lt.s32.totalorder %s3479_s14, 5 }
   0x9   : > { %p147_p6 = pnand %p2648_p3, %p146_p5 }
   0xa   : > { %v3357_v0 = vld [vmem:[%s4306_s1] sm:$0xff] (!%p147_p6)   ;;  %v3358_v1 = vld [vmem:[%s4306_s1 + $0x8] sm:$0xff] (!%p147_p6)   ;;  %s3569_s25 = sshll.u32 (!%p147_p6), %s3546_s15, 7  ;;  %v3359_v2 = vld [vmem:[%s4306_s1 + $0x10] ss:$0 sps:$4 sm:$0x33] (!%p147_p6)  }
   0xb   : > { %150 = sbr.rel (%p147_p6) target bundleno = 458 (0x1ca), region = 32  ;;  %3127 = vmatprep.subr.bf16.mxu0 (!%p147_p6), %v3357_v0  ;;  %3261 = vmatprep.subr.bf16.mxu1 (!%p147_p6), %v3357_v0  ;;  %p178_p7 = scmp.lt.s32.totalorder (!%p147_p6), %s3569_s25, 440  ;;  %vm861_vm0 = vcmask (!%p147_p6), 1041408   ;;  %vm668_vm1 = vcmask (!%p147_p6), 293888   ;;  %vm2050_vm2 = vcmask (!%p147_p6), 257024  }
   0xc   : > { %3128 = vmatpush3.bf16.msra.mxu0 (!%p147_p6), %v3357_v0  ;;  %3264 = vmatpush3.bf16.msra.mxu1 (!%p147_p6), %v3357_v0  ;;  %v863_v3 = vsel (!%p147_p6), %vm861_vm0, %v3359_v2, 0  ;;  %s170_s6 = sand.u32 (!%p147_p6), 1, %s3471_s12  }
   0xd   : > { %3129 = vmatprep.subr.bf16.mxu0 (!%p147_p6), %v3358_v1  ;;  %3262 = vmatprep.subr.bf16.mxu1 (!%p147_p6), %v3358_v1  ;;  %s2649_s9 = sshll.u32 (!%p147_p6), %s170_s6, 9 }
   0xe   : > { %s3723_s10 = scalar_lea.vmem (!%p147_p6), [#allocation2], %s2649_s9  }
  0x10   : > { %3130 = vmatpush3.bf16.msra.mxu0 (!%p147_p6), %v3358_v1  ;;  %3265 = vmatpush3.bf16.msra.mxu1 (!%p147_p6), %v3358_v1 }
  0x11   : > { %3267 = vmatprep.subr.msk.bf16.mxu0 (!%p147_p6), %vm861_vm0, %v3359_v2  ;;  %3268 = vmatprep.subr.msk.bf16.mxu1 (!%p147_p6), %vm861_vm0, %v3359_v2 }
  0x12   : > { %s179_s28 = scalar_select %p178_p7, %s3569_s25, 440 }
  0x13   : > { %s2187_s14 = ssub.s32 (%p3558_p4), 441, %s3569_s25  ;;  %s3057_s17 = sshll.u32 (%p3558_p4), %s3546_s15, 9 }
  0x14   : > { %s2651_s29 = sshll.u32 %s179_s28, 2  ;;  %3132 = vmatpush3.bf16.msra.mxu0 %v863_v3  ;;  %3266 = vmatpush3.bf16.msra.mxu1 %v863_v3  ;;  %p2188_p8 = scmp.lt.s32.totalorder (%p3558_p4), %s2187_s14, 128 }
  0x15   : > { %s3579_s5 = scalar_lea.vmem %s4305_s0, %s2651_s29  ;;  %s4113_s22 = scalar_lea.vmem (%p3558_p4), %s4308_s3, %s3057_s17  }
  0x16   : > { %v3360_v4 = vld [vmem:[%s3579_s5] sm:$0xff]   ;;  %v3362_v6 = vld [vmem:[%s3579_s5 + $0x8] sm:$0xff]   ;;  %v3364_v8 = vld [vmem:[%s3579_s5 + $0x10] sm:$0xff]  }
  0x17   : > { %v3361_v5 = vld [vmem:[%s3579_s5 + $0x100] sm:$0xff]   ;;  %3133 = vmatprep.mubr.msk.bf16.mxu0 %vm668_vm1, %v3360_v4  ;;  %v3363_v7 = vld [vmem:[%s3579_s5 + $0x108] sm:$0xff]   ;;  %v3365_v9 = vld [vmem:[%s3579_s5 + $0x110] sm:$0xff]  }
  0x18   : > { %3197 = vmatprep.mubr.msk.bf16.mxu1 %vm668_vm1, %v3361_v5  ;;  %3134 = vmatmul.mubr.msk.bf16.vlgmr.msra.gmra.mrb[0].mxu0 %vm668_vm1, %v3362_v6  ;;  %v3366_v10 = vld [vmem:[%s3579_s5 + $0x18] sm:$0xff]   ;;  %v3368_v12 = vld [vmem:[%s3579_s5 + $0x20] sm:$0xff]   ;;  %v3370_v14 = vld [vmem:[%s3579_s5 + $0x28] sm:$0xff]  }
  0x19   : > { %3198 = vmatmul.mubr.msk.bf16.vlgmr.msra.gmra.mrb[0].mxu1 %vm668_vm1, %v3363_v7  ;;  %3137 = vmatprep.mubr.msk.bf16.mxu0 %vm668_vm1, %v3364_v8  ;;  %v3367_v11 = vld [vmem:[%s3579_s5 + $0x118] sm:$0xff]   ;;  %v3369_v13 = vld [vmem:[%s3579_s5 + $0x120] sm:$0xff]   ;;  %v3371_v15 = vld [vmem:[%s3579_s5 + $0x128] sm:$0xff]  }
  0x1a   : > { %3201 = vmatprep.mubr.msk.bf16.mxu1 %vm668_vm1, %v3365_v9  ;;  %v3372_v16 = vld [vmem:[%s3579_s5 + $0x30] sm:$0xff]   ;;  %v3374_v18 = vld [vmem:[%s3579_s5 + $0x38] sm:$0xff]   ;;  %v3376_v20 = vld [vmem:[%s3579_s5 + $0x40] sm:$0xff]  }
  0x1b   : > { %v3373_v17 = vld [vmem:[%s3579_s5 + $0x130] sm:$0xff]   ;;  %v3375_v19 = vld [vmem:[%s3579_s5 + $0x138] sm:$0xff]   ;;  %v3377_v21 = vld [vmem:[%s3579_s5 + $0x140] sm:$0xff]  }
  0x1c   : > { %v3378_v22 = vld [vmem:[%s3579_s5 + $0x48] sm:$0xff]   ;;  %v3380_v24 = vld [vmem:[%s3579_s5 + $0x50] sm:$0xff]   ;;  %v3382_v26 = vld [vmem:[%s3579_s5 + $0x58] sm:$0xff]  }
  0x1d   : > { %v3379_v23 = vld [vmem:[%s3579_s5 + $0x148] sm:$0xff]   ;;  %v3381_v25 = vld [vmem:[%s3579_s5 + $0x150] sm:$0xff]   ;;  %v3383_v27 = vld [vmem:[%s3579_s5 + $0x158] sm:$0xff]  }
  0x1e   : > { %v3384_v28 = vld [vmem:[%s3579_s5 + $0x60] sm:$0xff]   ;;  %v3386_v30 = vld [vmem:[%s3579_s5 + $0x68] sm:$0xff]   ;;  %v3388_v32 = vld [vmem:[%s3579_s5 + $0x70] sm:$0xff]  }
  0x1f   : > { %v3385_v29 = vld [vmem:[%s3579_s5 + $0x160] sm:$0xff]   ;;  %v3387_v31 = vld [vmem:[%s3579_s5 + $0x168] sm:$0xff]   ;;  %v3389_v33 = vld [vmem:[%s3579_s5 + $0x170] sm:$0xff]  }
  0x20   : > { %3138 = vmatmul.mubr.msk.bf16.gmra.mrb[4].mxu0 %vm668_vm1, %v3366_v10  ;;  %v3390_v34 = vld [vmem:[%s3579_s5 + $0x78] sm:$0xff]   ;;  %v3392_v36 = vld [vmem:[%s3579_s5 + $0x80] sm:$0xff]   ;;  %v3394_v38 = vld [vmem:[%s3579_s5 + $0x88] sm:$0xff]  }
  0x21   : > { %3202 = vmatmul.mubr.msk.bf16.gmra.mrb[4].mxu1 %vm668_vm1, %v3367_v11  ;;  %3141 = vmatprep.mubr.msk.bf16.mxu0 %vm668_vm1, %v3368_v12  ;;  %v3391_v35 = vld [vmem:[%s3579_s5 + $0x178] sm:$0xff]   ;;  %v3393_v37 = vld [vmem:[%s3579_s5 + $0x180] sm:$0xff]   ;;  %v3395_v39 = vld [vmem:[%s3579_s5 + $0x188] sm:$0xff]  }
  0x22   : > { %3205 = vmatprep.mubr.msk.bf16.mxu1 %vm668_vm1, %v3369_v13  ;;  %v3396_v40 = vld [vmem:[%s3579_s5 + $0x90] sm:$0xff]   ;;  %v3398_v42 = vld [vmem:[%s3579_s5 + $0x98] sm:$0xff]   ;;  %v3400_v44 = vld [vmem:[%s3579_s5 + $0xa0] sm:$0xff]  }
  0x23   : > { %v3397_v41 = vld [vmem:[%s3579_s5 + $0x190] sm:$0xff]   ;;  %v3399_v43 = vld [vmem:[%s3579_s5 + $0x198] sm:$0xff]   ;;  %v3401_v45 = vld [vmem:[%s3579_s5 + $0x1a0] sm:$0xff]  }
  0x24   : > { %v3402_v46 = vld [vmem:[%s3579_s5 + $0xa8] sm:$0xff]   ;;  %v3404_v48 = vld [vmem:[%s3579_s5 + $0xb0] sm:$0xff]   ;;  %v3406_v50 = vld [vmem:[%s3579_s5 + $0xb8] sm:$0xff]  }
  0x25   : > { %v3403_v47 = vld [vmem:[%s3579_s5 + $0x1a8] sm:$0xff]   ;;  %v3405_v49 = vld [vmem:[%s3579_s5 + $0x1b0] sm:$0xff]   ;;  %v3407_v51 = vld [vmem:[%s3579_s5 + $0x1b8] sm:$0xff]  }
  0x26   : > { %v3408_v52 = vld [vmem:[%s3579_s5 + $0xc0] sm:$0xff]   ;;  %v3410_v54 = vld [vmem:[%s3579_s5 + $0xc8] sm:$0xff]   ;;  %v3412_v56 = vld [vmem:[%s3579_s5 + $0xd0] sm:$0xff]  }
  0x27   : > { %v3409_v53 = vld [vmem:[%s3579_s5 + $0x1c0] sm:$0xff]   ;;  %v3411_v55 = vld [vmem:[%s3579_s5 + $0x1c8] sm:$0xff]   ;;  %v3413_v57 = vld [vmem:[%s3579_s5 + $0x1d0] sm:$0xff]  }
  0x28   : > { %3142 = vmatmul.mubr.msk.bf16.gmra.mrb[8].mxu0 %vm668_vm1, %v3370_v14  ;;  %v3414_v58 = vld [vmem:[%s3579_s5 + $0xd8] sm:$0xff]   ;;  %v3416_v60 = vld [vmem:[%s3579_s5 + $0xe0] sm:$0xff]   ;;  %v3418_v62 = vld [vmem:[%s3579_s5 + $0xe8] sm:$0xff]  }
  0x29   : > { %3206 = vmatmul.mubr.msk.bf16.gmra.mrb[8].mxu1 %vm668_vm1, %v3371_v15  ;;  %3145 = vmatprep.mubr.msk.bf16.mxu0 %vm668_vm1, %v3372_v16  ;;  %v3415_v59 = vld [vmem:[%s3579_s5 + $0x1d8] sm:$0xff]   ;;  %v3417_v61 = vld [vmem:[%s3579_s5 + $0x1e0] sm:$0xff]   ;;  %v3419_v63 = vld [vmem:[%s3579_s5 + $0x1e8] sm:$0xff]  }
  0x2a   : > { %3209 = vmatprep.mubr.msk.bf16.mxu1 %vm668_vm1, %v3373_v17  ;;  %v3420_v0 = vld [vmem:[%s3579_s5 + $0xf0] sm:$0xff]   ;;  %v3422_v2 = vld [vmem:[%s3579_s5 + $0xf8] sm:$0xff]   ;;  %v3713_v4 = vld [vmem:[%s4307_s2] ss:$0 sm:$0xff] }
  0x2b   : > { %v3421_v1 = vld [vmem:[%s3579_s5 + $0x1f0] sm:$0xff]   ;;  %v3423_v3 = vld [vmem:[%s3579_s5 + $0x1f8] sm:$0xff]  }
  0x30   : > { %3146 = vmatmul.mubr.msk.bf16.gmra.mrb[12].mxu0 %vm668_vm1, %v3374_v18 }
  0x31   : > { %3210 = vmatmul.mubr.msk.bf16.gmra.mrb[12].mxu1 %vm668_vm1, %v3375_v19  ;;  %3149 = vmatprep.mubr.msk.bf16.mxu0 %vm668_vm1, %v3376_v20 }
  0x32   : > { %3213 = vmatprep.mubr.msk.bf16.mxu1 %vm668_vm1, %v3377_v21 }
  0x38   : > { %3150 = vmatmul.mubr.msk.bf16.gmra.mrb[16].mxu0 %vm668_vm1, %v3378_v22 }
  0x39   : > { %3214 = vmatmul.mubr.msk.bf16.gmra.mrb[16].mxu1 %vm668_vm1, %v3379_v23  ;;  %3153 = vmatprep.mubr.msk.bf16.mxu0 %vm668_vm1, %v3380_v24 }
  0x3a   : > { %3217 = vmatprep.mubr.msk.bf16.mxu1 %vm668_vm1, %v3381_v25 }
  0x40   : > { %3154 = vmatmul.mubr.msk.bf16.gmra.mrb[20].mxu0 %vm668_vm1, %v3382_v26 }
  0x41   : > { %3218 = vmatmul.mubr.msk.bf16.gmra.mrb[20].mxu1 %vm668_vm1, %v3383_v27  ;;  %3157 = vmatprep.mubr.msk.bf16.mxu0 %vm668_vm1, %v3384_v28 }
  0x42   : > { %3221 = vmatprep.mubr.msk.bf16.mxu1 %vm668_vm1, %v3385_v29 }
  0x48   : > { %3158 = vmatmul.mubr.msk.bf16.gmra.mrb[24].mxu0 %vm668_vm1, %v3386_v30 }
  0x49   : > { %3222 = vmatmul.mubr.msk.bf16.gmra.mrb[24].mxu1 %vm668_vm1, %v3387_v31  ;;  %3161 = vmatprep.mubr.msk.bf16.mxu0 %vm668_vm1, %v3388_v32 }
  0x4a   : > { %3225 = vmatprep.mubr.msk.bf16.mxu1 %vm668_vm1, %v3389_v33 }
  0x50   : > { %3162 = vmatmul.mubr.msk.bf16.gmra.mrb[28].mxu0 %vm668_vm1, %v3390_v34 }
  0x51   : > { %3226 = vmatmul.mubr.msk.bf16.gmra.mrb[28].mxu1 %vm668_vm1, %v3391_v35  ;;  %3165 = vmatprep.mubr.msk.bf16.mxu0 %vm668_vm1, %v3392_v36 }
  0x52   : > { %3229 = vmatprep.mubr.msk.bf16.mxu1 %vm668_vm1, %v3393_v37 }
  0x58   : > { %3166 = vmatmul.mubr.msk.bf16.gmra.mrb[32].mxu0 %vm668_vm1, %v3394_v38 }
  0x59   : > { %3230 = vmatmul.mubr.msk.bf16.gmra.mrb[32].mxu1 %vm668_vm1, %v3395_v39  ;;  %3169 = vmatprep.mubr.msk.bf16.mxu0 %vm668_vm1, %v3396_v40 }
  0x5a   : > { %3233 = vmatprep.mubr.msk.bf16.mxu1 %vm668_vm1, %v3397_v41 }
  0x60   : > { %3170 = vmatmul.mubr.msk.bf16.gmra.mrb[36].mxu0 %vm668_vm1, %v3398_v42 }
  0x61   : > { %3234 = vmatmul.mubr.msk.bf16.gmra.mrb[36].mxu1 %vm668_vm1, %v3399_v43  ;;  %3173 = vmatprep.mubr.msk.bf16.mxu0 %vm668_vm1, %v3400_v44 }
  0x62   : > { %3237 = vmatprep.mubr.msk.bf16.mxu1 %vm668_vm1, %v3401_v45 }
  0x68   : > { %3174 = vmatmul.mubr.msk.bf16.gmra.mrb[40].mxu0 %vm668_vm1, %v3402_v46 }
  0x69   : > { %3238 = vmatmul.mubr.msk.bf16.gmra.mrb[40].mxu1 %vm668_vm1, %v3403_v47  ;;  %3177 = vmatprep.mubr.msk.bf16.mxu0 %vm668_vm1, %v3404_v48 }
  0x6a   : > { %3241 = vmatprep.mubr.msk.bf16.mxu1 %vm668_vm1, %v3405_v49 }
  0x70   : > { %3178 = vmatmul.mubr.msk.bf16.gmra.mrb[44].mxu0 %vm668_vm1, %v3406_v50 }
  0x71   : > { %3242 = vmatmul.mubr.msk.bf16.gmra.mrb[44].mxu1 %vm668_vm1, %v3407_v51  ;;  %3181 = vmatprep.mubr.msk.bf16.mxu0 %vm668_vm1, %v3408_v52 }
  0x72   : > { %3245 = vmatprep.mubr.msk.bf16.mxu1 %vm668_vm1, %v3409_v53 }
  0x78   : > { %3182 = vmatmul.mubr.msk.bf16.gmra.mrb[48].mxu0 %vm668_vm1, %v3410_v54 }
  0x79   : > { %3246 = vmatmul.mubr.msk.bf16.gmra.mrb[48].mxu1 %vm668_vm1, %v3411_v55  ;;  %3185 = vmatprep.mubr.msk.bf16.mxu0 %vm668_vm1, %v3412_v56 }
  0x7a   : > { %3249 = vmatprep.mubr.msk.bf16.mxu1 %vm668_vm1, %v3413_v57 }
  0x80   : > { %3186 = vmatmul.mubr.msk.bf16.gmra.mrb[52].mxu0 %vm668_vm1, %v3414_v58 }
  0x81   : > { %3250 = vmatmul.mubr.msk.bf16.gmra.mrb[52].mxu1 %vm668_vm1, %v3415_v59  ;;  %3189 = vmatprep.mubr.msk.bf16.mxu0 %vm668_vm1, %v3416_v60 }
  0x82   : > { %3253 = vmatprep.mubr.msk.bf16.mxu1 %vm668_vm1, %v3417_v61 }
  0x88   : > { %3190 = vmatmul.mubr.msk.bf16.gmra.mrb[56].mxu0 %vm668_vm1, %v3418_v62 }
  0x89   : > { %3254 = vmatmul.mubr.msk.bf16.gmra.mrb[56].mxu1 %vm668_vm1, %v3419_v63  ;;  %3193 = vmatprep.mubr.msk.bf16.mxu0 %vm668_vm1, %v3420_v0 }
  0x8a   : > { %3257 = vmatprep.mubr.msk.bf16.mxu1 %vm668_vm1, %v3421_v1 }
  0x90   : > { %3194 = vmatmul.mubr.msk.bf16.gmra.mrb[60].mxu0 %vm668_vm1, %v3422_v2 }
  0x91   : > { %3258 = vmatmul.mubr.msk.bf16.gmra.mrb[60].mxu1 %vm668_vm1, %v3423_v3 }
  0xeb   : > { %v3135_v5 = vpop.f32.mrb[0].mxu0 }
  0xec   : > { %v3199_v6 = vpop.f32.mrb[0].mxu1  ;;  %v908_v7 = vadd.f32 %v3135_v5, %v3713_v4  ;;  %v899_v9 = vpop.f32.mrb[1].mxu0 }
  0xed   : > { %v1164_v8 = vadd.f32 %v3199_v6, %v3713_v4  ;;  %v1155_v10 = vpop.f32.mrb[1].mxu1  ;;  %v900_v11 = vadd.f32 %v3713_v4, %v899_v9  ;;  %v3136_v13 = vpop.f32.mrb[2].mxu0 }
  0xee   : > { %v1156_v12 = vadd.f32 %v3713_v4, %v1155_v10  ;;  %v3200_v14 = vpop.f32.mrb[2].mxu1  ;;  %v1412_v15 = vmax.f32 %v908_v7, 0.0  ;;  %v911_v17 = vadd.f32 %v3136_v13, %v3713_v4  ;;  %v902_v19 = vpop.f32.mrb[3].mxu0 }
  0xef   : > { %v1476_v16 = vmax.f32 %v1164_v8, 0.0  ;;  %v1167_v18 = vadd.f32 %v3200_v14, %v3713_v4  ;;  %v1158_v20 = vpop.f32.mrb[3].mxu1  ;;  %v1410_v21 = vmax.f32 %v900_v11, 0.0  ;;  %v903_v23 = vadd.f32 %v3713_v4, %v902_v19 }
  0xf0   : > { %v1474_v22 = vmax.f32 %v1156_v12, 0.0  ;;  %v1159_v24 = vadd.f32 %v3713_v4, %v1158_v20  ;;  %v2931_v25 = vpack.c.bf16 %v1412_v15, %v1412_v15  ;;  %v1413_v27 = vmax.f32 %v911_v17, 0.0 }
  0xf1   : > { %v2995_v26 = vpack.c.bf16 %v1476_v16, %v1476_v16  ;;  %v1477_v28 = vmax.f32 %v1167_v18, 0.0  ;;  %v2929_v29 = vpack.c.bf16 %v1410_v21, %v1410_v21  ;;  %v1411_v31 = vmax.f32 %v903_v23, 0.0 }
  0xf2   : > { %v2993_v30 = vpack.c.bf16 %v1474_v22, %v1474_v22  ;;  %v1475_v32 = vmax.f32 %v1159_v24, 0.0  ;;  %2053 = vst.msk [vmem:[%s3723_s10 + $0x8] sm:$0xf] %vm2050_vm2, %v2931_v25  ;;  %v2932_v33 = vpack.c.bf16 %v1413_v27, %v1413_v27 }
  0xf3   : > { %2117 = vst.msk [vmem:[%s3723_s10 + $0x108] sm:$0xf] %vm2050_vm2, %v2995_v26  ;;  %v2996_v34 = vpack.c.bf16 %v1477_v28, %v1477_v28  ;;  %2051 = vst.msk [vmem:[%s3723_s10] sm:$0xf] %vm2050_vm2, %v2929_v29  ;;  %v2930_v35 = vpack.c.bf16 %v1411_v31, %v1411_v31  ;;  %v3139_v37 = vpop.f32.mrb[4].mxu0 }
  0xf4   : > { %2115 = vst.msk [vmem:[%s3723_s10 + $0x100] sm:$0xf] %vm2050_vm2, %v2993_v30  ;;  %v2994_v36 = vpack.c.bf16 %v1475_v32, %v1475_v32  ;;  %v3203_v38 = vpop.f32.mrb[4].mxu1  ;;  %2054 = vst.msk [vmem:[%s3723_s10 + $0xc] sm:$0xf] %vm2050_vm2, %v2932_v33  ;;  %v924_v39 = vadd.f32 %v3139_v37, %v3713_v4  ;;  %v915_v41 = vpop.f32.mrb[5].mxu0 }
  0xf5   : > { %2118 = vst.msk [vmem:[%s3723_s10 + $0x10c] sm:$0xf] %vm2050_vm2, %v2996_v34  ;;  %v1180_v40 = vadd.f32 %v3203_v38, %v3713_v4  ;;  %v1171_v42 = vpop.f32.mrb[5].mxu1  ;;  %2052 = vst.msk [vmem:[%s3723_s10 + $0x4] sm:$0xf] %vm2050_vm2, %v2930_v35  ;;  %v916_v43 = vadd.f32 %v3713_v4, %v915_v41  ;;  %v3140_v45 = vpop.f32.mrb[6].mxu0 }
  0xf6   : > { %2116 = vst.msk [vmem:[%s3723_s10 + $0x104] sm:$0xf] %vm2050_vm2, %v2994_v36  ;;  %v1172_v44 = vadd.f32 %v3713_v4, %v1171_v42  ;;  %v3204_v46 = vpop.f32.mrb[6].mxu1  ;;  %v1416_v47 = vmax.f32 %v924_v39, 0.0  ;;  %v927_v49 = vadd.f32 %v3140_v45, %v3713_v4  ;;  %v918_v51 = vpop.f32.mrb[7].mxu0 }
  0xf7   : > { %v1480_v48 = vmax.f32 %v1180_v40, 0.0  ;;  %v1183_v50 = vadd.f32 %v3204_v46, %v3713_v4  ;;  %v1174_v52 = vpop.f32.mrb[7].mxu1  ;;  %v1414_v53 = vmax.f32 %v916_v43, 0.0  ;;  %v919_v55 = vadd.f32 %v3713_v4, %v918_v51 }
  0xf8   : > { %v1478_v54 = vmax.f32 %v1172_v44, 0.0  ;;  %v1175_v56 = vadd.f32 %v3713_v4, %v1174_v52  ;;  %v2935_v57 = vpack.c.bf16 %v1416_v47, %v1416_v47  ;;  %v1417_v59 = vmax.f32 %v927_v49, 0.0 }
  0xf9   : > { %v2999_v58 = vpack.c.bf16 %v1480_v48, %v1480_v48  ;;  %v1481_v60 = vmax.f32 %v1183_v50, 0.0  ;;  %v2933_v61 = vpack.c.bf16 %v1414_v53, %v1414_v53  ;;  %v1415_v63 = vmax.f32 %v919_v55, 0.0 }
  0xfa   : > { %v2997_v62 = vpack.c.bf16 %v1478_v54, %v1478_v54  ;;  %v1479_v0 = vmax.f32 %v1175_v56, 0.0  ;;  %2057 = vst.msk [vmem:[%s3723_s10 + $0x18] sm:$0xf] %vm2050_vm2, %v2935_v57  ;;  %v2936_v1 = vpack.c.bf16 %v1417_v59, %v1417_v59 }
  0xfb   : > { %2121 = vst.msk [vmem:[%s3723_s10 + $0x118] sm:$0xf] %vm2050_vm2, %v2999_v58  ;;  %v3000_v2 = vpack.c.bf16 %v1481_v60, %v1481_v60  ;;  %2055 = vst.msk [vmem:[%s3723_s10 + $0x10] sm:$0xf] %vm2050_vm2, %v2933_v61  ;;  %v2934_v3 = vpack.c.bf16 %v1415_v63, %v1415_v63  ;;  %v3143_v6 = vpop.f32.mrb[8].mxu0 }
  0xfc   : > { %2119 = vst.msk [vmem:[%s3723_s10 + $0x110] sm:$0xf] %vm2050_vm2, %v2997_v62  ;;  %v2998_v5 = vpack.c.bf16 %v1479_v0, %v1479_v0  ;;  %v3207_v7 = vpop.f32.mrb[8].mxu1  ;;  %2058 = vst.msk [vmem:[%s3723_s10 + $0x1c] sm:$0xf] %vm2050_vm2, %v2936_v1  ;;  %v940_v8 = vadd.f32 %v3143_v6, %v3713_v4  ;;  %v931_v10 = vpop.f32.mrb[9].mxu0 }
  0xfd   : > { %2122 = vst.msk [vmem:[%s3723_s10 + $0x11c] sm:$0xf] %vm2050_vm2, %v3000_v2  ;;  %v1196_v9 = vadd.f32 %v3207_v7, %v3713_v4  ;;  %v1187_v11 = vpop.f32.mrb[9].mxu1  ;;  %2056 = vst.msk [vmem:[%s3723_s10 + $0x14] sm:$0xf] %vm2050_vm2, %v2934_v3  ;;  %v932_v12 = vadd.f32 %v3713_v4, %v931_v10  ;;  %v3144_v14 = vpop.f32.mrb[10].mxu0 }
  0xfe   : > { %2120 = vst.msk [vmem:[%s3723_s10 + $0x114] sm:$0xf] %vm2050_vm2, %v2998_v5  ;;  %v1188_v13 = vadd.f32 %v3713_v4, %v1187_v11  ;;  %v3208_v15 = vpop.f32.mrb[10].mxu1  ;;  %v1420_v16 = vmax.f32 %v940_v8, 0.0  ;;  %v943_v18 = vadd.f32 %v3144_v14, %v3713_v4  ;;  %v934_v20 = vpop.f32.mrb[11].mxu0 }
  0xff   : > { %v1484_v17 = vmax.f32 %v1196_v9, 0.0  ;;  %v1199_v19 = vadd.f32 %v3208_v15, %v3713_v4  ;;  %v1190_v21 = vpop.f32.mrb[11].mxu1  ;;  %v1418_v22 = vmax.f32 %v932_v12, 0.0  ;;  %v935_v24 = vadd.f32 %v3713_v4, %v934_v20 }
 0x100   : > { %v1482_v23 = vmax.f32 %v1188_v13, 0.0  ;;  %v1191_v25 = vadd.f32 %v3713_v4, %v1190_v21  ;;  %v2939_v26 = vpack.c.bf16 %v1420_v16, %v1420_v16  ;;  %v1421_v28 = vmax.f32 %v943_v18, 0.0 }
 0x101   : > { %v3003_v27 = vpack.c.bf16 %v1484_v17, %v1484_v17  ;;  %v1485_v29 = vmax.f32 %v1199_v19, 0.0  ;;  %v2937_v30 = vpack.c.bf16 %v1418_v22, %v1418_v22  ;;  %v1419_v32 = vmax.f32 %v935_v24, 0.0 }
 0x102   : > { %v3001_v31 = vpack.c.bf16 %v1482_v23, %v1482_v23  ;;  %v1483_v33 = vmax.f32 %v1191_v25, 0.0  ;;  %2061 = vst.msk [vmem:[%s3723_s10 + $0x28] sm:$0xf] %vm2050_vm2, %v2939_v26  ;;  %v2940_v34 = vpack.c.bf16 %v1421_v28, %v1421_v28 }
 0x103   : > { %2125 = vst.msk [vmem:[%s3723_s10 + $0x128] sm:$0xf] %vm2050_vm2, %v3003_v27  ;;  %v3004_v35 = vpack.c.bf16 %v1485_v29, %v1485_v29  ;;  %2059 = vst.msk [vmem:[%s3723_s10 + $0x20] sm:$0xf] %vm2050_vm2, %v2937_v30  ;;  %v2938_v36 = vpack.c.bf16 %v1419_v32, %v1419_v32  ;;  %v3147_v38 = vpop.f32.mrb[12].mxu0 }
 0x104   : > { %2123 = vst.msk [vmem:[%s3723_s10 + $0x120] sm:$0xf] %vm2050_vm2, %v3001_v31  ;;  %v3002_v37 = vpack.c.bf16 %v1483_v33, %v1483_v33  ;;  %v3211_v39 = vpop.f32.mrb[12].mxu1  ;;  %2062 = vst.msk [vmem:[%s3723_s10 + $0x2c] sm:$0xf] %vm2050_vm2, %v2940_v34  ;;  %v956_v40 = vadd.f32 %v3147_v38, %v3713_v4  ;;  %v947_v42 = vpop.f32.mrb[13].mxu0 }
 0x105   : > { %2126 = vst.msk [vmem:[%s3723_s10 + $0x12c] sm:$0xf] %vm2050_vm2, %v3004_v35  ;;  %v1212_v41 = vadd.f32 %v3211_v39, %v3713_v4  ;;  %v1203_v43 = vpop.f32.mrb[13].mxu1  ;;  %2060 = vst.msk [vmem:[%s3723_s10 + $0x24] sm:$0xf] %vm2050_vm2, %v2938_v36  ;;  %v948_v44 = vadd.f32 %v3713_v4, %v947_v42  ;;  %v3148_v46 = vpop.f32.mrb[14].mxu0 }
 0x106   : > { %2124 = vst.msk [vmem:[%s3723_s10 + $0x124] sm:$0xf] %vm2050_vm2, %v3002_v37  ;;  %v1204_v45 = vadd.f32 %v3713_v4, %v1203_v43  ;;  %v3212_v47 = vpop.f32.mrb[14].mxu1  ;;  %v1424_v48 = vmax.f32 %v956_v40, 0.0  ;;  %v959_v50 = vadd.f32 %v3148_v46, %v3713_v4  ;;  %v950_v52 = vpop.f32.mrb[15].mxu0 }
 0x107   : > { %v1488_v49 = vmax.f32 %v1212_v41, 0.0  ;;  %v1215_v51 = vadd.f32 %v3212_v47, %v3713_v4  ;;  %v1206_v53 = vpop.f32.mrb[15].mxu1  ;;  %v1422_v54 = vmax.f32 %v948_v44, 0.0  ;;  %v951_v56 = vadd.f32 %v3713_v4, %v950_v52 }
 0x108   : > { %v1486_v55 = vmax.f32 %v1204_v45, 0.0  ;;  %v1207_v57 = vadd.f32 %v3713_v4, %v1206_v53  ;;  %v2943_v58 = vpack.c.bf16 %v1424_v48, %v1424_v48  ;;  %v1425_v60 = vmax.f32 %v959_v50, 0.0 }
 0x109   : > { %v3007_v59 = vpack.c.bf16 %v1488_v49, %v1488_v49  ;;  %v1489_v61 = vmax.f32 %v1215_v51, 0.0  ;;  %v2941_v62 = vpack.c.bf16 %v1422_v54, %v1422_v54  ;;  %v1423_v0 = vmax.f32 %v951_v56, 0.0 }
 0x10a   : > { %v3005_v63 = vpack.c.bf16 %v1486_v55, %v1486_v55  ;;  %v1487_v1 = vmax.f32 %v1207_v57, 0.0  ;;  %2065 = vst.msk [vmem:[%s3723_s10 + $0x38] sm:$0xf] %vm2050_vm2, %v2943_v58  ;;  %v2944_v2 = vpack.c.bf16 %v1425_v60, %v1425_v60 }
 0x10b   : > { %2129 = vst.msk [vmem:[%s3723_s10 + $0x138] sm:$0xf] %vm2050_vm2, %v3007_v59  ;;  %v3008_v3 = vpack.c.bf16 %v1489_v61, %v1489_v61  ;;  %2063 = vst.msk [vmem:[%s3723_s10 + $0x30] sm:$0xf] %vm2050_vm2, %v2941_v62  ;;  %v2942_v5 = vpack.c.bf16 %v1423_v0, %v1423_v0  ;;  %v3151_v7 = vpop.f32.mrb[16].mxu0 }
 0x10c   : > { %2127 = vst.msk [vmem:[%s3723_s10 + $0x130] sm:$0xf] %vm2050_vm2, %v3005_v63  ;;  %v3006_v6 = vpack.c.bf16 %v1487_v1, %v1487_v1  ;;  %v3215_v8 = vpop.f32.mrb[16].mxu1  ;;  %2066 = vst.msk [vmem:[%s3723_s10 + $0x3c] sm:$0xf] %vm2050_vm2, %v2944_v2  ;;  %v972_v9 = vadd.f32 %v3151_v7, %v3713_v4  ;;  %v963_v11 = vpop.f32.mrb[17].mxu0 }
 0x10d   : > { %2130 = vst.msk [vmem:[%s3723_s10 + $0x13c] sm:$0xf] %vm2050_vm2, %v3008_v3  ;;  %v1228_v10 = vadd.f32 %v3215_v8, %v3713_v4  ;;  %v1219_v12 = vpop.f32.mrb[17].mxu1  ;;  %2064 = vst.msk [vmem:[%s3723_s10 + $0x34] sm:$0xf] %vm2050_vm2, %v2942_v5  ;;  %v964_v13 = vadd.f32 %v3713_v4, %v963_v11  ;;  %v3152_v15 = vpop.f32.mrb[18].mxu0 }
 0x10e   : > { %2128 = vst.msk [vmem:[%s3723_s10 + $0x134] sm:$0xf] %vm2050_vm2, %v3006_v6  ;;  %v1220_v14 = vadd.f32 %v3713_v4, %v1219_v12  ;;  %v3216_v16 = vpop.f32.mrb[18].mxu1  ;;  %v1428_v17 = vmax.f32 %v972_v9, 0.0  ;;  %v975_v19 = vadd.f32 %v3152_v15, %v3713_v4  ;;  %v966_v21 = vpop.f32.mrb[19].mxu0 }
 0x10f   : > { %v1492_v18 = vmax.f32 %v1228_v10, 0.0  ;;  %v1231_v20 = vadd.f32 %v3216_v16, %v3713_v4  ;;  %v1222_v22 = vpop.f32.mrb[19].mxu1  ;;  %v1426_v23 = vmax.f32 %v964_v13, 0.0  ;;  %v967_v25 = vadd.f32 %v3713_v4, %v966_v21 }
 0x110   : > { %v1490_v24 = vmax.f32 %v1220_v14, 0.0  ;;  %v1223_v26 = vadd.f32 %v3713_v4, %v1222_v22  ;;  %v2947_v27 = vpack.c.bf16 %v1428_v17, %v1428_v17  ;;  %v1429_v29 = vmax.f32 %v975_v19, 0.0 }
 0x111   : > { %v3011_v28 = vpack.c.bf16 %v1492_v18, %v1492_v18  ;;  %v1493_v30 = vmax.f32 %v1231_v20, 0.0  ;;  %v2945_v31 = vpack.c.bf16 %v1426_v23, %v1426_v23  ;;  %v1427_v33 = vmax.f32 %v967_v25, 0.0 }
 0x112   : > { %v3009_v32 = vpack.c.bf16 %v1490_v24, %v1490_v24  ;;  %v1491_v34 = vmax.f32 %v1223_v26, 0.0  ;;  %2069 = vst.msk [vmem:[%s3723_s10 + $0x48] sm:$0xf] %vm2050_vm2, %v2947_v27  ;;  %v2948_v35 = vpack.c.bf16 %v1429_v29, %v1429_v29 }
 0x113   : > { %2133 = vst.msk [vmem:[%s3723_s10 + $0x148] sm:$0xf] %vm2050_vm2, %v3011_v28  ;;  %v3012_v36 = vpack.c.bf16 %v1493_v30, %v1493_v30  ;;  %2067 = vst.msk [vmem:[%s3723_s10 + $0x40] sm:$0xf] %vm2050_vm2, %v2945_v31  ;;  %v2946_v37 = vpack.c.bf16 %v1427_v33, %v1427_v33  ;;  %v3155_v39 = vpop.f32.mrb[20].mxu0 }
 0x114   : > { %2131 = vst.msk [vmem:[%s3723_s10 + $0x140] sm:$0xf] %vm2050_vm2, %v3009_v32  ;;  %v3010_v38 = vpack.c.bf16 %v1491_v34, %v1491_v34  ;;  %v3219_v40 = vpop.f32.mrb[20].mxu1  ;;  %2070 = vst.msk [vmem:[%s3723_s10 + $0x4c] sm:$0xf] %vm2050_vm2, %v2948_v35  ;;  %v988_v41 = vadd.f32 %v3155_v39, %v3713_v4  ;;  %v979_v43 = vpop.f32.mrb[21].mxu0 }
 0x115   : > { %2134 = vst.msk [vmem:[%s3723_s10 + $0x14c] sm:$0xf] %vm2050_vm2, %v3012_v36  ;;  %v1244_v42 = vadd.f32 %v3219_v40, %v3713_v4  ;;  %v1235_v44 = vpop.f32.mrb[21].mxu1  ;;  %2068 = vst.msk [vmem:[%s3723_s10 + $0x44] sm:$0xf] %vm2050_vm2, %v2946_v37  ;;  %v980_v45 = vadd.f32 %v3713_v4, %v979_v43  ;;  %v3156_v47 = vpop.f32.mrb[22].mxu0 }
 0x116   : > { %2132 = vst.msk [vmem:[%s3723_s10 + $0x144] sm:$0xf] %vm2050_vm2, %v3010_v38  ;;  %v1236_v46 = vadd.f32 %v3713_v4, %v1235_v44  ;;  %v3220_v48 = vpop.f32.mrb[22].mxu1  ;;  %v1432_v49 = vmax.f32 %v988_v41, 0.0  ;;  %v991_v51 = vadd.f32 %v3156_v47, %v3713_v4  ;;  %v982_v53 = vpop.f32.mrb[23].mxu0 }
 0x117   : > { %v1496_v50 = vmax.f32 %v1244_v42, 0.0  ;;  %v1247_v52 = vadd.f32 %v3220_v48, %v3713_v4  ;;  %v1238_v54 = vpop.f32.mrb[23].mxu1  ;;  %v1430_v55 = vmax.f32 %v980_v45, 0.0  ;;  %v983_v57 = vadd.f32 %v3713_v4, %v982_v53 }
 0x118   : > { %v1494_v56 = vmax.f32 %v1236_v46, 0.0  ;;  %v1239_v58 = vadd.f32 %v3713_v4, %v1238_v54  ;;  %v2951_v59 = vpack.c.bf16 %v1432_v49, %v1432_v49  ;;  %v1433_v61 = vmax.f32 %v991_v51, 0.0 }
 0x119   : > { %v3015_v60 = vpack.c.bf16 %v1496_v50, %v1496_v50  ;;  %v1497_v62 = vmax.f32 %v1247_v52, 0.0  ;;  %v2949_v63 = vpack.c.bf16 %v1430_v55, %v1430_v55  ;;  %v1431_v1 = vmax.f32 %v983_v57, 0.0 }
 0x11a   : > { %v3013_v0 = vpack.c.bf16 %v1494_v56, %v1494_v56  ;;  %v1495_v2 = vmax.f32 %v1239_v58, 0.0  ;;  %2073 = vst.msk [vmem:[%s3723_s10 + $0x58] sm:$0xf] %vm2050_vm2, %v2951_v59  ;;  %v2952_v3 = vpack.c.bf16 %v1433_v61, %v1433_v61 }
 0x11b   : > { %2137 = vst.msk [vmem:[%s3723_s10 + $0x158] sm:$0xf] %vm2050_vm2, %v3015_v60  ;;  %v3016_v5 = vpack.c.bf16 %v1497_v62, %v1497_v62  ;;  %2071 = vst.msk [vmem:[%s3723_s10 + $0x50] sm:$0xf] %vm2050_vm2, %v2949_v63  ;;  %v2950_v6 = vpack.c.bf16 %v1431_v1, %v1431_v1  ;;  %v3159_v8 = vpop.f32.mrb[24].mxu0 }
 0x11c   : > { %2135 = vst.msk [vmem:[%s3723_s10 + $0x150] sm:$0xf] %vm2050_vm2, %v3013_v0  ;;  %v3014_v7 = vpack.c.bf16 %v1495_v2, %v1495_v2  ;;  %v3223_v9 = vpop.f32.mrb[24].mxu1  ;;  %2074 = vst.msk [vmem:[%s3723_s10 + $0x5c] sm:$0xf] %vm2050_vm2, %v2952_v3  ;;  %v1004_v10 = vadd.f32 %v3159_v8, %v3713_v4  ;;  %v995_v12 = vpop.f32.mrb[25].mxu0 }
 0x11d   : > { %2138 = vst.msk [vmem:[%s3723_s10 + $0x15c] sm:$0xf] %vm2050_vm2, %v3016_v5  ;;  %v1260_v11 = vadd.f32 %v3223_v9, %v3713_v4  ;;  %v1251_v13 = vpop.f32.mrb[25].mxu1  ;;  %2072 = vst.msk [vmem:[%s3723_s10 + $0x54] sm:$0xf] %vm2050_vm2, %v2950_v6  ;;  %v996_v14 = vadd.f32 %v3713_v4, %v995_v12  ;;  %v3160_v16 = vpop.f32.mrb[26].mxu0 }
 0x11e   : > { %2136 = vst.msk [vmem:[%s3723_s10 + $0x154] sm:$0xf] %vm2050_vm2, %v3014_v7  ;;  %v1252_v15 = vadd.f32 %v3713_v4, %v1251_v13  ;;  %v3224_v17 = vpop.f32.mrb[26].mxu1  ;;  %v1436_v18 = vmax.f32 %v1004_v10, 0.0  ;;  %v1007_v20 = vadd.f32 %v3160_v16, %v3713_v4  ;;  %v998_v22 = vpop.f32.mrb[27].mxu0 }
 0x11f   : > { %v1500_v19 = vmax.f32 %v1260_v11, 0.0  ;;  %v1263_v21 = vadd.f32 %v3224_v17, %v3713_v4  ;;  %v1254_v23 = vpop.f32.mrb[27].mxu1  ;;  %v1434_v24 = vmax.f32 %v996_v14, 0.0  ;;  %v999_v26 = vadd.f32 %v3713_v4, %v998_v22 }
 0x120   : > { %v1498_v25 = vmax.f32 %v1252_v15, 0.0  ;;  %v1255_v27 = vadd.f32 %v3713_v4, %v1254_v23  ;;  %v2955_v28 = vpack.c.bf16 %v1436_v18, %v1436_v18  ;;  %v1437_v30 = vmax.f32 %v1007_v20, 0.0 }
 0x121   : > { %v3019_v29 = vpack.c.bf16 %v1500_v19, %v1500_v19  ;;  %v1501_v31 = vmax.f32 %v1263_v21, 0.0  ;;  %v2953_v32 = vpack.c.bf16 %v1434_v24, %v1434_v24  ;;  %v1435_v34 = vmax.f32 %v999_v26, 0.0 }
 0x122   : > { %v3017_v33 = vpack.c.bf16 %v1498_v25, %v1498_v25  ;;  %v1499_v35 = vmax.f32 %v1255_v27, 0.0  ;;  %2077 = vst.msk [vmem:[%s3723_s10 + $0x68] sm:$0xf] %vm2050_vm2, %v2955_v28  ;;  %v2956_v36 = vpack.c.bf16 %v1437_v30, %v1437_v30 }
 0x123   : > { %2141 = vst.msk [vmem:[%s3723_s10 + $0x168] sm:$0xf] %vm2050_vm2, %v3019_v29  ;;  %v3020_v37 = vpack.c.bf16 %v1501_v31, %v1501_v31  ;;  %2075 = vst.msk [vmem:[%s3723_s10 + $0x60] sm:$0xf] %vm2050_vm2, %v2953_v32  ;;  %v2954_v38 = vpack.c.bf16 %v1435_v34, %v1435_v34  ;;  %v3163_v40 = vpop.f32.mrb[28].mxu0 }
 0x124   : > { %2139 = vst.msk [vmem:[%s3723_s10 + $0x160] sm:$0xf] %vm2050_vm2, %v3017_v33  ;;  %v3018_v39 = vpack.c.bf16 %v1499_v35, %v1499_v35  ;;  %v3227_v41 = vpop.f32.mrb[28].mxu1  ;;  %2078 = vst.msk [vmem:[%s3723_s10 + $0x6c] sm:$0xf] %vm2050_vm2, %v2956_v36  ;;  %v1020_v42 = vadd.f32 %v3163_v40, %v3713_v4  ;;  %v1011_v44 = vpop.f32.mrb[29].mxu0 }
 0x125   : > { %2142 = vst.msk [vmem:[%s3723_s10 + $0x16c] sm:$0xf] %vm2050_vm2, %v3020_v37  ;;  %v1276_v43 = vadd.f32 %v3227_v41, %v3713_v4  ;;  %v1267_v45 = vpop.f32.mrb[29].mxu1  ;;  %2076 = vst.msk [vmem:[%s3723_s10 + $0x64] sm:$0xf] %vm2050_vm2, %v2954_v38  ;;  %v1012_v46 = vadd.f32 %v3713_v4, %v1011_v44  ;;  %v3164_v48 = vpop.f32.mrb[30].mxu0 }
 0x126   : > { %2140 = vst.msk [vmem:[%s3723_s10 + $0x164] sm:$0xf] %vm2050_vm2, %v3018_v39  ;;  %v1268_v47 = vadd.f32 %v3713_v4, %v1267_v45  ;;  %v3228_v49 = vpop.f32.mrb[30].mxu1  ;;  %v1440_v50 = vmax.f32 %v1020_v42, 0.0  ;;  %v1023_v52 = vadd.f32 %v3164_v48, %v3713_v4  ;;  %v1014_v54 = vpop.f32.mrb[31].mxu0 }
 0x127   : > { %v1504_v51 = vmax.f32 %v1276_v43, 0.0  ;;  %v1279_v53 = vadd.f32 %v3228_v49, %v3713_v4  ;;  %v1270_v55 = vpop.f32.mrb[31].mxu1  ;;  %v1438_v56 = vmax.f32 %v1012_v46, 0.0  ;;  %v1015_v58 = vadd.f32 %v3713_v4, %v1014_v54 }
 0x128   : > { %v1502_v57 = vmax.f32 %v1268_v47, 0.0  ;;  %v1271_v59 = vadd.f32 %v3713_v4, %v1270_v55  ;;  %v2959_v60 = vpack.c.bf16 %v1440_v50, %v1440_v50  ;;  %v1441_v62 = vmax.f32 %v1023_v52, 0.0 }
 0x129   : > { %v3023_v61 = vpack.c.bf16 %v1504_v51, %v1504_v51  ;;  %v1505_v63 = vmax.f32 %v1279_v53, 0.0  ;;  %v2957_v0 = vpack.c.bf16 %v1438_v56, %v1438_v56  ;;  %v1439_v2 = vmax.f32 %v1015_v58, 0.0 }
 0x12a   : > { %v3021_v1 = vpack.c.bf16 %v1502_v57, %v1502_v57  ;;  %v1503_v3 = vmax.f32 %v1271_v59, 0.0  ;;  %2081 = vst.msk [vmem:[%s3723_s10 + $0x78] sm:$0xf] %vm2050_vm2, %v2959_v60  ;;  %v2960_v5 = vpack.c.bf16 %v1441_v62, %v1441_v62 }
 0x12b   : > { %2145 = vst.msk [vmem:[%s3723_s10 + $0x178] sm:$0xf] %vm2050_vm2, %v3023_v61  ;;  %v3024_v6 = vpack.c.bf16 %v1505_v63, %v1505_v63  ;;  %2079 = vst.msk [vmem:[%s3723_s10 + $0x70] sm:$0xf] %vm2050_vm2, %v2957_v0  ;;  %v2958_v7 = vpack.c.bf16 %v1439_v2, %v1439_v2  ;;  %v3167_v9 = vpop.f32.mrb[32].mxu0 }
 0x12c   : > { %2143 = vst.msk [vmem:[%s3723_s10 + $0x170] sm:$0xf] %vm2050_vm2, %v3021_v1  ;;  %v3022_v8 = vpack.c.bf16 %v1503_v3, %v1503_v3  ;;  %v3231_v10 = vpop.f32.mrb[32].mxu1  ;;  %2082 = vst.msk [vmem:[%s3723_s10 + $0x7c] sm:$0xf] %vm2050_vm2, %v2960_v5  ;;  %v1036_v11 = vadd.f32 %v3167_v9, %v3713_v4  ;;  %v1027_v13 = vpop.f32.mrb[33].mxu0 }
 0x12d   : > { %2146 = vst.msk [vmem:[%s3723_s10 + $0x17c] sm:$0xf] %vm2050_vm2, %v3024_v6  ;;  %v1292_v12 = vadd.f32 %v3231_v10, %v3713_v4  ;;  %v1283_v14 = vpop.f32.mrb[33].mxu1  ;;  %2080 = vst.msk [vmem:[%s3723_s10 + $0x74] sm:$0xf] %vm2050_vm2, %v2958_v7  ;;  %v1028_v15 = vadd.f32 %v3713_v4, %v1027_v13  ;;  %v3168_v17 = vpop.f32.mrb[34].mxu0 }
 0x12e   : > { %2144 = vst.msk [vmem:[%s3723_s10 + $0x174] sm:$0xf] %vm2050_vm2, %v3022_v8  ;;  %v1284_v16 = vadd.f32 %v3713_v4, %v1283_v14  ;;  %v3232_v18 = vpop.f32.mrb[34].mxu1  ;;  %v1444_v19 = vmax.f32 %v1036_v11, 0.0  ;;  %v1039_v21 = vadd.f32 %v3168_v17, %v3713_v4  ;;  %v1030_v23 = vpop.f32.mrb[35].mxu0 }
 0x12f   : > { %v1508_v20 = vmax.f32 %v1292_v12, 0.0  ;;  %v1295_v22 = vadd.f32 %v3232_v18, %v3713_v4  ;;  %v1286_v24 = vpop.f32.mrb[35].mxu1  ;;  %v1442_v25 = vmax.f32 %v1028_v15, 0.0  ;;  %v1031_v27 = vadd.f32 %v3713_v4, %v1030_v23 }
 0x130   : > { %v1506_v26 = vmax.f32 %v1284_v16, 0.0  ;;  %v1287_v28 = vadd.f32 %v3713_v4, %v1286_v24  ;;  %v2963_v29 = vpack.c.bf16 %v1444_v19, %v1444_v19  ;;  %v1445_v31 = vmax.f32 %v1039_v21, 0.0 }
 0x131   : > { %v3027_v30 = vpack.c.bf16 %v1508_v20, %v1508_v20  ;;  %v1509_v32 = vmax.f32 %v1295_v22, 0.0  ;;  %v2961_v33 = vpack.c.bf16 %v1442_v25, %v1442_v25  ;;  %v1443_v35 = vmax.f32 %v1031_v27, 0.0 }
 0x132   : > { %v3025_v34 = vpack.c.bf16 %v1506_v26, %v1506_v26  ;;  %v1507_v36 = vmax.f32 %v1287_v28, 0.0  ;;  %2085 = vst.msk [vmem:[%s3723_s10 + $0x88] sm:$0xf] %vm2050_vm2, %v2963_v29  ;;  %v2964_v37 = vpack.c.bf16 %v1445_v31, %v1445_v31 }
 0x133   : > { %2149 = vst.msk [vmem:[%s3723_s10 + $0x188] sm:$0xf] %vm2050_vm2, %v3027_v30  ;;  %v3028_v38 = vpack.c.bf16 %v1509_v32, %v1509_v32  ;;  %2083 = vst.msk [vmem:[%s3723_s10 + $0x80] sm:$0xf] %vm2050_vm2, %v2961_v33  ;;  %v2962_v39 = vpack.c.bf16 %v1443_v35, %v1443_v35  ;;  %v3171_v41 = vpop.f32.mrb[36].mxu0 }
 0x134   : > { %2147 = vst.msk [vmem:[%s3723_s10 + $0x180] sm:$0xf] %vm2050_vm2, %v3025_v34  ;;  %v3026_v40 = vpack.c.bf16 %v1507_v36, %v1507_v36  ;;  %v3235_v42 = vpop.f32.mrb[36].mxu1  ;;  %2086 = vst.msk [vmem:[%s3723_s10 + $0x8c] sm:$0xf] %vm2050_vm2, %v2964_v37  ;;  %v1052_v43 = vadd.f32 %v3171_v41, %v3713_v4  ;;  %v1043_v45 = vpop.f32.mrb[37].mxu0 }
 0x135   : > { %2150 = vst.msk [vmem:[%s3723_s10 + $0x18c] sm:$0xf] %vm2050_vm2, %v3028_v38  ;;  %v1308_v44 = vadd.f32 %v3235_v42, %v3713_v4  ;;  %v1299_v46 = vpop.f32.mrb[37].mxu1  ;;  %2084 = vst.msk [vmem:[%s3723_s10 + $0x84] sm:$0xf] %vm2050_vm2, %v2962_v39  ;;  %v1044_v47 = vadd.f32 %v3713_v4, %v1043_v45  ;;  %v3172_v49 = vpop.f32.mrb[38].mxu0 }
 0x136   : > { %2148 = vst.msk [vmem:[%s3723_s10 + $0x184] sm:$0xf] %vm2050_vm2, %v3026_v40  ;;  %v1300_v48 = vadd.f32 %v3713_v4, %v1299_v46  ;;  %v3236_v50 = vpop.f32.mrb[38].mxu1  ;;  %v1448_v51 = vmax.f32 %v1052_v43, 0.0  ;;  %v1055_v53 = vadd.f32 %v3172_v49, %v3713_v4  ;;  %v1046_v55 = vpop.f32.mrb[39].mxu0 }
 0x137   : > { %v1512_v52 = vmax.f32 %v1308_v44, 0.0  ;;  %v1311_v54 = vadd.f32 %v3236_v50, %v3713_v4  ;;  %v1302_v56 = vpop.f32.mrb[39].mxu1  ;;  %v1446_v57 = vmax.f32 %v1044_v47, 0.0  ;;  %v1047_v59 = vadd.f32 %v3713_v4, %v1046_v55 }
 0x138   : > { %v1510_v58 = vmax.f32 %v1300_v48, 0.0  ;;  %v1303_v60 = vadd.f32 %v3713_v4, %v1302_v56  ;;  %v2967_v61 = vpack.c.bf16 %v1448_v51, %v1448_v51  ;;  %v1449_v63 = vmax.f32 %v1055_v53, 0.0 }
 0x139   : > { %v3031_v62 = vpack.c.bf16 %v1512_v52, %v1512_v52  ;;  %v1513_v0 = vmax.f32 %v1311_v54, 0.0  ;;  %v2965_v1 = vpack.c.bf16 %v1446_v57, %v1446_v57  ;;  %v1447_v3 = vmax.f32 %v1047_v59, 0.0 }
 0x13a   : > { %v3029_v2 = vpack.c.bf16 %v1510_v58, %v1510_v58  ;;  %v1511_v5 = vmax.f32 %v1303_v60, 0.0  ;;  %2089 = vst.msk [vmem:[%s3723_s10 + $0x98] sm:$0xf] %vm2050_vm2, %v2967_v61  ;;  %v2968_v6 = vpack.c.bf16 %v1449_v63, %v1449_v63 }
 0x13b   : > { %2153 = vst.msk [vmem:[%s3723_s10 + $0x198] sm:$0xf] %vm2050_vm2, %v3031_v62  ;;  %v3032_v7 = vpack.c.bf16 %v1513_v0, %v1513_v0  ;;  %2087 = vst.msk [vmem:[%s3723_s10 + $0x90] sm:$0xf] %vm2050_vm2, %v2965_v1  ;;  %v2966_v8 = vpack.c.bf16 %v1447_v3, %v1447_v3  ;;  %v3175_v10 = vpop.f32.mrb[40].mxu0 }
 0x13c   : > { %2151 = vst.msk [vmem:[%s3723_s10 + $0x190] sm:$0xf] %vm2050_vm2, %v3029_v2  ;;  %v3030_v9 = vpack.c.bf16 %v1511_v5, %v1511_v5  ;;  %v3239_v11 = vpop.f32.mrb[40].mxu1  ;;  %2090 = vst.msk [vmem:[%s3723_s10 + $0x9c] sm:$0xf] %vm2050_vm2, %v2968_v6  ;;  %v1068_v12 = vadd.f32 %v3175_v10, %v3713_v4  ;;  %v1059_v14 = vpop.f32.mrb[41].mxu0 }
 0x13d   : > { %2154 = vst.msk [vmem:[%s3723_s10 + $0x19c] sm:$0xf] %vm2050_vm2, %v3032_v7  ;;  %v1324_v13 = vadd.f32 %v3239_v11, %v3713_v4  ;;  %v1315_v15 = vpop.f32.mrb[41].mxu1  ;;  %2088 = vst.msk [vmem:[%s3723_s10 + $0x94] sm:$0xf] %vm2050_vm2, %v2966_v8  ;;  %v1060_v16 = vadd.f32 %v3713_v4, %v1059_v14  ;;  %v3176_v18 = vpop.f32.mrb[42].mxu0 }
 0x13e   : > { %2152 = vst.msk [vmem:[%s3723_s10 + $0x194] sm:$0xf] %vm2050_vm2, %v3030_v9  ;;  %v1316_v17 = vadd.f32 %v3713_v4, %v1315_v15  ;;  %v3240_v19 = vpop.f32.mrb[42].mxu1  ;;  %v1452_v20 = vmax.f32 %v1068_v12, 0.0  ;;  %v1071_v22 = vadd.f32 %v3176_v18, %v3713_v4  ;;  %v1062_v24 = vpop.f32.mrb[43].mxu0 }
 0x13f   : > { %v1516_v21 = vmax.f32 %v1324_v13, 0.0  ;;  %v1327_v23 = vadd.f32 %v3240_v19, %v3713_v4  ;;  %v1318_v25 = vpop.f32.mrb[43].mxu1  ;;  %v1450_v26 = vmax.f32 %v1060_v16, 0.0  ;;  %v1063_v28 = vadd.f32 %v3713_v4, %v1062_v24 }
 0x140   : > { %v1514_v27 = vmax.f32 %v1316_v17, 0.0  ;;  %v1319_v29 = vadd.f32 %v3713_v4, %v1318_v25  ;;  %v2971_v30 = vpack.c.bf16 %v1452_v20, %v1452_v20  ;;  %v1453_v32 = vmax.f32 %v1071_v22, 0.0 }
 0x141   : > { %v3035_v31 = vpack.c.bf16 %v1516_v21, %v1516_v21  ;;  %v1517_v33 = vmax.f32 %v1327_v23, 0.0  ;;  %v2969_v34 = vpack.c.bf16 %v1450_v26, %v1450_v26  ;;  %v1451_v36 = vmax.f32 %v1063_v28, 0.0 }
 0x142   : > { %v3033_v35 = vpack.c.bf16 %v1514_v27, %v1514_v27  ;;  %v1515_v37 = vmax.f32 %v1319_v29, 0.0  ;;  %2093 = vst.msk [vmem:[%s3723_s10 + $0xa8] sm:$0xf] %vm2050_vm2, %v2971_v30  ;;  %v2972_v38 = vpack.c.bf16 %v1453_v32, %v1453_v32 }
 0x143   : > { %2157 = vst.msk [vmem:[%s3723_s10 + $0x1a8] sm:$0xf] %vm2050_vm2, %v3035_v31  ;;  %v3036_v39 = vpack.c.bf16 %v1517_v33, %v1517_v33  ;;  %2091 = vst.msk [vmem:[%s3723_s10 + $0xa0] sm:$0xf] %vm2050_vm2, %v2969_v34  ;;  %v2970_v40 = vpack.c.bf16 %v1451_v36, %v1451_v36  ;;  %v3179_v42 = vpop.f32.mrb[44].mxu0 }
 0x144   : > { %2155 = vst.msk [vmem:[%s3723_s10 + $0x1a0] sm:$0xf] %vm2050_vm2, %v3033_v35  ;;  %v3034_v41 = vpack.c.bf16 %v1515_v37, %v1515_v37  ;;  %v3243_v43 = vpop.f32.mrb[44].mxu1  ;;  %2094 = vst.msk [vmem:[%s3723_s10 + $0xac] sm:$0xf] %vm2050_vm2, %v2972_v38  ;;  %v1084_v44 = vadd.f32 %v3179_v42, %v3713_v4  ;;  %v1075_v46 = vpop.f32.mrb[45].mxu0 }
 0x145   : > { %2158 = vst.msk [vmem:[%s3723_s10 + $0x1ac] sm:$0xf] %vm2050_vm2, %v3036_v39  ;;  %v1340_v45 = vadd.f32 %v3243_v43, %v3713_v4  ;;  %v1331_v47 = vpop.f32.mrb[45].mxu1  ;;  %2092 = vst.msk [vmem:[%s3723_s10 + $0xa4] sm:$0xf] %vm2050_vm2, %v2970_v40  ;;  %v1076_v48 = vadd.f32 %v3713_v4, %v1075_v46  ;;  %v3180_v50 = vpop.f32.mrb[46].mxu0 }
 0x146   : > { %2156 = vst.msk [vmem:[%s3723_s10 + $0x1a4] sm:$0xf] %vm2050_vm2, %v3034_v41  ;;  %v1332_v49 = vadd.f32 %v3713_v4, %v1331_v47  ;;  %v3244_v51 = vpop.f32.mrb[46].mxu1  ;;  %v1456_v52 = vmax.f32 %v1084_v44, 0.0  ;;  %v1087_v54 = vadd.f32 %v3180_v50, %v3713_v4  ;;  %v1078_v56 = vpop.f32.mrb[47].mxu0 }
 0x147   : > { %v1520_v53 = vmax.f32 %v1340_v45, 0.0  ;;  %v1343_v55 = vadd.f32 %v3244_v51, %v3713_v4  ;;  %v1334_v57 = vpop.f32.mrb[47].mxu1  ;;  %v1454_v58 = vmax.f32 %v1076_v48, 0.0  ;;  %v1079_v60 = vadd.f32 %v3713_v4, %v1078_v56  ;;  %v4028_v44 = vld [vmem:[%s4307_s2] ss:$0 sm:$0xff] }
 0x148   : > { %v1518_v59 = vmax.f32 %v1332_v49, 0.0  ;;  %v1335_v61 = vadd.f32 %v3713_v4, %v1334_v57  ;;  %v2975_v62 = vpack.c.bf16 %v1456_v52, %v1456_v52  ;;  %v1457_v0 = vmax.f32 %v1087_v54, 0.0 }
 0x149   : > { %v3039_v63 = vpack.c.bf16 %v1520_v53, %v1520_v53  ;;  %v1521_v1 = vmax.f32 %v1343_v55, 0.0  ;;  %v2973_v2 = vpack.c.bf16 %v1454_v58, %v1454_v58  ;;  %v1455_v5 = vmax.f32 %v1079_v60, 0.0 }
 0x14a   : > { %v3037_v3 = vpack.c.bf16 %v1518_v59, %v1518_v59  ;;  %v1519_v6 = vmax.f32 %v1335_v61, 0.0  ;;  %2097 = vst.msk [vmem:[%s3723_s10 + $0xb8] sm:$0xf] %vm2050_vm2, %v2975_v62  ;;  %v2976_v7 = vpack.c.bf16 %v1457_v0, %v1457_v0 }
 0x14b   : > { %2161 = vst.msk [vmem:[%s3723_s10 + $0x1b8] sm:$0xf] %vm2050_vm2, %v3039_v63  ;;  %v3040_v8 = vpack.c.bf16 %v1521_v1, %v1521_v1  ;;  %2095 = vst.msk [vmem:[%s3723_s10 + $0xb0] sm:$0xf] %vm2050_vm2, %v2973_v2  ;;  %v2974_v9 = vpack.c.bf16 %v1455_v5, %v1455_v5  ;;  %v3183_v11 = vpop.f32.mrb[48].mxu0 }
 0x14c   : > { %2159 = vst.msk [vmem:[%s3723_s10 + $0x1b0] sm:$0xf] %vm2050_vm2, %v3037_v3  ;;  %v3038_v10 = vpack.c.bf16 %v1519_v6, %v1519_v6  ;;  %v3247_v12 = vpop.f32.mrb[48].mxu1  ;;  %2098 = vst.msk [vmem:[%s3723_s10 + $0xbc] sm:$0xf] %vm2050_vm2, %v2976_v7  ;;  %v1100_v13 = vadd.f32 %v3183_v11, %v3713_v4  ;;  %v1091_v15 = vpop.f32.mrb[49].mxu0 }
 0x14d   : > { %2162 = vst.msk [vmem:[%s3723_s10 + $0x1bc] sm:$0xf] %vm2050_vm2, %v3040_v8  ;;  %v1356_v14 = vadd.f32 %v3247_v12, %v3713_v4  ;;  %v1347_v16 = vpop.f32.mrb[49].mxu1  ;;  %2096 = vst.msk [vmem:[%s3723_s10 + $0xb4] sm:$0xf] %vm2050_vm2, %v2974_v9  ;;  %v1092_v17 = vadd.f32 %v3713_v4, %v1091_v15  ;;  %v3184_v19 = vpop.f32.mrb[50].mxu0 }
 0x14e   : > { %2160 = vst.msk [vmem:[%s3723_s10 + $0x1b4] sm:$0xf] %vm2050_vm2, %v3038_v10  ;;  %v1348_v18 = vadd.f32 %v3713_v4, %v1347_v16  ;;  %v3248_v20 = vpop.f32.mrb[50].mxu1  ;;  %v1460_v21 = vmax.f32 %v1100_v13, 0.0  ;;  %v1103_v23 = vadd.f32 %v3184_v19, %v3713_v4  ;;  %v1094_v25 = vpop.f32.mrb[51].mxu0 }
 0x14f   : > { %v1524_v22 = vmax.f32 %v1356_v14, 0.0  ;;  %v1359_v24 = vadd.f32 %v3248_v20, %v3713_v4  ;;  %v1350_v26 = vpop.f32.mrb[51].mxu1  ;;  %v1458_v27 = vmax.f32 %v1092_v17, 0.0  ;;  %v1095_v29 = vadd.f32 %v3713_v4, %v1094_v25 }
 0x150   : > { %v1522_v28 = vmax.f32 %v1348_v18, 0.0  ;;  %v1351_v30 = vadd.f32 %v3713_v4, %v1350_v26  ;;  %v2979_v31 = vpack.c.bf16 %v1460_v21, %v1460_v21  ;;  %v1461_v33 = vmax.f32 %v1103_v23, 0.0 }
 0x151   : > { %v3043_v32 = vpack.c.bf16 %v1524_v22, %v1524_v22  ;;  %v1525_v34 = vmax.f32 %v1359_v24, 0.0  ;;  %v2977_v35 = vpack.c.bf16 %v1458_v27, %v1458_v27  ;;  %v1459_v37 = vmax.f32 %v1095_v29, 0.0 }
 0x152   : > { %v3041_v36 = vpack.c.bf16 %v1522_v28, %v1522_v28  ;;  %v1523_v38 = vmax.f32 %v1351_v30, 0.0  ;;  %2101 = vst.msk [vmem:[%s3723_s10 + $0xc8] sm:$0xf] %vm2050_vm2, %v2979_v31  ;;  %v2980_v39 = vpack.c.bf16 %v1461_v33, %v1461_v33 }
 0x153   : > { %2165 = vst.msk [vmem:[%s3723_s10 + $0x1c8] sm:$0xf] %vm2050_vm2, %v3043_v32  ;;  %v3044_v40 = vpack.c.bf16 %v1525_v34, %v1525_v34  ;;  %2099 = vst.msk [vmem:[%s3723_s10 + $0xc0] sm:$0xf] %vm2050_vm2, %v2977_v35  ;;  %v2978_v4 = vpack.c.bf16 %v1459_v37, %v1459_v37  ;;  %v3187_v42 = vpop.f32.mrb[52].mxu0 }
 0x154   : > { %2163 = vst.msk [vmem:[%s3723_s10 + $0x1c0] sm:$0xf] %vm2050_vm2, %v3041_v36  ;;  %v3042_v41 = vpack.c.bf16 %v1523_v38, %v1523_v38  ;;  %v3251_v43 = vpop.f32.mrb[52].mxu1  ;;  %2102 = vst.msk [vmem:[%s3723_s10 + $0xcc] sm:$0xf] %vm2050_vm2, %v2980_v39  ;;  %v1116_v45 = vadd.f32 %v4028_v44, %v3187_v42  ;;  %v1107_v47 = vpop.f32.mrb[53].mxu0 }
 0x155   : > { %2166 = vst.msk [vmem:[%s3723_s10 + $0x1cc] sm:$0xf] %vm2050_vm2, %v3044_v40  ;;  %v1372_v46 = vadd.f32 %v4028_v44, %v3251_v43  ;;  %v1363_v48 = vpop.f32.mrb[53].mxu1  ;;  %2100 = vst.msk [vmem:[%s3723_s10 + $0xc4] sm:$0xf] %vm2050_vm2, %v2978_v4  ;;  %v1108_v49 = vadd.f32 %v4028_v44, %v1107_v47  ;;  %v3188_v51 = vpop.f32.mrb[54].mxu0 }
 0x156   : > { %2164 = vst.msk [vmem:[%s3723_s10 + $0x1c4] sm:$0xf] %vm2050_vm2, %v3042_v41  ;;  %v1364_v50 = vadd.f32 %v4028_v44, %v1363_v48  ;;  %v3252_v52 = vpop.f32.mrb[54].mxu1  ;;  %v1464_v53 = vmax.f32 %v1116_v45, 0.0  ;;  %v1119_v55 = vadd.f32 %v4028_v44, %v3188_v51  ;;  %v1110_v57 = vpop.f32.mrb[55].mxu0 }
 0x157   : > { %v1528_v54 = vmax.f32 %v1372_v46, 0.0  ;;  %v1375_v56 = vadd.f32 %v4028_v44, %v3252_v52  ;;  %v1366_v58 = vpop.f32.mrb[55].mxu1  ;;  %v1462_v59 = vmax.f32 %v1108_v49, 0.0  ;;  %v1111_v61 = vadd.f32 %v4028_v44, %v1110_v57 }
 0x158   : > { %v1526_v60 = vmax.f32 %v1364_v50, 0.0  ;;  %v1367_v62 = vadd.f32 %v4028_v44, %v1366_v58  ;;  %v2983_v63 = vpack.c.bf16 %v1464_v53, %v1464_v53  ;;  %v1465_v1 = vmax.f32 %v1119_v55, 0.0 }
 0x159   : > { %v3047_v0 = vpack.c.bf16 %v1528_v54, %v1528_v54  ;;  %v1529_v2 = vmax.f32 %v1375_v56, 0.0  ;;  %v2981_v3 = vpack.c.bf16 %v1462_v59, %v1462_v59  ;;  %v1463_v6 = vmax.f32 %v1111_v61, 0.0 }
 0x15a   : > { %v3045_v5 = vpack.c.bf16 %v1526_v60, %v1526_v60  ;;  %v1527_v7 = vmax.f32 %v1367_v62, 0.0  ;;  %2105 = vst.msk [vmem:[%s3723_s10 + $0xd8] sm:$0xf] %vm2050_vm2, %v2983_v63  ;;  %v2984_v8 = vpack.c.bf16 %v1465_v1, %v1465_v1 }
 0x15b   : > { %2169 = vst.msk [vmem:[%s3723_s10 + $0x1d8] sm:$0xf] %vm2050_vm2, %v3047_v0  ;;  %v3048_v9 = vpack.c.bf16 %v1529_v2, %v1529_v2  ;;  %2103 = vst.msk [vmem:[%s3723_s10 + $0xd0] sm:$0xf] %vm2050_vm2, %v2981_v3  ;;  %v2982_v10 = vpack.c.bf16 %v1463_v6, %v1463_v6  ;;  %v3191_v12 = vpop.f32.mrb[56].mxu0 }
 0x15c   : > { %2167 = vst.msk [vmem:[%s3723_s10 + $0x1d0] sm:$0xf] %vm2050_vm2, %v3045_v5  ;;  %v3046_v11 = vpack.c.bf16 %v1527_v7, %v1527_v7  ;;  %v3255_v13 = vpop.f32.mrb[56].mxu1  ;;  %2106 = vst.msk [vmem:[%s3723_s10 + $0xdc] sm:$0xf] %vm2050_vm2, %v2984_v8  ;;  %v1132_v14 = vadd.f32 %v4028_v44, %v3191_v12  ;;  %v1123_v16 = vpop.f32.mrb[57].mxu0 }
 0x15d   : > { %2170 = vst.msk [vmem:[%s3723_s10 + $0x1dc] sm:$0xf] %vm2050_vm2, %v3048_v9  ;;  %v1388_v15 = vadd.f32 %v4028_v44, %v3255_v13  ;;  %v1379_v17 = vpop.f32.mrb[57].mxu1  ;;  %2104 = vst.msk [vmem:[%s3723_s10 + $0xd4] sm:$0xf] %vm2050_vm2, %v2982_v10  ;;  %v1124_v18 = vadd.f32 %v4028_v44, %v1123_v16  ;;  %v3192_v20 = vpop.f32.mrb[58].mxu0 }
 0x15e   : > { %2168 = vst.msk [vmem:[%s3723_s10 + $0x1d4] sm:$0xf] %vm2050_vm2, %v3046_v11  ;;  %v1380_v19 = vadd.f32 %v4028_v44, %v1379_v17  ;;  %v3256_v21 = vpop.f32.mrb[58].mxu1  ;;  %v1468_v22 = vmax.f32 %v1132_v14, 0.0  ;;  %v1135_v24 = vadd.f32 %v4028_v44, %v3192_v20  ;;  %v1126_v26 = vpop.f32.mrb[59].mxu0 }
 0x15f   : > { %v1532_v23 = vmax.f32 %v1388_v15, 0.0  ;;  %v1391_v25 = vadd.f32 %v4028_v44, %v3256_v21  ;;  %v1382_v27 = vpop.f32.mrb[59].mxu1  ;;  %v1466_v28 = vmax.f32 %v1124_v18, 0.0  ;;  %v1127_v30 = vadd.f32 %v4028_v44, %v1126_v26 }
 0x160   : > { %v1530_v29 = vmax.f32 %v1380_v19, 0.0  ;;  %v1383_v31 = vadd.f32 %v4028_v44, %v1382_v27  ;;  %v2987_v32 = vpack.c.bf16 %v1468_v22, %v1468_v22  ;;  %v1469_v34 = vmax.f32 %v1135_v24, 0.0 }
 0x161   : > { %v3051_v33 = vpack.c.bf16 %v1532_v23, %v1532_v23  ;;  %v1533_v35 = vmax.f32 %v1391_v25, 0.0  ;;  %v2985_v36 = vpack.c.bf16 %v1466_v28, %v1466_v28  ;;  %v1467_v38 = vmax.f32 %v1127_v30, 0.0 }
 0x162   : > { %v3049_v37 = vpack.c.bf16 %v1530_v29, %v1530_v29  ;;  %v1531_v39 = vmax.f32 %v1383_v31, 0.0  ;;  %2109 = vst.msk [vmem:[%s3723_s10 + $0xe8] sm:$0xf] %vm2050_vm2, %v2987_v32  ;;  %v2988_v40 = vpack.c.bf16 %v1469_v34, %v1469_v34 }
 0x163   : > { %2173 = vst.msk [vmem:[%s3723_s10 + $0x1e8] sm:$0xf] %vm2050_vm2, %v3051_v33  ;;  %v3052_v4 = vpack.c.bf16 %v1533_v35, %v1533_v35  ;;  %2107 = vst.msk [vmem:[%s3723_s10 + $0xe0] sm:$0xf] %vm2050_vm2, %v2985_v36  ;;  %v2986_v41 = vpack.c.bf16 %v1467_v38, %v1467_v38  ;;  %v3195_v43 = vpop.f32.mrb[60].mxu0 }
 0x164   : > { %2171 = vst.msk [vmem:[%s3723_s10 + $0x1e0] sm:$0xf] %vm2050_vm2, %v3049_v37  ;;  %v3050_v42 = vpack.c.bf16 %v1531_v39, %v1531_v39  ;;  %v3259_v45 = vpop.f32.mrb[60].mxu1  ;;  %2110 = vst.msk [vmem:[%s3723_s10 + $0xec] sm:$0xf] %vm2050_vm2, %v2988_v40  ;;  %v1148_v46 = vadd.f32 %v4028_v44, %v3195_v43  ;;  %v1139_v48 = vpop.f32.mrb[61].mxu0 }
 0x165   : > { %2174 = vst.msk [vmem:[%s3723_s10 + $0x1ec] sm:$0xf] %vm2050_vm2, %v3052_v4  ;;  %v1404_v47 = vadd.f32 %v4028_v44, %v3259_v45  ;;  %v1395_v49 = vpop.f32.mrb[61].mxu1  ;;  %2108 = vst.msk [vmem:[%s3723_s10 + $0xe4] sm:$0xf] %vm2050_vm2, %v2986_v41  ;;  %v1140_v50 = vadd.f32 %v4028_v44, %v1139_v48  ;;  %v3196_v52 = vpop.f32.mrb[62].mxu0 }
 0x166   : > { %2172 = vst.msk [vmem:[%s3723_s10 + $0x1e4] sm:$0xf] %vm2050_vm2, %v3050_v42  ;;  %v1396_v51 = vadd.f32 %v4028_v44, %v1395_v49  ;;  %v3260_v53 = vpop.f32.mrb[62].mxu1  ;;  %v1472_v54 = vmax.f32 %v1148_v46, 0.0  ;;  %v1151_v56 = vadd.f32 %v4028_v44, %v3196_v52  ;;  %v1142_v58 = vpop.f32.mrb[63].mxu0 }
 0x167   : > { %v1536_v55 = vmax.f32 %v1404_v47, 0.0  ;;  %v1407_v57 = vadd.f32 %v4028_v44, %v3260_v53  ;;  %v1398_v59 = vpop.f32.mrb[63].mxu1  ;;  %v1470_v60 = vmax.f32 %v1140_v50, 0.0  ;;  %v1143_v62 = vadd.f32 %v4028_v44, %v1142_v58 }
 0x168   : > { %v1534_v61 = vmax.f32 %v1396_v51, 0.0  ;;  %v1399_v63 = vadd.f32 %v4028_v44, %v1398_v59  ;;  %v2991_v0 = vpack.c.bf16 %v1472_v54, %v1472_v54  ;;  %v1473_v2 = vmax.f32 %v1151_v56, 0.0  ;;  %2185 = sbr.rel (!%p3558_p4) target bundleno = 458 (0x1ca), region = 36 }
 0x169   : > { %v3055_v1 = vpack.c.bf16 %v1536_v55, %v1536_v55  ;;  %v1537_v3 = vmax.f32 %v1407_v57, 0.0  ;;  %v2989_v5 = vpack.c.bf16 %v1470_v60, %v1470_v60  ;;  %v1471_v7 = vmax.f32 %v1143_v62, 0.0 }
 0x16a   : > { %v3053_v6 = vpack.c.bf16 %v1534_v61, %v1534_v61  ;;  %v1535_v8 = vmax.f32 %v1399_v63, 0.0  ;;  %2113 = vst.msk [vmem:[%s3723_s10 + $0xf8] sm:$0xf] %vm2050_vm2, %v2991_v0  ;;  %v2992_v9 = vpack.c.bf16 %v1473_v2, %v1473_v2 }
 0x16b   : > { %2177 = vst.msk [vmem:[%s3723_s10 + $0x1f8] sm:$0xf] %vm2050_vm2, %v3055_v1  ;;  %v3056_v10 = vpack.c.bf16 %v1537_v3, %v1537_v3  ;;  %2111 = vst.msk [vmem:[%s3723_s10 + $0xf0] sm:$0xf] %vm2050_vm2, %v2989_v5  ;;  %v2990_v44 = vpack.c.bf16 %v1471_v7, %v1471_v7 }
 0x16c   : > { %2175 = vst.msk [vmem:[%s3723_s10 + $0x1f0] sm:$0xf] %vm2050_vm2, %v3053_v6  ;;  %v3054_v11 = vpack.c.bf16 %v1535_v8, %v1535_v8  ;;  %2114 = vst.msk [vmem:[%s3723_s10 + $0xfc] sm:$0xf] %vm2050_vm2, %v2992_v9 }
 0x16d   : > { %2178 = vst.msk [vmem:[%s3723_s10 + $0x1fc] sm:$0xf] %vm2050_vm2, %v3056_v10  ;;  %2112 = vst.msk [vmem:[%s3723_s10 + $0xf4] sm:$0xf] %vm2050_vm2, %v2990_v44 }
 0x16e   : > { %2176 = vst.msk [vmem:[%s3723_s10 + $0x1f4] sm:$0xf] %vm2050_vm2, %v3054_v11 }
 0x16f   : > { %s4317_s14 = smov (!%p2188_p8, %s2187_s14), 128 }
 0x170   : > { %s2914_s23 = sshll.u32 %s4317_s14, 6 }
 0x171   : > { %p2917_p9 = scmp.eq.s32.totalorder %s2914_s23, 0 }
 0x172   : > { %s4119_s24 = sshrl.u32 (!%p2917_p9), %s4317_s14, 6 }
 0x173   : > { %2196 = sbr.rel (%p2917_p9) target bundleno = 458 (0x1ca), region = 40  ;;  %p2918_p10 = scmp.le.s32.totalorder (!%p2917_p9), %s4119_s24, 0 }
 0x17a   : > { %2601 = sbr.rel (%p2918_p10) target bundleno = 437 (0x1b5), region = 112  ;;  %s4310_s15 = smov (!%p2918_p10), %s4113_s22 }
 0x17b   : > { %s4311_s20 = smov (!%p2918_p10), %s3723_s10  ;;  %s4128_s25 = smov (!%p2918_p10), 0  }
 0x17c   : > { %s4130_s26 = smov (!%p2918_p10), 0  }
 0x181 LB: >> { %v2212_v12 = vld [vmem:[%s3487_s20] sm:$0xf]  ;;  %v2214_v13 = vld [vmem:[%s3487_s20 + $0x4] sm:$0xf]  ;;  %v2216_v14 = vld [vmem:[%s3487_s20 + $0x8] sm:$0xf]  ;;  %s3495_s26 = sphi %s4130_s26, %s2206_s26   ;;  %s3491_s25 = sphi %s4128_s25, %s4312_s25   ;;  %s3487_s20 = sphi %s4311_s20, %s2345_s20   ;;  %s3483_s15 = sphi %s4310_s15, %s2346_s15  }
 0x182   : >> { %2213 = vst [vmem:[%s3483_s15] sm:$0xf] %v2212_v12  ;;  %2215 = vst [vmem:[%s3483_s15 + $0x4] sm:$0xf] %v2214_v13  ;;  %v2218_v15 = vld [vmem:[%s3487_s20 + $0xc] sm:$0xf]  ;;  %s2340_s27 = sadd.s32 1, %s3491_s25 }
 0x183   : >> { %2217 = vst [vmem:[%s3483_s15 + $0x8] sm:$0xf] %v2216_v14  ;;  %v2220_v16 = vld [vmem:[%s3487_s20 + $0x10] sm:$0xf]  ;;  %v2222_v17 = vld [vmem:[%s3487_s20 + $0x14] sm:$0xf]  ;;  %p2341_p11 = scmp.ge.s32.totalorder %s2340_s27, %s4119_s24 }
 0x184   : >> { %2219 = vst [vmem:[%s3483_s15 + $0xc] sm:$0xf] %v2218_v15  ;;  %2221 = vst [vmem:[%s3483_s15 + $0x10] sm:$0xf] %v2220_v16  ;;  %v2224_v18 = vld [vmem:[%s3487_s20 + $0x18] sm:$0xf] }
 0x185   : >> { %2223 = vst [vmem:[%s3483_s15 + $0x14] sm:$0xf] %v2222_v17  ;;  %v2226_v19 = vld [vmem:[%s3487_s20 + $0x1c] sm:$0xf]  ;;  %v2228_v20 = vld [vmem:[%s3487_s20 + $0x20] sm:$0xf] }
 0x186   : >> { %2225 = vst [vmem:[%s3483_s15 + $0x18] sm:$0xf] %v2224_v18  ;;  %2227 = vst [vmem:[%s3483_s15 + $0x1c] sm:$0xf] %v2226_v19  ;;  %v2230_v21 = vld [vmem:[%s3487_s20 + $0x24] sm:$0xf] }
 0x187   : >> { %2229 = vst [vmem:[%s3483_s15 + $0x20] sm:$0xf] %v2228_v20  ;;  %v2232_v22 = vld [vmem:[%s3487_s20 + $0x28] sm:$0xf]  ;;  %v2234_v23 = vld [vmem:[%s3487_s20 + $0x2c] sm:$0xf] }
 0x188   : >> { %2231 = vst [vmem:[%s3483_s15 + $0x24] sm:$0xf] %v2230_v21  ;;  %2233 = vst [vmem:[%s3483_s15 + $0x28] sm:$0xf] %v2232_v22  ;;  %v2236_v24 = vld [vmem:[%s3487_s20 + $0x30] sm:$0xf] }
 0x189   : >> { %2235 = vst [vmem:[%s3483_s15 + $0x2c] sm:$0xf] %v2234_v23  ;;  %v2238_v25 = vld [vmem:[%s3487_s20 + $0x34] sm:$0xf]  ;;  %v2240_v26 = vld [vmem:[%s3487_s20 + $0x38] sm:$0xf] }
 0x18a   : >> { %2237 = vst [vmem:[%s3483_s15 + $0x30] sm:$0xf] %v2236_v24  ;;  %2239 = vst [vmem:[%s3483_s15 + $0x34] sm:$0xf] %v2238_v25  ;;  %v2242_v27 = vld [vmem:[%s3487_s20 + $0x3c] sm:$0xf] }
 0x18b   : >> { %2241 = vst [vmem:[%s3483_s15 + $0x38] sm:$0xf] %v2240_v26  ;;  %v2244_v28 = vld [vmem:[%s3487_s20 + $0x40] sm:$0xf]  ;;  %v2246_v29 = vld [vmem:[%s3487_s20 + $0x44] sm:$0xf] }
 0x18c   : >> { %2243 = vst [vmem:[%s3483_s15 + $0x3c] sm:$0xf] %v2242_v27  ;;  %2245 = vst [vmem:[%s3483_s15 + $0x40] sm:$0xf] %v2244_v28  ;;  %v2248_v30 = vld [vmem:[%s3487_s20 + $0x48] sm:$0xf] }
 0x18d   : >> { %2247 = vst [vmem:[%s3483_s15 + $0x44] sm:$0xf] %v2246_v29  ;;  %v2250_v31 = vld [vmem:[%s3487_s20 + $0x4c] sm:$0xf]  ;;  %v2252_v32 = vld [vmem:[%s3487_s20 + $0x50] sm:$0xf] }
 0x18e   : >> { %2249 = vst [vmem:[%s3483_s15 + $0x48] sm:$0xf] %v2248_v30  ;;  %2251 = vst [vmem:[%s3483_s15 + $0x4c] sm:$0xf] %v2250_v31  ;;  %v2254_v33 = vld [vmem:[%s3487_s20 + $0x54] sm:$0xf] }
 0x18f   : >> { %2253 = vst [vmem:[%s3483_s15 + $0x50] sm:$0xf] %v2252_v32  ;;  %v2256_v34 = vld [vmem:[%s3487_s20 + $0x58] sm:$0xf]  ;;  %v2258_v35 = vld [vmem:[%s3487_s20 + $0x5c] sm:$0xf] }
 0x190   : >> { %2255 = vst [vmem:[%s3483_s15 + $0x54] sm:$0xf] %v2254_v33  ;;  %2257 = vst [vmem:[%s3483_s15 + $0x58] sm:$0xf] %v2256_v34  ;;  %v2260_v36 = vld [vmem:[%s3487_s20 + $0x60] sm:$0xf] }
 0x191   : >> { %2259 = vst [vmem:[%s3483_s15 + $0x5c] sm:$0xf] %v2258_v35  ;;  %v2262_v37 = vld [vmem:[%s3487_s20 + $0x64] sm:$0xf]  ;;  %v2264_v38 = vld [vmem:[%s3487_s20 + $0x68] sm:$0xf] }
 0x192   : >> { %2261 = vst [vmem:[%s3483_s15 + $0x60] sm:$0xf] %v2260_v36  ;;  %2263 = vst [vmem:[%s3483_s15 + $0x64] sm:$0xf] %v2262_v37  ;;  %v2266_v39 = vld [vmem:[%s3487_s20 + $0x6c] sm:$0xf] }
 0x193   : >> { %2265 = vst [vmem:[%s3483_s15 + $0x68] sm:$0xf] %v2264_v38  ;;  %v2268_v40 = vld [vmem:[%s3487_s20 + $0x70] sm:$0xf]  ;;  %v2270_v4 = vld [vmem:[%s3487_s20 + $0x74] sm:$0xf] }
 0x194   : >> { %2267 = vst [vmem:[%s3483_s15 + $0x6c] sm:$0xf] %v2266_v39  ;;  %2269 = vst [vmem:[%s3483_s15 + $0x70] sm:$0xf] %v2268_v40  ;;  %v2272_v41 = vld [vmem:[%s3487_s20 + $0x78] sm:$0xf] }
 0x195   : >> { %2271 = vst [vmem:[%s3483_s15 + $0x74] sm:$0xf] %v2270_v4  ;;  %v2274_v42 = vld [vmem:[%s3487_s20 + $0x7c] sm:$0xf]  ;;  %v2276_v43 = vld [vmem:[%s3487_s20 + $0x80] sm:$0xf] }
 0x196   : >> { %2273 = vst [vmem:[%s3483_s15 + $0x78] sm:$0xf] %v2272_v41  ;;  %2275 = vst [vmem:[%s3483_s15 + $0x7c] sm:$0xf] %v2274_v42  ;;  %v2278_v45 = vld [vmem:[%s3487_s20 + $0x84] sm:$0xf] }
 0x197   : >> { %2277 = vst [vmem:[%s3483_s15 + $0x80] sm:$0xf] %v2276_v43  ;;  %v2280_v46 = vld [vmem:[%s3487_s20 + $0x88] sm:$0xf]  ;;  %v2282_v47 = vld [vmem:[%s3487_s20 + $0x8c] sm:$0xf] }
 0x198   : >> { %2279 = vst [vmem:[%s3483_s15 + $0x84] sm:$0xf] %v2278_v45  ;;  %2281 = vst [vmem:[%s3483_s15 + $0x88] sm:$0xf] %v2280_v46  ;;  %v2284_v48 = vld [vmem:[%s3487_s20 + $0x90] sm:$0xf] }
 0x199   : >> { %2283 = vst [vmem:[%s3483_s15 + $0x8c] sm:$0xf] %v2282_v47  ;;  %v2286_v49 = vld [vmem:[%s3487_s20 + $0x94] sm:$0xf]  ;;  %v2288_v50 = vld [vmem:[%s3487_s20 + $0x98] sm:$0xf] }
 0x19a   : >> { %2285 = vst [vmem:[%s3483_s15 + $0x90] sm:$0xf] %v2284_v48  ;;  %2287 = vst [vmem:[%s3483_s15 + $0x94] sm:$0xf] %v2286_v49  ;;  %v2290_v51 = vld [vmem:[%s3487_s20 + $0x9c] sm:$0xf] }
 0x19b   : >> { %2289 = vst [vmem:[%s3483_s15 + $0x98] sm:$0xf] %v2288_v50  ;;  %v2292_v52 = vld [vmem:[%s3487_s20 + $0xa0] sm:$0xf]  ;;  %v2294_v53 = vld [vmem:[%s3487_s20 + $0xa4] sm:$0xf] }
 0x19c   : >> { %2291 = vst [vmem:[%s3483_s15 + $0x9c] sm:$0xf] %v2290_v51  ;;  %2293 = vst [vmem:[%s3483_s15 + $0xa0] sm:$0xf] %v2292_v52  ;;  %v2296_v54 = vld [vmem:[%s3487_s20 + $0xa8] sm:$0xf] }
 0x19d   : >> { %2295 = vst [vmem:[%s3483_s15 + $0xa4] sm:$0xf] %v2294_v53  ;;  %v2298_v55 = vld [vmem:[%s3487_s20 + $0xac] sm:$0xf]  ;;  %v2300_v56 = vld [vmem:[%s3487_s20 + $0xb0] sm:$0xf] }
 0x19e   : >> { %2297 = vst [vmem:[%s3483_s15 + $0xa8] sm:$0xf] %v2296_v54  ;;  %2299 = vst [vmem:[%s3483_s15 + $0xac] sm:$0xf] %v2298_v55  ;;  %v2302_v57 = vld [vmem:[%s3487_s20 + $0xb4] sm:$0xf] }
 0x19f   : >> { %2301 = vst [vmem:[%s3483_s15 + $0xb0] sm:$0xf] %v2300_v56  ;;  %v2304_v58 = vld [vmem:[%s3487_s20 + $0xb8] sm:$0xf]  ;;  %v2306_v59 = vld [vmem:[%s3487_s20 + $0xbc] sm:$0xf] }
 0x1a0   : >> { %2303 = vst [vmem:[%s3483_s15 + $0xb4] sm:$0xf] %v2302_v57  ;;  %2305 = vst [vmem:[%s3483_s15 + $0xb8] sm:$0xf] %v2304_v58  ;;  %v2308_v60 = vld [vmem:[%s3487_s20 + $0xc0] sm:$0xf] }
 0x1a1   : >> { %2307 = vst [vmem:[%s3483_s15 + $0xbc] sm:$0xf] %v2306_v59  ;;  %v2310_v61 = vld [vmem:[%s3487_s20 + $0xc4] sm:$0xf]  ;;  %v2312_v62 = vld [vmem:[%s3487_s20 + $0xc8] sm:$0xf] }
 0x1a2   : >> { %2309 = vst [vmem:[%s3483_s15 + $0xc0] sm:$0xf] %v2308_v60  ;;  %2311 = vst [vmem:[%s3483_s15 + $0xc4] sm:$0xf] %v2310_v61  ;;  %v2314_v63 = vld [vmem:[%s3487_s20 + $0xcc] sm:$0xf] }
 0x1a3   : >> { %2313 = vst [vmem:[%s3483_s15 + $0xc8] sm:$0xf] %v2312_v62  ;;  %v2316_v0 = vld [vmem:[%s3487_s20 + $0xd0] sm:$0xf]  ;;  %v2318_v1 = vld [vmem:[%s3487_s20 + $0xd4] sm:$0xf] }
 0x1a4   : >> { %2315 = vst [vmem:[%s3483_s15 + $0xcc] sm:$0xf] %v2314_v63  ;;  %2317 = vst [vmem:[%s3483_s15 + $0xd0] sm:$0xf] %v2316_v0  ;;  %v2320_v2 = vld [vmem:[%s3487_s20 + $0xd8] sm:$0xf] }
 0x1a5   : >> { %2319 = vst [vmem:[%s3483_s15 + $0xd4] sm:$0xf] %v2318_v1  ;;  %v2322_v3 = vld [vmem:[%s3487_s20 + $0xdc] sm:$0xf]  ;;  %v2324_v5 = vld [vmem:[%s3487_s20 + $0xe0] sm:$0xf] }
 0x1a6   : >> { %2321 = vst [vmem:[%s3483_s15 + $0xd8] sm:$0xf] %v2320_v2  ;;  %2323 = vst [vmem:[%s3483_s15 + $0xdc] sm:$0xf] %v2322_v3  ;;  %v2326_v6 = vld [vmem:[%s3487_s20 + $0xe4] sm:$0xf] }
 0x1a7   : >> { %2325 = vst [vmem:[%s3483_s15 + $0xe0] sm:$0xf] %v2324_v5  ;;  %v2328_v7 = vld [vmem:[%s3487_s20 + $0xe8] sm:$0xf]  ;;  %v2330_v8 = vld [vmem:[%s3487_s20 + $0xec] sm:$0xf] }
 0x1a8   : >> { %2327 = vst [vmem:[%s3483_s15 + $0xe4] sm:$0xf] %v2326_v6  ;;  %2329 = vst [vmem:[%s3483_s15 + $0xe8] sm:$0xf] %v2328_v7  ;;  %v2332_v9 = vld [vmem:[%s3487_s20 + $0xf0] sm:$0xf] }
 0x1a9   : >> { %2331 = vst [vmem:[%s3483_s15 + $0xec] sm:$0xf] %v2330_v8  ;;  %v2334_v10 = vld [vmem:[%s3487_s20 + $0xf4] sm:$0xf]  ;;  %v2336_v44 = vld [vmem:[%s3487_s20 + $0xf8] sm:$0xf] }
 0x1aa   : >> { %2333 = vst [vmem:[%s3483_s15 + $0xf0] sm:$0xf] %v2332_v9  ;;  %2335 = vst [vmem:[%s3483_s15 + $0xf4] sm:$0xf] %v2334_v10  ;;  %v2338_v11 = vld [vmem:[%s3487_s20 + $0xfc] sm:$0xf] }
 0x1ab   : >> { %2337 = vst [vmem:[%s3483_s15 + $0xf8] sm:$0xf] %v2336_v44  ;;  %2339 = vst [vmem:[%s3483_s15 + $0xfc] sm:$0xf] %v2338_v11  ;;  %s4319_s27 = smov (%p2341_p11, %s2340_s27), 0  ;;  %s2206_s26 = sadd.s32 1, %s3495_s26  }
 0x1ac   : >> { %s2919_s28 = sshll.u32 %s4319_s27, 8  ;;  %p2205_p12 = scmp.ge.s32.totalorder %s2206_s26, %s4119_s24 }
 0x1ad   : >> { %s2345_s20 = scalar_lea.vmem %s3723_s10, %s2919_s28 [#allocation2]   ;;  %s2346_s15 = scalar_lea.vmem %s4113_s22, %s2919_s28  }
 0x1ae   : >> { %s4312_s25 = smov %s4319_s27  ;;  %2208 = sbr.rel (!%p2205_p12) target bundleno = 385 (0x181), region = 118 }
 0x1b5 PF: > { %s4287_s29 = sand.u32 63, %s4317_s14   ;;  %s3058_s30 = sshll.u32 %s4119_s24, 8 }
 0x1b6   : > { %s2351_s4 = scalar_lea.vmem %s3723_s10, %s3058_s30 [#allocation2]   ;;  %s2353_s5 = scalar_lea.vmem %s4113_s22, %s3058_s30  }
 0x1b7   : > { %p2924_p13 = scmp.le.s32.totalorder %s4287_s29, 0 }
 0x1b8   : > { %s3497_s6 = smov (!%p2924_p13), %s2353_s5   ;;  %s3501_s7 = smov (!%p2924_p13), %s2351_s4  }
 0x1b9   : > { %2615 = sbr.rel (%p2924_p13) target bundleno = 458 (0x1ca), region = 123  ;;  %s3505_s8 = smov (!%p2924_p13), 0  }
 0x1ba   : > { %s3509_s9 = smov (!%p2924_p13), 0  }
 0x1c0 LB: >> { %v2363_v12 = vld [vmem:[%s3503_s7] sm:$0xf]  ;;  %s2365_s11 = sadd.s32 1, %s3507_s8  ;;  %s2357_s9 = sadd.s32 1, %s3511_s9   ;;  %s3511_s9 = sphi %s3509_s9, %s2357_s9   ;;  %s3507_s8 = sphi %s3505_s8, %s3506_s8   ;;  %s3503_s7 = sphi %s3501_s7, %s2370_s7   ;;  %s3499_s6 = sphi %s3497_s6, %s2371_s6  }
 0x1c1   : >> { %2364 = vst [vmem:[%s3499_s6] sm:$0xf] %v2363_v12  ;;  %p2366_p0 = scmp.ge.s32.totalorder %s2365_s11, %s4287_s29  ;;  %p2356_p1 = scmp.ge.s32.totalorder %s2357_s9, %s4287_s29 }
 0x1c3   : >> { %s4321_s11 = smov (%p2366_p0, %s2365_s11), 0  ;;  %2359 = sbr.rel (!%p2356_p1) target bundleno = 448 (0x1c0), region = 129 }
 0x1c4   : >> { %s2925_s10 = sshll.u32 %s4321_s11, 2  ;;  %s3506_s8 = smov %s4321_s11  }
 0x1c5   : >> { %s2370_s7 = scalar_lea.vmem %s2351_s4, %s2925_s10 [#allocation2]   ;;  %s2371_s6 = scalar_lea.vmem %s2353_s5, %s2925_s10  }
 0x1ca PF: > { %p10_p2 = scmp.ge.s32.totalorder %s3548_s16, 6   ;;  %s4313_s12 = smov %s3475_s13 }
 0x1cb   : > { %s4314_s13 = smov %s3556_s19  ;;  %s4315_s14 = smov %s3548_s16 }
 0x1cc   :  { %12 = sbr.rel (!%p10_p2) target bundleno = 2 (0x2), region = 140 }

// kernel: mario_forward.6
= control target key start
LH: loop header
LB: loop body
LE: loop exit
PB: predicated region body
PF: predicated region fallthrough
CT: control target
= control target key end

     0   :  { %s3267_s12 = smov 0   ;;  %s3269_s13 = smov 0   ;;  %s4045_s0 = inlined_call_operand.vmem [shape: bf16[882,288], index: 0, kind: input, shape index: {}]   ;;  %s4046_s1 = inlined_call_operand.vmem [shape: bf16[288,64], index: 1, kind: input, shape index: {}]   ;;  %s4047_s2 = inlined_call_operand.vmem [shape: f32[1,64], index: 2, kind: input, shape index: {}]   ;;  %s4048_s3 = inlined_call_operand.vmem [shape: bf16[882,64], index: 3, kind: output, shape index: {}]  }
   0x1   :  { %s3271_s14 = smov 0  }
   0x2 LB: > { %s3280_s15 = sadd.s32 4294967295, %s3212_s14   ;;  %s3282_s16 = sadd.s32 1, %s3212_s14   ;;  %s3212_s14 = sphi %s3271_s14, %s4055_s14   ;;  %s3208_s13 = sphi %s3269_s13, %s4054_s13   ;;  %s3204_s12 = sphi %s3267_s12, %s4053_s12  }
   0x3   : > { %s85_s17 = ssub.s32 %s3212_s14, %s3282_s16  ;;  %s88_s18 = sadd.s32 1, %s3208_s13 }
   0x4   : > { %p86_p0 = scmp.eq.s32.totalorder %s85_s17, 0  ;;  %p98_p1 = scmp.ne.s32.totalorder %s3208_s13, %s3204_s12 }
   0x5   : > { %p99_p2 = scmp.eq.s32.totalorder %s3280_s15, 1  ;;  %p2489_p3 = scmp.ge.s32.totalorder %s3212_s14, 1 }
   0x6   : > { %s3290_s19 = scalar_select %p86_p0, %s3208_s13, %s88_s18  }
   0x7   : > { %p3292_p4 = por %p99_p2, %p98_p1  ;;  %p149_p5 = scmp.lt.s32.totalorder %s3212_s14, 3 }
   0x9   : > { %p150_p6 = pnand %p2489_p3, %p149_p5 }
   0xa   : > { %v3012_v0 = vld [vmem:[%s4046_s1] sm:$0xff] (!%p150_p6)   ;;  %v3246_v1 = vmov (!%p150_p6), 0   ;;  %s3302_s23 = sshll.u32 (!%p150_p6), %s3280_s15, 6  ;;  %v3013_v2 = vld [vmem:[%s4046_s1 + $0x8] sm:$0xff] (!%p150_p6)   ;;  %v3014_v3 = vld [vmem:[%s4046_s1 + $0x10] sm:$0xff] (!%p150_p6)   ;;  %vm960_vm0 = vcmask (!%p150_p6), 261120  }
   0xb   : > { %153 = sbr.rel (%p150_p6) target bundleno = 573 (0x23d), region = 32  ;;  %1057 = vmatprep.subr.bf16.mxu0 (!%p150_p6), %v3246_v1  ;;  %2890 = vmatprep.subr.bf16.mxu1 (!%p150_p6), %v3246_v1  ;;  %p184_p7 = scmp.lt.s32.totalorder (!%p150_p6), %s3302_s23, 110  ;;  %v3015_v4 = vld [vmem:[%s4046_s1 + $0x18] sm:$0xff] (!%p150_p6)   ;;  %v3016_v5 = vld [vmem:[%s4046_s1 + $0x20] sm:$0xff] (!%p150_p6)   ;;  %v3017_v7 = vld [vmem:[%s4046_s1 + $0x28] sm:$0xff] (!%p150_p6)   ;;  %vm1955_vm1 = vcmask (!%p150_p6), 519168  }
   0xc   : > { %1058 = vmatpush1.bf16.msra.mxu0 (!%p150_p6), %v3012_v0  ;;  %2906 = vmatpush1.bf16.msra.mxu1 (!%p150_p6), %v3012_v0  ;;  %v3018_v9 = vld [vmem:[%s4046_s1 + $0x30] sm:$0xff] (!%p150_p6)   ;;  %v3019_v10 = vld [vmem:[%s4046_s1 + $0x38] sm:$0xff] (!%p150_p6)   ;;  %v3020_v11 = vld [vmem:[%s4046_s1 + $0x40] sm:$0xff] (!%p150_p6)   ;;  %s175_s25 = sand.u32 (!%p150_p6), 1, %s3204_s12  }
   0xd   : > { %1059 = vmatprep.subr.bf16.mxu0 (!%p150_p6), %v3246_v1  ;;  %2891 = vmatprep.subr.bf16.mxu1 (!%p150_p6), %v3246_v1  ;;  %v3021_v12 = vld [vmem:[%s4046_s1 + $0x48] sm:$0xff] (!%p150_p6)   ;;  %v3022_v13 = vld [vmem:[%s4046_s1 + $0x50] sm:$0xff] (!%p150_p6)   ;;  %v3023_v14 = vld [vmem:[%s4046_s1 + $0x58] sm:$0xff] (!%p150_p6)   ;;  %s2490_s26 = sshll.u32 (!%p150_p6), %s175_s25, 8 }
   0xe   : > { %v3024_v15 = vld [vmem:[%s4046_s1 + $0x60] sm:$0xff] (!%p150_p6)   ;;  %v3025_v16 = vld [vmem:[%s4046_s1 + $0x68] sm:$0xff] (!%p150_p6)   ;;  %v3026_v17 = vld [vmem:[%s4046_s1 + $0x70] sm:$0xff] (!%p150_p6)   ;;  %s3598_s12 = scalar_lea.vmem (!%p150_p6), [#allocation2], %s2490_s26  }
   0xf   : > { %v3027_v18 = vld [vmem:[%s4046_s1 + $0x78] sm:$0xff] (!%p150_p6)   ;;  %v3034_v19 = vld [vmem:[%s4046_s1 + $0x80] sm:$0xff] (!%p150_p6)   ;;  %v3059_v24 = vld [vmem:[%s4046_s1 + $0x88] sm:$0xff] (!%p150_p6)  }
  0x10   : > { %1060 = vmatpush1.bf16.msra.mxu0 (!%p150_p6), %v3013_v2  ;;  %2907 = vmatpush1.bf16.msra.mxu1 (!%p150_p6), %v3013_v2 }
  0x11   : > { %1061 = vmatprep.subr.bf16.mxu0 (!%p150_p6), %v3246_v1  ;;  %2892 = vmatprep.subr.bf16.mxu1 (!%p150_p6), %v3246_v1 }
  0x12   : > { %s185_s28 = scalar_select %p184_p7, %s3302_s23, 110 }
  0x13   : > { %s2028_s27 = ssub.s32 (%p3292_p4), 111, %s3302_s23 }
  0x14   : > { %1062 = vmatpush1.bf16.msra.mxu0 %v3014_v3  ;;  %2908 = vmatpush1.bf16.msra.mxu1 %v3014_v3  ;;  %s2922_s4 = smul.u32 12, %s185_s28  ;;  %s2785_s28 = sshll.u32 (%p3292_p4), %s3280_s15, 8 }
  0x15   : > { %1063 = vmatprep.subr.bf16.mxu0 %v3246_v1  ;;  %2893 = vmatprep.subr.bf16.mxu1 %v3246_v1  ;;  %p2029_p8 = scmp.lt.s32.totalorder (%p3292_p4), %s2028_s27, 64 }
  0x16   : > { %s3327_s9 = scalar_lea.vmem %s4045_s0, %s2922_s4  ;;  %s3853_s4 = scalar_lea.vmem (%p3292_p4), %s4048_s3, %s2785_s28  }
  0x17   : > { %v3030_v6 = vld [vmem:[%s3327_s9 + $0x4] ss:$12 sps:$4 sm:$0xff]   ;;  %v3028_v20 = vld [vmem:[%s3327_s9] ss:$12 sps:$4 sm:$0xff]   ;;  %v3035_v22 = vld [vmem:[%s3327_s9 + $0x1c] ss:$12 sps:$4 sm:$0xff]  }
  0x18   : > { %1064 = vmatpush1.bf16.msra.mxu0 %v3015_v4  ;;  %2909 = vmatpush1.bf16.msra.mxu1 %v3015_v4  ;;  %v3033_v8 = vld [vmem:[%s3327_s9 + $0x244] ss:$12 sps:$4 sm:$0xff]   ;;  %v3031_v21 = vld [vmem:[%s3327_s9 + $0x240] ss:$12 sps:$4 sm:$0xff]   ;;  %v3037_v23 = vld [vmem:[%s3327_s9 + $0x25c] ss:$12 sps:$4 sm:$0xff]  }
  0x19   : > { %1065 = vmatprep.subr.bf16.mxu0 %v3246_v1  ;;  %2894 = vmatprep.subr.bf16.mxu1 %v3246_v1  ;;  %v3039_v25 = vld [vmem:[%s3327_s9 + $0x18] ss:$12 sps:$4 sm:$0xff]   ;;  %v3041_v27 = vld [vmem:[%s3327_s9 + $0x34] ss:$12 sps:$4 sm:$0xff]   ;;  %v3045_v29 = vld [vmem:[%s3327_s9 + $0x30] ss:$12 sps:$4 sm:$0xff]  }
  0x1a   : > { %1089 = vmatprep.mubr.bf16.mxu0 %v3030_v6  ;;  %1281 = vmatprep.mubr.bf16.mxu1 %v3033_v8  ;;  %v3040_v26 = vld [vmem:[%s3327_s9 + $0x258] ss:$12 sps:$4 sm:$0xff]   ;;  %v3043_v28 = vld [vmem:[%s3327_s9 + $0x274] ss:$12 sps:$4 sm:$0xff]   ;;  %v3046_v30 = vld [vmem:[%s3327_s9 + $0x270] ss:$12 sps:$4 sm:$0xff]  }
  0x1b   : > { %v3047_v31 = vld [vmem:[%s3327_s9 + $0x4c] ss:$12 sps:$4 sm:$0xff]   ;;  %v3051_v33 = vld [vmem:[%s3327_s9 + $0x48] ss:$12 sps:$4 sm:$0xff]   ;;  %v3053_v35 = vld [vmem:[%s3327_s9 + $0x64] ss:$12 sps:$4 sm:$0xff]  }
  0x1c   : > { %1066 = vmatpush1.bf16.msra.mxu0 %v3016_v5  ;;  %2910 = vmatpush1.bf16.msra.mxu1 %v3016_v5  ;;  %v3049_v32 = vld [vmem:[%s3327_s9 + $0x28c] ss:$12 sps:$4 sm:$0xff]   ;;  %v3052_v34 = vld [vmem:[%s3327_s9 + $0x288] ss:$12 sps:$4 sm:$0xff]   ;;  %v3055_v36 = vld [vmem:[%s3327_s9 + $0x2a4] ss:$12 sps:$4 sm:$0xff]  }
  0x1d   : > { %1067 = vmatprep.subr.bf16.mxu0 %v3246_v1  ;;  %2895 = vmatprep.subr.bf16.mxu1 %v3246_v1  ;;  %v3057_v37 = vld [vmem:[%s3327_s9 + $0x60] ss:$12 sps:$4 sm:$0xff]   ;;  %v3060_v39 = vld [vmem:[%s3327_s9 + $0x7c] ss:$12 sps:$4 sm:$0xff]   ;;  %v3064_v41 = vld [vmem:[%s3327_s9 + $0x78] ss:$12 sps:$4 sm:$0xff]  }
  0x1e   : > { %v3058_v38 = vld [vmem:[%s3327_s9 + $0x2a0] ss:$12 sps:$4 sm:$0xff]   ;;  %v3062_v40 = vld [vmem:[%s3327_s9 + $0x2bc] ss:$12 sps:$4 sm:$0xff]   ;;  %v3065_v42 = vld [vmem:[%s3327_s9 + $0x2b8] ss:$12 sps:$4 sm:$0xff]  }
  0x1f   : > { %v3066_v43 = vld [vmem:[%s3327_s9 + $0x94] ss:$12 sps:$4 sm:$0xff]   ;;  %v3070_v45 = vld [vmem:[%s3327_s9 + $0x90] ss:$12 sps:$4 sm:$0xff]   ;;  %v3072_v47 = vld [vmem:[%s3327_s9 + $0xac] ss:$12 sps:$4 sm:$0xff]  }
  0x20   : > { %1068 = vmatpush1.bf16.msra.mxu0 %v3017_v7  ;;  %2911 = vmatpush1.bf16.msra.mxu1 %v3017_v7  ;;  %v3068_v44 = vld [vmem:[%s3327_s9 + $0x2d4] ss:$12 sps:$4 sm:$0xff]   ;;  %v3071_v46 = vld [vmem:[%s3327_s9 + $0x2d0] ss:$12 sps:$4 sm:$0xff]   ;;  %v3074_v48 = vld [vmem:[%s3327_s9 + $0x2ec] ss:$12 sps:$4 sm:$0xff]  }
  0x21   : > { %1069 = vmatprep.subr.bf16.mxu0 %v3246_v1  ;;  %2896 = vmatprep.subr.bf16.mxu1 %v3246_v1  ;;  %v3076_v49 = vld [vmem:[%s3327_s9 + $0xa8] ss:$12 sps:$4 sm:$0xff]   ;;  %v3078_v51 = vld [vmem:[%s3327_s9 + $0xc4] ss:$12 sps:$4 sm:$0xff]   ;;  %v3081_v53 = vld [vmem:[%s3327_s9 + $0xc0] ss:$12 sps:$4 sm:$0xff]  }
  0x22   : > { %v3077_v50 = vld [vmem:[%s3327_s9 + $0x2e8] ss:$12 sps:$4 sm:$0xff]   ;;  %v3082_v54 = vld [vmem:[%s3327_s9 + $0x20] ss:$12 sps:$4 sm:$0xff]   ;;  %v3085_v56 = vld [vmem:[%s3327_s9 + $0x38] ss:$12 sps:$4 sm:$0xff]  }
  0x23   : > { %v3080_v52 = vld [vmem:[%s3327_s9 + $0x8] ss:$12 sps:$4 sm:$0xff]   ;;  %v3086_v57 = vld [vmem:[%s3327_s9 + $0xd8] ss:$12 sps:$4 sm:$0xff]   ;;  %v3087_v58 = vld [vmem:[%s3327_s9 + $0x50] ss:$12 sps:$4 sm:$0xff]  }
  0x24   : > { %1070 = vmatpush1.bf16.msra.mxu0 %v3018_v9  ;;  %2912 = vmatpush1.bf16.msra.mxu1 %v3018_v9  ;;  %v3083_v55 = vld [vmem:[%s3327_s9 + $0xdc] ss:$12 sps:$4 sm:$0xff]   ;;  %v3088_v59 = vld [vmem:[%s3327_s9 + $0xf4] ss:$12 sps:$4 sm:$0xff]   ;;  %v3093_v63 = vld [vmem:[%s3327_s9 + $0x10c] ss:$12 sps:$4 sm:$0xff]  }
  0x25   : > { %1071 = vmatprep.subr.bf16.mxu0 %v3246_v1  ;;  %2897 = vmatprep.subr.bf16.mxu1 %v3246_v1  ;;  %v3090_v60 = vld [vmem:[%s3327_s9 + $0x68] ss:$12 sps:$4 sm:$0xff]   ;;  %v3091_v61 = vld [vmem:[%s3327_s9 + $0xf0] ss:$12 sps:$4 sm:$0xff]   ;;  %v3092_v62 = vld [vmem:[%s3327_s9 + $0x80] ss:$12 sps:$4 sm:$0xff]  }
  0x26   : > { %v3095_v0 = vld [vmem:[%s3327_s9 + $0x98] ss:$12 sps:$4 sm:$0xff]   ;;  %v3097_v2 = vld [vmem:[%s3327_s9 + $0xb0] ss:$12 sps:$4 sm:$0xff]   ;;  %v3100_v4 = vld [vmem:[%s3327_s9 + $0xc8] ss:$12 sps:$4 sm:$0xff]  }
  0x27   : > { %v3098_v3 = vld [vmem:[%s3327_s9 + $0x124] ss:$12 sps:$4 sm:$0xff]   ;;  %v3101_v5 = vld [vmem:[%s3327_s9 + $0x120] ss:$12 sps:$4 sm:$0xff]   ;;  %v3103_v7 = vld [vmem:[%s3327_s9 + $0x13c] ss:$12 sps:$4 sm:$0xff]  }
  0x28   : > { %1072 = vmatpush1.bf16.msra.mxu0 %v3019_v10  ;;  %2913 = vmatpush1.bf16.msra.mxu1 %v3019_v10  ;;  %v3102_v6 = vld [vmem:[%s3327_s9 + $0xe0] ss:$12 sps:$4 sm:$0xff]   ;;  %v3105_v8 = vld [vmem:[%s3327_s9 + $0xf8] ss:$12 sps:$4 sm:$0xff]   ;;  %v3107_v10 = vld [vmem:[%s3327_s9 + $0x110] ss:$12 sps:$4 sm:$0xff]  }
  0x29   : > { %1073 = vmatprep.subr.bf16.mxu0 %v3246_v1  ;;  %2898 = vmatprep.subr.bf16.mxu1 %v3246_v1  ;;  %v3106_v9 = vld [vmem:[%s3327_s9 + $0x138] ss:$12 sps:$4 sm:$0xff]  }
  0x2c   : > { %1074 = vmatpush1.bf16.msra.mxu0 %v3020_v11  ;;  %2914 = vmatpush1.bf16.msra.mxu1 %v3020_v11  ;;  %v3108_v11 = vld [vmem:[%s3327_s9 + $0x154] ss:$12 sps:$4 sm:$0xff]  }
  0x2d   : > { %1075 = vmatprep.subr.bf16.mxu0 %v3246_v1  ;;  %2899 = vmatprep.subr.bf16.mxu1 %v3246_v1 }
  0x30   : > { %1076 = vmatpush1.bf16.msra.mxu0 %v3021_v12  ;;  %2915 = vmatpush1.bf16.msra.mxu1 %v3021_v12  ;;  %v3110_v12 = vld [vmem:[%s3327_s9 + $0x128] ss:$12 sps:$4 sm:$0xff]  }
  0x31   : > { %1077 = vmatprep.subr.bf16.mxu0 %v3246_v1  ;;  %2900 = vmatprep.subr.bf16.mxu1 %v3246_v1 }
  0x34   : > { %1078 = vmatpush1.bf16.msra.mxu0 %v3022_v13  ;;  %2916 = vmatpush1.bf16.msra.mxu1 %v3022_v13  ;;  %v3111_v13 = vld [vmem:[%s3327_s9 + $0x150] ss:$12 sps:$4 sm:$0xff]  }
  0x35   : > { %1079 = vmatprep.subr.bf16.mxu0 %v3246_v1  ;;  %2901 = vmatprep.subr.bf16.mxu1 %v3246_v1 }
  0x38   : > { %1080 = vmatpush1.bf16.msra.mxu0 %v3023_v14  ;;  %2917 = vmatpush1.bf16.msra.mxu1 %v3023_v14  ;;  %v3112_v14 = vld [vmem:[%s3327_s9 + $0x140] ss:$12 sps:$4 sm:$0xff]  }
  0x39   : > { %1081 = vmatprep.subr.bf16.mxu0 %v3246_v1  ;;  %2902 = vmatprep.subr.bf16.mxu1 %v3246_v1 }
  0x3c   : > { %1082 = vmatpush1.bf16.msra.mxu0 %v3024_v15  ;;  %2918 = vmatpush1.bf16.msra.mxu1 %v3024_v15  ;;  %v3113_v15 = vld [vmem:[%s3327_s9 + $0x16c] ss:$12 sps:$4 sm:$0xff]  }
  0x3d   : > { %1083 = vmatprep.subr.bf16.mxu0 %v3246_v1  ;;  %2903 = vmatprep.subr.bf16.mxu1 %v3246_v1 }
  0x40   : > { %1084 = vmatpush1.bf16.msra.mxu0 %v3025_v16  ;;  %2919 = vmatpush1.bf16.msra.mxu1 %v3025_v16  ;;  %v3115_v16 = vld [vmem:[%s3327_s9 + $0x158] ss:$12 sps:$4 sm:$0xff]  }
  0x41   : > { %1085 = vmatprep.subr.bf16.mxu0 %v3246_v1  ;;  %2904 = vmatprep.subr.bf16.mxu1 %v3246_v1 }
  0x44   : > { %1086 = vmatpush1.bf16.msra.mxu0 %v3026_v17  ;;  %2920 = vmatpush1.bf16.msra.mxu1 %v3026_v17  ;;  %v3116_v17 = vld [vmem:[%s3327_s9 + $0x168] ss:$12 sps:$4 sm:$0xff]  }
  0x45   : > { %1087 = vmatprep.subr.bf16.mxu0 %v3246_v1  ;;  %2905 = vmatprep.subr.bf16.mxu1 %v3246_v1  ;;  %v3096_v1 = vld [vmem:[%s3327_s9 + $0x108] ss:$12 sps:$4 sm:$0xff]  }
  0x48   : > { %1088 = vmatpush1.bf16.msra.mxu0 %v3027_v18  ;;  %2921 = vmatpush1.bf16.msra.mxu1 %v3027_v18  ;;  %v3117_v18 = vld [vmem:[%s3327_s9 + $0x170] ss:$12 sps:$4 sm:$0xff]  }
  0x49   : > { %2822 = vmatprep.subr.bf16.mxu1 %v3034_v19 }
  0x4b   : > { %1090 = vmatmul.mubr.bf16.vlgmr.msra.gmra.mrb[0].mxu0 %v3028_v20  ;;  %1282 = vmatmul.mubr.bf16.vlgmr.msra.gmra.mrb[0].mxu1 %v3031_v21  ;;  %v3120_v20 = vld [vmem:[%s3327_s9 + $0x188] ss:$12 sps:$4 sm:$0xff]   ;;  %v3121_v21 = vld [vmem:[%s3327_s9 + $0x180] ss:$12 sps:$4 sm:$0xff]  }
  0x4c   : > { %2823 = vmatpush3.bf16.msra.mxu1 %v3034_v19  ;;  %1097 = vmatprep.mubr.bf16.mxu0 %v3035_v22  ;;  %v3118_v19 = vld [vmem:[%s3327_s9 + $0x184] ss:$12 sps:$4 sm:$0xff]   ;;  %v3122_v22 = vld [vmem:[%s3327_s9 + $0x1a0] ss:$12 sps:$4 sm:$0xff]  }
  0x4d   : > { %1289 = vmatprep.mubr.bf16.mxu1 %v3037_v23  ;;  %2824 = vmatprep.subr.bf16.mxu1 %v3059_v24  ;;  %v3123_v23 = vld [vmem:[%s3327_s9 + $0x19c] ss:$12 sps:$4 sm:$0xff]  }
  0x50   : > { %2825 = vmatpush3.bf16.msra.mxu1 %v3059_v24  ;;  %v3125_v24 = vld [vmem:[%s3327_s9 + $0x1b8] ss:$12 sps:$4 sm:$0xff]  }
  0x53   : > { %1098 = vmatmul.mubr.bf16.gmra.mrb[4].mxu0 %v3039_v25  ;;  %1290 = vmatmul.mubr.bf16.gmra.mrb[4].mxu1 %v3040_v26  ;;  %v3126_v25 = vld [vmem:[%s3327_s9 + $0x198] ss:$12 sps:$4 sm:$0xff]   ;;  %v3127_v26 = vld [vmem:[%s3327_s9 + $0x1d0] ss:$12 sps:$4 sm:$0xff]  }
  0x54   : > { %1105 = vmatprep.mubr.bf16.mxu0 %v3041_v27  ;;  %1297 = vmatprep.mubr.bf16.mxu1 %v3043_v28  ;;  %v3128_v27 = vld [vmem:[%s3327_s9 + $0x1b4] ss:$12 sps:$4 sm:$0xff]  }
  0x55   : > { %v3130_v28 = vld [vmem:[%s3327_s9 + $0x1e8] ss:$12 sps:$4 sm:$0xff]  }
  0x5b   : > { %1106 = vmatmul.mubr.bf16.gmra.mrb[8].mxu0 %v3045_v29  ;;  %1298 = vmatmul.mubr.bf16.gmra.mrb[8].mxu1 %v3046_v30  ;;  %v3131_v29 = vld [vmem:[%s3327_s9 + $0x1b0] ss:$12 sps:$4 sm:$0xff]   ;;  %v3132_v30 = vld [vmem:[%s3327_s9 + $0x200] ss:$12 sps:$4 sm:$0xff]  }
  0x5c   : > { %1113 = vmatprep.mubr.bf16.mxu0 %v3047_v31  ;;  %1305 = vmatprep.mubr.bf16.mxu1 %v3049_v32  ;;  %v3133_v31 = vld [vmem:[%s3327_s9 + $0x1cc] ss:$12 sps:$4 sm:$0xff]  }
  0x5d   : > { %v3135_v32 = vld [vmem:[%s3327_s9 + $0x218] ss:$12 sps:$4 sm:$0xff]  }
  0x63   : > { %1114 = vmatmul.mubr.bf16.gmra.mrb[12].mxu0 %v3051_v33  ;;  %1306 = vmatmul.mubr.bf16.gmra.mrb[12].mxu1 %v3052_v34  ;;  %v3136_v33 = vld [vmem:[%s3327_s9 + $0x1c8] ss:$12 sps:$4 sm:$0xff]   ;;  %v3137_v34 = vld [vmem:[%s3327_s9 + $0x230] ss:$12 sps:$4 sm:$0xff]  }
  0x64   : > { %1121 = vmatprep.mubr.bf16.mxu0 %v3053_v35  ;;  %1313 = vmatprep.mubr.bf16.mxu1 %v3055_v36  ;;  %v3138_v35 = vld [vmem:[%s3327_s9 + $0x1e4] ss:$12 sps:$4 sm:$0xff]   ;;  %v3140_v36 = vld [vmem:[%s3327_s9 + $0x248] ss:$12 sps:$4 sm:$0xff]  }
  0x6b   : > { %1122 = vmatmul.mubr.bf16.gmra.mrb[16].mxu0 %v3057_v37  ;;  %1314 = vmatmul.mubr.bf16.gmra.mrb[16].mxu1 %v3058_v38  ;;  %v3141_v37 = vld [vmem:[%s3327_s9 + $0x1e0] ss:$12 sps:$4 sm:$0xff]  }
  0x6c   : > { %1129 = vmatprep.mubr.bf16.mxu0 %v3060_v39  ;;  %1321 = vmatprep.mubr.bf16.mxu1 %v3062_v40  ;;  %v3142_v38 = vld [vmem:[%s3327_s9 + $0x260] ss:$12 sps:$4 sm:$0xff]   ;;  %v3143_v39 = vld [vmem:[%s3327_s9 + $0x1fc] ss:$12 sps:$4 sm:$0xff]   ;;  %v3145_v40 = vld [vmem:[%s3327_s9 + $0x278] ss:$12 sps:$4 sm:$0xff]  }
  0x73   : > { %1130 = vmatmul.mubr.bf16.gmra.mrb[20].mxu0 %v3064_v41  ;;  %1322 = vmatmul.mubr.bf16.gmra.mrb[20].mxu1 %v3065_v42  ;;  %v3146_v41 = vld [vmem:[%s3327_s9 + $0x1f8] ss:$12 sps:$4 sm:$0xff]   ;;  %v3147_v42 = vld [vmem:[%s3327_s9 + $0x290] ss:$12 sps:$4 sm:$0xff]  }
  0x74   : > { %1137 = vmatprep.mubr.bf16.mxu0 %v3066_v43  ;;  %1329 = vmatprep.mubr.bf16.mxu1 %v3068_v44  ;;  %v3148_v43 = vld [vmem:[%s3327_s9 + $0x214] ss:$12 sps:$4 sm:$0xff]  }
  0x75   : > { %v3150_v44 = vld [vmem:[%s3327_s9 + $0x2a8] ss:$12 sps:$4 sm:$0xff]  }
  0x7b   : > { %1138 = vmatmul.mubr.bf16.gmra.mrb[24].mxu0 %v3070_v45  ;;  %1330 = vmatmul.mubr.bf16.gmra.mrb[24].mxu1 %v3071_v46  ;;  %v3151_v45 = vld [vmem:[%s3327_s9 + $0x210] ss:$12 sps:$4 sm:$0xff]   ;;  %v3152_v46 = vld [vmem:[%s3327_s9 + $0x2c0] ss:$12 sps:$4 sm:$0xff]  }
  0x7c   : > { %1145 = vmatprep.mubr.bf16.mxu0 %v3072_v47  ;;  %1337 = vmatprep.mubr.bf16.mxu1 %v3074_v48  ;;  %v3153_v47 = vld [vmem:[%s3327_s9 + $0x22c] ss:$12 sps:$4 sm:$0xff]  }
  0x7d   : > { %v3155_v48 = vld [vmem:[%s3327_s9 + $0x2d8] ss:$12 sps:$4 sm:$0xff]  }
  0x83   : > { %1146 = vmatmul.mubr.bf16.gmra.mrb[28].mxu0 %v3076_v49  ;;  %1338 = vmatmul.mubr.bf16.gmra.mrb[28].mxu1 %v3077_v50  ;;  %v3156_v49 = vld [vmem:[%s3327_s9 + $0x228] ss:$12 sps:$4 sm:$0xff]   ;;  %v3157_v50 = vld [vmem:[%s3327_s9 + $0x2f0] ss:$12 sps:$4 sm:$0xff]  }
  0x84   : > { %1153 = vmatprep.mubr.bf16.mxu0 %v3078_v51  ;;  %2826 = vmatprep.mubr.msk.bf16.mxu1 %vm960_vm0, %v3080_v52 }
  0x8b   : > { %1154 = vmatmul.mubr.bf16.gmra.mrb[32].mxu0 %v3081_v53  ;;  %2827 = vmatmul.mubr.msk.bf16.vlgmr.msra.gmra.mrb[32].mxu1 %vm960_vm0, %v3082_v54 }
  0x8c   : > { %1161 = vmatprep.mubr.bf16.mxu0 %v3083_v55  ;;  %2830 = vmatprep.mubr.msk.bf16.mxu1 %vm960_vm0, %v3085_v56 }
  0x93   : > { %1162 = vmatmul.mubr.bf16.gmra.mrb[36].mxu0 %v3086_v57  ;;  %2831 = vmatmul.mubr.msk.bf16.gmra.mrb[36].mxu1 %vm960_vm0, %v3087_v58 }
  0x94   : > { %1169 = vmatprep.mubr.bf16.mxu0 %v3088_v59  ;;  %2834 = vmatprep.mubr.msk.bf16.mxu1 %vm960_vm0, %v3090_v60 }
  0x9b   : > { %1170 = vmatmul.mubr.bf16.gmra.mrb[40].mxu0 %v3091_v61  ;;  %2835 = vmatmul.mubr.msk.bf16.gmra.mrb[40].mxu1 %vm960_vm0, %v3092_v62 }
  0x9c   : > { %1177 = vmatprep.mubr.bf16.mxu0 %v3093_v63  ;;  %2838 = vmatprep.mubr.msk.bf16.mxu1 %vm960_vm0, %v3095_v0 }
  0xa3   : > { %1178 = vmatmul.mubr.bf16.gmra.mrb[44].mxu0 %v3096_v1  ;;  %2839 = vmatmul.mubr.msk.bf16.gmra.mrb[44].mxu1 %vm960_vm0, %v3097_v2 }
  0xa4   : > { %1185 = vmatprep.mubr.bf16.mxu0 %v3098_v3  ;;  %2842 = vmatprep.mubr.msk.bf16.mxu1 %vm960_vm0, %v3100_v4 }
  0xab   : > { %1186 = vmatmul.mubr.bf16.gmra.mrb[48].mxu0 %v3101_v5  ;;  %2843 = vmatmul.mubr.msk.bf16.gmra.mrb[48].mxu1 %vm960_vm0, %v3102_v6 }
  0xac   : > { %1193 = vmatprep.mubr.bf16.mxu0 %v3103_v7  ;;  %2846 = vmatprep.mubr.msk.bf16.mxu1 %vm960_vm0, %v3105_v8 }
  0xb3   : > { %1194 = vmatmul.mubr.bf16.gmra.mrb[52].mxu0 %v3106_v9  ;;  %2847 = vmatmul.mubr.msk.bf16.gmra.mrb[52].mxu1 %vm960_vm0, %v3107_v10 }
  0xb4   : > { %1201 = vmatprep.mubr.bf16.mxu0 %v3108_v11  ;;  %2850 = vmatprep.mubr.msk.bf16.mxu1 %vm960_vm0, %v3110_v12 }
  0xbb   : > { %1202 = vmatmul.mubr.bf16.gmra.mrb[56].mxu0 %v3111_v13  ;;  %2851 = vmatmul.mubr.msk.bf16.gmra.mrb[56].mxu1 %vm960_vm0, %v3112_v14 }
  0xbc   : > { %1209 = vmatprep.mubr.bf16.mxu0 %v3113_v15  ;;  %2854 = vmatprep.mubr.msk.bf16.mxu1 %vm960_vm0, %v3115_v16 }
  0xc3   : > { %1210 = vmatmul.mubr.bf16.gmra.mrb[60].mxu0 %v3116_v17  ;;  %2855 = vmatmul.mubr.msk.bf16.gmra.mrb[60].mxu1 %vm960_vm0, %v3117_v18 }
  0xc4   : > { %1217 = vmatprep.mubr.bf16.mxu0 %v3118_v19  ;;  %2858 = vmatprep.mubr.msk.bf16.mxu1 %vm960_vm0, %v3120_v20 }
  0xcb   : > { %1218 = vmatmul.mubr.bf16.gmra.mrb[64].mxu0 %v3121_v21  ;;  %2859 = vmatmul.mubr.msk.bf16.gmra.mrb[64].mxu1 %vm960_vm0, %v3122_v22 }
  0xcc   : > { %1225 = vmatprep.mubr.bf16.mxu0 %v3123_v23  ;;  %2862 = vmatprep.mubr.msk.bf16.mxu1 %vm960_vm0, %v3125_v24 }
  0xd3   : > { %1226 = vmatmul.mubr.bf16.gmra.mrb[68].mxu0 %v3126_v25  ;;  %2863 = vmatmul.mubr.msk.bf16.gmra.mrb[68].mxu1 %vm960_vm0, %v3127_v26 }
  0xd4   : > { %1233 = vmatprep.mubr.bf16.mxu0 %v3128_v27  ;;  %2866 = vmatprep.mubr.msk.bf16.mxu1 %vm960_vm0, %v3130_v28 }
  0xdb   : > { %1234 = vmatmul.mubr.bf16.gmra.mrb[72].mxu0 %v3131_v29  ;;  %2867 = vmatmul.mubr.msk.bf16.gmra.mrb[72].mxu1 %vm960_vm0, %v3132_v30 }
  0xdc   : > { %1241 = vmatprep.mubr.bf16.mxu0 %v3133_v31  ;;  %2870 = vmatprep.mubr.msk.bf16.mxu1 %vm960_vm0, %v3135_v32 }
  0xe3   : > { %1242 = vmatmul.mubr.bf16.gmra.mrb[76].mxu0 %v3136_v33  ;;  %2871 = vmatmul.mubr.msk.bf16.gmra.mrb[76].mxu1 %vm960_vm0, %v3137_v34 }
  0xe4   : > { %1249 = vmatprep.mubr.bf16.mxu0 %v3138_v35  ;;  %2874 = vmatprep.mubr.msk.bf16.mxu1 %vm960_vm0, %v3140_v36 }
  0xeb   : > { %1250 = vmatmul.mubr.bf16.gmra.mrb[80].mxu0 %v3141_v37  ;;  %2875 = vmatmul.mubr.msk.bf16.gmra.mrb[80].mxu1 %vm960_vm0, %v3142_v38 }
  0xec   : > { %1257 = vmatprep.mubr.bf16.mxu0 %v3143_v39  ;;  %2878 = vmatprep.mubr.msk.bf16.mxu1 %vm960_vm0, %v3145_v40 }
  0xf3   : > { %1258 = vmatmul.mubr.bf16.gmra.mrb[84].mxu0 %v3146_v41  ;;  %2879 = vmatmul.mubr.msk.bf16.gmra.mrb[84].mxu1 %vm960_vm0, %v3147_v42 }
  0xf4   : > { %1265 = vmatprep.mubr.bf16.mxu0 %v3148_v43  ;;  %2882 = vmatprep.mubr.msk.bf16.mxu1 %vm960_vm0, %v3150_v44 }
  0xfb   : > { %1266 = vmatmul.mubr.bf16.gmra.mrb[88].mxu0 %v3151_v45  ;;  %2883 = vmatmul.mubr.msk.bf16.gmra.mrb[88].mxu1 %vm960_vm0, %v3152_v46 }
  0xfc   : > { %1273 = vmatprep.mubr.bf16.mxu0 %v3153_v47  ;;  %2886 = vmatprep.mubr.msk.bf16.mxu1 %vm960_vm0, %v3155_v48 }
 0x103   : > { %1274 = vmatmul.mubr.bf16.gmra.mrb[92].mxu0 %v3156_v49  ;;  %2887 = vmatmul.mubr.msk.bf16.gmra.mrb[92].mxu1 %vm960_vm0, %v3157_v50 }
 0x11e   : > { %v3520_v51 = vpop.f32.mrb[0].mxu0  ;;  %v3522_v52 = vpop.f32.mrb[0].mxu1 }
 0x11f   : > { %v1093_v53 = vpop.f32.mrb[1].mxu0  ;;  %v1285_v54 = vpop.f32.mrb[1].mxu1 }
 0x120   : > { %v3524_v55 = vpop.f32.mrb[2].mxu0  ;;  %v3526_v56 = vpop.f32.mrb[2].mxu1  ;;  %v3583_v53 = vld [vmem:[%s4047_s2] ss:$0 sm:$0xff] }
 0x121   : > { %v1096_v57 = vpop.f32.mrb[3].mxu0  ;;  %v1288_v58 = vpop.f32.mrb[3].mxu1 }
 0x122   : > { %v1092_v57 = vadd.f32 %v3583_v53, %v3520_v51 }
 0x126   : > { %v1099_v59 = vpop.f32.mrb[4].mxu0  ;;  %v3528_v60 = vpop.f32.mrb[4].mxu1 }
 0x127   : > { %v1101_v61 = vpop.f32.mrb[5].mxu0  ;;  %v1293_v62 = vpop.f32.mrb[5].mxu1  ;;  %v1100_v54 = vadd.f32 %v3583_v53, %v1099_v59 }
 0x128   : > { %v1102_v63 = vpop.f32.mrb[6].mxu0  ;;  %v3530_v0 = vpop.f32.mrb[6].mxu1 }
 0x129   : > { %v1104_v1 = vpop.f32.mrb[7].mxu0  ;;  %v1296_v2 = vpop.f32.mrb[7].mxu1  ;;  %v1103_v62 = vadd.f32 %v3583_v53, %v1102_v63 }
 0x12e   : > { %v3532_v3 = vpop.f32.mrb[8].mxu0  ;;  %v3534_v4 = vpop.f32.mrb[8].mxu1 }
 0x12f   : > { %v1109_v5 = vpop.f32.mrb[9].mxu0  ;;  %v1301_v6 = vpop.f32.mrb[9].mxu1 }
 0x130   : > { %v3536_v7 = vpop.f32.mrb[10].mxu0  ;;  %v3538_v8 = vpop.f32.mrb[10].mxu1  ;;  %v1095_v6 = vadd.f32 %v3583_v53, %v3524_v55 }
 0x131   : > { %v1112_v9 = vpop.f32.mrb[11].mxu0  ;;  %v1304_v10 = vpop.f32.mrb[11].mxu1 }
 0x136   : > { %v3540_v11 = vpop.f32.mrb[12].mxu0  ;;  %v3542_v12 = vpop.f32.mrb[12].mxu1 }
 0x137   : > { %v1117_v13 = vpop.f32.mrb[13].mxu0  ;;  %v1309_v14 = vpop.f32.mrb[13].mxu1 }
 0x138   : > { %v3544_v15 = vpop.f32.mrb[14].mxu0  ;;  %v3546_v16 = vpop.f32.mrb[14].mxu1 }
 0x139   : > { %v1120_v17 = vpop.f32.mrb[15].mxu0  ;;  %v1312_v18 = vpop.f32.mrb[15].mxu1 }
 0x13e   : > { %v3548_v19 = vpop.f32.mrb[16].mxu0  ;;  %v3550_v20 = vpop.f32.mrb[16].mxu1 }
 0x13f   : > { %v1125_v21 = vpop.f32.mrb[17].mxu0  ;;  %v1317_v22 = vpop.f32.mrb[17].mxu1 }
 0x140   : > { %v3552_v23 = vpop.f32.mrb[18].mxu0  ;;  %v3554_v24 = vpop.f32.mrb[18].mxu1 }
 0x141   : > { %v1128_v25 = vpop.f32.mrb[19].mxu0  ;;  %v1320_v26 = vpop.f32.mrb[19].mxu1 }
 0x146   : > { %v3556_v27 = vpop.f32.mrb[20].mxu0  ;;  %v3558_v28 = vpop.f32.mrb[20].mxu1 }
 0x147   : > { %v1133_v29 = vpop.f32.mrb[21].mxu0  ;;  %v1325_v30 = vpop.f32.mrb[21].mxu1 }
 0x148   : > { %v3560_v31 = vpop.f32.mrb[22].mxu0  ;;  %v3562_v32 = vpop.f32.mrb[22].mxu1  ;;  %v1116_v29 = vadd.f32 %v3583_v53, %v3540_v11  ;;  %v1108_v30 = vadd.f32 %v3583_v53, %v3532_v3  ;;  %v1119_v11 = vadd.f32 %v3583_v53, %v3544_v15 }
 0x149   : > { %v1136_v33 = vpop.f32.mrb[23].mxu0  ;;  %v1328_v34 = vpop.f32.mrb[23].mxu1 }
 0x14e   : > { %v3564_v35 = vpop.f32.mrb[24].mxu0  ;;  %v3566_v36 = vpop.f32.mrb[24].mxu1 }
 0x14f   : > { %v1141_v37 = vpop.f32.mrb[25].mxu0  ;;  %v1333_v38 = vpop.f32.mrb[25].mxu1 }
 0x150   : > { %v3568_v39 = vpop.f32.mrb[26].mxu0  ;;  %v3570_v40 = vpop.f32.mrb[26].mxu1 }
 0x151   : > { %v1144_v41 = vpop.f32.mrb[27].mxu0  ;;  %v1336_v42 = vpop.f32.mrb[27].mxu1 }
 0x156   : > { %v3572_v43 = vpop.f32.mrb[28].mxu0  ;;  %v3574_v44 = vpop.f32.mrb[28].mxu1 }
 0x157   : > { %v1149_v45 = vpop.f32.mrb[29].mxu0  ;;  %v1341_v46 = vpop.f32.mrb[29].mxu1 }
 0x158   : > { %v3576_v47 = vpop.f32.mrb[30].mxu0  ;;  %v3578_v48 = vpop.f32.mrb[30].mxu1  ;;  %v1111_v45 = vadd.f32 %v3583_v53, %v3536_v7 }
 0x159   : > { %v1152_v49 = vpop.f32.mrb[31].mxu0  ;;  %v1344_v50 = vpop.f32.mrb[31].mxu1 }
 0x15e   : > { %v3589_v58 = vpop.f32.mrb[32].mxu0  ;;  %v2828_v61 = vpop.f32.mrb[32].mxu1 }
 0x15f   : > { %v1389_v1 = vadd.f32 %v2828_v61, %v1100_v54  ;;  %v1157_v2 = vpop.f32.mrb[33].mxu0  ;;  %v1380_v5 = vpop.f32.mrb[33].mxu1 }
 0x160   : > { %v1381_v9 = vadd.f32 %v1380_v5, %v1092_v57  ;;  %v3594_v10 = vpop.f32.mrb[34].mxu0  ;;  %v2829_v13 = vpop.f32.mrb[34].mxu1 }
 0x161   : > { %v1637_v59 = vmax.f32 %v1389_v1, 0.0  ;;  %v1392_v14 = vadd.f32 %v2829_v13, %v1103_v62  ;;  %v1160_v17 = vpop.f32.mrb[35].mxu0  ;;  %v1383_v51 = vpop.f32.mrb[35].mxu1  ;;  %v1124_v13 = vadd.f32 %v3583_v53, %v3548_v19 }
 0x162   : > { %v1635_v18 = vmax.f32 %v1381_v9, 0.0  ;;  %v1384_v21 = vadd.f32 %v1383_v51, %v1095_v6  ;;  %v1132_v6 = vadd.f32 %v3583_v53, %v3556_v27  ;;  %v1135_v51 = vadd.f32 %v3583_v53, %v3560_v31 }
 0x163   : > { %v2723_v22 = vpack.c.bf16 %v1637_v59, %v1637_v59  ;;  %v1638_v63 = vmax.f32 %v1392_v14, 0.0 }
 0x164   : > { %v2721_v25 = vpack.c.bf16 %v1635_v18, %v1635_v18  ;;  %v1636_v26 = vmax.f32 %v1384_v21, 0.0 }
 0x165   : > { %1958 = vst.msk [vmem:[%s3598_s12 + $0x8] sm:$0xf] %vm1955_vm1, %v2723_v22  ;;  %v2724_v55 = vpack.c.bf16 %v1638_v63, %v1638_v63  ;;  %v1127_v22 = vadd.f32 %v3583_v53, %v3552_v23 }
 0x166   : > { %1956 = vst.msk [vmem:[%s3598_s12] sm:$0xf] %vm1955_vm1, %v2721_v25  ;;  %v2722_v33 = vpack.c.bf16 %v1636_v26, %v1636_v26  ;;  %v3606_v34 = vpop.f32.mrb[36].mxu0  ;;  %v2832_v37 = vpop.f32.mrb[36].mxu1 }
 0x167   : > { %1959 = vst.msk [vmem:[%s3598_s12 + $0xc] sm:$0xf] %vm1955_vm1, %v2724_v55  ;;  %v1405_v38 = vadd.f32 %v2832_v37, %v1116_v29  ;;  %v1165_v41 = vpop.f32.mrb[37].mxu0  ;;  %v1396_v42 = vpop.f32.mrb[37].mxu1 }
 0x168   : > { %1957 = vst.msk [vmem:[%s3598_s12 + $0x4] sm:$0xf] %vm1955_vm1, %v2722_v33  ;;  %v1397_v3 = vadd.f32 %v1396_v42, %v1108_v30  ;;  %v3616_v46 = vpop.f32.mrb[38].mxu0  ;;  %v2833_v49 = vpop.f32.mrb[38].mxu1  ;;  %v1148_v41 = vadd.f32 %v3583_v53, %v3572_v43  ;;  %v1143_v43 = vadd.f32 %v3583_v53, %v3568_v39  ;;  %v1164_v39 = vadd.f32 %v3583_v53, %v3606_v34 }
 0x169   : > { %v1641_v50 = vmax.f32 %v1405_v38, 0.0  ;;  %v1408_v54 = vadd.f32 %v2833_v49, %v1119_v11  ;;  %v1168_v57 = vpop.f32.mrb[39].mxu0  ;;  %v1399_v15 = vpop.f32.mrb[39].mxu1  ;;  %v1159_v34 = vadd.f32 %v3583_v53, %v3594_v10 }
 0x16a   : > { %v1639_v61 = vmax.f32 %v1397_v3, 0.0  ;;  %v1400_v62 = vadd.f32 %v1399_v15, %v1111_v45  ;;  %v1140_v45 = vadd.f32 %v3583_v53, %v3564_v35 }
 0x16b   : > { %v2727_v1 = vpack.c.bf16 %v1641_v50, %v1641_v50  ;;  %v1642_v2 = vmax.f32 %v1408_v54, 0.0  ;;  %v1151_v54 = vadd.f32 %v3583_v53, %v3576_v47 }
 0x16c   : > { %v2725_v5 = vpack.c.bf16 %v1639_v61, %v1639_v61  ;;  %v1640_v7 = vmax.f32 %v1400_v62, 0.0 }
 0x16d   : > { %1962 = vst.msk [vmem:[%s3598_s12 + $0x18] sm:$0xf] %vm1955_vm1, %v2727_v1  ;;  %v2728_v9 = vpack.c.bf16 %v1642_v2, %v1642_v2 }
 0x16e   : > { %1960 = vst.msk [vmem:[%s3598_s12 + $0x10] sm:$0xf] %vm1955_vm1, %v2725_v5  ;;  %v2726_v59 = vpack.c.bf16 %v1640_v7, %v1640_v7  ;;  %v3626_v14 = vpop.f32.mrb[40].mxu0  ;;  %v2836_v17 = vpop.f32.mrb[40].mxu1 }
 0x16f   : > { %1963 = vst.msk [vmem:[%s3598_s12 + $0x1c] sm:$0xf] %vm1955_vm1, %v2728_v9  ;;  %v1421_v18 = vadd.f32 %v2836_v17, %v1132_v6  ;;  %v1173_v21 = vpop.f32.mrb[41].mxu0  ;;  %v1412_v27 = vpop.f32.mrb[41].mxu1 }
 0x170   : > { %1961 = vst.msk [vmem:[%s3598_s12 + $0x14] sm:$0xf] %vm1955_vm1, %v2726_v59  ;;  %v1413_v19 = vadd.f32 %v1412_v27, %v1124_v13  ;;  %v3636_v63 = vpop.f32.mrb[42].mxu0  ;;  %v2837_v25 = vpop.f32.mrb[42].mxu1  ;;  %v1156_v21 = vadd.f32 %v3583_v53, %v3589_v58 }
 0x171   : > { %v1645_v26 = vmax.f32 %v1421_v18, 0.0  ;;  %v1424_v29 = vadd.f32 %v2837_v25, %v1135_v51  ;;  %v1176_v55 = vpop.f32.mrb[43].mxu0  ;;  %v1415_v31 = vpop.f32.mrb[43].mxu1  ;;  %v1167_v25 = vadd.f32 %v3583_v53, %v3616_v46 }
 0x172   : > { %v1643_v30 = vmax.f32 %v1413_v19, 0.0  ;;  %v1416_v33 = vadd.f32 %v1415_v31, %v1127_v22 }
 0x173   : > { %v2731_v37 = vpack.c.bf16 %v1645_v26, %v1645_v26  ;;  %v1646_v11 = vmax.f32 %v1424_v29, 0.0 }
 0x174   : > { %v2729_v38 = vpack.c.bf16 %v1643_v30, %v1643_v30  ;;  %v1644_v23 = vmax.f32 %v1416_v33, 0.0 }
 0x175   : > { %1966 = vst.msk [vmem:[%s3598_s12 + $0x28] sm:$0xf] %vm1955_vm1, %v2731_v37  ;;  %v2732_v42 = vpack.c.bf16 %v1646_v11, %v1646_v11 }
 0x176   : > { %1964 = vst.msk [vmem:[%s3598_s12 + $0x20] sm:$0xf] %vm1955_vm1, %v2729_v38  ;;  %v2730_v3 = vpack.c.bf16 %v1644_v23, %v1644_v23  ;;  %v1179_v49 = vpop.f32.mrb[44].mxu0  ;;  %v2840_v50 = vpop.f32.mrb[44].mxu1 }
 0x177   : > { %1967 = vst.msk [vmem:[%s3598_s12 + $0x2c] sm:$0xf] %vm1955_vm1, %v2732_v42  ;;  %v1437_v57 = vadd.f32 %v2840_v50, %v1148_v41  ;;  %v1181_v15 = vpop.f32.mrb[45].mxu0  ;;  %v1428_v61 = vpop.f32.mrb[45].mxu1  ;;  %v1180_v10 = vadd.f32 %v3583_v53, %v1179_v49  ;;  %v1175_v49 = vadd.f32 %v3583_v53, %v3636_v63 }
 0x178   : > { %1965 = vst.msk [vmem:[%s3598_s12 + $0x24] sm:$0xf] %vm1955_vm1, %v2730_v3  ;;  %v1429_v35 = vadd.f32 %v1428_v61, %v1140_v45  ;;  %v1182_v62 = vpop.f32.mrb[46].mxu0  ;;  %v2841_v1 = vpop.f32.mrb[46].mxu1 }
 0x179   : > { %v1649_v2 = vmax.f32 %v1437_v57, 0.0  ;;  %v1440_v5 = vadd.f32 %v2841_v1, %v1151_v54  ;;  %v1184_v7 = vpop.f32.mrb[47].mxu0  ;;  %v1431_v6 = vpop.f32.mrb[47].mxu1  ;;  %v1172_v54 = vadd.f32 %v3583_v53, %v3626_v14 }
 0x17a   : > { %v1647_v47 = vmax.f32 %v1429_v35, 0.0  ;;  %v1432_v9 = vadd.f32 %v1431_v6, %v1143_v43  ;;  %v1183_v43 = vadd.f32 %v3583_v53, %v1182_v62 }
 0x17b   : > { %v2735_v13 = vpack.c.bf16 %v1649_v2, %v1649_v2  ;;  %v1650_v59 = vmax.f32 %v1440_v5, 0.0 }
 0x17c   : > { %v2733_v17 = vpack.c.bf16 %v1647_v47, %v1647_v47  ;;  %v1648_v51 = vmax.f32 %v1432_v9, 0.0 }
 0x17d   : > { %1970 = vst.msk [vmem:[%s3598_s12 + $0x38] sm:$0xf] %vm1955_vm1, %v2735_v13  ;;  %v2736_v18 = vpack.c.bf16 %v1650_v59, %v1650_v59 }
 0x17e   : > { %1968 = vst.msk [vmem:[%s3598_s12 + $0x30] sm:$0xf] %vm1955_vm1, %v2733_v17  ;;  %v2734_v27 = vpack.c.bf16 %v1648_v51, %v1648_v51  ;;  %v1187_v22 = vpop.f32.mrb[48].mxu0  ;;  %v2844_v19 = vpop.f32.mrb[48].mxu1 }
 0x17f   : > { %1971 = vst.msk [vmem:[%s3598_s12 + $0x3c] sm:$0xf] %vm1955_vm1, %v2736_v18  ;;  %v1453_v26 = vadd.f32 %v2844_v19, %v1164_v39  ;;  %v1189_v29 = vpop.f32.mrb[49].mxu0  ;;  %v1444_v55 = vpop.f32.mrb[49].mxu1 }
 0x180   : > { %1969 = vst.msk [vmem:[%s3598_s12 + $0x34] sm:$0xf] %vm1955_vm1, %v2734_v27  ;;  %v1445_v58 = vadd.f32 %v1444_v55, %v1156_v21  ;;  %v1190_v31 = vpop.f32.mrb[50].mxu0  ;;  %v2845_v30 = vpop.f32.mrb[50].mxu1  ;;  %v1188_v27 = vadd.f32 %v3583_v53, %v1187_v22 }
 0x181   : > { %v1653_v33 = vmax.f32 %v1453_v26, 0.0  ;;  %v1456_v37 = vadd.f32 %v2845_v30, %v1167_v25  ;;  %v1192_v11 = vpop.f32.mrb[51].mxu0  ;;  %v1447_v38 = vpop.f32.mrb[51].mxu1  ;;  %v1191_v30 = vadd.f32 %v3583_v53, %v1190_v31 }
 0x182   : > { %v1651_v46 = vmax.f32 %v1445_v58, 0.0  ;;  %v1448_v23 = vadd.f32 %v1447_v38, %v1159_v34 }
 0x183   : > { %v2739_v41 = vpack.c.bf16 %v1653_v33, %v1653_v33  ;;  %v1654_v42 = vmax.f32 %v1456_v37, 0.0 }
 0x184   : > { %v2737_v45 = vpack.c.bf16 %v1651_v46, %v1651_v46  ;;  %v1652_v3 = vmax.f32 %v1448_v23, 0.0 }
 0x185   : > { %1974 = vst.msk [vmem:[%s3598_s12 + $0x48] sm:$0xf] %vm1955_vm1, %v2739_v41  ;;  %v2740_v50 = vpack.c.bf16 %v1654_v42, %v1654_v42 }
 0x186   : > { %1972 = vst.msk [vmem:[%s3598_s12 + $0x40] sm:$0xf] %vm1955_vm1, %v2737_v45  ;;  %v2738_v57 = vpack.c.bf16 %v1652_v3, %v1652_v3  ;;  %v1195_v15 = vpop.f32.mrb[52].mxu0  ;;  %v2848_v61 = vpop.f32.mrb[52].mxu1 }
 0x187   : > { %1975 = vst.msk [vmem:[%s3598_s12 + $0x4c] sm:$0xf] %vm1955_vm1, %v2740_v50  ;;  %v1469_v35 = vadd.f32 %v2848_v61, %v1180_v10  ;;  %v1197_v1 = vpop.f32.mrb[53].mxu0  ;;  %v1460_v2 = vpop.f32.mrb[53].mxu1  ;;  %v1196_v63 = vadd.f32 %v3583_v53, %v1195_v15 }
 0x188   : > { %1973 = vst.msk [vmem:[%s3598_s12 + $0x44] sm:$0xf] %vm1955_vm1, %v2738_v57  ;;  %v1461_v5 = vadd.f32 %v1460_v2, %v1172_v54  ;;  %v1198_v14 = vpop.f32.mrb[54].mxu0  ;;  %v2849_v7 = vpop.f32.mrb[54].mxu1 }
 0x189   : > { %v1657_v6 = vmax.f32 %v1469_v35, 0.0  ;;  %v1472_v47 = vadd.f32 %v2849_v7, %v1183_v43  ;;  %v1200_v9 = vpop.f32.mrb[55].mxu0  ;;  %v1463_v13 = vpop.f32.mrb[55].mxu1  ;;  %v1199_v29 = vadd.f32 %v3583_v53, %v1198_v14 }
 0x18a   : > { %v1655_v62 = vmax.f32 %v1461_v5, 0.0  ;;  %v1464_v59 = vadd.f32 %v1463_v13, %v1175_v49 }
 0x18b   : > { %v2743_v17 = vpack.c.bf16 %v1657_v6, %v1657_v6  ;;  %v1658_v51 = vmax.f32 %v1472_v47, 0.0 }
 0x18c   : > { %v2741_v39 = vpack.c.bf16 %v1655_v62, %v1655_v62  ;;  %v1656_v18 = vmax.f32 %v1464_v59, 0.0 }
 0x18d   : > { %1978 = vst.msk [vmem:[%s3598_s12 + $0x58] sm:$0xf] %vm1955_vm1, %v2743_v17  ;;  %v2744_v21 = vpack.c.bf16 %v1658_v51, %v1658_v51 }
 0x18e   : > { %1976 = vst.msk [vmem:[%s3598_s12 + $0x50] sm:$0xf] %vm1955_vm1, %v2741_v39  ;;  %v2742_v19 = vpack.c.bf16 %v1656_v18, %v1656_v18  ;;  %v1203_v25 = vpop.f32.mrb[56].mxu0  ;;  %v2852_v26 = vpop.f32.mrb[56].mxu1 }
 0x18f   : > { %1979 = vst.msk [vmem:[%s3598_s12 + $0x5c] sm:$0xf] %vm1955_vm1, %v2744_v21  ;;  %v1485_v55 = vadd.f32 %v2852_v26, %v1196_v63  ;;  %v1205_v34 = vpop.f32.mrb[57].mxu0  ;;  %v1476_v58 = vpop.f32.mrb[57].mxu1  ;;  %v1204_v54 = vadd.f32 %v3583_v53, %v1203_v25 }
 0x190   : > { %1977 = vst.msk [vmem:[%s3598_s12 + $0x54] sm:$0xf] %vm1955_vm1, %v2742_v19  ;;  %v1477_v33 = vadd.f32 %v1476_v58, %v1188_v27  ;;  %v1206_v22 = vpop.f32.mrb[58].mxu0  ;;  %v2853_v37 = vpop.f32.mrb[58].mxu1 }
 0x191   : > { %v1661_v11 = vmax.f32 %v1485_v55, 0.0  ;;  %v1488_v38 = vadd.f32 %v2853_v37, %v1199_v29  ;;  %v1208_v46 = vpop.f32.mrb[59].mxu0  ;;  %v1479_v23 = vpop.f32.mrb[59].mxu1  ;;  %v1207_v2 = vadd.f32 %v3583_v53, %v1206_v22 }
 0x192   : > { %v1659_v41 = vmax.f32 %v1477_v33, 0.0  ;;  %v1480_v42 = vadd.f32 %v1479_v23, %v1191_v30 }
 0x193   : > { %v2747_v45 = vpack.c.bf16 %v1661_v11, %v1661_v11  ;;  %v1662_v3 = vmax.f32 %v1488_v38, 0.0 }
 0x194   : > { %v2745_v10 = vpack.c.bf16 %v1659_v41, %v1659_v41  ;;  %v1660_v50 = vmax.f32 %v1480_v42, 0.0 }
 0x195   : > { %1982 = vst.msk [vmem:[%s3598_s12 + $0x68] sm:$0xf] %vm1955_vm1, %v2747_v45  ;;  %v2748_v31 = vpack.c.bf16 %v1662_v3, %v1662_v3 }
 0x196   : > { %1980 = vst.msk [vmem:[%s3598_s12 + $0x60] sm:$0xf] %vm1955_vm1, %v2745_v10  ;;  %v2746_v57 = vpack.c.bf16 %v1660_v50, %v1660_v50  ;;  %v1211_v15 = vpop.f32.mrb[60].mxu0  ;;  %v2856_v61 = vpop.f32.mrb[60].mxu1 }
 0x197   : > { %1983 = vst.msk [vmem:[%s3598_s12 + $0x6c] sm:$0xf] %vm1955_vm1, %v2748_v31  ;;  %v1212_v43 = vadd.f32 %v3583_v53, %v1211_v15  ;;  %v1213_v35 = vpop.f32.mrb[61].mxu0  ;;  %v1492_v1 = vpop.f32.mrb[61].mxu1 }
 0x198   : > { %1981 = vst.msk [vmem:[%s3598_s12 + $0x64] sm:$0xf] %vm1955_vm1, %v2746_v57  ;;  %v1493_v49 = vadd.f32 %v1492_v1, %v1204_v54  ;;  %v1214_v5 = vpop.f32.mrb[62].mxu0  ;;  %v2857_v14 = vpop.f32.mrb[62].mxu1 }
 0x199   : > { %v1501_v7 = vadd.f32 %v2856_v61, %v1212_v43  ;;  %v1215_v6 = vadd.f32 %v3583_v53, %v1214_v5  ;;  %v1216_v47 = vpop.f32.mrb[63].mxu0  ;;  %v1495_v9 = vpop.f32.mrb[63].mxu1 }
 0x19a   : > { %v1663_v13 = vmax.f32 %v1493_v49, 0.0  ;;  %v1496_v62 = vadd.f32 %v1495_v9, %v1207_v2 }
 0x19b   : > { %v1665_v59 = vmax.f32 %v1501_v7, 0.0  ;;  %v1504_v17 = vadd.f32 %v2857_v14, %v1215_v6 }
 0x19c   : > { %v2749_v51 = vpack.c.bf16 %v1663_v13, %v1663_v13  ;;  %v1664_v39 = vmax.f32 %v1496_v62, 0.0 }
 0x19d   : > { %v2751_v18 = vpack.c.bf16 %v1665_v59, %v1665_v59  ;;  %v1666_v63 = vmax.f32 %v1504_v17, 0.0 }
 0x19e   : > { %1984 = vst.msk [vmem:[%s3598_s12 + $0x70] sm:$0xf] %vm1955_vm1, %v2749_v51  ;;  %v2750_v21 = vpack.c.bf16 %v1664_v39, %v1664_v39  ;;  %v1219_v27 = vpop.f32.mrb[64].mxu0  ;;  %v2860_v19 = vpop.f32.mrb[64].mxu1 }
 0x19f   : > { %1986 = vst.msk [vmem:[%s3598_s12 + $0x78] sm:$0xf] %vm1955_vm1, %v2751_v18  ;;  %v2752_v25 = vpack.c.bf16 %v1666_v63, %v1666_v63  ;;  %v1220_v26 = vadd.f32 %v3583_v53, %v1219_v27  ;;  %v1221_v29 = vpop.f32.mrb[65].mxu0  ;;  %v1508_v55 = vpop.f32.mrb[65].mxu1 }
 0x1a0   : > { %1985 = vst.msk [vmem:[%s3598_s12 + $0x74] sm:$0xf] %vm1955_vm1, %v2750_v21  ;;  %v1222_v34 = vpop.f32.mrb[66].mxu0  ;;  %v2861_v58 = vpop.f32.mrb[66].mxu1 }
 0x1a1   : > { %1987 = vst.msk [vmem:[%s3598_s12 + $0x7c] sm:$0xf] %vm1955_vm1, %v2752_v25  ;;  %v1509_v30 = vadd.f32 %v1508_v55, %v1220_v26  ;;  %v1223_v33 = vadd.f32 %v3583_v53, %v1222_v34  ;;  %v1224_v22 = vpop.f32.mrb[67].mxu0  ;;  %v1511_v37 = vpop.f32.mrb[67].mxu1 }
 0x1a3   : > { %v1667_v11 = vmax.f32 %v1509_v30, 0.0  ;;  %v1512_v38 = vadd.f32 %v1511_v37, %v1223_v33 }
 0x1a5   : > { %v2753_v46 = vpack.c.bf16 %v1667_v11, %v1667_v11  ;;  %v1668_v23 = vmax.f32 %v1512_v38, 0.0 }
 0x1a6   : > { %v1227_v41 = vpop.f32.mrb[68].mxu0  ;;  %v2864_v42 = vpop.f32.mrb[68].mxu1 }
 0x1a7   : > { %1988 = vst.msk [vmem:[%s3598_s12 + $0x80] sm:$0xf] %vm1955_vm1, %v2753_v46  ;;  %v2754_v45 = vpack.c.bf16 %v1668_v23, %v1668_v23  ;;  %v1228_v3 = vadd.f32 %v3583_v53, %v1227_v41  ;;  %v1229_v10 = vpop.f32.mrb[69].mxu0  ;;  %v1524_v50 = vpop.f32.mrb[69].mxu1  ;;  %v1292_v23 = vadd.f32 %v3583_v53, %v3528_v60  ;;  %v1287_v60 = vadd.f32 %v3583_v53, %v3526_v56 }
 0x1a8   : > { %v1230_v31 = vpop.f32.mrb[70].mxu0  ;;  %v2865_v54 = vpop.f32.mrb[70].mxu1 }
 0x1a9   : > { %1989 = vst.msk [vmem:[%s3598_s12 + $0x84] sm:$0xf] %vm1955_vm1, %v2754_v45  ;;  %v1517_v57 = vadd.f32 %v2860_v19, %v1228_v3  ;;  %v1231_v15 = vadd.f32 %v3583_v53, %v1230_v31  ;;  %v1232_v61 = vpop.f32.mrb[71].mxu0  ;;  %v1527_v43 = vpop.f32.mrb[71].mxu1  ;;  %v1284_v3 = vadd.f32 %v3583_v53, %v3522_v52 }
 0x1ab   : > { %v1669_v35 = vmax.f32 %v1517_v57, 0.0  ;;  %v1520_v1 = vadd.f32 %v2861_v58, %v1231_v15 }
 0x1ad   : > { %v2755_v2 = vpack.c.bf16 %v1669_v35, %v1669_v35  ;;  %v1670_v49 = vmax.f32 %v1520_v1, 0.0 }
 0x1ae   : > { %v1235_v5 = vpop.f32.mrb[72].mxu0  ;;  %v3724_v14 = vpop.f32.mrb[72].mxu1 }
 0x1af   : > { %1990 = vst.msk [vmem:[%s3598_s12 + $0x88] sm:$0xf] %vm1955_vm1, %v2755_v2  ;;  %v2756_v7 = vpack.c.bf16 %v1670_v49, %v1670_v49  ;;  %v1236_v6 = vadd.f32 %v3583_v53, %v1235_v5  ;;  %v1237_v47 = vpop.f32.mrb[73].mxu0  ;;  %v1540_v9 = vpop.f32.mrb[73].mxu1 }
 0x1b0   : > { %v1238_v13 = vpop.f32.mrb[74].mxu0  ;;  %v3729_v62 = vpop.f32.mrb[74].mxu1 }
 0x1b1   : > { %1991 = vst.msk [vmem:[%s3598_s12 + $0x8c] sm:$0xf] %vm1955_vm1, %v2756_v7  ;;  %v1525_v59 = vadd.f32 %v1524_v50, %v1236_v6  ;;  %v1239_v17 = vadd.f32 %v3583_v53, %v1238_v13  ;;  %v1240_v51 = vpop.f32.mrb[75].mxu0  ;;  %v1543_v39 = vpop.f32.mrb[75].mxu1 }
 0x1b3   : > { %v1671_v18 = vmax.f32 %v1525_v59, 0.0  ;;  %v1528_v63 = vadd.f32 %v1527_v43, %v1239_v17 }
 0x1b5   : > { %v2757_v21 = vpack.c.bf16 %v1671_v18, %v1671_v18  ;;  %v1672_v27 = vmax.f32 %v1528_v63, 0.0 }
 0x1b6   : > { %v1243_v19 = vpop.f32.mrb[76].mxu0  ;;  %v3734_v25 = vpop.f32.mrb[76].mxu1 }
 0x1b7   : > { %1992 = vst.msk [vmem:[%s3598_s12 + $0x90] sm:$0xf] %vm1955_vm1, %v2757_v21  ;;  %v2758_v26 = vpack.c.bf16 %v1672_v27, %v1672_v27  ;;  %v1244_v29 = vadd.f32 %v3583_v53, %v1243_v19  ;;  %v1245_v55 = vpop.f32.mrb[77].mxu0  ;;  %v3739_v34 = vpop.f32.mrb[77].mxu1  ;;  %v1300_v19 = vadd.f32 %v3583_v53, %v3534_v4  ;;  %v1303_v4 = vadd.f32 %v3583_v53, %v3538_v8 }
 0x1b8   : > { %v1246_v58 = vpop.f32.mrb[78].mxu0  ;;  %v3741_v30 = vpop.f32.mrb[78].mxu1  ;;  %v1311_v55 = vadd.f32 %v3583_v53, %v3546_v16 }
 0x1b9   : > { %1993 = vst.msk [vmem:[%s3598_s12 + $0x94] sm:$0xf] %vm1955_vm1, %v2758_v26  ;;  %v1533_v33 = vadd.f32 %v2864_v42, %v1244_v29  ;;  %v1247_v22 = vadd.f32 %v3583_v53, %v1246_v58  ;;  %v1248_v37 = vpop.f32.mrb[79].mxu0  ;;  %v3746_v11 = vpop.f32.mrb[79].mxu1  ;;  %v1295_v42 = vadd.f32 %v3583_v53, %v3530_v0 }
 0x1bb   : > { %v1673_v38 = vmax.f32 %v1533_v33, 0.0  ;;  %v1536_v46 = vadd.f32 %v2865_v54, %v1247_v22 }
 0x1bd   : > { %v2759_v41 = vpack.c.bf16 %v1673_v38, %v1673_v38  ;;  %v1674_v45 = vmax.f32 %v1536_v46, 0.0 }
 0x1be   : > { %v1251_v10 = vpop.f32.mrb[80].mxu0  ;;  %v2876_v50 = vpop.f32.mrb[80].mxu1 }
 0x1bf   : > { %1994 = vst.msk [vmem:[%s3598_s12 + $0x98] sm:$0xf] %vm1955_vm1, %v2759_v41  ;;  %v2760_v31 = vpack.c.bf16 %v1674_v45, %v1674_v45  ;;  %v1252_v57 = vadd.f32 %v3583_v53, %v1251_v10  ;;  %v1581_v54 = vadd.f32 %v2876_v50, %v1292_v23  ;;  %v1253_v15 = vpop.f32.mrb[81].mxu0  ;;  %v1572_v61 = vpop.f32.mrb[81].mxu1 }
 0x1c0   : > { %v1573_v43 = vadd.f32 %v1572_v61, %v1284_v3  ;;  %v1254_v35 = vpop.f32.mrb[82].mxu0  ;;  %v2877_v1 = vpop.f32.mrb[82].mxu1 }
 0x1c1   : > { %1995 = vst.msk [vmem:[%s3598_s12 + $0x9c] sm:$0xf] %vm1955_vm1, %v2760_v31  ;;  %v1541_v52 = vadd.f32 %v1540_v9, %v1252_v57  ;;  %v1685_v2 = vmax.f32 %v1581_v54, 0.0  ;;  %v1255_v0 = vadd.f32 %v3583_v53, %v1254_v35  ;;  %v1584_v49 = vadd.f32 %v2877_v1, %v1295_v42  ;;  %v1256_v5 = vpop.f32.mrb[83].mxu0  ;;  %v1575_v7 = vpop.f32.mrb[83].mxu1 }
 0x1c2   : > { %v1683_v6 = vmax.f32 %v1573_v43, 0.0  ;;  %v1576_v47 = vadd.f32 %v1575_v7, %v1287_v60  ;;  %v1308_v9 = vadd.f32 %v3583_v53, %v3542_v12 }
 0x1c3   : > { %v1675_v13 = vmax.f32 %v1541_v52, 0.0  ;;  %v2771_v59 = vpack.c.bf16 %v1685_v2, %v1685_v2  ;;  %v1544_v56 = vadd.f32 %v1543_v39, %v1255_v0  ;;  %v1686_v17 = vmax.f32 %v1584_v49, 0.0 }
 0x1c4   : > { %v2769_v51 = vpack.c.bf16 %v1683_v6, %v1683_v6  ;;  %v1684_v18 = vmax.f32 %v1576_v47, 0.0  ;;  %v1316_v52 = vadd.f32 %v3583_v53, %v3550_v20  ;;  %v1327_v49 = vadd.f32 %v3583_v53, %v3562_v32 }
 0x1c5   : > { %v2761_v63 = vpack.c.bf16 %v1675_v13, %v1675_v13  ;;  %2006 = vst.msk [vmem:[%s3598_s12 + $0xc8] sm:$0xf] %vm1955_vm1, %v2771_v59  ;;  %v1676_v21 = vmax.f32 %v1544_v56, 0.0  ;;  %v2772_v27 = vpack.c.bf16 %v1686_v17, %v1686_v17  ;;  %v1319_v20 = vadd.f32 %v3583_v53, %v3554_v24 }
 0x1c6   : > { %2004 = vst.msk [vmem:[%s3598_s12 + $0xc0] sm:$0xf] %vm1955_vm1, %v2769_v51  ;;  %v2770_v26 = vpack.c.bf16 %v1684_v18, %v1684_v18  ;;  %v1259_v39 = vpop.f32.mrb[84].mxu0  ;;  %v2880_v29 = vpop.f32.mrb[84].mxu1 }
 0x1c7   : > { %1996 = vst.msk [vmem:[%s3598_s12 + $0xa0] sm:$0xf] %vm1955_vm1, %v2761_v63  ;;  %v2762_v12 = vpack.c.bf16 %v1676_v21, %v1676_v21  ;;  %2007 = vst.msk [vmem:[%s3598_s12 + $0xcc] sm:$0xf] %vm1955_vm1, %v2772_v27  ;;  %v1260_v58 = vadd.f32 %v3583_v53, %v1259_v39  ;;  %v1597_v33 = vadd.f32 %v2880_v29, %v1308_v9  ;;  %v1261_v22 = vpop.f32.mrb[85].mxu0  ;;  %v1588_v37 = vpop.f32.mrb[85].mxu1 }
 0x1c8   : > { %2005 = vst.msk [vmem:[%s3598_s12 + $0xc4] sm:$0xf] %vm1955_vm1, %v2770_v26  ;;  %v1589_v38 = vadd.f32 %v1588_v37, %v1300_v19  ;;  %v1262_v46 = vpop.f32.mrb[86].mxu0  ;;  %v2881_v23 = vpop.f32.mrb[86].mxu1  ;;  %v1332_v22 = vadd.f32 %v3583_v53, %v3566_v36  ;;  %v1335_v36 = vadd.f32 %v3583_v53, %v3570_v40 }
 0x1c9   : > { %1997 = vst.msk [vmem:[%s3598_s12 + $0xa4] sm:$0xf] %vm1955_vm1, %v2762_v12  ;;  %v1549_v16 = vadd.f32 %v3724_v14, %v1260_v58  ;;  %v1689_v41 = vmax.f32 %v1597_v33, 0.0  ;;  %v1263_v45 = vadd.f32 %v3583_v53, %v1262_v46  ;;  %v1600_v3 = vadd.f32 %v2881_v23, %v1311_v55  ;;  %v1264_v10 = vpop.f32.mrb[87].mxu0  ;;  %v1591_v50 = vpop.f32.mrb[87].mxu1 }
 0x1ca   : > { %v1687_v42 = vmax.f32 %v1589_v38, 0.0  ;;  %v1592_v31 = vadd.f32 %v1591_v50, %v1303_v4  ;;  %v1324_v14 = vadd.f32 %v3583_v53, %v3558_v28  ;;  %v1343_v38 = vadd.f32 %v3583_v53, %v3578_v48 }
 0x1cb   : > { %v1677_v8 = vmax.f32 %v1549_v16, 0.0  ;;  %v2775_v57 = vpack.c.bf16 %v1689_v41, %v1689_v41  ;;  %v1552_v54 = vadd.f32 %v3729_v62, %v1263_v45  ;;  %v1690_v15 = vmax.f32 %v1600_v3, 0.0 }
 0x1cc   : > { %v2773_v61 = vpack.c.bf16 %v1687_v42, %v1687_v42  ;;  %v1688_v60 = vmax.f32 %v1592_v31, 0.0 }
 0x1cd   : > { %v2763_v43 = vpack.c.bf16 %v1677_v8, %v1677_v8  ;;  %2010 = vst.msk [vmem:[%s3598_s12 + $0xd8] sm:$0xf] %vm1955_vm1, %v2775_v57  ;;  %v1678_v35 = vmax.f32 %v1552_v54, 0.0  ;;  %v2776_v1 = vpack.c.bf16 %v1690_v15, %v1690_v15 }
 0x1ce   : > { %2008 = vst.msk [vmem:[%s3598_s12 + $0xd0] sm:$0xf] %vm1955_vm1, %v2773_v61  ;;  %v2774_v2 = vpack.c.bf16 %v1688_v60, %v1688_v60  ;;  %v1267_v62 = vpop.f32.mrb[88].mxu0  ;;  %v2884_v0 = vpop.f32.mrb[88].mxu1 }
 0x1cf   : > { %1998 = vst.msk [vmem:[%s3598_s12 + $0xa8] sm:$0xf] %vm1955_vm1, %v2763_v43  ;;  %v2764_v28 = vpack.c.bf16 %v1678_v35, %v1678_v35  ;;  %2011 = vst.msk [vmem:[%s3598_s12 + $0xdc] sm:$0xf] %vm1955_vm1, %v2776_v1  ;;  %v1268_v5 = vadd.f32 %v3583_v53, %v1267_v62  ;;  %v1613_v7 = vadd.f32 %v2884_v0, %v1324_v14  ;;  %v1269_v6 = vpop.f32.mrb[89].mxu0  ;;  %v1604_v47 = vpop.f32.mrb[89].mxu1 }
 0x1d0   : > { %2009 = vst.msk [vmem:[%s3598_s12 + $0xd4] sm:$0xf] %vm1955_vm1, %v2774_v2  ;;  %v1605_v13 = vadd.f32 %v1604_v47, %v1316_v52  ;;  %v1270_v59 = vpop.f32.mrb[90].mxu0  ;;  %v2885_v56 = vpop.f32.mrb[90].mxu1 }
 0x1d1   : > { %1999 = vst.msk [vmem:[%s3598_s12 + $0xac] sm:$0xf] %vm1955_vm1, %v2764_v28  ;;  %v1557_v32 = vadd.f32 %v3739_v34, %v1268_v5  ;;  %v1693_v17 = vmax.f32 %v1613_v7, 0.0  ;;  %v1271_v51 = vadd.f32 %v3583_v53, %v1270_v59  ;;  %v1616_v18 = vadd.f32 %v2885_v56, %v1327_v49  ;;  %v1272_v9 = vpop.f32.mrb[91].mxu0  ;;  %v1607_v63 = vpop.f32.mrb[91].mxu1 }
 0x1d2   : > { %v1691_v21 = vmax.f32 %v1605_v13, 0.0  ;;  %v1608_v27 = vadd.f32 %v1607_v63, %v1319_v20  ;;  %v1340_v34 = vadd.f32 %v3583_v53, %v3574_v44 }
 0x1d3   : > { %v1679_v24 = vmax.f32 %v1557_v32, 0.0  ;;  %v2779_v19 = vpack.c.bf16 %v1693_v17, %v1693_v17  ;;  %v1560_v26 = vadd.f32 %v3746_v11, %v1271_v51  ;;  %v1694_v39 = vmax.f32 %v1616_v18, 0.0 }
 0x1d4   : > { %v2777_v29 = vpack.c.bf16 %v1691_v21, %v1691_v21  ;;  %v1692_v55 = vmax.f32 %v1608_v27, 0.0 }
 0x1d5   : > { %v2765_v12 = vpack.c.bf16 %v1679_v24, %v1679_v24  ;;  %2014 = vst.msk [vmem:[%s3598_s12 + $0xe8] sm:$0xf] %vm1955_vm1, %v2779_v19  ;;  %v1680_v58 = vmax.f32 %v1560_v26, 0.0  ;;  %v2780_v33 = vpack.c.bf16 %v1694_v39, %v1694_v39 }
 0x1d6   : > { %2012 = vst.msk [vmem:[%s3598_s12 + $0xe0] sm:$0xf] %vm1955_vm1, %v2777_v29  ;;  %v2778_v37 = vpack.c.bf16 %v1692_v55, %v1692_v55  ;;  %v1275_v11 = vpop.f32.mrb[92].mxu0  ;;  %v2888_v4 = vpop.f32.mrb[92].mxu1 }
 0x1d7   : > { %2000 = vst.msk [vmem:[%s3598_s12 + $0xb0] sm:$0xf] %vm1955_vm1, %v2765_v12  ;;  %v2766_v44 = vpack.c.bf16 %v1680_v58, %v1680_v58  ;;  %2015 = vst.msk [vmem:[%s3598_s12 + $0xec] sm:$0xf] %vm1955_vm1, %v2780_v33  ;;  %v1276_v46 = vadd.f32 %v3583_v53, %v1275_v11  ;;  %v1629_v23 = vadd.f32 %v2888_v4, %v1340_v34  ;;  %v1277_v16 = vpop.f32.mrb[93].mxu0  ;;  %v1620_v41 = vpop.f32.mrb[93].mxu1 }
 0x1d8   : > { %2013 = vst.msk [vmem:[%s3598_s12 + $0xe4] sm:$0xf] %vm1955_vm1, %v2778_v37  ;;  %v1621_v45 = vadd.f32 %v1620_v41, %v1332_v22  ;;  %v1278_v3 = vpop.f32.mrb[94].mxu0  ;;  %v2889_v10 = vpop.f32.mrb[94].mxu1 }
 0x1d9   : > { %2001 = vst.msk [vmem:[%s3598_s12 + $0xb4] sm:$0xf] %vm1955_vm1, %v2766_v44  ;;  %v1565_v48 = vadd.f32 %v3734_v25, %v1276_v46  ;;  %v1697_v50 = vmax.f32 %v1629_v23, 0.0  ;;  %v1279_v42 = vadd.f32 %v3583_v53, %v1278_v3  ;;  %v1632_v31 = vadd.f32 %v2889_v10, %v1343_v38  ;;  %v1280_v8 = vpop.f32.mrb[95].mxu0  ;;  %v1623_v57 = vpop.f32.mrb[95].mxu1 }
 0x1da   : > { %v1695_v54 = vmax.f32 %v1621_v45, 0.0  ;;  %v1624_v40 = vadd.f32 %v1623_v57, %v1335_v36 }
 0x1db   : > { %v1681_v15 = vmax.f32 %v1565_v48, 0.0  ;;  %v2783_v61 = vpack.c.bf16 %v1697_v50, %v1697_v50  ;;  %v1568_v60 = vadd.f32 %v3741_v30, %v1279_v42  ;;  %v1698_v14 = vmax.f32 %v1632_v31, 0.0  ;;  %2026 = sbr.rel (!%p3292_p4) target bundleno = 573 (0x23d), region = 36 }
 0x1dc   : > { %v2781_v43 = vpack.c.bf16 %v1695_v54, %v1695_v54  ;;  %v1696_v25 = vmax.f32 %v1624_v40, 0.0 }
 0x1dd   : > { %v2767_v35 = vpack.c.bf16 %v1681_v15, %v1681_v15  ;;  %2018 = vst.msk [vmem:[%s3598_s12 + $0xf8] sm:$0xf] %vm1955_vm1, %v2783_v61  ;;  %v1682_v53 = vmax.f32 %v1568_v60, 0.0  ;;  %v2784_v1 = vpack.c.bf16 %v1698_v14, %v1698_v14 }
 0x1de   : > { %2016 = vst.msk [vmem:[%s3598_s12 + $0xf0] sm:$0xf] %vm1955_vm1, %v2781_v43  ;;  %v2782_v52 = vpack.c.bf16 %v1696_v25, %v1696_v25 }
 0x1df   : > { %2002 = vst.msk [vmem:[%s3598_s12 + $0xb8] sm:$0xf] %vm1955_vm1, %v2767_v35  ;;  %v2768_v2 = vpack.c.bf16 %v1682_v53, %v1682_v53  ;;  %2019 = vst.msk [vmem:[%s3598_s12 + $0xfc] sm:$0xf] %vm1955_vm1, %v2784_v1 }
 0x1e0   : > { %2017 = vst.msk [vmem:[%s3598_s12 + $0xf4] sm:$0xf] %vm1955_vm1, %v2782_v52 }
 0x1e1   : > { %2003 = vst.msk [vmem:[%s3598_s12 + $0xbc] sm:$0xf] %vm1955_vm1, %v2768_v2 }
 0x1e2   : > { %s4057_s27 = smov (!%p2029_p8, %s2028_s27), 64 }
 0x1e3   : > { %s2706_s5 = sshll.u32 %s4057_s27, 6 }
 0x1e4   : > { %p2709_p9 = scmp.eq.s32.totalorder %s2706_s5, 0 }
 0x1e5   : > { %s3859_s6 = sshrl.u32 (!%p2709_p9), %s4057_s27, 6 }
 0x1e6   : > { %2037 = sbr.rel (%p2709_p9) target bundleno = 573 (0x23d), region = 40  ;;  %p2710_p10 = scmp.le.s32.totalorder (!%p2709_p9), %s3859_s6, 0 }
 0x1ed   : > { %2442 = sbr.rel (%p2710_p10) target bundleno = 552 (0x228), region = 112  ;;  %s4050_s15 = smov (!%p2710_p10), %s3853_s4 }
 0x1ee   : > { %s4051_s20 = smov (!%p2710_p10), %s3598_s12  ;;  %s3868_s23 = smov (!%p2710_p10), 0  }
 0x1ef   : > { %s3870_s7 = smov (!%p2710_p10), 0  }
 0x1f4 LB: >> { %v2053_v30 = vld [vmem:[%s3220_s20] sm:$0xf]  ;;  %v2055_v62 = vld [vmem:[%s3220_s20 + $0x4] sm:$0xf]  ;;  %v2057_v0 = vld [vmem:[%s3220_s20 + $0x8] sm:$0xf]  ;;  %s3228_s7 = sphi %s3870_s7, %s2047_s7   ;;  %s3224_s23 = sphi %s3868_s23, %s4052_s23   ;;  %s3220_s20 = sphi %s4051_s20, %s2186_s20   ;;  %s3216_s15 = sphi %s4050_s15, %s2187_s15  }
 0x1f5   : >> { %2054 = vst [vmem:[%s3216_s15] sm:$0xf] %v2053_v30  ;;  %2056 = vst [vmem:[%s3216_s15 + $0x4] sm:$0xf] %v2055_v62  ;;  %v2059_v49 = vld [vmem:[%s3220_s20 + $0xc] sm:$0xf]  ;;  %s2181_s8 = sadd.s32 1, %s3224_s23 }
 0x1f6   : >> { %2058 = vst [vmem:[%s3216_s15 + $0x8] sm:$0xf] %v2057_v0  ;;  %v2061_v28 = vld [vmem:[%s3220_s20 + $0x10] sm:$0xf]  ;;  %v2063_v5 = vld [vmem:[%s3220_s20 + $0x14] sm:$0xf]  ;;  %p2182_p11 = scmp.ge.s32.totalorder %s2181_s8, %s3859_s6 }
 0x1f7   : >> { %2060 = vst [vmem:[%s3216_s15 + $0xc] sm:$0xf] %v2059_v49  ;;  %2062 = vst [vmem:[%s3216_s15 + $0x10] sm:$0xf] %v2061_v28  ;;  %v2065_v7 = vld [vmem:[%s3220_s20 + $0x18] sm:$0xf] }
 0x1f8   : >> { %2064 = vst [vmem:[%s3216_s15 + $0x14] sm:$0xf] %v2063_v5  ;;  %v2067_v6 = vld [vmem:[%s3220_s20 + $0x1c] sm:$0xf]  ;;  %v2069_v47 = vld [vmem:[%s3220_s20 + $0x20] sm:$0xf] }
 0x1f9   : >> { %2066 = vst [vmem:[%s3216_s15 + $0x18] sm:$0xf] %v2065_v7  ;;  %2068 = vst [vmem:[%s3216_s15 + $0x1c] sm:$0xf] %v2067_v6  ;;  %v2071_v20 = vld [vmem:[%s3220_s20 + $0x24] sm:$0xf] }
 0x1fa   : >> { %2070 = vst [vmem:[%s3216_s15 + $0x20] sm:$0xf] %v2069_v47  ;;  %v2073_v13 = vld [vmem:[%s3220_s20 + $0x28] sm:$0xf]  ;;  %v2075_v59 = vld [vmem:[%s3220_s20 + $0x2c] sm:$0xf] }
 0x1fb   : >> { %2072 = vst [vmem:[%s3216_s15 + $0x24] sm:$0xf] %v2071_v20  ;;  %2074 = vst [vmem:[%s3216_s15 + $0x28] sm:$0xf] %v2073_v13  ;;  %v2077_v56 = vld [vmem:[%s3220_s20 + $0x30] sm:$0xf] }
 0x1fc   : >> { %2076 = vst [vmem:[%s3216_s15 + $0x2c] sm:$0xf] %v2075_v59  ;;  %v2079_v32 = vld [vmem:[%s3220_s20 + $0x34] sm:$0xf]  ;;  %v2081_v17 = vld [vmem:[%s3220_s20 + $0x38] sm:$0xf] }
 0x1fd   : >> { %2078 = vst [vmem:[%s3216_s15 + $0x30] sm:$0xf] %v2077_v56  ;;  %2080 = vst [vmem:[%s3216_s15 + $0x34] sm:$0xf] %v2079_v32  ;;  %v2083_v51 = vld [vmem:[%s3220_s20 + $0x3c] sm:$0xf] }
 0x1fe   : >> { %2082 = vst [vmem:[%s3216_s15 + $0x38] sm:$0xf] %v2081_v17  ;;  %v2085_v18 = vld [vmem:[%s3220_s20 + $0x40] sm:$0xf]  ;;  %v2087_v9 = vld [vmem:[%s3220_s20 + $0x44] sm:$0xf] }
 0x1ff   : >> { %2084 = vst [vmem:[%s3216_s15 + $0x3c] sm:$0xf] %v2083_v51  ;;  %2086 = vst [vmem:[%s3216_s15 + $0x40] sm:$0xf] %v2085_v18  ;;  %v2089_v63 = vld [vmem:[%s3220_s20 + $0x48] sm:$0xf] }
 0x200   : >> { %2088 = vst [vmem:[%s3216_s15 + $0x44] sm:$0xf] %v2087_v9  ;;  %v2091_v21 = vld [vmem:[%s3220_s20 + $0x4c] sm:$0xf]  ;;  %v2093_v27 = vld [vmem:[%s3220_s20 + $0x50] sm:$0xf] }
 0x201   : >> { %2090 = vst [vmem:[%s3216_s15 + $0x48] sm:$0xf] %v2089_v63  ;;  %2092 = vst [vmem:[%s3216_s15 + $0x4c] sm:$0xf] %v2091_v21  ;;  %v2095_v24 = vld [vmem:[%s3220_s20 + $0x54] sm:$0xf] }
 0x202   : >> { %2094 = vst [vmem:[%s3216_s15 + $0x50] sm:$0xf] %v2093_v27  ;;  %v2097_v19 = vld [vmem:[%s3220_s20 + $0x58] sm:$0xf]  ;;  %v2099_v26 = vld [vmem:[%s3220_s20 + $0x5c] sm:$0xf] }
 0x203   : >> { %2096 = vst [vmem:[%s3216_s15 + $0x54] sm:$0xf] %v2095_v24  ;;  %2098 = vst [vmem:[%s3216_s15 + $0x58] sm:$0xf] %v2097_v19  ;;  %v2101_v39 = vld [vmem:[%s3220_s20 + $0x60] sm:$0xf] }
 0x204   : >> { %2100 = vst [vmem:[%s3216_s15 + $0x5c] sm:$0xf] %v2099_v26  ;;  %v2103_v29 = vld [vmem:[%s3220_s20 + $0x64] sm:$0xf]  ;;  %v2105_v55 = vld [vmem:[%s3220_s20 + $0x68] sm:$0xf] }
 0x205   : >> { %2102 = vst [vmem:[%s3216_s15 + $0x60] sm:$0xf] %v2101_v39  ;;  %2104 = vst [vmem:[%s3216_s15 + $0x64] sm:$0xf] %v2103_v29  ;;  %v2107_v34 = vld [vmem:[%s3220_s20 + $0x6c] sm:$0xf] }
 0x206   : >> { %2106 = vst [vmem:[%s3216_s15 + $0x68] sm:$0xf] %v2105_v55  ;;  %v2109_v12 = vld [vmem:[%s3220_s20 + $0x70] sm:$0xf]  ;;  %v2111_v58 = vld [vmem:[%s3220_s20 + $0x74] sm:$0xf] }
 0x207   : >> { %2108 = vst [vmem:[%s3216_s15 + $0x6c] sm:$0xf] %v2107_v34  ;;  %2110 = vst [vmem:[%s3216_s15 + $0x70] sm:$0xf] %v2109_v12  ;;  %v2113_v33 = vld [vmem:[%s3220_s20 + $0x78] sm:$0xf] }
 0x208   : >> { %2112 = vst [vmem:[%s3216_s15 + $0x74] sm:$0xf] %v2111_v58  ;;  %v2115_v22 = vld [vmem:[%s3220_s20 + $0x7c] sm:$0xf]  ;;  %v2117_v37 = vld [vmem:[%s3220_s20 + $0x80] sm:$0xf] }
 0x209   : >> { %2114 = vst [vmem:[%s3216_s15 + $0x78] sm:$0xf] %v2113_v33  ;;  %2116 = vst [vmem:[%s3216_s15 + $0x7c] sm:$0xf] %v2115_v22  ;;  %v2119_v11 = vld [vmem:[%s3220_s20 + $0x84] sm:$0xf] }
 0x20a   : >> { %2118 = vst [vmem:[%s3216_s15 + $0x80] sm:$0xf] %v2117_v37  ;;  %v2121_v4 = vld [vmem:[%s3220_s20 + $0x88] sm:$0xf]  ;;  %v2123_v38 = vld [vmem:[%s3220_s20 + $0x8c] sm:$0xf] }
 0x20b   : >> { %2120 = vst [vmem:[%s3216_s15 + $0x84] sm:$0xf] %v2119_v11  ;;  %2122 = vst [vmem:[%s3216_s15 + $0x88] sm:$0xf] %v2121_v4  ;;  %v2125_v44 = vld [vmem:[%s3220_s20 + $0x90] sm:$0xf] }
 0x20c   : >> { %2124 = vst [vmem:[%s3216_s15 + $0x8c] sm:$0xf] %v2123_v38  ;;  %v2127_v46 = vld [vmem:[%s3220_s20 + $0x94] sm:$0xf]  ;;  %v2129_v23 = vld [vmem:[%s3220_s20 + $0x98] sm:$0xf] }
 0x20d   : >> { %2126 = vst [vmem:[%s3216_s15 + $0x90] sm:$0xf] %v2125_v44  ;;  %2128 = vst [vmem:[%s3216_s15 + $0x94] sm:$0xf] %v2127_v46  ;;  %v2131_v16 = vld [vmem:[%s3220_s20 + $0x9c] sm:$0xf] }
 0x20e   : >> { %2130 = vst [vmem:[%s3216_s15 + $0x98] sm:$0xf] %v2129_v23  ;;  %v2133_v41 = vld [vmem:[%s3220_s20 + $0xa0] sm:$0xf]  ;;  %v2135_v36 = vld [vmem:[%s3220_s20 + $0xa4] sm:$0xf] }
 0x20f   : >> { %2132 = vst [vmem:[%s3216_s15 + $0x9c] sm:$0xf] %v2131_v16  ;;  %2134 = vst [vmem:[%s3216_s15 + $0xa0] sm:$0xf] %v2133_v41  ;;  %v2137_v45 = vld [vmem:[%s3220_s20 + $0xa8] sm:$0xf] }
 0x210   : >> { %2136 = vst [vmem:[%s3216_s15 + $0xa4] sm:$0xf] %v2135_v36  ;;  %v2139_v3 = vld [vmem:[%s3220_s20 + $0xac] sm:$0xf]  ;;  %v2141_v10 = vld [vmem:[%s3220_s20 + $0xb0] sm:$0xf] }
 0x211   : >> { %2138 = vst [vmem:[%s3216_s15 + $0xa8] sm:$0xf] %v2137_v45  ;;  %2140 = vst [vmem:[%s3216_s15 + $0xac] sm:$0xf] %v2139_v3  ;;  %v2143_v48 = vld [vmem:[%s3220_s20 + $0xb4] sm:$0xf] }
 0x212   : >> { %2142 = vst [vmem:[%s3216_s15 + $0xb0] sm:$0xf] %v2141_v10  ;;  %v2145_v50 = vld [vmem:[%s3220_s20 + $0xb8] sm:$0xf]  ;;  %v2147_v42 = vld [vmem:[%s3220_s20 + $0xbc] sm:$0xf] }
 0x213   : >> { %2144 = vst [vmem:[%s3216_s15 + $0xb4] sm:$0xf] %v2143_v48  ;;  %2146 = vst [vmem:[%s3216_s15 + $0xb8] sm:$0xf] %v2145_v50  ;;  %v2149_v31 = vld [vmem:[%s3220_s20 + $0xc0] sm:$0xf] }
 0x214   : >> { %2148 = vst [vmem:[%s3216_s15 + $0xbc] sm:$0xf] %v2147_v42  ;;  %v2151_v8 = vld [vmem:[%s3220_s20 + $0xc4] sm:$0xf]  ;;  %v2153_v57 = vld [vmem:[%s3220_s20 + $0xc8] sm:$0xf] }
 0x215   : >> { %2150 = vst [vmem:[%s3216_s15 + $0xc0] sm:$0xf] %v2149_v31  ;;  %2152 = vst [vmem:[%s3216_s15 + $0xc4] sm:$0xf] %v2151_v8  ;;  %v2155_v54 = vld [vmem:[%s3220_s20 + $0xcc] sm:$0xf] }
 0x216   : >> { %2154 = vst [vmem:[%s3216_s15 + $0xc8] sm:$0xf] %v2153_v57  ;;  %v2157_v40 = vld [vmem:[%s3220_s20 + $0xd0] sm:$0xf]  ;;  %v2159_v15 = vld [vmem:[%s3220_s20 + $0xd4] sm:$0xf] }
 0x217   : >> { %2156 = vst [vmem:[%s3216_s15 + $0xcc] sm:$0xf] %v2155_v54  ;;  %2158 = vst [vmem:[%s3216_s15 + $0xd0] sm:$0xf] %v2157_v40  ;;  %v2161_v61 = vld [vmem:[%s3220_s20 + $0xd8] sm:$0xf] }
 0x218   : >> { %2160 = vst [vmem:[%s3216_s15 + $0xd4] sm:$0xf] %v2159_v15  ;;  %v2163_v60 = vld [vmem:[%s3220_s20 + $0xdc] sm:$0xf]  ;;  %v2165_v14 = vld [vmem:[%s3220_s20 + $0xe0] sm:$0xf] }
 0x219   : >> { %2162 = vst [vmem:[%s3216_s15 + $0xd8] sm:$0xf] %v2161_v61  ;;  %2164 = vst [vmem:[%s3216_s15 + $0xdc] sm:$0xf] %v2163_v60  ;;  %v2167_v43 = vld [vmem:[%s3220_s20 + $0xe4] sm:$0xf] }
 0x21a   : >> { %2166 = vst [vmem:[%s3216_s15 + $0xe0] sm:$0xf] %v2165_v14  ;;  %v2169_v25 = vld [vmem:[%s3220_s20 + $0xe8] sm:$0xf]  ;;  %v2171_v35 = vld [vmem:[%s3220_s20 + $0xec] sm:$0xf] }
 0x21b   : >> { %2168 = vst [vmem:[%s3216_s15 + $0xe4] sm:$0xf] %v2167_v43  ;;  %2170 = vst [vmem:[%s3216_s15 + $0xe8] sm:$0xf] %v2169_v25  ;;  %v2173_v53 = vld [vmem:[%s3220_s20 + $0xf0] sm:$0xf] }
 0x21c   : >> { %2172 = vst [vmem:[%s3216_s15 + $0xec] sm:$0xf] %v2171_v35  ;;  %v2175_v1 = vld [vmem:[%s3220_s20 + $0xf4] sm:$0xf]  ;;  %v2177_v52 = vld [vmem:[%s3220_s20 + $0xf8] sm:$0xf] }
 0x21d   : >> { %2174 = vst [vmem:[%s3216_s15 + $0xf0] sm:$0xf] %v2173_v53  ;;  %2176 = vst [vmem:[%s3216_s15 + $0xf4] sm:$0xf] %v2175_v1  ;;  %v2179_v2 = vld [vmem:[%s3220_s20 + $0xfc] sm:$0xf] }
 0x21e   : >> { %2178 = vst [vmem:[%s3216_s15 + $0xf8] sm:$0xf] %v2177_v52  ;;  %2180 = vst [vmem:[%s3216_s15 + $0xfc] sm:$0xf] %v2179_v2  ;;  %s4059_s8 = smov (%p2182_p11, %s2181_s8), 0  ;;  %s2047_s7 = sadd.s32 1, %s3228_s7  }
 0x21f   : >> { %s2711_s10 = sshll.u32 %s4059_s8, 8  ;;  %p2046_p12 = scmp.ge.s32.totalorder %s2047_s7, %s3859_s6 }
 0x220   : >> { %s2186_s20 = scalar_lea.vmem %s3598_s12, %s2711_s10 [#allocation2]   ;;  %s2187_s15 = scalar_lea.vmem %s3853_s4, %s2711_s10  }
 0x221   : >> { %s4052_s23 = smov %s4059_s8  ;;  %2049 = sbr.rel (!%p2046_p12) target bundleno = 500 (0x1f4), region = 118 }
 0x228 PF: > { %s4027_s11 = sand.u32 63, %s4057_s27   ;;  %s2786_s14 = sshll.u32 %s3859_s6, 8 }
 0x229   : > { %s2192_s17 = scalar_lea.vmem %s3598_s12, %s2786_s14 [#allocation2]   ;;  %s2194_s18 = scalar_lea.vmem %s3853_s4, %s2786_s14  }
 0x22a   : > { %p2716_p13 = scmp.le.s32.totalorder %s4027_s11, 0 }
 0x22b   : > { %s3230_s21 = smov (!%p2716_p13), %s2194_s18   ;;  %s3234_s22 = smov (!%p2716_p13), %s2192_s17  }
 0x22c   : > { %2456 = sbr.rel (%p2716_p13) target bundleno = 573 (0x23d), region = 123  ;;  %s3238_s9 = smov (!%p2716_p13), 0  }
 0x22d   : > { %s3242_s24 = smov (!%p2716_p13), 0  }
 0x233 LB: >> { %v2204_v30 = vld [vmem:[%s3236_s22] sm:$0xf]  ;;  %s2206_s25 = sadd.s32 1, %s3240_s9  ;;  %s2198_s24 = sadd.s32 1, %s3244_s24   ;;  %s3244_s24 = sphi %s3242_s24, %s2198_s24   ;;  %s3240_s9 = sphi %s3238_s9, %s3239_s9   ;;  %s3236_s22 = sphi %s3234_s22, %s2211_s22   ;;  %s3232_s21 = sphi %s3230_s21, %s2212_s21  }
 0x234   : >> { %2205 = vst [vmem:[%s3232_s21] sm:$0xf] %v2204_v30  ;;  %p2207_p0 = scmp.ge.s32.totalorder %s2206_s25, %s4027_s11  ;;  %p2197_p1 = scmp.ge.s32.totalorder %s2198_s24, %s4027_s11 }
 0x236   : >> { %s4061_s25 = smov (%p2207_p0, %s2206_s25), 0  ;;  %2200 = sbr.rel (!%p2197_p1) target bundleno = 563 (0x233), region = 129 }
 0x237   : >> { %s2717_s26 = sshll.u32 %s4061_s25, 2  ;;  %s3239_s9 = smov %s4061_s25  }
 0x238   : >> { %s2211_s22 = scalar_lea.vmem %s2192_s17, %s2717_s26 [#allocation2]   ;;  %s2212_s21 = scalar_lea.vmem %s2194_s18, %s2717_s26  }
 0x23d PF: > { %p10_p2 = scmp.ge.s32.totalorder %s3282_s16, 4   ;;  %s4053_s12 = smov %s3208_s13 }
 0x23e   : > { %s4054_s13 = smov %s3290_s19  ;;  %s4055_s14 = smov %s3282_s16 }
 0x23f   :  { %12 = sbr.rel (!%p10_p2) target bundleno = 2 (0x2), region = 140 }

// kernel: mario_forward.7
= control target key start
LH: loop header
LB: loop body
LE: loop exit
PB: predicated region body
PF: predicated region fallthrough
CT: control target
= control target key end

     0   :  { %vm795_vm0 = vcmask 523264   ;;  %vm1480_vm1 = vcmask 519168   ;;  %vm1511_vm2 = vcmask 516096   ;;  %s2827_s1 = inlined_call_operand.vmem [shape: bf16[576,64], index: 1, kind: input, shape index: {}]   ;;  %s2828_s0 = inlined_call_operand.vmem [shape: bf16[242,576], index: 0, kind: input, shape index: {}]   ;;  %s2829_s2 = inlined_call_operand.vmem [shape: f32[1,64], index: 2, kind: input, shape index: {}]   ;;  %s2830_s3 = inlined_call_operand.vmem [shape: bf16[242,64], index: 3, kind: output, shape index: {}]  }
   0x1   :  { %v2012_v0 = vld [vmem:[%s2827_s1 + $0x40] sm:$0xff]   ;;  %v2014_v2 = vld [vmem:[%s2827_s1 + $0x48] sm:$0xff]   ;;  %v2016_v4 = vld [vmem:[%s2827_s1 + $0x50] sm:$0xff]  }
   0x2   :  { %v2013_v1 = vld [vmem:[%s2827_s1] sm:$0xff]   ;;  %1712 = vmatprep.subr.bf16.mxu0 %v2012_v0  ;;  %1996 = vmatprep.subr.bf16.mxu1 %v2012_v0  ;;  %v2015_v3 = vld [vmem:[%s2827_s1 + $0x8] sm:$0xff]   ;;  %v2017_v5 = vld [vmem:[%s2827_s1 + $0x10] sm:$0xff]  }
   0x3   :  { %1713 = vmatpush3.bf16.msra.mxu0 %v2013_v1  ;;  %2004 = vmatpush3.bf16.msra.mxu1 %v2013_v1  ;;  %v2018_v6 = vld [vmem:[%s2827_s1 + $0x58] sm:$0xff]   ;;  %v2020_v8 = vld [vmem:[%s2827_s1 + $0x60] sm:$0xff]   ;;  %v2022_v10 = vld [vmem:[%s2827_s1 + $0x68] sm:$0xff]  }
   0x4   :  { %1714 = vmatprep.subr.bf16.mxu0 %v2014_v2  ;;  %1997 = vmatprep.subr.bf16.mxu1 %v2014_v2  ;;  %v2019_v7 = vld [vmem:[%s2827_s1 + $0x18] sm:$0xff]   ;;  %v2021_v9 = vld [vmem:[%s2827_s1 + $0x20] sm:$0xff]   ;;  %v2023_v13 = vld [vmem:[%s2827_s1 + $0x28] sm:$0xff]  }
   0x5   :  { %v2030_v11 = vld [vmem:[%s2828_s0 + $0x4] ss:$20 sps:$4 sm:$0xff]   ;;  %v2024_v14 = vld [vmem:[%s2827_s1 + $0x70] sm:$0xff]   ;;  %v2037_v23 = vld [vmem:[%s2827_s1 + $0xc8] sm:$0xff]  }
   0x6   :  { %v2033_v12 = vld [vmem:[%s2828_s0 + $0x1e4] ss:$20 sps:$4 sm:$0xff]   ;;  %876 = vmatprep.mubr.bf16.mxu0 %v2030_v11  ;;  %v2025_v15 = vld [vmem:[%s2827_s1 + $0x30] sm:$0xff]   ;;  %v2039_v24 = vld [vmem:[%s2828_s0 + $0x2c] ss:$20 sps:$4 sm:$0xff]  }
   0x7   :  { %1715 = vmatpush3.bf16.msra.mxu0 %v2015_v3  ;;  %2005 = vmatpush3.bf16.msra.mxu1 %v2015_v3  ;;  %v2026_v16 = vld [vmem:[%s2827_s1 + $0x78] sm:$0xff]   ;;  %v2034_v18 = vld [vmem:[%s2827_s1 + $0xc0] sm:$0xff]   ;;  %v2038_v26 = vld [vmem:[%s2827_s1 + $0x88] sm:$0xff]  }
   0x8   :  { %1716 = vmatprep.subr.bf16.mxu0 %v2016_v4  ;;  %1998 = vmatprep.subr.bf16.mxu1 %v2016_v4  ;;  %v2027_v17 = vld [vmem:[%s2827_s1 + $0x38] sm:$0xff]   ;;  %v2036_v19 = vld [vmem:[%s2827_s1 + $0x100] sm:$0xff]   ;;  %v2045_v28 = vld [vmem:[%s2827_s1 + $0xd0] sm:$0xff]  }
   0x9   :  { %972 = vmatprep.mubr.bf16.mxu1 %v2033_v12  ;;  %v2028_v20 = vld [vmem:[%s2828_s0] ss:$20 sps:$4 sm:$0xff]   ;;  %v2043_v27 = vld [vmem:[%s2828_s0 + $0x28] ss:$20 sps:$4 sm:$0xff]   ;;  %v2053_v36 = vld [vmem:[%s2828_s0 + $0x50] ss:$20 sps:$4 sm:$0xff]  }
   0xa   :  { %v2031_v21 = vld [vmem:[%s2828_s0 + $0x1e0] ss:$20 sps:$4 sm:$0xff]   ;;  %v2044_v29 = vld [vmem:[%s2828_s0 + $0x208] ss:$20 sps:$4 sm:$0xff]   ;;  %v2054_v38 = vld [vmem:[%s2828_s0 + $0x230] ss:$20 sps:$4 sm:$0xff]  }
   0xb   :  { %1717 = vmatpush3.bf16.msra.mxu0 %v2017_v5  ;;  %2006 = vmatpush3.bf16.msra.mxu1 %v2017_v5  ;;  %v2035_v22 = vld [vmem:[%s2827_s1 + $0x80] sm:$0xff]   ;;  %v2046_v30 = vld [vmem:[%s2827_s1 + $0x90] sm:$0xff]   ;;  %v2047_v31 = vld [vmem:[%s2827_s1 + $0xd8] sm:$0xff]  }
   0xc   :  { %1718 = vmatprep.subr.bf16.mxu0 %v2018_v6  ;;  %1999 = vmatprep.subr.bf16.mxu1 %v2018_v6  ;;  %v2041_v25 = vld [vmem:[%s2828_s0 + $0x20c] ss:$20 sps:$4 sm:$0xff]   ;;  %v2049_v32 = vld [vmem:[%s2828_s0 + $0x54] ss:$20 sps:$4 sm:$0xff]   ;;  %v2048_v35 = vld [vmem:[%s2827_s1 + $0x98] sm:$0xff]  }
   0xd   :  { %v2051_v33 = vld [vmem:[%s2828_s0 + $0x234] ss:$20 sps:$4 sm:$0xff]   ;;  %v2055_v37 = vld [vmem:[%s2827_s1 + $0xe0] sm:$0xff]   ;;  %v105_v39 = vld [vmem:[%s2828_s0 + $0x258] sm:$0x11] }
   0xe   :  { %v2066_v34 = vld [vmem:[%s2827_s1 + $0x108] sm:$0xff]   ;;  %v2056_v40 = vld [vmem:[%s2827_s1 + $0xa0] sm:$0xff]   ;;  %v2059_v41 = vld [vmem:[%s2828_s0 + $0x7c] ss:$20 sps:$4 sm:$0xff]   ;;  %v1594_v43 = vcombine.high %v105_v39, %v105_v39  ;;  %v1593_v48 = vcombine.low %v105_v39, %v105_v39 }
   0xf   :  { %1719 = vmatpush3.bf16.msra.mxu0 %v2019_v7  ;;  %2007 = vmatpush3.bf16.msra.mxu1 %v2019_v7  ;;  %v2057_v42 = vld [vmem:[%s2827_s1 + $0xe8] sm:$0xff]   ;;  %v2064_v45 = vld [vmem:[%s2827_s1 + $0xf0] sm:$0xff]   ;;  %v2067_v50 = vld [vmem:[%s2827_s1 + $0xf8] sm:$0xff]  }
  0x10   :  { %1720 = vmatprep.subr.bf16.mxu0 %v2020_v8  ;;  %2000 = vmatprep.subr.bf16.mxu1 %v2020_v8  ;;  %v2058_v44 = vld [vmem:[%s2827_s1 + $0xa8] sm:$0xff]   ;;  %v2087_v46 = vld [vmem:[%s2827_s1 + $0x110] sm:$0xff]   ;;  %v2069_v51 = vld [vmem:[%s2828_s0 + $0xa4] ss:$20 sps:$4 sm:$0xff]  }
  0x11   :  { %v2062_v47 = vld [vmem:[%s2828_s0 + $0x78] ss:$20 sps:$4 sm:$0xff]   ;;  %v2065_v49 = vld [vmem:[%s2827_s1 + $0xb0] sm:$0xff]   ;;  %v2071_v54 = vld [vmem:[%s2828_s0 + $0x8] ss:$20 sps:$4 sm:$0xff]  }
  0x12   :  { %v2073_v52 = vld [vmem:[%s2828_s0 + $0xc] ss:$20 sps:$4 sm:$0xff]   ;;  %v2068_v53 = vld [vmem:[%s2827_s1 + $0xb8] sm:$0xff]   ;;  %v2077_v58 = vld [vmem:[%s2828_s0 + $0x34] ss:$20 sps:$4 sm:$0xff]  }
  0x13   :  { %1721 = vmatpush3.bf16.msra.mxu0 %v2021_v9  ;;  %2008 = vmatpush3.bf16.msra.mxu1 %v2021_v9  ;;  %v2106_v55 = vld [vmem:[%s2827_s1 + $0x118] sm:$0xff]   ;;  %v2074_v56 = vld [vmem:[%s2828_s0 + $0xa0] ss:$20 sps:$4 sm:$0xff]   ;;  %v2080_v60 = vld [vmem:[%s2828_s0 + $0x30] ss:$20 sps:$4 sm:$0xff]  }
  0x14   :  { %1722 = vmatprep.subr.bf16.mxu0 %v2022_v10  ;;  %2001 = vmatprep.subr.bf16.mxu1 %v2022_v10  ;;  %v2075_v57 = vld [vmem:[%s2828_s0 + $0xcc] ss:$20 sps:$4 sm:$0xff]   ;;  %v2079_v59 = vld [vmem:[%s2828_s0 + $0xc8] ss:$20 sps:$4 sm:$0xff]   ;;  %v2085_v63 = vld [vmem:[%s2828_s0 + $0xf0] ss:$20 sps:$4 sm:$0xff]  }
  0x15   :  { %v2081_v61 = vld [vmem:[%s2828_s0 + $0xf4] ss:$20 sps:$4 sm:$0xff]   ;;  %v2083_v62 = vld [vmem:[%s2828_s0 + $0x5c] ss:$20 sps:$4 sm:$0xff]   ;;  %v2086_v0 = vld [vmem:[%s2828_s0 + $0x58] ss:$20 sps:$4 sm:$0xff]  }
  0x16   :  { %v2088_v1 = vld [vmem:[%s2828_s0 + $0x11c] ss:$20 sps:$4 sm:$0xff]   ;;  %v2090_v2 = vld [vmem:[%s2828_s0 + $0x84] ss:$20 sps:$4 sm:$0xff]   ;;  %v2093_v4 = vld [vmem:[%s2828_s0 + $0x80] ss:$20 sps:$4 sm:$0xff]  }
  0x17   :  { %1723 = vmatpush3.bf16.msra.mxu0 %v2023_v13  ;;  %2009 = vmatpush3.bf16.msra.mxu1 %v2023_v13  ;;  %v2092_v3 = vld [vmem:[%s2828_s0 + $0x118] ss:$20 sps:$4 sm:$0xff]   ;;  %v2098_v7 = vld [vmem:[%s2828_s0 + $0x140] ss:$20 sps:$4 sm:$0xff]   ;;  %v2099_v8 = vld [vmem:[%s2828_s0 + $0xa8] ss:$20 sps:$4 sm:$0xff]  }
  0x18   :  { %1724 = vmatprep.subr.bf16.mxu0 %v2024_v14  ;;  %2002 = vmatprep.subr.bf16.mxu1 %v2024_v14  ;;  %v2094_v5 = vld [vmem:[%s2828_s0 + $0x144] ss:$20 sps:$4 sm:$0xff]   ;;  %v2096_v6 = vld [vmem:[%s2828_s0 + $0xac] ss:$20 sps:$4 sm:$0xff]   ;;  %v2102_v10 = vld [vmem:[%s2828_s0 + $0xd4] ss:$20 sps:$4 sm:$0xff]  }
  0x19   :  { %v2100_v9 = vld [vmem:[%s2828_s0 + $0x16c] ss:$20 sps:$4 sm:$0xff]   ;;  %v2104_v11 = vld [vmem:[%s2828_s0 + $0x168] ss:$20 sps:$4 sm:$0xff]   ;;  %v2105_v12 = vld [vmem:[%s2828_s0 + $0xd0] ss:$20 sps:$4 sm:$0xff]  }
  0x1a   :  { %v2107_v13 = vld [vmem:[%s2828_s0 + $0x194] ss:$20 sps:$4 sm:$0xff]   ;;  %v2109_v14 = vld [vmem:[%s2828_s0 + $0xfc] ss:$20 sps:$4 sm:$0xff]  }
  0x1b   :  { %1725 = vmatpush3.bf16.msra.mxu0 %v2025_v15  ;;  %2010 = vmatpush3.bf16.msra.mxu1 %v2025_v15  ;;  %v2111_v15 = vld [vmem:[%s2828_s0 + $0x190] ss:$20 sps:$4 sm:$0xff]   ;;  %v2142_v39 = vld [vmem:[%s2828_s0 + $0x1e8] ss:$20 sps:$4 sm:$0xff]  }
  0x1c   :  { %1726 = vmatprep.subr.bf16.mxu0 %v2026_v16  ;;  %2003 = vmatprep.subr.bf16.mxu1 %v2026_v16  ;;  %v2112_v16 = vld [vmem:[%s2828_s0 + $0xf8] ss:$20 sps:$4 sm:$0xff]  }
  0x1f   :  { %1727 = vmatpush3.bf16.msra.mxu0 %v2027_v17  ;;  %2011 = vmatpush3.bf16.msra.mxu1 %v2027_v17  ;;  %v2113_v17 = vld [vmem:[%s2828_s0 + $0x1bc] ss:$20 sps:$4 sm:$0xff]  }
  0x20   :  { %1824 = vmatprep.subr.bf16.mxu1 %v2034_v18  ;;  %1956 = vmatprep.subr.bf16.mxu0 %v2036_v19  ;;  %v2115_v18 = vld [vmem:[%s2828_s0 + $0x124] ss:$20 sps:$4 sm:$0xff]  }
  0x22   :  { %877 = vmatmul.mubr.bf16.vlgmr.msra.gmra.mrb[0].mxu0 %v2028_v20  ;;  %973 = vmatmul.mubr.bf16.vlgmr.msra.gmra.mrb[0].mxu1 %v2031_v21  ;;  %v2118_v20 = vld [vmem:[%s2828_s0 + $0x120] ss:$20 sps:$4 sm:$0xff]  }
  0x23   :  { %1825 = vmatpush3.bf16.msra.mxu1 %v2035_v22  ;;  %1957 = vmatpush3.bf16.msra.mxu0 %v2036_v19  ;;  %v2117_v19 = vld [vmem:[%s2828_s0 + $0x1b8] ss:$20 sps:$4 sm:$0xff]   ;;  %v2121_v22 = vld [vmem:[%s2828_s0 + $0x10] ss:$20 sps:$4 sm:$0xff]  }
  0x24   :  { %1826 = vmatprep.subr.bf16.mxu1 %v2037_v23  ;;  %884 = vmatprep.mubr.bf16.mxu0 %v2039_v24  ;;  %v2119_v21 = vld [vmem:[%s2828_s0 + $0x14c] ss:$20 sps:$4 sm:$0xff]   ;;  %v2122_v23 = vld [vmem:[%s2828_s0 + $0x148] ss:$20 sps:$4 sm:$0xff]  }
  0x25   :  { %980 = vmatprep.mubr.bf16.mxu1 %v2041_v25  ;;  %1958 = vmatprep.subr.bf16.mxu0 %v2066_v34  ;;  %v2123_v24 = vld [vmem:[%s2828_s0 + $0x38] ss:$20 sps:$4 sm:$0xff]   ;;  %v2124_v25 = vld [vmem:[%s2828_s0 + $0x174] ss:$20 sps:$4 sm:$0xff]  }
  0x27   :  { %1827 = vmatpush3.bf16.msra.mxu1 %v2038_v26  ;;  %1959 = vmatpush3.bf16.msra.mxu0 %v2066_v34  ;;  %v2126_v26 = vld [vmem:[%s2828_s0 + $0x60] ss:$20 sps:$4 sm:$0xff]  }
  0x28   :  { %1828 = vmatprep.subr.bf16.mxu1 %v2045_v28  ;;  %1960 = vmatprep.subr.bf16.mxu0 %v2087_v46  ;;  %v2128_v28 = vld [vmem:[%s2828_s0 + $0x88] ss:$20 sps:$4 sm:$0xff]   ;;  %v2136_v34 = vld [vmem:[%s2828_s0 + $0x100] ss:$20 sps:$4 sm:$0xff]  }
  0x2a   :  { %885 = vmatmul.mubr.bf16.gmra.mrb[4].mxu0 %v2043_v27  ;;  %981 = vmatmul.mubr.bf16.gmra.mrb[4].mxu1 %v2044_v29  ;;  %v2127_v27 = vld [vmem:[%s2828_s0 + $0x170] ss:$20 sps:$4 sm:$0xff]  }
  0x2b   :  { %1829 = vmatpush3.bf16.msra.mxu1 %v2046_v30  ;;  %892 = vmatprep.mubr.bf16.mxu0 %v2049_v32  ;;  %v2129_v29 = vld [vmem:[%s2828_s0 + $0x19c] ss:$20 sps:$4 sm:$0xff]   ;;  %v2133_v32 = vld [vmem:[%s2828_s0 + $0xd8] ss:$20 sps:$4 sm:$0xff]  }
  0x2c   :  { %1830 = vmatprep.subr.bf16.mxu1 %v2047_v31  ;;  %988 = vmatprep.mubr.bf16.mxu1 %v2051_v33  ;;  %v2131_v30 = vld [vmem:[%s2828_s0 + $0xb0] ss:$20 sps:$4 sm:$0xff]   ;;  %v2132_v31 = vld [vmem:[%s2828_s0 + $0x198] ss:$20 sps:$4 sm:$0xff]  }
  0x2d   :  { %1961 = vmatpush3.bf16.msra.mxu0 %v2087_v46  ;;  %v2134_v33 = vld [vmem:[%s2828_s0 + $0x1c4] ss:$20 sps:$4 sm:$0xff]  }
  0x2e   :  { %1962 = vmatprep.subr.bf16.mxu0 %v2106_v55  ;;  %v2151_v46 = vld [vmem:[%s2828_s0 + $0x1f0] ss:$20 sps:$4 sm:$0xff]  }
  0x2f   :  { %1831 = vmatpush3.bf16.msra.mxu1 %v2048_v35  ;;  %v2137_v35 = vld [vmem:[%s2828_s0 + $0x1c0] ss:$20 sps:$4 sm:$0xff]  }
  0x30   :  { %1832 = vmatprep.subr.bf16.mxu1 %v2055_v37  ;;  %v2139_v37 = vld [vmem:[%s2828_s0 + $0x1ec] ss:$20 sps:$4 sm:$0xff]  }
  0x31   :  { %1963 = vmatpush3.bf16.msra.mxu0 %v2106_v55 }
  0x32   :  { %893 = vmatmul.mubr.bf16.gmra.mrb[8].mxu0 %v2053_v36  ;;  %989 = vmatmul.mubr.bf16.gmra.mrb[8].mxu1 %v2054_v38  ;;  %v2138_v36 = vld [vmem:[%s2828_s0 + $0x128] ss:$20 sps:$4 sm:$0xff]   ;;  %v2141_v38 = vld [vmem:[%s2828_s0 + $0x150] ss:$20 sps:$4 sm:$0xff]  }
  0x33   :  { %1833 = vmatpush3.bf16.msra.mxu1 %v2056_v40  ;;  %900 = vmatprep.mubr.bf16.mxu0 %v2059_v41  ;;  %v2143_v40 = vld [vmem:[%s2828_s0 + $0x178] ss:$20 sps:$4 sm:$0xff]   ;;  %v2144_v41 = vld [vmem:[%s2828_s0 + $0x214] ss:$20 sps:$4 sm:$0xff]  }
  0x34   :  { %1834 = vmatprep.subr.bf16.mxu1 %v2057_v42  ;;  %996 = vmatprep.mubr.bf16.mxu1 %v1594_v43  ;;  %v2146_v42 = vld [vmem:[%s2828_s0 + $0x1a0] ss:$20 sps:$4 sm:$0xff]   ;;  %v2147_v43 = vld [vmem:[%s2828_s0 + $0x210] ss:$20 sps:$4 sm:$0xff]  }
  0x37   :  { %1835 = vmatpush3.bf16.msra.mxu1 %v2058_v44  ;;  %v2148_v44 = vld [vmem:[%s2828_s0 + $0x1c8] ss:$20 sps:$4 sm:$0xff]  }
  0x38   :  { %1836 = vmatprep.subr.bf16.mxu1 %v2064_v45  ;;  %v2149_v45 = vld [vmem:[%s2828_s0 + $0x23c] ss:$20 sps:$4 sm:$0xff]  }
  0x3a   :  { %901 = vmatmul.mubr.bf16.gmra.mrb[12].mxu0 %v2062_v47  ;;  %997 = vmatmul.mubr.bf16.gmra.mrb[12].mxu1 %v1593_v48  ;;  %v106_v47 = vld [vmem:[%s2828_s0 + $0x260] sm:$0x11]  ;;  %v2152_v48 = vld [vmem:[%s2828_s0 + $0x238] ss:$20 sps:$4 sm:$0xff]  }
  0x3b   :  { %1837 = vmatpush3.bf16.msra.mxu1 %v2065_v49  ;;  %908 = vmatprep.mubr.bf16.mxu0 %v2069_v51  ;;  %v2153_v49 = vld [vmem:[%s2828_s0 + $0x218] ss:$20 sps:$4 sm:$0xff]   ;;  %v2155_v51 = vld [vmem:[%s2828_s0 + $0x240] ss:$20 sps:$4 sm:$0xff]  }
  0x3c   :  { %1838 = vmatprep.subr.bf16.mxu1 %v2067_v50  ;;  %1036 = vmatprep.mubr.bf16.mxu1 %v2073_v52  ;;  %v1596_v50 = vcombine.high %v106_v47, %v106_v47  ;;  %v1595_v52 = vcombine.low %v106_v47, %v106_v47 }
  0x3f   :  { %1839 = vmatpush3.bf16.msra.mxu1 %v2068_v53  ;;  %v2157_v53 = vld [vmem:[%s2828_s0 + $0x268] ss:$0 sps:$4 sm:$0x11]  }
  0x42   :  { %909 = vmatmul.mubr.bf16.gmra.mrb[16].mxu0 %v2074_v56  ;;  %1037 = vmatmul.mubr.bf16.vlgmr.msra.gmra.mrb[16].mxu1 %v2071_v54 }
  0x43   :  { %916 = vmatprep.mubr.bf16.mxu0 %v2075_v57  ;;  %1044 = vmatprep.mubr.bf16.mxu1 %v2077_v58 }
  0x4a   :  { %917 = vmatmul.mubr.bf16.gmra.mrb[20].mxu0 %v2079_v59  ;;  %1045 = vmatmul.mubr.bf16.gmra.mrb[20].mxu1 %v2080_v60 }
  0x4b   :  { %924 = vmatprep.mubr.bf16.mxu0 %v2081_v61  ;;  %1052 = vmatprep.mubr.bf16.mxu1 %v2083_v62 }
  0x52   :  { %925 = vmatmul.mubr.bf16.gmra.mrb[24].mxu0 %v2085_v63  ;;  %1053 = vmatmul.mubr.bf16.gmra.mrb[24].mxu1 %v2086_v0 }
  0x53   :  { %932 = vmatprep.mubr.bf16.mxu0 %v2088_v1  ;;  %1060 = vmatprep.mubr.bf16.mxu1 %v2090_v2 }
  0x5a   :  { %933 = vmatmul.mubr.bf16.gmra.mrb[28].mxu0 %v2092_v3  ;;  %1061 = vmatmul.mubr.bf16.gmra.mrb[28].mxu1 %v2093_v4 }
  0x5b   :  { %940 = vmatprep.mubr.bf16.mxu0 %v2094_v5  ;;  %1068 = vmatprep.mubr.bf16.mxu1 %v2096_v6 }
  0x62   :  { %941 = vmatmul.mubr.bf16.gmra.mrb[32].mxu0 %v2098_v7  ;;  %1069 = vmatmul.mubr.bf16.gmra.mrb[32].mxu1 %v2099_v8 }
  0x63   :  { %948 = vmatprep.mubr.bf16.mxu0 %v2100_v9  ;;  %1076 = vmatprep.mubr.bf16.mxu1 %v2102_v10 }
  0x6a   :  { %949 = vmatmul.mubr.bf16.gmra.mrb[36].mxu0 %v2104_v11  ;;  %1077 = vmatmul.mubr.bf16.gmra.mrb[36].mxu1 %v2105_v12 }
  0x6b   :  { %956 = vmatprep.mubr.bf16.mxu0 %v2107_v13  ;;  %1084 = vmatprep.mubr.bf16.mxu1 %v2109_v14 }
  0x72   :  { %957 = vmatmul.mubr.bf16.gmra.mrb[40].mxu0 %v2111_v15  ;;  %1085 = vmatmul.mubr.bf16.gmra.mrb[40].mxu1 %v2112_v16 }
  0x73   :  { %964 = vmatprep.mubr.bf16.mxu0 %v2113_v17  ;;  %1092 = vmatprep.mubr.bf16.mxu1 %v2115_v18 }
  0x7a   :  { %965 = vmatmul.mubr.bf16.gmra.mrb[44].mxu0 %v2117_v19  ;;  %1093 = vmatmul.mubr.bf16.gmra.mrb[44].mxu1 %v2118_v20 }
  0x7b   :  { %1100 = vmatprep.mubr.bf16.mxu1 %v2119_v21  ;;  %1964 = vmatprep.mubr.msk.bf16.mxu0 %vm795_vm0, %v2121_v22 }
  0x82   :  { %1101 = vmatmul.mubr.bf16.gmra.mrb[48].mxu1 %v2122_v23  ;;  %1965 = vmatmul.mubr.msk.bf16.vlgmr.msra.gmra.mrb[48].mxu0 %vm795_vm0, %v2123_v24 }
  0x83   :  { %1108 = vmatprep.mubr.bf16.mxu1 %v2124_v25  ;;  %1968 = vmatprep.mubr.msk.bf16.mxu0 %vm795_vm0, %v2126_v26 }
  0x8a   :  { %1109 = vmatmul.mubr.bf16.gmra.mrb[52].mxu1 %v2127_v27  ;;  %1969 = vmatmul.mubr.msk.bf16.gmra.mrb[52].mxu0 %vm795_vm0, %v2128_v28 }
  0x8b   :  { %1116 = vmatprep.mubr.bf16.mxu1 %v2129_v29  ;;  %1972 = vmatprep.mubr.msk.bf16.mxu0 %vm795_vm0, %v2131_v30 }
  0x92   :  { %1117 = vmatmul.mubr.bf16.gmra.mrb[56].mxu1 %v2132_v31  ;;  %1973 = vmatmul.mubr.msk.bf16.gmra.mrb[56].mxu0 %vm795_vm0, %v2133_v32 }
  0x93   :  { %1124 = vmatprep.mubr.bf16.mxu1 %v2134_v33  ;;  %1976 = vmatprep.mubr.msk.bf16.mxu0 %vm795_vm0, %v2136_v34 }
  0x9a   :  { %1125 = vmatmul.mubr.bf16.gmra.mrb[60].mxu1 %v2137_v35  ;;  %1977 = vmatmul.mubr.msk.bf16.gmra.mrb[60].mxu0 %vm795_vm0, %v2138_v36 }
  0x9b   :  { %1132 = vmatprep.mubr.bf16.mxu1 %v2139_v37  ;;  %1980 = vmatprep.mubr.msk.bf16.mxu0 %vm795_vm0, %v2141_v38  ;;  %v2553_v37 = vld [vmem:[%s2829_s2] ss:$0 sm:$0xff] }
  0xa2   :  { %1133 = vmatmul.mubr.bf16.gmra.mrb[64].mxu1 %v2142_v39  ;;  %1981 = vmatmul.mubr.msk.bf16.gmra.mrb[64].mxu0 %vm795_vm0, %v2143_v40 }
  0xa3   :  { %1140 = vmatprep.mubr.bf16.mxu1 %v2144_v41  ;;  %1984 = vmatprep.mubr.msk.bf16.mxu0 %vm795_vm0, %v2146_v42 }
  0xaa   :  { %1141 = vmatmul.mubr.bf16.gmra.mrb[68].mxu1 %v2147_v43  ;;  %1985 = vmatmul.mubr.msk.bf16.gmra.mrb[68].mxu0 %vm795_vm0, %v2148_v44 }
  0xab   :  { %1148 = vmatprep.mubr.bf16.mxu1 %v2149_v45  ;;  %1988 = vmatprep.mubr.msk.bf16.mxu0 %vm795_vm0, %v2151_v46 }
  0xb2   :  { %1149 = vmatmul.mubr.bf16.gmra.mrb[72].mxu1 %v2152_v48  ;;  %1989 = vmatmul.mubr.msk.bf16.gmra.mrb[72].mxu0 %vm795_vm0, %v2153_v49 }
  0xb3   :  { %1156 = vmatprep.mubr.bf16.mxu1 %v1596_v50  ;;  %1992 = vmatprep.mubr.msk.bf16.mxu0 %vm795_vm0, %v2155_v51 }
  0xba   :  { %1157 = vmatmul.mubr.bf16.gmra.mrb[76].mxu1 %v1595_v52  ;;  %1993 = vmatmul.mubr.msk.bf16.gmra.mrb[76].mxu0 %vm795_vm0, %v2157_v53 }
  0xf5   :  { %v1728_v54 = vpop.f32.mrb[0].mxu0  ;;  %v1800_v55 = vpop.f32.mrb[0].mxu1 }
  0xf6   :  { %v1729_v56 = vpop.f32.mrb[1].mxu0  ;;  %v1801_v57 = vpop.f32.mrb[1].mxu1 }
  0xf7   :  { %v1730_v58 = vadd.f32 %v1729_v56, %v1728_v54  ;;  %v2536_v59 = vadd.f32 %v1801_v57, %v1800_v55  ;;  %v1731_v60 = vpop.f32.mrb[2].mxu0  ;;  %v1803_v61 = vpop.f32.mrb[2].mxu1 }
  0xf8   :  { %v1732_v62 = vpop.f32.mrb[3].mxu0  ;;  %v1804_v63 = vpop.f32.mrb[3].mxu1 }
  0xf9   :  { %v1733_v0 = vadd.f32 %v1732_v62, %v1731_v60  ;;  %v2538_v1 = vadd.f32 %v1804_v63, %v1803_v61  ;;  %v879_v42 = vadd.f32 %v1730_v58, %v2553_v37 }
  0xfb   :  { %v882_v49 = vadd.f32 %v1733_v0, %v2553_v37 }
  0xfd   :  { %v1734_v2 = vpop.f32.mrb[4].mxu0  ;;  %v1806_v3 = vpop.f32.mrb[4].mxu1 }
  0xfe   :  { %v1735_v4 = vpop.f32.mrb[5].mxu0  ;;  %v1807_v5 = vpop.f32.mrb[5].mxu1 }
  0xff   :  { %v1736_v6 = vadd.f32 %v1735_v4, %v1734_v2  ;;  %v2540_v7 = vadd.f32 %v1807_v5, %v1806_v3  ;;  %v1737_v8 = vpop.f32.mrb[6].mxu0  ;;  %v1809_v9 = vpop.f32.mrb[6].mxu1 }
 0x100   :  { %v1738_v10 = vpop.f32.mrb[7].mxu0  ;;  %v1810_v11 = vpop.f32.mrb[7].mxu1 }
 0x101   :  { %v1739_v12 = vadd.f32 %v1738_v10, %v1737_v8  ;;  %v2542_v13 = vadd.f32 %v1810_v11, %v1809_v9  ;;  %v887_v58 = vadd.f32 %v1736_v6, %v2553_v37 }
 0x103   :  { %v890_v3 = vadd.f32 %v1739_v12, %v2553_v37 }
 0x105   :  { %v1740_v14 = vpop.f32.mrb[8].mxu0  ;;  %v1812_v15 = vpop.f32.mrb[8].mxu1 }
 0x106   :  { %v1741_v16 = vpop.f32.mrb[9].mxu0  ;;  %v1813_v17 = vpop.f32.mrb[9].mxu1 }
 0x107   :  { %v1742_v18 = vadd.f32 %v1741_v16, %v1740_v14  ;;  %v2544_v19 = vadd.f32 %v1813_v17, %v1812_v15  ;;  %v1743_v20 = vpop.f32.mrb[10].mxu0  ;;  %v1815_v21 = vpop.f32.mrb[10].mxu1 }
 0x108   :  { %v1744_v22 = vpop.f32.mrb[11].mxu0  ;;  %v1816_v23 = vpop.f32.mrb[11].mxu1 }
 0x109   :  { %v1745_v24 = vadd.f32 %v1744_v22, %v1743_v20  ;;  %v2546_v25 = vadd.f32 %v1816_v23, %v1815_v21  ;;  %v895_v15 = vadd.f32 %v1742_v18, %v2553_v37 }
 0x10b   :  { %v898_v23 = vadd.f32 %v1745_v24, %v2553_v37 }
 0x10d   :  { %v1746_v26 = vpop.f32.mrb[12].mxu0  ;;  %v1818_v27 = vpop.f32.mrb[12].mxu1 }
 0x10e   :  { %v1747_v28 = vpop.f32.mrb[13].mxu0  ;;  %v1819_v29 = vpop.f32.mrb[13].mxu1 }
 0x10f   :  { %v1748_v30 = vadd.f32 %v1747_v28, %v1746_v26  ;;  %v2548_v31 = vadd.f32 %v1819_v29, %v1818_v27  ;;  %v1749_v32 = vpop.f32.mrb[14].mxu0  ;;  %v1821_v33 = vpop.f32.mrb[14].mxu1 }
 0x110   :  { %v1750_v34 = vpop.f32.mrb[15].mxu0  ;;  %v1822_v35 = vpop.f32.mrb[15].mxu1 }
 0x111   :  { %v1751_v36 = vadd.f32 %v1750_v34, %v1749_v32  ;;  %v903_v35 = vadd.f32 %v1748_v30, %v2553_v37 }
 0x115   :  { %v1752_v38 = vpop.f32.mrb[16].mxu0  ;;  %v1840_v39 = vpop.f32.mrb[16].mxu1 }
 0x116   :  { %v1753_v40 = vpop.f32.mrb[17].mxu0  ;;  %v1841_v41 = vpop.f32.mrb[17].mxu1 }
 0x117   :  { %v2556_v43 = vadd.f32 %v1753_v40, %v1752_v38  ;;  %v1842_v44 = vadd.f32 %v1841_v41, %v1840_v39  ;;  %v1755_v45 = vpop.f32.mrb[18].mxu0  ;;  %v1843_v46 = vpop.f32.mrb[18].mxu1 }
 0x118   :  { %v1756_v47 = vpop.f32.mrb[19].mxu0  ;;  %v1844_v48 = vpop.f32.mrb[19].mxu1 }
 0x119   :  { %v2559_v50 = vadd.f32 %v1756_v47, %v1755_v45  ;;  %v1845_v51 = vadd.f32 %v1844_v48, %v1843_v46  ;;  %v2561_v52 = vadd.f32 %v1842_v44, %v879_v42  ;;  %v906_v44 = vadd.f32 %v1751_v36, %v2553_v37 }
 0x11b   :  { %v2563_v53 = vadd.f32 %v1845_v51, %v882_v49 }
 0x11d   :  { %v1758_v54 = vpop.f32.mrb[20].mxu0  ;;  %v1846_v55 = vpop.f32.mrb[20].mxu1 }
 0x11e   :  { %v1759_v56 = vpop.f32.mrb[21].mxu0  ;;  %v1847_v57 = vpop.f32.mrb[21].mxu1 }
 0x11f   :  { %v2566_v60 = vadd.f32 %v1759_v56, %v1758_v54  ;;  %v1848_v61 = vadd.f32 %v1847_v57, %v1846_v55  ;;  %v1761_v62 = vpop.f32.mrb[22].mxu0  ;;  %v1849_v63 = vpop.f32.mrb[22].mxu1  ;;  %v911_v55 = vadd.f32 %v2556_v43, %v2553_v37 }
 0x120   :  { %v1762_v2 = vpop.f32.mrb[23].mxu0  ;;  %v1850_v0 = vpop.f32.mrb[23].mxu1 }
 0x121   :  { %v2569_v4 = vadd.f32 %v1762_v2, %v1761_v62  ;;  %v1851_v5 = vadd.f32 %v1850_v0, %v1849_v63  ;;  %v2571_v8 = vadd.f32 %v1848_v61, %v887_v58  ;;  %v914_v63 = vadd.f32 %v2559_v50, %v2553_v37 }
 0x123   :  { %v2573_v9 = vadd.f32 %v1851_v5, %v890_v3 }
 0x125   :  { %v1764_v10 = vpop.f32.mrb[24].mxu0  ;;  %v1852_v11 = vpop.f32.mrb[24].mxu1 }
 0x126   :  { %v1765_v14 = vpop.f32.mrb[25].mxu0  ;;  %v1853_v6 = vpop.f32.mrb[25].mxu1 }
 0x127   :  { %v2576_v16 = vadd.f32 %v1765_v14, %v1764_v10  ;;  %v1854_v17 = vadd.f32 %v1853_v6, %v1852_v11  ;;  %v1767_v20 = vpop.f32.mrb[26].mxu0  ;;  %v1855_v21 = vpop.f32.mrb[26].mxu1  ;;  %v919_v6 = vadd.f32 %v2566_v60, %v2553_v37 }
 0x128   :  { %v1768_v22 = vpop.f32.mrb[27].mxu0  ;;  %v1856_v12 = vpop.f32.mrb[27].mxu1 }
 0x129   :  { %v2579_v26 = vadd.f32 %v1768_v22, %v1767_v20  ;;  %v1857_v27 = vadd.f32 %v1856_v12, %v1855_v21  ;;  %v2581_v28 = vadd.f32 %v1854_v17, %v895_v15  ;;  %v922_v12 = vadd.f32 %v2569_v4, %v2553_v37 }
 0x12b   :  { %v2583_v29 = vadd.f32 %v1857_v27, %v898_v23 }
 0x12d   :  { %v1770_v32 = vpop.f32.mrb[28].mxu0  ;;  %v1858_v33 = vpop.f32.mrb[28].mxu1 }
 0x12e   :  { %v1771_v34 = vpop.f32.mrb[29].mxu0  ;;  %v1859_v18 = vpop.f32.mrb[29].mxu1 }
 0x12f   :  { %v2586_v38 = vadd.f32 %v1771_v34, %v1770_v32  ;;  %v1860_v39 = vadd.f32 %v1859_v18, %v1858_v33  ;;  %v1773_v40 = vpop.f32.mrb[30].mxu0  ;;  %v1861_v41 = vpop.f32.mrb[30].mxu1 }
 0x130   :  { %v1774_v42 = vpop.f32.mrb[31].mxu0  ;;  %v1862_v24 = vpop.f32.mrb[31].mxu1 }
 0x131   :  { %v2589_v45 = vadd.f32 %v1774_v42, %v1773_v40  ;;  %v1863_v46 = vadd.f32 %v1862_v24, %v1861_v41  ;;  %v2591_v47 = vadd.f32 %v1860_v39, %v903_v35  ;;  %v927_v39 = vadd.f32 %v2576_v16, %v2553_v37 }
 0x133   :  { %v2593_v48 = vadd.f32 %v1863_v46, %v906_v44  ;;  %v930_v46 = vadd.f32 %v2579_v26, %v2553_v37 }
 0x135   :  { %v1776_v49 = vpop.f32.mrb[32].mxu0  ;;  %v1864_v51 = vpop.f32.mrb[32].mxu1 }
 0x136   :  { %v1777_v54 = vpop.f32.mrb[33].mxu0  ;;  %v1865_v30 = vpop.f32.mrb[33].mxu1 }
 0x137   :  { %v2597_v56 = vadd.f32 %v1777_v54, %v1776_v49  ;;  %v1866_v57 = vadd.f32 %v1865_v30, %v1864_v51  ;;  %v1779_v58 = vpop.f32.mrb[34].mxu0  ;;  %v1867_v61 = vpop.f32.mrb[34].mxu1 }
 0x138   :  { %v1780_v36 = vpop.f32.mrb[35].mxu0  ;;  %v1868_v62 = vpop.f32.mrb[35].mxu1 }
 0x139   :  { %v1781_v2 = vadd.f32 %v1780_v36, %v1779_v58  ;;  %v1869_v0 = vadd.f32 %v1868_v62, %v1867_v61  ;;  %v2601_v3 = vadd.f32 %v1866_v57, %v911_v55  ;;  %v935_v61 = vadd.f32 %v2586_v38, %v2553_v37 }
 0x13b   :  { %v2603_v5 = vadd.f32 %v1869_v0, %v914_v63 }
 0x13d   :  { %v1782_v10 = vpop.f32.mrb[36].mxu0  ;;  %v1870_v11 = vpop.f32.mrb[36].mxu1 }
 0x13e   :  { %v1783_v14 = vpop.f32.mrb[37].mxu0  ;;  %v1871_v43 = vpop.f32.mrb[37].mxu1 }
 0x13f   :  { %v2607_v15 = vadd.f32 %v1783_v14, %v1782_v10  ;;  %v1872_v17 = vadd.f32 %v1871_v43, %v1870_v11  ;;  %v1785_v20 = vpop.f32.mrb[38].mxu0  ;;  %v1873_v21 = vpop.f32.mrb[38].mxu1  ;;  %v938_v11 = vadd.f32 %v2589_v45, %v2553_v37 }
 0x140   :  { %v1786_v22 = vpop.f32.mrb[39].mxu0  ;;  %v1874_v50 = vpop.f32.mrb[39].mxu1 }
 0x141   :  { %v2611_v23 = vadd.f32 %v1786_v22, %v1785_v20  ;;  %v1875_v27 = vadd.f32 %v1874_v50, %v1873_v21  ;;  %v2613_v32 = vadd.f32 %v1872_v17, %v919_v6 }
 0x143   :  { %v2615_v33 = vadd.f32 %v1875_v27, %v922_v12  ;;  %v943_v12 = vadd.f32 %v2597_v56, %v2553_v37 }
 0x145   :  { %v1788_v34 = vpop.f32.mrb[40].mxu0  ;;  %v1876_v18 = vpop.f32.mrb[40].mxu1 }
 0x146   :  { %v1789_v60 = vpop.f32.mrb[41].mxu0  ;;  %v1877_v35 = vpop.f32.mrb[41].mxu1 }
 0x147   :  { %v2619_v40 = vadd.f32 %v1789_v60, %v1788_v34  ;;  %v1878_v41 = vadd.f32 %v1877_v35, %v1876_v18  ;;  %v1791_v42 = vpop.f32.mrb[42].mxu0  ;;  %v1879_v24 = vpop.f32.mrb[42].mxu1  ;;  %v946_v60 = vadd.f32 %v1781_v2, %v2553_v37 }
 0x148   :  { %v1792_v4 = vpop.f32.mrb[43].mxu0  ;;  %v1880_v44 = vpop.f32.mrb[43].mxu1 }
 0x149   :  { %v2623_v49 = vadd.f32 %v1792_v4, %v1791_v42  ;;  %v1881_v51 = vadd.f32 %v1880_v44, %v1879_v24  ;;  %v2625_v54 = vadd.f32 %v1878_v41, %v927_v39 }
 0x14b   :  { %v2627_v30 = vadd.f32 %v1881_v51, %v930_v46 }
 0x14d   :  { %v1794_v55 = vpop.f32.mrb[44].mxu0  ;;  %v1882_v57 = vpop.f32.mrb[44].mxu1 }
 0x14e   :  { %v1795_v16 = vpop.f32.mrb[45].mxu0  ;;  %v1883_v58 = vpop.f32.mrb[45].mxu1 }
 0x14f   :  { %v2631_v36 = vadd.f32 %v1795_v16, %v1794_v55  ;;  %v1884_v62 = vadd.f32 %v1883_v58, %v1882_v57  ;;  %v1797_v63 = vpop.f32.mrb[46].mxu0  ;;  %v1885_v0 = vpop.f32.mrb[46].mxu1 }
 0x150   :  { %v1798_v26 = vpop.f32.mrb[47].mxu0  ;;  %v1886_v10 = vpop.f32.mrb[47].mxu1 }
 0x151   :  { %v2635_v14 = vadd.f32 %v1798_v26, %v1797_v63  ;;  %v1887_v43 = vadd.f32 %v1886_v10, %v1885_v0  ;;  %v2637_v6 = vadd.f32 %v1884_v62, %v935_v61  ;;  %v951_v62 = vadd.f32 %v2607_v15, %v2553_v37 }
 0x153   :  { %v2639_v17 = vadd.f32 %v1887_v43, %v938_v11  ;;  %v954_v11 = vadd.f32 %v2611_v23, %v2553_v37 }
 0x155   :  { %v1888_v20 = vpop.f32.mrb[48].mxu1  ;;  %v1966_v21 = vpop.f32.mrb[48].mxu0 }
 0x156   :  { %v1207_v38 = vadd.f32 %v1966_v21, %v2571_v8  ;;  %v1889_v22 = vpop.f32.mrb[49].mxu1  ;;  %v1198_v50 = vpop.f32.mrb[49].mxu0 }
 0x157   :  { %v1890_v27 = vadd.f32 %v1889_v22, %v1888_v20  ;;  %v1199_v34 = vadd.f32 %v1198_v50, %v2561_v52  ;;  %v1891_v45 = vpop.f32.mrb[50].mxu1  ;;  %v1967_v18 = vpop.f32.mrb[50].mxu0 }
 0x158   :  { %v1326_v35 = vmax.f32 %v1207_v38, 0.0  ;;  %v1210_v39 = vadd.f32 %v1967_v18, %v2573_v9  ;;  %v1892_v41 = vpop.f32.mrb[51].mxu1  ;;  %v1201_v42 = vpop.f32.mrb[51].mxu0 }
 0x159   :  { %v1324_v24 = vmax.f32 %v1199_v34, 0.0  ;;  %v1893_v8 = vadd.f32 %v1892_v41, %v1891_v45  ;;  %v1202_v4 = vadd.f32 %v1201_v42, %v2563_v53  ;;  %v2648_v44 = vadd.f32 %v1890_v27, %v943_v12 }
 0x15a   :  { %v1683_v56 = vpack.c.bf16 %v1326_v35, %v1326_v35  ;;  %v1327_v46 = vmax.f32 %v1210_v39, 0.0  ;;  %v959_v41 = vadd.f32 %v2619_v40, %v2553_v37 }
 0x15b   :  { %v1681_v51 = vpack.c.bf16 %v1324_v24, %v1324_v24  ;;  %v1325_v52 = vmax.f32 %v1202_v4, 0.0  ;;  %v2650_v55 = vadd.f32 %v1893_v8, %v946_v60 }
 0x15c   :  { %1483 = vst.msk [vmem:[%s2830_s3 + $0x8] sm:$0xf] %vm1480_vm1, %v1683_v56  ;;  %v1684_v9 = vpack.c.bf16 %v1327_v46, %v1327_v46  ;;  %v962_v56 = vadd.f32 %v2623_v49, %v2553_v37 }
 0x15d   :  { %1481 = vst.msk [vmem:[%s2830_s3] sm:$0xf] %vm1480_vm1, %v1681_v51  ;;  %v1682_v53 = vpack.c.bf16 %v1325_v52, %v1325_v52  ;;  %v1894_v2 = vpop.f32.mrb[52].mxu1  ;;  %v1970_v57 = vpop.f32.mrb[52].mxu0 }
 0x15e   :  { %1484 = vst.msk [vmem:[%s2830_s3 + $0xc] sm:$0xf] %vm1480_vm1, %v1684_v9  ;;  %v1223_v16 = vadd.f32 %v1970_v57, %v2591_v47  ;;  %v1895_v58 = vpop.f32.mrb[53].mxu1  ;;  %v1214_v61 = vpop.f32.mrb[53].mxu0 }
 0x15f   :  { %1482 = vst.msk [vmem:[%s2830_s3 + $0x4] sm:$0xf] %vm1480_vm1, %v1682_v53  ;;  %v1896_v63 = vadd.f32 %v1895_v58, %v1894_v2  ;;  %v1215_v0 = vadd.f32 %v1214_v61, %v2581_v28  ;;  %v1897_v26 = vpop.f32.mrb[54].mxu1  ;;  %v1971_v10 = vpop.f32.mrb[54].mxu0 }
 0x160   :  { %v1330_v43 = vmax.f32 %v1223_v16, 0.0  ;;  %v1226_v47 = vadd.f32 %v1971_v10, %v2593_v48  ;;  %v1898_v20 = vpop.f32.mrb[55].mxu1  ;;  %v1217_v21 = vpop.f32.mrb[55].mxu0  ;;  %v967_v10 = vadd.f32 %v2631_v36, %v2553_v37 }
 0x161   :  { %v1328_v38 = vmax.f32 %v1215_v0, 0.0  ;;  %v1899_v15 = vadd.f32 %v1898_v20, %v1897_v26  ;;  %v1218_v22 = vadd.f32 %v1217_v21, %v2583_v29  ;;  %v2676_v50 = vadd.f32 %v1896_v63, %v951_v62 }
 0x162   :  { %v1687_v12 = vpack.c.bf16 %v1330_v43, %v1330_v43  ;;  %v1331_v27 = vmax.f32 %v1226_v47, 0.0  ;;  %v970_v21 = vadd.f32 %v2635_v14, %v2553_v37 }
 0x163   :  { %v1685_v34 = vpack.c.bf16 %v1328_v38, %v1328_v38  ;;  %v1329_v28 = vmax.f32 %v1218_v22, 0.0  ;;  %v2678_v45 = vadd.f32 %v1899_v15, %v954_v11 }
 0x164   :  { %1487 = vst.msk [vmem:[%s2830_s3 + $0x18] sm:$0xf] %vm1480_vm1, %v1687_v12  ;;  %v1688_v48 = vpack.c.bf16 %v1331_v27, %v1331_v27 }
 0x165   :  { %1485 = vst.msk [vmem:[%s2830_s3 + $0x10] sm:$0xf] %vm1480_vm1, %v1685_v34  ;;  %v1686_v29 = vpack.c.bf16 %v1329_v28, %v1329_v28  ;;  %v1900_v23 = vpop.f32.mrb[56].mxu1  ;;  %v1974_v18 = vpop.f32.mrb[56].mxu0 }
 0x166   :  { %1488 = vst.msk [vmem:[%s2830_s3 + $0x1c] sm:$0xf] %vm1480_vm1, %v1688_v48  ;;  %v1239_v60 = vadd.f32 %v1974_v18, %v2613_v32  ;;  %v1901_v35 = vpop.f32.mrb[57].mxu1  ;;  %v1230_v39 = vpop.f32.mrb[57].mxu0 }
 0x167   :  { %1486 = vst.msk [vmem:[%s2830_s3 + $0x14] sm:$0xf] %vm1480_vm1, %v1686_v29  ;;  %v1902_v42 = vadd.f32 %v1901_v35, %v1900_v23  ;;  %v1231_v24 = vadd.f32 %v1230_v39, %v2601_v3  ;;  %v1903_v8 = vpop.f32.mrb[58].mxu1  ;;  %v1975_v4 = vpop.f32.mrb[58].mxu0 }
 0x168   :  { %v1334_v46 = vmax.f32 %v1239_v60, 0.0  ;;  %v1242_v32 = vadd.f32 %v1975_v4, %v2615_v33  ;;  %v1904_v51 = vpop.f32.mrb[59].mxu1  ;;  %v1233_v52 = vpop.f32.mrb[59].mxu0 }
 0x169   :  { %v1332_v9 = vmax.f32 %v1231_v24, 0.0  ;;  %v1905_v40 = vadd.f32 %v1904_v51, %v1903_v8  ;;  %v1234_v53 = vadd.f32 %v1233_v52, %v2603_v5  ;;  %v2704_v2 = vadd.f32 %v1902_v42, %v959_v41 }
 0x16a   :  { %v1691_v57 = vpack.c.bf16 %v1334_v46, %v1334_v46  ;;  %v1335_v16 = vmax.f32 %v1242_v32, 0.0  ;;  %v975_v41 = vadd.f32 %v2536_v59, %v2553_v37 }
 0x16b   :  { %v1689_v58 = vpack.c.bf16 %v1332_v9, %v1332_v9  ;;  %v1333_v3 = vmax.f32 %v1234_v53, 0.0  ;;  %v2706_v61 = vadd.f32 %v1905_v40, %v962_v56  ;;  %v978_v56 = vadd.f32 %v2538_v1, %v2553_v37 }
 0x16c   :  { %1491 = vst.msk [vmem:[%s2830_s3 + $0x28] sm:$0xf] %vm1480_vm1, %v1691_v57  ;;  %v1692_v33 = vpack.c.bf16 %v1335_v16, %v1335_v16 }
 0x16d   :  { %1489 = vst.msk [vmem:[%s2830_s3 + $0x20] sm:$0xf] %vm1480_vm1, %v1689_v58  ;;  %v1690_v5 = vpack.c.bf16 %v1333_v3, %v1333_v3  ;;  %v1906_v49 = vpop.f32.mrb[60].mxu1  ;;  %v1978_v62 = vpop.f32.mrb[60].mxu0 }
 0x16e   :  { %1492 = vst.msk [vmem:[%s2830_s3 + $0x2c] sm:$0xf] %vm1480_vm1, %v1692_v33  ;;  %v1255_v63 = vadd.f32 %v1978_v62, %v2637_v6  ;;  %v1907_v0 = vpop.f32.mrb[61].mxu1  ;;  %v1246_v26 = vpop.f32.mrb[61].mxu0  ;;  %v983_v62 = vadd.f32 %v2540_v7, %v2553_v37 }
 0x16f   :  { %1490 = vst.msk [vmem:[%s2830_s3 + $0x24] sm:$0xf] %vm1480_vm1, %v1690_v5  ;;  %v1908_v11 = vadd.f32 %v1907_v0, %v1906_v49  ;;  %v1247_v43 = vadd.f32 %v1246_v26, %v2625_v54  ;;  %v1909_v47 = vpop.f32.mrb[62].mxu1  ;;  %v1979_v20 = vpop.f32.mrb[62].mxu0 }
 0x170   :  { %v1338_v38 = vmax.f32 %v1255_v63, 0.0  ;;  %v1258_v6 = vadd.f32 %v1979_v20, %v2639_v17  ;;  %v1910_v15 = vpop.f32.mrb[63].mxu1  ;;  %v1249_v22 = vpop.f32.mrb[63].mxu0 }
 0x171   :  { %v1336_v12 = vmax.f32 %v1247_v43, 0.0  ;;  %v1911_v36 = vadd.f32 %v1910_v15, %v1909_v47  ;;  %v1250_v27 = vadd.f32 %v1249_v22, %v2627_v30  ;;  %v1127_v34 = vadd.f32 %v1908_v11, %v967_v10 }
 0x172   :  { %v1695_v28 = vpack.c.bf16 %v1338_v38, %v1338_v38  ;;  %v1339_v48 = vmax.f32 %v1258_v6, 0.0  ;;  %v986_v11 = vadd.f32 %v2542_v13, %v2553_v37 }
 0x173   :  { %v1693_v29 = vpack.c.bf16 %v1336_v12, %v1336_v12  ;;  %v1337_v23 = vmax.f32 %v1250_v27, 0.0  ;;  %v1130_v54 = vadd.f32 %v1911_v36, %v970_v21 }
 0x174   :  { %1495 = vst.msk [vmem:[%s2830_s3 + $0x38] sm:$0xf] %vm1480_vm1, %v1695_v28  ;;  %v1696_v14 = vpack.c.bf16 %v1339_v48, %v1339_v48 }
 0x175   :  { %1493 = vst.msk [vmem:[%s2830_s3 + $0x30] sm:$0xf] %vm1480_vm1, %v1693_v29  ;;  %v1694_v17 = vpack.c.bf16 %v1337_v23, %v1337_v23  ;;  %v1912_v18 = vpop.f32.mrb[64].mxu1  ;;  %v1982_v30 = vpop.f32.mrb[64].mxu0 }
 0x176   :  { %1496 = vst.msk [vmem:[%s2830_s3 + $0x3c] sm:$0xf] %vm1480_vm1, %v1696_v14  ;;  %v1271_v60 = vadd.f32 %v1982_v30, %v2676_v50  ;;  %v1913_v35 = vpop.f32.mrb[65].mxu1  ;;  %v1262_v39 = vpop.f32.mrb[65].mxu0 }
 0x177   :  { %1494 = vst.msk [vmem:[%s2830_s3 + $0x34] sm:$0xf] %vm1480_vm1, %v1694_v17  ;;  %v1914_v42 = vadd.f32 %v1913_v35, %v1912_v18  ;;  %v1263_v24 = vadd.f32 %v1262_v39, %v2648_v44  ;;  %v1915_v8 = vpop.f32.mrb[66].mxu1  ;;  %v1983_v4 = vpop.f32.mrb[66].mxu0 }
 0x178   :  { %v1342_v46 = vmax.f32 %v1271_v60, 0.0  ;;  %v1274_v50 = vadd.f32 %v1983_v4, %v2678_v45  ;;  %v1916_v32 = vpop.f32.mrb[67].mxu1  ;;  %v1265_v51 = vpop.f32.mrb[67].mxu0  ;;  %v994_v60 = vadd.f32 %v2546_v25, %v2553_v37 }
 0x179   :  { %v1340_v52 = vmax.f32 %v1263_v24, 0.0  ;;  %v1917_v59 = vadd.f32 %v1916_v32, %v1915_v8  ;;  %v1266_v9 = vadd.f32 %v1265_v51, %v2650_v55  ;;  %v1135_v40 = vadd.f32 %v1914_v42, %v975_v41 }
 0x17a   :  { %v1699_v53 = vpack.c.bf16 %v1342_v46, %v1342_v46  ;;  %v1343_v57 = vmax.f32 %v1274_v50, 0.0 }
 0x17b   :  { %v1697_v16 = vpack.c.bf16 %v1340_v52, %v1340_v52  ;;  %v1341_v58 = vmax.f32 %v1266_v9, 0.0  ;;  %v1138_v44 = vadd.f32 %v1917_v59, %v978_v56 }
 0x17c   :  { %1499 = vst.msk [vmem:[%s2830_s3 + $0x48] sm:$0xf] %vm1480_vm1, %v1699_v53  ;;  %v1700_v1 = vpack.c.bf16 %v1343_v57, %v1343_v57  ;;  %v999_v57 = vadd.f32 %v2548_v31, %v2553_v37 }
 0x17d   :  { %1497 = vst.msk [vmem:[%s2830_s3 + $0x40] sm:$0xf] %vm1480_vm1, %v1697_v16  ;;  %v1698_v45 = vpack.c.bf16 %v1341_v58, %v1341_v58  ;;  %v1918_v3 = vpop.f32.mrb[68].mxu1  ;;  %v1986_v55 = vpop.f32.mrb[68].mxu0 }
 0x17e   :  { %1500 = vst.msk [vmem:[%s2830_s3 + $0x4c] sm:$0xf] %vm1480_vm1, %v1700_v1  ;;  %v1287_v33 = vadd.f32 %v1986_v55, %v1127_v34  ;;  %v1919_v5 = vpop.f32.mrb[69].mxu1  ;;  %v1278_v49 = vpop.f32.mrb[69].mxu0 }
 0x17f   :  { %1498 = vst.msk [vmem:[%s2830_s3 + $0x44] sm:$0xf] %vm1480_vm1, %v1698_v45  ;;  %v1920_v63 = vadd.f32 %v1919_v5, %v1918_v3  ;;  %v1279_v0 = vadd.f32 %v1278_v49, %v2704_v2  ;;  %v1921_v26 = vpop.f32.mrb[70].mxu1  ;;  %v1987_v10 = vpop.f32.mrb[70].mxu0 }
 0x180   :  { %v1346_v43 = vmax.f32 %v1287_v33, 0.0  ;;  %v1290_v47 = vadd.f32 %v1987_v10, %v1130_v54  ;;  %v1922_v20 = vpop.f32.mrb[71].mxu1  ;;  %v1281_v21 = vpop.f32.mrb[71].mxu0  ;;  %v991_v54 = vadd.f32 %v2544_v19, %v2553_v37 }
 0x181   :  { %v1344_v38 = vmax.f32 %v1279_v0, 0.0  ;;  %v1923_v6 = vadd.f32 %v1922_v20, %v1921_v26  ;;  %v1282_v7 = vadd.f32 %v1281_v21, %v2706_v61  ;;  %v1143_v15 = vadd.f32 %v1920_v63, %v983_v62 }
 0x182   :  { %v1703_v22 = vpack.c.bf16 %v1346_v43, %v1346_v43  ;;  %v1347_v12 = vmax.f32 %v1290_v47, 0.0 }
 0x183   :  { %v1701_v36 = vpack.c.bf16 %v1344_v38, %v1344_v38  ;;  %v1345_v27 = vmax.f32 %v1282_v7, 0.0  ;;  %v1146_v34 = vadd.f32 %v1923_v6, %v986_v11 }
 0x184   :  { %1503 = vst.msk [vmem:[%s2830_s3 + $0x58] sm:$0xf] %vm1480_vm1, %v1703_v22  ;;  %v1704_v13 = vpack.c.bf16 %v1347_v12, %v1347_v12 }
 0x185   :  { %1501 = vst.msk [vmem:[%s2830_s3 + $0x50] sm:$0xf] %vm1480_vm1, %v1701_v36  ;;  %v1702_v2 = vpack.c.bf16 %v1345_v27, %v1345_v27  ;;  %v1924_v28 = vpop.f32.mrb[72].mxu1  ;;  %v1990_v61 = vpop.f32.mrb[72].mxu0 }
 0x186   :  { %1504 = vst.msk [vmem:[%s2830_s3 + $0x5c] sm:$0xf] %vm1480_vm1, %v1704_v13  ;;  %v1303_v48 = vadd.f32 %v1990_v61, %v1143_v15  ;;  %v1925_v29 = vpop.f32.mrb[73].mxu1  ;;  %v1294_v23 = vpop.f32.mrb[73].mxu0 }
 0x187   :  { %1502 = vst.msk [vmem:[%s2830_s3 + $0x54] sm:$0xf] %vm1480_vm1, %v1702_v2  ;;  %v1926_v14 = vadd.f32 %v1925_v29, %v1924_v28  ;;  %v1295_v17 = vadd.f32 %v1294_v23, %v1135_v40  ;;  %v1927_v18 = vpop.f32.mrb[74].mxu1  ;;  %v1991_v30 = vpop.f32.mrb[74].mxu0 }
 0x188   :  { %v1350_v35 = vmax.f32 %v1303_v48, 0.0  ;;  %v1306_v39 = vadd.f32 %v1991_v30, %v1146_v34  ;;  %v1928_v41 = vpop.f32.mrb[75].mxu1  ;;  %v1297_v42 = vpop.f32.mrb[75].mxu0 }
 0x189   :  { %v1348_v24 = vmax.f32 %v1295_v17, 0.0  ;;  %v1929_v8 = vadd.f32 %v1928_v41, %v1927_v18  ;;  %v1298_v4 = vadd.f32 %v1297_v42, %v1138_v44  ;;  %v1151_v19 = vadd.f32 %v1926_v14, %v991_v54 }
 0x18a   :  { %v1707_v56 = vpack.c.bf16 %v1350_v35, %v1350_v35  ;;  %v1351_v46 = vmax.f32 %v1306_v39, 0.0 }
 0x18b   :  { %v1705_v50 = vpack.c.bf16 %v1348_v24, %v1348_v24  ;;  %v1349_v32 = vmax.f32 %v1298_v4, 0.0  ;;  %v1154_v51 = vadd.f32 %v1929_v8, %v994_v60 }
 0x18c   :  { %1507 = vst.msk [vmem:[%s2830_s3 + $0x68] sm:$0xf] %vm1480_vm1, %v1707_v56  ;;  %v1708_v52 = vpack.c.bf16 %v1351_v46, %v1351_v46 }
 0x18d   :  { %1505 = vst.msk [vmem:[%s2830_s3 + $0x60] sm:$0xf] %vm1480_vm1, %v1705_v50  ;;  %v1706_v25 = vpack.c.bf16 %v1349_v32, %v1349_v32  ;;  %v1930_v59 = vpop.f32.mrb[76].mxu1  ;;  %v1994_v9 = vpop.f32.mrb[76].mxu0 }
 0x18e   :  { %1508 = vst.msk [vmem:[%s2830_s3 + $0x6c] sm:$0xf] %vm1480_vm1, %v1708_v52  ;;  %v1931_v40 = vpop.f32.mrb[77].mxu1  ;;  %v1310_v53 = vpop.f32.mrb[77].mxu0 }
 0x18f   :  { %1506 = vst.msk [vmem:[%s2830_s3 + $0x64] sm:$0xf] %vm1480_vm1, %v1706_v25  ;;  %v1932_v16 = vadd.f32 %v1931_v40, %v1930_v59  ;;  %v1311_v58 = vadd.f32 %v1310_v53, %v1151_v19  ;;  %v1933_v44 = vpop.f32.mrb[78].mxu1  ;;  %v1995_v1 = vpop.f32.mrb[78].mxu0 }
 0x190   :  { %v1934_v45 = vpop.f32.mrb[79].mxu1  ;;  %v1313_v3 = vpop.f32.mrb[79].mxu0 }
 0x191   :  { %v1159_v55 = vadd.f32 %v1932_v16, %v999_v57  ;;  %v1352_v33 = vmax.f32 %v1311_v58, 0.0  ;;  %v1314_v5 = vadd.f32 %v1313_v3, %v1154_v51 }
 0x193   :  { %v1319_v49 = vadd.f32 %v1994_v9, %v1159_v55  ;;  %v1709_v62 = vpack.c.bf16 %v1352_v33, %v1352_v33  ;;  %v1353_v63 = vmax.f32 %v1314_v5, 0.0 }
 0x195   :  { %v1354_v0 = vmax.f32 %v1319_v49, 0.0  ;;  %1509 = vst.msk [vmem:[%s2830_s3 + $0x70] sm:$0xf] %vm1480_vm1, %v1709_v62  ;;  %v1710_v31 = vpack.c.bf16 %v1353_v63, %v1353_v63 }
 0x197   :  { %v1711_v37 = vpack.c.bf16 %v1354_v0, %v1354_v0  ;;  %1510 = vst.msk [vmem:[%s2830_s3 + $0x74] sm:$0xf] %vm1480_vm1, %v1710_v31 }
 0x199   :  { %1512 = vst.msk [vmem:[%s2830_s3 + $0x78] sm:$0x1] %vm1511_vm2, %v1711_v37 }

// kernel: mario_forward.8
= control target key start
LH: loop header
LB: loop body
LE: loop exit
PB: predicated region body
PF: predicated region fallthrough
CT: control target
= control target key end

     0   :  { %v1039_v34 = vmov 0.0   ;;  %vm1040_vm0 = vmmov 0   ;;  %vm454_vm1 = vcmask 523264   ;;  %vm732_vm2 = vcmask 257024   ;;  %s1319_s1 = inlined_call_operand.vmem [shape: bf16[576,32], index: 1, kind: input, shape index: {}]   ;;  %s1320_s0 = inlined_call_operand.vmem [shape: bf16[72,576], index: 0, kind: input, shape index: {}]   ;;  %s1321_s2 = inlined_call_operand.vmem [shape: f32[1,32], index: 2, kind: input, shape index: {}]   ;;  %s1322_s3 = inlined_call_operand.vmem [shape: bf16[72,32], index: 3, kind: output, shape index: {}]  }
   0x1   :  { %v970_v0 = vld [vmem:[%s1319_s1 + $0x40] sm:$0xff]   ;;  %v974_v4 = vld [vmem:[%s1319_s1 + $0x48] sm:$0xff]   ;;  %v978_v8 = vld [vmem:[%s1319_s1 + $0x50] sm:$0xff]  }
   0x2   :  { %v971_v1 = vld [vmem:[%s1319_s1 + $0xc0] sm:$0xff]   ;;  %831 = vmatprep.subr.bf16.mxu0 %v970_v0  ;;  %v975_v5 = vld [vmem:[%s1319_s1 + $0xc8] sm:$0xff]   ;;  %v979_v9 = vld [vmem:[%s1319_s1 + $0xd0] sm:$0xff]  }
   0x3   :  { %v972_v2 = vld [vmem:[%s1319_s1] sm:$0xff]   ;;  %877 = vmatprep.subr.bf16.mxu1 %v971_v1  ;;  %v976_v6 = vld [vmem:[%s1319_s1 + $0x8] sm:$0xff]   ;;  %v980_v10 = vld [vmem:[%s1319_s1 + $0x10] sm:$0xff]  }
   0x4   :  { %v973_v3 = vld [vmem:[%s1319_s1 + $0x80] sm:$0xff]   ;;  %832 = vmatpush3.bf16.msra.mxu0 %v972_v2  ;;  %v977_v7 = vld [vmem:[%s1319_s1 + $0x88] sm:$0xff]   ;;  %v981_v11 = vld [vmem:[%s1319_s1 + $0x90] sm:$0xff]  }
   0x5   :  { %878 = vmatpush3.bf16.msra.mxu1 %v973_v3  ;;  %833 = vmatprep.subr.bf16.mxu0 %v974_v4  ;;  %v982_v12 = vld [vmem:[%s1319_s1 + $0x58] sm:$0xff]   ;;  %v986_v16 = vld [vmem:[%s1319_s1 + $0x60] sm:$0xff]   ;;  %v990_v20 = vld [vmem:[%s1319_s1 + $0x68] sm:$0xff]  }
   0x6   :  { %879 = vmatprep.subr.bf16.mxu1 %v975_v5  ;;  %v983_v13 = vld [vmem:[%s1319_s1 + $0xd8] sm:$0xff]   ;;  %v987_v17 = vld [vmem:[%s1319_s1 + $0xe0] sm:$0xff]   ;;  %v991_v21 = vld [vmem:[%s1319_s1 + $0xe8] sm:$0xff]  }
   0x7   :  { %v984_v14 = vld [vmem:[%s1319_s1 + $0x18] sm:$0xff]   ;;  %v988_v18 = vld [vmem:[%s1319_s1 + $0x20] sm:$0xff]   ;;  %v992_v22 = vld [vmem:[%s1319_s1 + $0x28] sm:$0xff]  }
   0x8   :  { %834 = vmatpush3.bf16.msra.mxu0 %v976_v6  ;;  %v985_v15 = vld [vmem:[%s1319_s1 + $0x98] sm:$0xff]   ;;  %v989_v19 = vld [vmem:[%s1319_s1 + $0xa0] sm:$0xff]   ;;  %v993_v23 = vld [vmem:[%s1319_s1 + $0xa8] sm:$0xff]  }
   0x9   :  { %880 = vmatpush3.bf16.msra.mxu1 %v977_v7  ;;  %835 = vmatprep.subr.bf16.mxu0 %v978_v8  ;;  %v994_v24 = vld [vmem:[%s1319_s1 + $0x70] sm:$0xff]   ;;  %v998_v28 = vld [vmem:[%s1319_s1 + $0x78] sm:$0xff]   ;;  %v1007_v36 = vld [vmem:[%s1320_s0 + $0xc] ss:$20 sps:$4 sm:$0xff]  }
   0xa   :  { %881 = vmatprep.subr.bf16.mxu1 %v979_v9  ;;  %v995_v25 = vld [vmem:[%s1319_s1 + $0xf0] sm:$0xff]   ;;  %v999_v29 = vld [vmem:[%s1319_s1 + $0xf8] sm:$0xff]   ;;  %v1008_v37 = vld [vmem:[%s1319_s1 + $0x100] sm:$0xff]   ;;  %574 = vmatprep.mubr.bf16.mxu1 %v1007_v36 }
   0xb   :  { %v996_v26 = vld [vmem:[%s1319_s1 + $0x30] sm:$0xff]   ;;  %v1000_v30 = vld [vmem:[%s1319_s1 + $0x38] sm:$0xff]   ;;  %v1009_v38 = vld [vmem:[%s1320_s0 + $0x2c] ss:$20 sps:$4 sm:$0xff]  }
   0xc   :  { %836 = vmatpush3.bf16.msra.mxu0 %v980_v10  ;;  %v997_v27 = vld [vmem:[%s1319_s1 + $0xb0] sm:$0xff]   ;;  %v1001_v31 = vld [vmem:[%s1319_s1 + $0xb8] sm:$0xff]   ;;  %v1015_v40 = vld [vmem:[%s1319_s1 + $0x108] sm:$0xff]  }
   0xd   :  { %882 = vmatpush3.bf16.msra.mxu1 %v981_v11  ;;  %837 = vmatprep.subr.bf16.mxu0 %v982_v12  ;;  %v1002_v32 = vld [vmem:[%s1320_s0] ss:$20 sps:$4 sm:$0xff]   ;;  %v1004_v33 = vld [vmem:[%s1320_s0 + $0x4] ss:$20 sps:$4 sm:$0xff]   ;;  %v1005_v35 = vld [vmem:[%s1320_s0 + $0x8] ss:$20 sps:$4 sm:$0xff]  }
   0xe   :  { %883 = vmatprep.subr.bf16.mxu1 %v983_v13  ;;  %502 = vmatprep.mubr.bf16.mxu0 %v1004_v33  ;;  %v1011_v39 = vld [vmem:[%s1320_s0 + $0x34] ss:$20 sps:$4 sm:$0xff]   ;;  %v1014_v42 = vld [vmem:[%s1320_s0 + $0x30] ss:$20 sps:$4 sm:$0xff]   ;;  %v1031_v47 = vld [vmem:[%s1319_s1 + $0x118] sm:$0xff]  }
   0xf   :  { %v1013_v41 = vld [vmem:[%s1320_s0 + $0x28] ss:$20 sps:$4 sm:$0xff]   ;;  %v1022_v45 = vld [vmem:[%s1319_s1 + $0x110] sm:$0xff]   ;;  %v1021_v48 = vld [vmem:[%s1320_s0 + $0x58] ss:$20 sps:$4 sm:$0xff]  }
  0x10   :  { %838 = vmatpush3.bf16.msra.mxu0 %v984_v14  ;;  %v1016_v43 = vld [vmem:[%s1320_s0 + $0x54] ss:$20 sps:$4 sm:$0xff]   ;;  %v1018_v44 = vld [vmem:[%s1320_s0 + $0x5c] ss:$20 sps:$4 sm:$0xff]   ;;  %v1025_v50 = vld [vmem:[%s1320_s0 + $0x84] ss:$20 sps:$4 sm:$0xff]  }
  0x11   :  { %884 = vmatpush3.bf16.msra.mxu1 %v985_v15  ;;  %839 = vmatprep.subr.bf16.mxu0 %v986_v16  ;;  %v1020_v46 = vld [vmem:[%s1320_s0 + $0x50] ss:$20 sps:$4 sm:$0xff]   ;;  %v40_v52 = vld [vmem:[%s1320_s0 + $0xa8] sm:$0xff]  ;;  %v1028_v54 = vld [vmem:[%s1320_s0 + $0x80] ss:$20 sps:$4 sm:$0xff]  }
  0x12   :  { %885 = vmatprep.subr.bf16.mxu1 %v987_v17  ;;  %v1023_v49 = vld [vmem:[%s1320_s0 + $0x7c] ss:$20 sps:$4 sm:$0xff]   ;;  %v39_v51 = vld [vmem:[%s1320_s0 + $0xa0] sm:$0xff]  ;;  %v1027_v53 = vld [vmem:[%s1320_s0 + $0x78] ss:$20 sps:$4 sm:$0xff]   ;;  %v770_v56 = vcombine.high %v40_v52, %v40_v52  ;;  %v769_v58 = vcombine.low %v40_v52, %v40_v52 }
  0x13   :  { %v768_v55 = vcombine.high %v39_v51, %v39_v51  ;;  %v767_v57 = vcombine.low %v39_v51, %v39_v51  ;;  %v1034_v59 = vld [vmem:[%s1320_s0 + $0x10] ss:$20 sps:$4 sm:$0xff]   ;;  %v1035_v60 = vld [vmem:[%s1320_s0 + $0x88] ss:$20 sps:$4 sm:$0xff]   ;;  %v1036_v61 = vld [vmem:[%s1320_s0 + $0x38] ss:$20 sps:$4 sm:$0xff]  }
  0x14   :  { %840 = vmatpush3.bf16.msra.mxu0 %v988_v18  ;;  %v1037_v62 = vld [vmem:[%s1320_s0 + $0xb0] ss:$0 sps:$4 sm:$0xff]   ;;  %v1038_v63 = vld [vmem:[%s1320_s0 + $0x60] ss:$20 sps:$4 sm:$0xff]  }
  0x15   :  { %886 = vmatpush3.bf16.msra.mxu1 %v989_v19  ;;  %841 = vmatprep.subr.bf16.mxu0 %v990_v20  ;;  %v1254_v1 = vld [vmem:[%s1321_s2] ss:$0 sm:$0xff] }
  0x16   :  { %887 = vmatprep.subr.bf16.mxu1 %v991_v21 }
  0x18   :  { %842 = vmatpush3.bf16.msra.mxu0 %v992_v22 }
  0x19   :  { %888 = vmatpush3.bf16.msra.mxu1 %v993_v23  ;;  %843 = vmatprep.subr.bf16.mxu0 %v994_v24 }
  0x1a   :  { %889 = vmatprep.subr.bf16.mxu1 %v995_v25 }
  0x1c   :  { %844 = vmatpush3.bf16.msra.mxu0 %v996_v26 }
  0x1d   :  { %890 = vmatpush3.bf16.msra.mxu1 %v997_v27  ;;  %845 = vmatprep.subr.bf16.mxu0 %v998_v28 }
  0x1e   :  { %891 = vmatprep.subr.bf16.mxu1 %v999_v29 }
  0x20   :  { %846 = vmatpush3.bf16.msra.mxu0 %v1000_v30 }
  0x21   :  { %892 = vmatpush3.bf16.msra.mxu1 %v1001_v31  ;;  %932 = vmatprep.subr.bf16.mxu0 %v1039_v34 }
  0x22   :  { %960 = vmatprep.subr.bf16.mxu1 %v1039_v34 }
  0x23   :  { %503 = vmatmul.mubr.bf16.vlgmr.msra.gmra.mrb[0].mxu0 %v1002_v32 }
  0x24   :  { %575 = vmatmul.mubr.bf16.vlgmr.msra.gmra.mrb[0].mxu1 %v1005_v35  ;;  %933 = vmatpush3.bf16.msra.mxu0 %v1008_v37 }
  0x25   :  { %510 = vmatprep.mubr.bf16.mxu0 %v1009_v38  ;;  %934 = vmatprep.subr.bf16.mxu0 %v1039_v34 }
  0x26   :  { %582 = vmatprep.mubr.bf16.mxu1 %v1011_v39  ;;  %964 = vmatpush3.bf16.msra.mxu1 %v1008_v37 }
  0x27   :  { %961 = vmatprep.subr.bf16.mxu1 %v1039_v34 }
  0x28   :  { %935 = vmatpush3.bf16.msra.mxu0 %v1015_v40 }
  0x29   :  { %936 = vmatprep.subr.bf16.mxu0 %v1039_v34 }
  0x2a   :  { %965 = vmatpush3.bf16.msra.mxu1 %v1015_v40 }
  0x2b   :  { %511 = vmatmul.mubr.bf16.gmra.mrb[4].mxu0 %v1013_v41  ;;  %962 = vmatprep.subr.bf16.mxu1 %v1039_v34 }
  0x2c   :  { %583 = vmatmul.mubr.bf16.gmra.mrb[4].mxu1 %v1014_v42  ;;  %518 = vmatprep.mubr.bf16.mxu0 %v1016_v43 }
  0x2d   :  { %590 = vmatprep.mubr.bf16.mxu1 %v1018_v44  ;;  %937 = vmatpush3.bf16.msra.mxu0 %v1022_v45 }
  0x2e   :  { %938 = vmatprep.subr.bf16.mxu0 %v1039_v34  ;;  %966 = vmatpush3.bf16.msra.mxu1 %v1022_v45 }
  0x2f   :  { %963 = vmatprep.subr.bf16.mxu1 %v1039_v34 }
  0x31   :  { %939 = vmatpush3.bf16.msra.mxu0 %v1031_v47 }
  0x32   :  { %967 = vmatpush3.bf16.msra.mxu1 %v1031_v47 }
  0x33   :  { %519 = vmatmul.mubr.bf16.gmra.mrb[8].mxu0 %v1020_v46 }
  0x34   :  { %591 = vmatmul.mubr.bf16.gmra.mrb[8].mxu1 %v1021_v48  ;;  %526 = vmatprep.mubr.bf16.mxu0 %v1023_v49 }
  0x35   :  { %598 = vmatprep.mubr.bf16.mxu1 %v1025_v50 }
  0x3b   :  { %527 = vmatmul.mubr.bf16.gmra.mrb[12].mxu0 %v1027_v53 }
  0x3c   :  { %599 = vmatmul.mubr.bf16.gmra.mrb[12].mxu1 %v1028_v54  ;;  %534 = vmatprep.mubr.bf16.mxu0 %v768_v55 }
  0x3d   :  { %606 = vmatprep.mubr.bf16.mxu1 %v770_v56 }
  0x43   :  { %535 = vmatmul.mubr.bf16.gmra.mrb[16].mxu0 %v767_v57 }
  0x44   :  { %607 = vmatmul.mubr.bf16.gmra.mrb[16].mxu1 %v769_v58  ;;  %940 = vmatprep.mubr.msk.bf16.mxu0 %vm1040_vm0, %v1039_v34 }
  0x45   :  { %952 = vmatprep.mubr.msk.bf16.mxu1 %vm1040_vm0, %v1039_v34 }
  0x4b   :  { %941 = vmatmul.mubr.msk.bf16.vlgmr.msra.gmra.mrb[20].mxu0 %vm454_vm1, %v1034_v59 }
  0x4c   :  { %953 = vmatmul.mubr.msk.bf16.vlgmr.msra.gmra.mrb[20].mxu1 %vm454_vm1, %v1035_v60  ;;  %944 = vmatprep.mubr.msk.bf16.mxu0 %vm1040_vm0, %v1039_v34 }
  0x4d   :  { %956 = vmatprep.mubr.msk.bf16.mxu1 %vm1040_vm0, %v1039_v34 }
  0x53   :  { %945 = vmatmul.mubr.msk.bf16.gmra.mrb[24].mxu0 %vm454_vm1, %v1036_v61 }
  0x54   :  { %957 = vmatmul.mubr.msk.bf16.gmra.mrb[24].mxu1 %vm454_vm1, %v1037_v62  ;;  %948 = vmatprep.mubr.msk.bf16.mxu0 %vm1040_vm0, %v1039_v34 }
  0x5b   :  { %949 = vmatmul.mubr.msk.bf16.gmra.mrb[28].mxu0 %vm454_vm1, %v1038_v63 }
  0xf6   :  { %v847_v0 = vpop.f32.mrb[0].mxu0 }
  0xf7   :  { %v848_v2 = vpop.f32.mrb[1].mxu0  ;;  %v893_v3 = vpop.f32.mrb[0].mxu1 }
  0xf8   :  { %v849_v4 = vadd.f32 %v848_v2, %v847_v0  ;;  %v850_v5 = vpop.f32.mrb[2].mxu0  ;;  %v894_v6 = vpop.f32.mrb[1].mxu1 }
  0xf9   :  { %v851_v7 = vpop.f32.mrb[3].mxu0  ;;  %v895_v8 = vadd.f32 %v894_v6, %v893_v3  ;;  %v896_v9 = vpop.f32.mrb[2].mxu1 }
  0xfa   :  { %v505_v10 = vadd.f32 %v849_v4, %v1254_v1  ;;  %v852_v11 = vadd.f32 %v851_v7, %v850_v5  ;;  %v897_v12 = vpop.f32.mrb[3].mxu1 }
  0xfb   :  { %v898_v13 = vadd.f32 %v897_v12, %v896_v9 }
  0xfc   :  { %v508_v14 = vadd.f32 %v852_v11, %v1254_v1  ;;  %v1258_v15 = vadd.f32 %v895_v8, %v505_v10 }
  0xfe   :  { %v853_v16 = vpop.f32.mrb[4].mxu0  ;;  %v1260_v17 = vadd.f32 %v898_v13, %v508_v14 }
  0xff   :  { %v854_v18 = vpop.f32.mrb[5].mxu0  ;;  %v899_v19 = vpop.f32.mrb[4].mxu1 }
 0x100   :  { %v855_v20 = vadd.f32 %v854_v18, %v853_v16  ;;  %v856_v21 = vpop.f32.mrb[6].mxu0  ;;  %v900_v22 = vpop.f32.mrb[5].mxu1 }
 0x101   :  { %v857_v23 = vpop.f32.mrb[7].mxu0  ;;  %v901_v24 = vadd.f32 %v900_v22, %v899_v19  ;;  %v902_v25 = vpop.f32.mrb[6].mxu1 }
 0x102   :  { %v513_v26 = vadd.f32 %v855_v20, %v1254_v1  ;;  %v858_v27 = vadd.f32 %v857_v23, %v856_v21  ;;  %v903_v28 = vpop.f32.mrb[7].mxu1 }
 0x103   :  { %v904_v29 = vadd.f32 %v903_v28, %v902_v25 }
 0x104   :  { %v516_v30 = vadd.f32 %v858_v27, %v1254_v1  ;;  %v1264_v31 = vadd.f32 %v901_v24, %v513_v26 }
 0x106   :  { %v859_v32 = vpop.f32.mrb[8].mxu0  ;;  %v1266_v33 = vadd.f32 %v904_v29, %v516_v30 }
 0x107   :  { %v860_v34 = vpop.f32.mrb[9].mxu0  ;;  %v905_v35 = vpop.f32.mrb[8].mxu1 }
 0x108   :  { %v861_v36 = vadd.f32 %v860_v34, %v859_v32  ;;  %v862_v37 = vpop.f32.mrb[10].mxu0  ;;  %v906_v38 = vpop.f32.mrb[9].mxu1 }
 0x109   :  { %v863_v39 = vpop.f32.mrb[11].mxu0  ;;  %v907_v40 = vadd.f32 %v906_v38, %v905_v35  ;;  %v908_v41 = vpop.f32.mrb[10].mxu1 }
 0x10a   :  { %v521_v42 = vadd.f32 %v861_v36, %v1254_v1  ;;  %v864_v43 = vadd.f32 %v863_v39, %v862_v37  ;;  %v909_v44 = vpop.f32.mrb[11].mxu1 }
 0x10b   :  { %v910_v45 = vadd.f32 %v909_v44, %v908_v41 }
 0x10c   :  { %v524_v46 = vadd.f32 %v864_v43, %v1254_v1  ;;  %v1270_v47 = vadd.f32 %v907_v40, %v521_v42 }
 0x10e   :  { %v865_v48 = vpop.f32.mrb[12].mxu0  ;;  %v1272_v49 = vadd.f32 %v910_v45, %v524_v46 }
 0x10f   :  { %v866_v50 = vpop.f32.mrb[13].mxu0  ;;  %v911_v51 = vpop.f32.mrb[12].mxu1 }
 0x110   :  { %v867_v52 = vadd.f32 %v866_v50, %v865_v48  ;;  %v868_v53 = vpop.f32.mrb[14].mxu0  ;;  %v912_v54 = vpop.f32.mrb[13].mxu1 }
 0x111   :  { %v869_v55 = vpop.f32.mrb[15].mxu0  ;;  %v913_v56 = vadd.f32 %v912_v54, %v911_v51  ;;  %v914_v57 = vpop.f32.mrb[14].mxu1 }
 0x112   :  { %v529_v58 = vadd.f32 %v867_v52, %v1254_v1  ;;  %v870_v59 = vadd.f32 %v869_v55, %v868_v53  ;;  %v915_v60 = vpop.f32.mrb[15].mxu1 }
 0x113   :  { %v916_v61 = vadd.f32 %v915_v60, %v914_v57 }
 0x114   :  { %v532_v62 = vadd.f32 %v870_v59, %v1254_v1  ;;  %v601_v63 = vadd.f32 %v913_v56, %v529_v58 }
 0x116   :  { %v871_v0 = vpop.f32.mrb[16].mxu0  ;;  %v604_v2 = vadd.f32 %v916_v61, %v532_v62 }
 0x117   :  { %v872_v3 = vpop.f32.mrb[17].mxu0  ;;  %v917_v4 = vpop.f32.mrb[16].mxu1 }
 0x118   :  { %v873_v5 = vadd.f32 %v872_v3, %v871_v0  ;;  %v874_v6 = vpop.f32.mrb[18].mxu0  ;;  %v918_v7 = vpop.f32.mrb[17].mxu1 }
 0x119   :  { %v875_v8 = vpop.f32.mrb[19].mxu0  ;;  %v919_v9 = vadd.f32 %v918_v7, %v917_v4  ;;  %v920_v10 = vpop.f32.mrb[18].mxu1 }
 0x11a   :  { %v537_v11 = vadd.f32 %v873_v5, %v1254_v1  ;;  %v921_v12 = vpop.f32.mrb[19].mxu1 }
 0x11c   :  { %v609_v13 = vadd.f32 %v919_v9, %v537_v11 }
 0x11e   :  { %v648_v14 = vpop.f32.mrb[20].mxu0 }
 0x11f   :  { %v649_v16 = vadd.f32 %v648_v14, %v1258_v15  ;;  %v672_v18 = vpop.f32.mrb[20].mxu1  ;;  %v942_v19 = vpop.f32.mrb[21].mxu0 }
 0x120   :  { %v673_v20 = vadd.f32 %v672_v18, %v601_v63  ;;  %v954_v21 = vpop.f32.mrb[21].mxu1  ;;  %v651_v22 = vpop.f32.mrb[22].mxu0 }
 0x121   :  { %v686_v23 = vmax.f32 %v649_v16, 0.0  ;;  %v652_v24 = vadd.f32 %v651_v22, %v1260_v17  ;;  %v675_v25 = vpop.f32.mrb[22].mxu1  ;;  %v943_v26 = vpop.f32.mrb[23].mxu0 }
 0x122   :  { %v692_v27 = vmax.f32 %v673_v20, 0.0  ;;  %v676_v28 = vadd.f32 %v675_v25, %v604_v2  ;;  %v955_v29 = vpop.f32.mrb[23].mxu1 }
 0x123   :  { %v822_v1 = vpack.c.bf16 %v686_v23, %v686_v23  ;;  %v687_v30 = vmax.f32 %v652_v24, 0.0 }
 0x124   :  { %v828_v32 = vpack.c.bf16 %v692_v27, %v692_v27  ;;  %v693_v34 = vmax.f32 %v676_v28, 0.0 }
 0x125   :  { %733 = vst.msk [vmem:[%s1322_s3] sm:$0xf] %vm732_vm2, %v822_v1  ;;  %v823_v15 = vpack.c.bf16 %v687_v30, %v687_v30 }
 0x126   :  { %739 = vst.msk [vmem:[%s1322_s3 + $0x18] sm:$0xf] %vm732_vm2, %v828_v32  ;;  %v829_v17 = vpack.c.bf16 %v693_v34, %v693_v34  ;;  %v656_v35 = vpop.f32.mrb[24].mxu0 }
 0x127   :  { %734 = vst.msk [vmem:[%s1322_s3 + $0x4] sm:$0xf] %vm732_vm2, %v823_v15  ;;  %v657_v36 = vadd.f32 %v656_v35, %v1264_v31  ;;  %v680_v37 = vpop.f32.mrb[24].mxu1  ;;  %v946_v38 = vpop.f32.mrb[25].mxu0 }
 0x128   :  { %740 = vst.msk [vmem:[%s1322_s3 + $0x1c] sm:$0xf] %vm732_vm2, %v829_v17  ;;  %v681_v39 = vadd.f32 %v680_v37, %v609_v13  ;;  %v659_v40 = vpop.f32.mrb[26].mxu0  ;;  %v958_v41 = vpop.f32.mrb[25].mxu1 }
 0x129   :  { %v688_v42 = vmax.f32 %v657_v36, 0.0  ;;  %v660_v43 = vadd.f32 %v659_v40, %v1266_v33  ;;  %v947_v44 = vpop.f32.mrb[27].mxu0  ;;  %v683_v45 = vpop.f32.mrb[26].mxu1 }
 0x12a   :  { %v694_v46 = vmax.f32 %v681_v39, 0.0  ;;  %v959_v48 = vpop.f32.mrb[27].mxu1 }
 0x12b   :  { %v824_v50 = vpack.c.bf16 %v688_v42, %v688_v42  ;;  %v689_v51 = vmax.f32 %v660_v43, 0.0 }
 0x12c   :  { %v830_v31 = vpack.c.bf16 %v694_v46, %v694_v46 }
 0x12d   :  { %735 = vst.msk [vmem:[%s1322_s3 + $0x8] sm:$0xf] %vm732_vm2, %v824_v50  ;;  %v825_v52 = vpack.c.bf16 %v689_v51, %v689_v51 }
 0x12e   :  { %741 = vst.msk [vmem:[%s1322_s3 + $0x20] sm:$0xf] %vm732_vm2, %v830_v31  ;;  %v664_v53 = vpop.f32.mrb[28].mxu0 }
 0x12f   :  { %736 = vst.msk [vmem:[%s1322_s3 + $0xc] sm:$0xf] %vm732_vm2, %v825_v52  ;;  %v665_v33 = vadd.f32 %v664_v53, %v1270_v47  ;;  %v950_v54 = vpop.f32.mrb[29].mxu0 }
 0x130   :  { %v667_v55 = vpop.f32.mrb[30].mxu0 }
 0x131   :  { %v690_v56 = vmax.f32 %v665_v33, 0.0  ;;  %v668_v57 = vadd.f32 %v667_v55, %v1272_v49  ;;  %v951_v58 = vpop.f32.mrb[31].mxu0 }
 0x133   :  { %v826_v59 = vpack.c.bf16 %v690_v56, %v690_v56  ;;  %v691_v60 = vmax.f32 %v668_v57, 0.0 }
 0x135   :  { %737 = vst.msk [vmem:[%s1322_s3 + $0x10] sm:$0xf] %vm732_vm2, %v826_v59  ;;  %v827_v61 = vpack.c.bf16 %v691_v60, %v691_v60 }
 0x137   :  { %738 = vst.msk [vmem:[%s1322_s3 + $0x14] sm:$0xf] %vm732_vm2, %v827_v61 }

// kernel: mario_forward.9
= control target key start
LH: loop header
LB: loop body
LE: loop exit
PB: predicated region body
PF: predicated region fallthrough
CT: control target
= control target key end

     0   :  { %v316_v36 = vlaneseq  ;;  %v3532_v37 = vmov 1966171168   ;;  %s4602_s0 = inlined_call_operand.vmem [shape: bf16[2,1152], index: 0, kind: input, shape index: {}]   ;;  %s4603_s1 = inlined_call_operand.vmem [shape: bf16[1152,512], index: 1, kind: input, shape index: {}]   ;;  %s4604_s2 = inlined_call_operand.vmem [shape: f32[1,512], index: 2, kind: input, shape index: {}]   ;;  %s4605_s3 = inlined_call_operand.vmem [shape: bf16[512,13], index: 3, kind: input, shape index: {}]   ;;  %s4606_s4 = inlined_call_operand.vmem [shape: f32[1,13], index: 4, kind: input, shape index: {}]   ;;  %s4607_s5 = inlined_call_operand.hbm [shape: f32[2,12], index: 5, kind: output, shape index: {0}]   ;;  %s4608_s6 = inlined_call_operand.vmem [shape: f32[2,1], index: 6, kind: output, shape index: {1}]  }
   0x1   :  { %v3043_v0 = vld [vmem:[%s4603_s1 + $0x4] ss:$16 sps:$4 sm:$0xff]   ;;  %v3045_v1 = vld [vmem:[%s4603_s1 + $0xc] ss:$16 sps:$4 sm:$0xff]   ;;  %v3047_v2 = vld [vmem:[%s4603_s1] ss:$16 sps:$4 sm:$0xff]   ;;  %v340_v38 = vunpack.c.l.s4 %v3532_v37 }
   0x2   :  { %1850 = vmatprep.subr.bf16.mxu0 %v3043_v0  ;;  %v3048_v3 = vld [vmem:[%s4603_s1 + $0x8] ss:$16 sps:$4 sm:$0xff]   ;;  %2055 = vmatprep.subr.bf16.mxu1 %v3045_v1  ;;  %v3049_v4 = vld [vmem:[%s4603_s1 + $0x24] ss:$16 sps:$4 sm:$0xff]   ;;  %v3051_v5 = vld [vmem:[%s4603_s1 + $0x2c] ss:$16 sps:$4 sm:$0xff]  }
   0x3   :  { %1851 = vmatpush1.bf16.msra.mxu0 %v3047_v2  ;;  %2056 = vmatpush1.bf16.msra.mxu1 %v3048_v3  ;;  %v3053_v6 = vld [vmem:[%s4603_s1 + $0x20] ss:$16 sps:$4 sm:$0xff]   ;;  %v3054_v7 = vld [vmem:[%s4603_s1 + $0x28] ss:$16 sps:$4 sm:$0xff]   ;;  %v3055_v8 = vld [vmem:[%s4603_s1 + $0x44] ss:$16 sps:$4 sm:$0xff]   ;;  %v341_v43 = vunpack.c.0.s8 %v340_v38 }
   0x4   :  { %1852 = vmatprep.subr.bf16.mxu0 %v3049_v4  ;;  %2057 = vmatprep.subr.bf16.mxu1 %v3051_v5  ;;  %v3057_v9 = vld [vmem:[%s4603_s1 + $0x4c] ss:$16 sps:$4 sm:$0xff]   ;;  %v3059_v10 = vld [vmem:[%s4603_s1 + $0x40] ss:$16 sps:$4 sm:$0xff]   ;;  %v3060_v11 = vld [vmem:[%s4603_s1 + $0x48] ss:$16 sps:$4 sm:$0xff]  }
   0x5   :  { %v3061_v12 = vld [vmem:[%s4603_s1 + $0x64] ss:$16 sps:$4 sm:$0xff]   ;;  %v3063_v13 = vld [vmem:[%s4603_s1 + $0x6c] ss:$16 sps:$4 sm:$0xff]   ;;  %v3065_v14 = vld [vmem:[%s4603_s1 + $0x60] ss:$16 sps:$4 sm:$0xff]  }
   0x6   :  { %v3066_v15 = vld [vmem:[%s4603_s1 + $0x68] ss:$16 sps:$4 sm:$0xff]   ;;  %v3067_v16 = vld [vmem:[%s4603_s1 + $0x84] ss:$16 sps:$4 sm:$0xff]   ;;  %v3069_v17 = vld [vmem:[%s4603_s1 + $0x8c] ss:$16 sps:$4 sm:$0xff]  }
   0x7   :  { %1853 = vmatpush1.bf16.msra.mxu0 %v3053_v6  ;;  %2058 = vmatpush1.bf16.msra.mxu1 %v3054_v7  ;;  %v3071_v18 = vld [vmem:[%s4603_s1 + $0x80] ss:$16 sps:$4 sm:$0xff]   ;;  %v3072_v19 = vld [vmem:[%s4603_s1 + $0x88] ss:$16 sps:$4 sm:$0xff]   ;;  %v3073_v20 = vld [vmem:[%s4603_s1 + $0xa4] ss:$16 sps:$4 sm:$0xff]  }
   0x8   :  { %1854 = vmatprep.subr.bf16.mxu0 %v3055_v8  ;;  %2059 = vmatprep.subr.bf16.mxu1 %v3057_v9  ;;  %v3075_v21 = vld [vmem:[%s4603_s1 + $0xac] ss:$16 sps:$4 sm:$0xff]   ;;  %v3077_v22 = vld [vmem:[%s4603_s1 + $0xa0] ss:$16 sps:$4 sm:$0xff]   ;;  %v3078_v23 = vld [vmem:[%s4603_s1 + $0xa8] ss:$16 sps:$4 sm:$0xff]  }
   0x9   :  { %v3079_v24 = vld [vmem:[%s4603_s1 + $0xc4] ss:$16 sps:$4 sm:$0xff]   ;;  %v3081_v25 = vld [vmem:[%s4603_s1 + $0xcc] ss:$16 sps:$4 sm:$0xff]   ;;  %v3083_v26 = vld [vmem:[%s4603_s1 + $0xc0] ss:$16 sps:$4 sm:$0xff]  }
   0xa   :  { %v3084_v27 = vld [vmem:[%s4603_s1 + $0xc8] ss:$16 sps:$4 sm:$0xff]   ;;  %v3085_v28 = vld [vmem:[%s4603_s1 + $0xe4] ss:$16 sps:$4 sm:$0xff]   ;;  %v3087_v29 = vld [vmem:[%s4603_s1 + $0xec] ss:$16 sps:$4 sm:$0xff]  }
   0xb   :  { %1855 = vmatpush1.bf16.msra.mxu0 %v3059_v10  ;;  %2060 = vmatpush1.bf16.msra.mxu1 %v3060_v11  ;;  %v3089_v30 = vld [vmem:[%s4603_s1 + $0xe0] ss:$16 sps:$4 sm:$0xff]   ;;  %v3090_v31 = vld [vmem:[%s4603_s1 + $0xe8] ss:$16 sps:$4 sm:$0xff]   ;;  %v3091_v32 = vld [vmem:[%s4603_s1 + $0x104] ss:$16 sps:$4 sm:$0xff]  }
   0xc   :  { %1856 = vmatprep.subr.bf16.mxu0 %v3061_v12  ;;  %2061 = vmatprep.subr.bf16.mxu1 %v3063_v13  ;;  %v3093_v33 = vld [vmem:[%s4603_s1 + $0x10c] ss:$16 sps:$4 sm:$0xff]   ;;  %v3095_v34 = vld [vmem:[%s4603_s1 + $0x100] ss:$16 sps:$4 sm:$0xff]   ;;  %v3096_v35 = vld [vmem:[%s4603_s1 + $0x108] ss:$16 sps:$4 sm:$0xff]  }
   0xd   :  { %v3097_v39 = vld [vmem:[%s4603_s1 + $0x124] ss:$16 sps:$4 sm:$0xff]   ;;  %v3099_v40 = vld [vmem:[%s4603_s1 + $0x12c] ss:$16 sps:$4 sm:$0xff]   ;;  %v3101_v41 = vld [vmem:[%s4603_s1 + $0x120] ss:$16 sps:$4 sm:$0xff]  }
   0xe   :  { %v3688_v42 = vshrl.u32 %v316_v36, 7  ;;  %v3102_v44 = vld [vmem:[%s4603_s1 + $0x128] ss:$16 sps:$4 sm:$0xff]   ;;  %v3103_v45 = vld [vmem:[%s4603_s1 + $0x144] ss:$16 sps:$4 sm:$0xff]  }
   0xf   :  { %1857 = vmatpush1.bf16.msra.mxu0 %v3065_v14  ;;  %2062 = vmatpush1.bf16.msra.mxu1 %v3066_v15  ;;  %v3105_v46 = vld [vmem:[%s4603_s1 + $0x14c] ss:$16 sps:$4 sm:$0xff]   ;;  %v3107_v47 = vld [vmem:[%s4603_s1 + $0x140] ss:$16 sps:$4 sm:$0xff]   ;;  %v3108_v48 = vld [vmem:[%s4603_s1 + $0x148] ss:$16 sps:$4 sm:$0xff]  }
  0x10   :  { %1858 = vmatprep.subr.bf16.mxu0 %v3067_v16  ;;  %2063 = vmatprep.subr.bf16.mxu1 %v3069_v17  ;;  %v3706_v49 = vsub.s32 %v341_v43, %v3688_v42  ;;  %v3109_v50 = vld [vmem:[%s4603_s1 + $0x164] ss:$16 sps:$4 sm:$0xff]   ;;  %v3111_v51 = vld [vmem:[%s4603_s1 + $0x16c] ss:$16 sps:$4 sm:$0xff]   ;;  %v3113_v53 = vld [vmem:[%s4603_s1 + $0x160] ss:$16 sps:$4 sm:$0xff]  }
  0x11   :  { %v3717_v52 = vld [vmem:[%s4602_s0] sm:$0xff]  ;;  %v3114_v55 = vld [vmem:[%s4603_s1 + $0x168] ss:$16 sps:$4 sm:$0xff]   ;;  %v3117_v57 = vld [vmem:[%s4603_s1 + $0x18c] ss:$16 sps:$4 sm:$0xff]  }
  0x12   :  { %v345_v54 = vrot.slane %v3717_v52, %v3706_v49  ;;  %v3115_v56 = vld [vmem:[%s4603_s1 + $0x184] ss:$16 sps:$4 sm:$0xff]   ;;  %v3119_v59 = vld [vmem:[%s4603_s1 + $0x180] ss:$16 sps:$4 sm:$0xff]   ;;  %v3120_v61 = vld [vmem:[%s4603_s1 + $0x188] ss:$16 sps:$4 sm:$0xff]  }
  0x13   :  { %1859 = vmatpush1.bf16.msra.mxu0 %v3071_v18  ;;  %2064 = vmatpush1.bf16.msra.mxu1 %v3072_v19  ;;  %v3121_v62 = vld [vmem:[%s4603_s1 + $0x1a4] ss:$16 sps:$4 sm:$0xff]   ;;  %v3123_v63 = vld [vmem:[%s4603_s1 + $0x1ac] ss:$16 sps:$4 sm:$0xff]   ;;  %v3125_v0 = vld [vmem:[%s4603_s1 + $0x1a0] ss:$16 sps:$4 sm:$0xff]  }
  0x14   :  { %1860 = vmatprep.subr.bf16.mxu0 %v3073_v20  ;;  %2065 = vmatprep.subr.bf16.mxu1 %v3075_v21  ;;  %v353_v58 = vcombine.high %v345_v54, %v345_v54  ;;  %v3126_v1 = vld [vmem:[%s4603_s1 + $0x1a8] ss:$16 sps:$4 sm:$0xff]   ;;  %v3127_v2 = vld [vmem:[%s4603_s1 + $0x1c4] ss:$16 sps:$4 sm:$0xff]   ;;  %v3129_v3 = vld [vmem:[%s4603_s1 + $0x1cc] ss:$16 sps:$4 sm:$0xff]   ;;  %v3786_v13 = vrot.slane %v345_v54, %v3706_v49 }
  0x15   :  { %v3131_v4 = vld [vmem:[%s4603_s1 + $0x1c0] ss:$16 sps:$4 sm:$0xff]   ;;  %v3132_v5 = vld [vmem:[%s4603_s1 + $0x1c8] ss:$16 sps:$4 sm:$0xff]   ;;  %v3133_v6 = vld [vmem:[%s4603_s1 + $0x1e4] ss:$16 sps:$4 sm:$0xff]  }
  0x16   :  { %v375_v60 = vrot.slane %v353_v58, %v3706_v49  ;;  %v3135_v7 = vld [vmem:[%s4603_s1 + $0x1ec] ss:$16 sps:$4 sm:$0xff]   ;;  %v3137_v8 = vld [vmem:[%s4603_s1 + $0x1e0] ss:$16 sps:$4 sm:$0xff]   ;;  %v3138_v9 = vld [vmem:[%s4603_s1 + $0x1e8] ss:$16 sps:$4 sm:$0xff]  }
  0x17   :  { %1861 = vmatpush1.bf16.msra.mxu0 %v3077_v22  ;;  %2066 = vmatpush1.bf16.msra.mxu1 %v3078_v23  ;;  %v3141_v10 = vld [vmem:[%s4603_s1 + $0x204] ss:$16 sps:$4 sm:$0xff]   ;;  %v3144_v11 = vld [vmem:[%s4603_s1 + $0x20c] ss:$16 sps:$4 sm:$0xff]   ;;  %v3139_v12 = vld [vmem:[%s4603_s1 + $0x200] ss:$16 sps:$4 sm:$0xff]  }
  0x18   :  { %1862 = vmatprep.subr.bf16.mxu0 %v3079_v24  ;;  %2067 = vmatprep.subr.bf16.mxu1 %v3081_v25  ;;  %v3142_v14 = vld [vmem:[%s4603_s1 + $0x208] ss:$16 sps:$4 sm:$0xff]   ;;  %v3147_v15 = vld [vmem:[%s4603_s1 + $0x224] ss:$16 sps:$4 sm:$0xff]   ;;  %v3150_v16 = vld [vmem:[%s4603_s1 + $0x22c] ss:$16 sps:$4 sm:$0xff]   ;;  %v385_v17 = vcombine.high %v375_v60, %v375_v60 }
  0x19   :  { %1882 = vmatprep.mubr.bf16.mxu0 %v375_v60  ;;  %2087 = vmatprep.mubr.bf16.mxu1 %v375_v60  ;;  %v3145_v18 = vld [vmem:[%s4603_s1 + $0x220] ss:$16 sps:$4 sm:$0xff]   ;;  %v3148_v19 = vld [vmem:[%s4603_s1 + $0x228] ss:$16 sps:$4 sm:$0xff]   ;;  %v3153_v20 = vld [vmem:[%s4603_s1 + $0x244] ss:$16 sps:$4 sm:$0xff]  }
  0x1a   :  { %v3156_v21 = vld [vmem:[%s4603_s1 + $0x24c] ss:$16 sps:$4 sm:$0xff]   ;;  %v3151_v22 = vld [vmem:[%s4603_s1 + $0x240] ss:$16 sps:$4 sm:$0xff]   ;;  %v3154_v23 = vld [vmem:[%s4603_s1 + $0x248] ss:$16 sps:$4 sm:$0xff]  }
  0x1b   :  { %1863 = vmatpush1.bf16.msra.mxu0 %v3083_v26  ;;  %2068 = vmatpush1.bf16.msra.mxu1 %v3084_v27  ;;  %v3159_v24 = vld [vmem:[%s4603_s1 + $0x264] ss:$16 sps:$4 sm:$0xff]   ;;  %v3162_v25 = vld [vmem:[%s4603_s1 + $0x26c] ss:$16 sps:$4 sm:$0xff]   ;;  %v3157_v26 = vld [vmem:[%s4603_s1 + $0x260] ss:$16 sps:$4 sm:$0xff]  }
  0x1c   :  { %1864 = vmatprep.subr.bf16.mxu0 %v3085_v28  ;;  %2069 = vmatprep.subr.bf16.mxu1 %v3087_v29  ;;  %v3160_v27 = vld [vmem:[%s4603_s1 + $0x268] ss:$16 sps:$4 sm:$0xff]   ;;  %v3165_v28 = vld [vmem:[%s4603_s1 + $0x284] ss:$16 sps:$4 sm:$0xff]   ;;  %v3168_v29 = vld [vmem:[%s4603_s1 + $0x28c] ss:$16 sps:$4 sm:$0xff]  }
  0x1d   :  { %v3177_v36 = vld [vmem:[%s4603_s1 + $0x2c4] ss:$16 sps:$4 sm:$0xff]   ;;  %v3180_v37 = vld [vmem:[%s4603_s1 + $0x2cc] ss:$16 sps:$4 sm:$0xff]   ;;  %v3175_v38 = vld [vmem:[%s4603_s1 + $0x2c0] ss:$16 sps:$4 sm:$0xff]  }
  0x1e   :  { %v3181_v43 = vld [vmem:[%s4603_s1 + $0x2e0] ss:$16 sps:$4 sm:$0xff]   ;;  %v3196_v54 = vld [vmem:[%s4603_s1 + $0x328] ss:$16 sps:$4 sm:$0xff]   ;;  %v3210_v60 = vld [vmem:[%s4603_s1 + $0x36c] ss:$16 sps:$4 sm:$0xff]  }
  0x1f   :  { %1865 = vmatpush1.bf16.msra.mxu0 %v3089_v30  ;;  %2070 = vmatpush1.bf16.msra.mxu1 %v3090_v31  ;;  %v3163_v30 = vld [vmem:[%s4603_s1 + $0x280] ss:$16 sps:$4 sm:$0xff]   ;;  %v3166_v31 = vld [vmem:[%s4603_s1 + $0x288] ss:$16 sps:$4 sm:$0xff]  }
  0x20   :  { %1866 = vmatprep.subr.bf16.mxu0 %v3091_v32  ;;  %2071 = vmatprep.subr.bf16.mxu1 %v3093_v33  ;;  %v3171_v32 = vld [vmem:[%s4603_s1 + $0x2a4] ss:$16 sps:$4 sm:$0xff]   ;;  %v3174_v33 = vld [vmem:[%s4603_s1 + $0x2ac] ss:$16 sps:$4 sm:$0xff]   ;;  %v3202_v58 = vld [vmem:[%s4603_s1 + $0x348] ss:$16 sps:$4 sm:$0xff]  }
  0x23   :  { %1867 = vmatpush1.bf16.msra.mxu0 %v3095_v34  ;;  %2072 = vmatpush1.bf16.msra.mxu1 %v3096_v35  ;;  %v3169_v34 = vld [vmem:[%s4603_s1 + $0x2a0] ss:$16 sps:$4 sm:$0xff]   ;;  %v3172_v35 = vld [vmem:[%s4603_s1 + $0x2a8] ss:$16 sps:$4 sm:$0xff]  }
  0x24   :  { %1868 = vmatprep.subr.bf16.mxu0 %v3097_v39  ;;  %2073 = vmatprep.subr.bf16.mxu1 %v3099_v40  ;;  %v3178_v39 = vld [vmem:[%s4603_s1 + $0x2c8] ss:$16 sps:$4 sm:$0xff]   ;;  %v3183_v40 = vld [vmem:[%s4603_s1 + $0x2e4] ss:$16 sps:$4 sm:$0xff]  }
  0x27   :  { %1869 = vmatpush1.bf16.msra.mxu0 %v3101_v41  ;;  %2074 = vmatpush1.bf16.msra.mxu1 %v3102_v44  ;;  %v3186_v41 = vld [vmem:[%s4603_s1 + $0x2ec] ss:$16 sps:$4 sm:$0xff]   ;;  %v3184_v44 = vld [vmem:[%s4603_s1 + $0x2e8] ss:$16 sps:$4 sm:$0xff]  }
  0x28   :  { %1870 = vmatprep.subr.bf16.mxu0 %v3103_v45  ;;  %2075 = vmatprep.subr.bf16.mxu1 %v3105_v46  ;;  %v3189_v45 = vld [vmem:[%s4603_s1 + $0x304] ss:$16 sps:$4 sm:$0xff]   ;;  %v3192_v46 = vld [vmem:[%s4603_s1 + $0x30c] ss:$16 sps:$4 sm:$0xff]  }
  0x2b   :  { %1871 = vmatpush1.bf16.msra.mxu0 %v3107_v47  ;;  %2076 = vmatpush1.bf16.msra.mxu1 %v3108_v48  ;;  %v3187_v47 = vld [vmem:[%s4603_s1 + $0x300] ss:$16 sps:$4 sm:$0xff]   ;;  %v3190_v48 = vld [vmem:[%s4603_s1 + $0x308] ss:$16 sps:$4 sm:$0xff]  }
  0x2c   :  { %1872 = vmatprep.subr.bf16.mxu0 %v3109_v50  ;;  %2077 = vmatprep.subr.bf16.mxu1 %v3111_v51  ;;  %v3195_v50 = vld [vmem:[%s4603_s1 + $0x324] ss:$16 sps:$4 sm:$0xff]   ;;  %v3198_v51 = vld [vmem:[%s4603_s1 + $0x32c] ss:$16 sps:$4 sm:$0xff]  }
  0x2f   :  { %1873 = vmatpush1.bf16.msra.mxu0 %v3113_v53  ;;  %2078 = vmatpush1.bf16.msra.mxu1 %v3114_v55  ;;  %v3193_v53 = vld [vmem:[%s4603_s1 + $0x320] ss:$16 sps:$4 sm:$0xff]   ;;  %v3201_v55 = vld [vmem:[%s4603_s1 + $0x344] ss:$16 sps:$4 sm:$0xff]  }
  0x30   :  { %1874 = vmatprep.subr.bf16.mxu0 %v3115_v56  ;;  %2079 = vmatprep.subr.bf16.mxu1 %v3117_v57  ;;  %v3204_v56 = vld [vmem:[%s4603_s1 + $0x34c] ss:$16 sps:$4 sm:$0xff]   ;;  %v3199_v57 = vld [vmem:[%s4603_s1 + $0x340] ss:$16 sps:$4 sm:$0xff]  }
  0x33   :  { %1875 = vmatpush1.bf16.msra.mxu0 %v3119_v59  ;;  %2080 = vmatpush1.bf16.msra.mxu1 %v3120_v61  ;;  %v3207_v59 = vld [vmem:[%s4603_s1 + $0x364] ss:$16 sps:$4 sm:$0xff]   ;;  %v3205_v61 = vld [vmem:[%s4603_s1 + $0x360] ss:$16 sps:$4 sm:$0xff]  }
  0x34   :  { %1876 = vmatprep.subr.bf16.mxu0 %v3121_v62  ;;  %2081 = vmatprep.subr.bf16.mxu1 %v3123_v63  ;;  %v3208_v62 = vld [vmem:[%s4603_s1 + $0x368] ss:$16 sps:$4 sm:$0xff]   ;;  %v3213_v63 = vld [vmem:[%s4603_s1 + $0x384] ss:$16 sps:$4 sm:$0xff]  }
  0x37   :  { %1877 = vmatpush1.bf16.msra.mxu0 %v3125_v0  ;;  %2082 = vmatpush1.bf16.msra.mxu1 %v3126_v1  ;;  %v3216_v0 = vld [vmem:[%s4603_s1 + $0x38c] ss:$16 sps:$4 sm:$0xff]   ;;  %v3211_v1 = vld [vmem:[%s4603_s1 + $0x380] ss:$16 sps:$4 sm:$0xff]  }
  0x38   :  { %1878 = vmatprep.subr.bf16.mxu0 %v3127_v2  ;;  %2083 = vmatprep.subr.bf16.mxu1 %v3129_v3  ;;  %v3214_v2 = vld [vmem:[%s4603_s1 + $0x388] ss:$16 sps:$4 sm:$0xff]   ;;  %v3219_v3 = vld [vmem:[%s4603_s1 + $0x3a4] ss:$16 sps:$4 sm:$0xff]  }
  0x3b   :  { %1879 = vmatpush1.bf16.msra.mxu0 %v3131_v4  ;;  %2084 = vmatpush1.bf16.msra.mxu1 %v3132_v5  ;;  %v3222_v4 = vld [vmem:[%s4603_s1 + $0x3ac] ss:$16 sps:$4 sm:$0xff]   ;;  %v3217_v5 = vld [vmem:[%s4603_s1 + $0x3a0] ss:$16 sps:$4 sm:$0xff]  }
  0x3c   :  { %1880 = vmatprep.subr.bf16.mxu0 %v3133_v6  ;;  %2085 = vmatprep.subr.bf16.mxu1 %v3135_v7  ;;  %v3220_v6 = vld [vmem:[%s4603_s1 + $0x3a8] ss:$16 sps:$4 sm:$0xff]   ;;  %v3225_v7 = vld [vmem:[%s4603_s1 + $0x3c4] ss:$16 sps:$4 sm:$0xff]  }
  0x3f   :  { %1881 = vmatpush1.bf16.msra.mxu0 %v3137_v8  ;;  %2086 = vmatpush1.bf16.msra.mxu1 %v3138_v9  ;;  %v3228_v8 = vld [vmem:[%s4603_s1 + $0x3cc] ss:$16 sps:$4 sm:$0xff]   ;;  %v338_v9 = vcombine.high %v3717_v52, %v3717_v52 }
  0x40   :  { %1891 = vmatprep.subr.bf16.mxu0 %v3141_v10  ;;  %2096 = vmatprep.subr.bf16.mxu1 %v3144_v11  ;;  %v3223_v10 = vld [vmem:[%s4603_s1 + $0x3c0] ss:$16 sps:$4 sm:$0xff]   ;;  %v3226_v11 = vld [vmem:[%s4603_s1 + $0x3c8] ss:$16 sps:$4 sm:$0xff]   ;;  %v3234_v52 = vld [vmem:[%s4603_s1 + $0x3ec] ss:$16 sps:$4 sm:$0xff]  }
  0x42   :  { %1883 = vmatmul.mubr.bf16.vlgmr.msra.gmra.mrb[0].mxu0 %v3786_v13  ;;  %2088 = vmatmul.mubr.bf16.vlgmr.msra.gmra.mrb[0].mxu1 %v3786_v13 }
  0x43   :  { %1892 = vmatpush1.bf16.msra.mxu0 %v3139_v12  ;;  %2097 = vmatpush1.bf16.msra.mxu1 %v3142_v14  ;;  %v3231_v12 = vld [vmem:[%s4603_s1 + $0x3e4] ss:$16 sps:$4 sm:$0xff]   ;;  %v3970_v14 = vrot.slane %v338_v9, %v3706_v49  ;;  %v3310_v9 = vld [vmem:[%s4603_s1 + $0x588] ss:$16 sps:$4 sm:$0xff]  }
  0x44   :  { %1893 = vmatprep.subr.bf16.mxu0 %v3147_v15  ;;  %2098 = vmatprep.subr.bf16.mxu1 %v3150_v16  ;;  %v3229_v15 = vld [vmem:[%s4603_s1 + $0x3e0] ss:$16 sps:$4 sm:$0xff]   ;;  %v3232_v16 = vld [vmem:[%s4603_s1 + $0x3e8] ss:$16 sps:$4 sm:$0xff]  }
  0x45   :  { %1923 = vmatprep.mubr.bf16.mxu0 %v385_v17  ;;  %2128 = vmatprep.mubr.bf16.mxu1 %v385_v17  ;;  %v3237_v17 = vld [vmem:[%s4603_s1 + $0x404] ss:$16 sps:$4 sm:$0xff]  }
  0x47   :  { %1894 = vmatpush1.bf16.msra.mxu0 %v3145_v18  ;;  %2099 = vmatpush1.bf16.msra.mxu1 %v3148_v19  ;;  %v3240_v18 = vld [vmem:[%s4603_s1 + $0x40c] ss:$16 sps:$4 sm:$0xff]   ;;  %v354_v19 = vcombine.high %v3970_v14, %v3970_v14 }
  0x48   :  { %1895 = vmatprep.subr.bf16.mxu0 %v3153_v20  ;;  %2100 = vmatprep.subr.bf16.mxu1 %v3156_v21  ;;  %v3235_v20 = vld [vmem:[%s4603_s1 + $0x400] ss:$16 sps:$4 sm:$0xff]   ;;  %v383_v21 = vcombine.high %v3786_v13, %v3786_v13 }
  0x49   :  { %v3241_v13 = vld [vmem:[%s4603_s1 + $0x420] ss:$16 sps:$4 sm:$0xff]  }
  0x4b   :  { %1896 = vmatpush1.bf16.msra.mxu0 %v3151_v22  ;;  %2101 = vmatpush1.bf16.msra.mxu1 %v3154_v23  ;;  %v3238_v22 = vld [vmem:[%s4603_s1 + $0x408] ss:$16 sps:$4 sm:$0xff]   ;;  %v3243_v23 = vld [vmem:[%s4603_s1 + $0x424] ss:$16 sps:$4 sm:$0xff]  }
  0x4c   :  { %1897 = vmatprep.subr.bf16.mxu0 %v3159_v24  ;;  %2102 = vmatprep.subr.bf16.mxu1 %v3162_v25  ;;  %v3246_v24 = vld [vmem:[%s4603_s1 + $0x42c] ss:$16 sps:$4 sm:$0xff]   ;;  %v4001_v25 = vrot.slane %v354_v19, %v3706_v49  ;;  %v3327_v19 = vld [vmem:[%s4603_s1 + $0x5e4] ss:$16 sps:$4 sm:$0xff]  }
  0x4f   :  { %1898 = vmatpush1.bf16.msra.mxu0 %v3157_v26  ;;  %2103 = vmatpush1.bf16.msra.mxu1 %v3160_v27  ;;  %v3244_v26 = vld [vmem:[%s4603_s1 + $0x428] ss:$16 sps:$4 sm:$0xff]   ;;  %v3249_v27 = vld [vmem:[%s4603_s1 + $0x444] ss:$16 sps:$4 sm:$0xff]  }
  0x50   :  { %1899 = vmatprep.subr.bf16.mxu0 %v3165_v28  ;;  %2104 = vmatprep.subr.bf16.mxu1 %v3168_v29  ;;  %v3252_v28 = vld [vmem:[%s4603_s1 + $0x44c] ss:$16 sps:$4 sm:$0xff]   ;;  %v3247_v29 = vld [vmem:[%s4603_s1 + $0x440] ss:$16 sps:$4 sm:$0xff]  }
  0x53   :  { %1900 = vmatpush1.bf16.msra.mxu0 %v3163_v30  ;;  %2105 = vmatpush1.bf16.msra.mxu1 %v3166_v31  ;;  %v3250_v30 = vld [vmem:[%s4603_s1 + $0x448] ss:$16 sps:$4 sm:$0xff]   ;;  %v3255_v31 = vld [vmem:[%s4603_s1 + $0x464] ss:$16 sps:$4 sm:$0xff]  }
  0x54   :  { %1901 = vmatprep.subr.bf16.mxu0 %v3171_v32  ;;  %2106 = vmatprep.subr.bf16.mxu1 %v3174_v33  ;;  %v3258_v32 = vld [vmem:[%s4603_s1 + $0x46c] ss:$16 sps:$4 sm:$0xff]   ;;  %v3253_v33 = vld [vmem:[%s4603_s1 + $0x460] ss:$16 sps:$4 sm:$0xff]  }
  0x57   :  { %1902 = vmatpush1.bf16.msra.mxu0 %v3169_v34  ;;  %2107 = vmatpush1.bf16.msra.mxu1 %v3172_v35  ;;  %v3256_v34 = vld [vmem:[%s4603_s1 + $0x468] ss:$16 sps:$4 sm:$0xff]   ;;  %v3261_v35 = vld [vmem:[%s4603_s1 + $0x484] ss:$16 sps:$4 sm:$0xff]  }
  0x58   :  { %1903 = vmatprep.subr.bf16.mxu0 %v3177_v36  ;;  %2108 = vmatprep.subr.bf16.mxu1 %v3180_v37  ;;  %v3264_v36 = vld [vmem:[%s4603_s1 + $0x48c] ss:$16 sps:$4 sm:$0xff]   ;;  %v3259_v37 = vld [vmem:[%s4603_s1 + $0x480] ss:$16 sps:$4 sm:$0xff]  }
  0x5b   :  { %1904 = vmatpush1.bf16.msra.mxu0 %v3175_v38  ;;  %2109 = vmatpush1.bf16.msra.mxu1 %v3178_v39  ;;  %v3262_v38 = vld [vmem:[%s4603_s1 + $0x488] ss:$16 sps:$4 sm:$0xff]   ;;  %v3267_v39 = vld [vmem:[%s4603_s1 + $0x4a4] ss:$16 sps:$4 sm:$0xff]  }
  0x5c   :  { %1905 = vmatprep.subr.bf16.mxu0 %v3183_v40  ;;  %2110 = vmatprep.subr.bf16.mxu1 %v3186_v41  ;;  %v3270_v40 = vld [vmem:[%s4603_s1 + $0x4ac] ss:$16 sps:$4 sm:$0xff]   ;;  %v3265_v41 = vld [vmem:[%s4603_s1 + $0x4a0] ss:$16 sps:$4 sm:$0xff]  }
  0x5f   :  { %1906 = vmatpush1.bf16.msra.mxu0 %v3181_v43  ;;  %2111 = vmatpush1.bf16.msra.mxu1 %v3184_v44  ;;  %v3268_v43 = vld [vmem:[%s4603_s1 + $0x4a8] ss:$16 sps:$4 sm:$0xff]   ;;  %v3273_v44 = vld [vmem:[%s4603_s1 + $0x4c4] ss:$16 sps:$4 sm:$0xff]  }
  0x60   :  { %1907 = vmatprep.subr.bf16.mxu0 %v3189_v45  ;;  %2112 = vmatprep.subr.bf16.mxu1 %v3192_v46  ;;  %v3276_v45 = vld [vmem:[%s4603_s1 + $0x4cc] ss:$16 sps:$4 sm:$0xff]   ;;  %v3271_v46 = vld [vmem:[%s4603_s1 + $0x4c0] ss:$16 sps:$4 sm:$0xff]  }
  0x63   :  { %1908 = vmatpush1.bf16.msra.mxu0 %v3187_v47  ;;  %2113 = vmatpush1.bf16.msra.mxu1 %v3190_v48  ;;  %v3274_v47 = vld [vmem:[%s4603_s1 + $0x4c8] ss:$16 sps:$4 sm:$0xff]   ;;  %v3279_v48 = vld [vmem:[%s4603_s1 + $0x4e4] ss:$16 sps:$4 sm:$0xff]  }
  0x64   :  { %1909 = vmatprep.subr.bf16.mxu0 %v3195_v50  ;;  %2114 = vmatprep.subr.bf16.mxu1 %v3198_v51  ;;  %v3282_v50 = vld [vmem:[%s4603_s1 + $0x4ec] ss:$16 sps:$4 sm:$0xff]   ;;  %v3277_v51 = vld [vmem:[%s4603_s1 + $0x4e0] ss:$16 sps:$4 sm:$0xff]  }
  0x67   :  { %1910 = vmatpush1.bf16.msra.mxu0 %v3193_v53  ;;  %2115 = vmatpush1.bf16.msra.mxu1 %v3196_v54  ;;  %v3280_v53 = vld [vmem:[%s4603_s1 + $0x4e8] ss:$16 sps:$4 sm:$0xff]   ;;  %v3285_v54 = vld [vmem:[%s4603_s1 + $0x504] ss:$16 sps:$4 sm:$0xff]  }
  0x68   :  { %1911 = vmatprep.subr.bf16.mxu0 %v3201_v55  ;;  %2116 = vmatprep.subr.bf16.mxu1 %v3204_v56  ;;  %v3288_v55 = vld [vmem:[%s4603_s1 + $0x50c] ss:$16 sps:$4 sm:$0xff]   ;;  %v3283_v56 = vld [vmem:[%s4603_s1 + $0x500] ss:$16 sps:$4 sm:$0xff]  }
  0x6b   :  { %1912 = vmatpush1.bf16.msra.mxu0 %v3199_v57  ;;  %2117 = vmatpush1.bf16.msra.mxu1 %v3202_v58  ;;  %v3286_v57 = vld [vmem:[%s4603_s1 + $0x508] ss:$16 sps:$4 sm:$0xff]   ;;  %v3291_v58 = vld [vmem:[%s4603_s1 + $0x524] ss:$16 sps:$4 sm:$0xff]  }
  0x6c   :  { %1913 = vmatprep.subr.bf16.mxu0 %v3207_v59  ;;  %2118 = vmatprep.subr.bf16.mxu1 %v3210_v60  ;;  %v3294_v59 = vld [vmem:[%s4603_s1 + $0x52c] ss:$16 sps:$4 sm:$0xff]   ;;  %v3289_v60 = vld [vmem:[%s4603_s1 + $0x520] ss:$16 sps:$4 sm:$0xff]  }
  0x6f   :  { %1914 = vmatpush1.bf16.msra.mxu0 %v3205_v61  ;;  %2119 = vmatpush1.bf16.msra.mxu1 %v3208_v62  ;;  %v3292_v61 = vld [vmem:[%s4603_s1 + $0x528] ss:$16 sps:$4 sm:$0xff]   ;;  %v3297_v62 = vld [vmem:[%s4603_s1 + $0x544] ss:$16 sps:$4 sm:$0xff]  }
  0x70   :  { %1915 = vmatprep.subr.bf16.mxu0 %v3213_v63  ;;  %2120 = vmatprep.subr.bf16.mxu1 %v3216_v0  ;;  %v3300_v63 = vld [vmem:[%s4603_s1 + $0x54c] ss:$16 sps:$4 sm:$0xff]   ;;  %v3295_v0 = vld [vmem:[%s4603_s1 + $0x540] ss:$16 sps:$4 sm:$0xff]  }
  0x73   :  { %1916 = vmatpush1.bf16.msra.mxu0 %v3211_v1  ;;  %2121 = vmatpush1.bf16.msra.mxu1 %v3214_v2  ;;  %v3298_v1 = vld [vmem:[%s4603_s1 + $0x548] ss:$16 sps:$4 sm:$0xff]   ;;  %v3303_v2 = vld [vmem:[%s4603_s1 + $0x564] ss:$16 sps:$4 sm:$0xff]  }
  0x74   :  { %1917 = vmatprep.subr.bf16.mxu0 %v3219_v3  ;;  %2122 = vmatprep.subr.bf16.mxu1 %v3222_v4  ;;  %v3306_v3 = vld [vmem:[%s4603_s1 + $0x56c] ss:$16 sps:$4 sm:$0xff]   ;;  %v3301_v4 = vld [vmem:[%s4603_s1 + $0x560] ss:$16 sps:$4 sm:$0xff]  }
  0x77   :  { %1918 = vmatpush1.bf16.msra.mxu0 %v3217_v5  ;;  %2123 = vmatpush1.bf16.msra.mxu1 %v3220_v6  ;;  %v3304_v5 = vld [vmem:[%s4603_s1 + $0x568] ss:$16 sps:$4 sm:$0xff]   ;;  %v3309_v6 = vld [vmem:[%s4603_s1 + $0x584] ss:$16 sps:$4 sm:$0xff]  }
  0x78   :  { %1919 = vmatprep.subr.bf16.mxu0 %v3225_v7  ;;  %2124 = vmatprep.subr.bf16.mxu1 %v3228_v8  ;;  %v3312_v7 = vld [vmem:[%s4603_s1 + $0x58c] ss:$16 sps:$4 sm:$0xff]   ;;  %v3307_v8 = vld [vmem:[%s4603_s1 + $0x580] ss:$16 sps:$4 sm:$0xff]  }
  0x7b   :  { %1920 = vmatpush1.bf16.msra.mxu0 %v3223_v10  ;;  %2125 = vmatpush1.bf16.msra.mxu1 %v3226_v11  ;;  %v3315_v10 = vld [vmem:[%s4603_s1 + $0x5a4] ss:$16 sps:$4 sm:$0xff]   ;;  %v3318_v11 = vld [vmem:[%s4603_s1 + $0x5ac] ss:$16 sps:$4 sm:$0xff]  }
  0x7c   :  { %1921 = vmatprep.subr.bf16.mxu0 %v3231_v12  ;;  %2126 = vmatprep.subr.bf16.mxu1 %v3234_v52  ;;  %v3313_v12 = vld [vmem:[%s4603_s1 + $0x5a0] ss:$16 sps:$4 sm:$0xff]   ;;  %v3316_v52 = vld [vmem:[%s4603_s1 + $0x5a8] ss:$16 sps:$4 sm:$0xff]  }
  0x7f   :  { %1922 = vmatpush1.bf16.msra.mxu0 %v3229_v15  ;;  %2127 = vmatpush1.bf16.msra.mxu1 %v3232_v16  ;;  %v3321_v15 = vld [vmem:[%s4603_s1 + $0x5c4] ss:$16 sps:$4 sm:$0xff]   ;;  %v3324_v16 = vld [vmem:[%s4603_s1 + $0x5cc] ss:$16 sps:$4 sm:$0xff]  }
  0x80   :  { %1932 = vmatprep.subr.bf16.mxu0 %v3237_v17  ;;  %2137 = vmatprep.subr.bf16.mxu1 %v3240_v18  ;;  %v3319_v17 = vld [vmem:[%s4603_s1 + $0x5c0] ss:$16 sps:$4 sm:$0xff]   ;;  %v3322_v18 = vld [vmem:[%s4603_s1 + $0x5c8] ss:$16 sps:$4 sm:$0xff]  }
  0x82   :  { %1924 = vmatmul.mubr.bf16.vlgmr.msra.gmra.mrb[0].mxu0 %v383_v21  ;;  %2129 = vmatmul.mubr.bf16.vlgmr.msra.gmra.mrb[0].mxu1 %v383_v21  ;;  %v3325_v21 = vld [vmem:[%s4603_s1 + $0x5e0] ss:$16 sps:$4 sm:$0xff]  }
  0x83   :  { %1933 = vmatpush1.bf16.msra.mxu0 %v3235_v20  ;;  %2138 = vmatpush1.bf16.msra.mxu1 %v3238_v22  ;;  %v3330_v20 = vld [vmem:[%s4603_s1 + $0x5ec] ss:$16 sps:$4 sm:$0xff]   ;;  %v3328_v22 = vld [vmem:[%s4603_s1 + $0x5e8] ss:$16 sps:$4 sm:$0xff]  }
  0x84   :  { %1934 = vmatprep.subr.bf16.mxu0 %v3243_v23  ;;  %2139 = vmatprep.subr.bf16.mxu1 %v3246_v24  ;;  %v3334_v23 = vld [vmem:[%s4603_s1 + $0x604] ss:$16 sps:$4 sm:$0xff]   ;;  %v3337_v24 = vld [vmem:[%s4603_s1 + $0x60c] ss:$16 sps:$4 sm:$0xff]  }
  0x85   :  { %1964 = vmatprep.mubr.bf16.mxu0 %v4001_v25  ;;  %2169 = vmatprep.mubr.bf16.mxu1 %v4001_v25 }
  0x87   :  { %1935 = vmatpush1.bf16.msra.mxu0 %v3241_v13  ;;  %2140 = vmatpush1.bf16.msra.mxu1 %v3244_v26  ;;  %v4187_v13 = vrot.slane %v3970_v14, %v3706_v49  ;;  %v3332_v26 = vld [vmem:[%s4603_s1 + $0x600] ss:$16 sps:$4 sm:$0xff]   ;;  %v3343_v14 = vld [vmem:[%s4603_s1 + $0x62c] ss:$16 sps:$4 sm:$0xff]  }
  0x88   :  { %1936 = vmatprep.subr.bf16.mxu0 %v3249_v27  ;;  %2141 = vmatprep.subr.bf16.mxu1 %v3252_v28  ;;  %v3335_v27 = vld [vmem:[%s4603_s1 + $0x608] ss:$16 sps:$4 sm:$0xff]   ;;  %v3340_v28 = vld [vmem:[%s4603_s1 + $0x624] ss:$16 sps:$4 sm:$0xff]  }
  0x8b   :  { %1937 = vmatpush1.bf16.msra.mxu0 %v3247_v29  ;;  %2142 = vmatpush1.bf16.msra.mxu1 %v3250_v30  ;;  %v3338_v29 = vld [vmem:[%s4603_s1 + $0x620] ss:$16 sps:$4 sm:$0xff]   ;;  %v386_v30 = vcombine.high %v4001_v25, %v4001_v25  ;;  %v3349_v25 = vld [vmem:[%s4603_s1 + $0x64c] ss:$16 sps:$4 sm:$0xff]  }
  0x8c   :  { %1938 = vmatprep.subr.bf16.mxu0 %v3255_v31  ;;  %2143 = vmatprep.subr.bf16.mxu1 %v3258_v32  ;;  %v3341_v31 = vld [vmem:[%s4603_s1 + $0x628] ss:$16 sps:$4 sm:$0xff]   ;;  %v3346_v32 = vld [vmem:[%s4603_s1 + $0x644] ss:$16 sps:$4 sm:$0xff]  }
  0x8f   :  { %1939 = vmatpush1.bf16.msra.mxu0 %v3253_v33  ;;  %2144 = vmatpush1.bf16.msra.mxu1 %v3256_v34  ;;  %v3344_v33 = vld [vmem:[%s4603_s1 + $0x640] ss:$16 sps:$4 sm:$0xff]   ;;  %v3347_v34 = vld [vmem:[%s4603_s1 + $0x648] ss:$16 sps:$4 sm:$0xff]  }
  0x90   :  { %1940 = vmatprep.subr.bf16.mxu0 %v3261_v35  ;;  %2145 = vmatprep.subr.bf16.mxu1 %v3264_v36  ;;  %v3352_v35 = vld [vmem:[%s4603_s1 + $0x664] ss:$16 sps:$4 sm:$0xff]   ;;  %v3355_v36 = vld [vmem:[%s4603_s1 + $0x66c] ss:$16 sps:$4 sm:$0xff]  }
  0x93   :  { %1941 = vmatpush1.bf16.msra.mxu0 %v3259_v37  ;;  %2146 = vmatpush1.bf16.msra.mxu1 %v3262_v38  ;;  %v3350_v37 = vld [vmem:[%s4603_s1 + $0x660] ss:$16 sps:$4 sm:$0xff]   ;;  %v3353_v38 = vld [vmem:[%s4603_s1 + $0x668] ss:$16 sps:$4 sm:$0xff]  }
  0x94   :  { %1942 = vmatprep.subr.bf16.mxu0 %v3267_v39  ;;  %2147 = vmatprep.subr.bf16.mxu1 %v3270_v40  ;;  %v3358_v39 = vld [vmem:[%s4603_s1 + $0x684] ss:$16 sps:$4 sm:$0xff]   ;;  %v3361_v40 = vld [vmem:[%s4603_s1 + $0x68c] ss:$16 sps:$4 sm:$0xff]  }
  0x97   :  { %1943 = vmatpush1.bf16.msra.mxu0 %v3265_v41  ;;  %2148 = vmatpush1.bf16.msra.mxu1 %v3268_v43  ;;  %v3356_v41 = vld [vmem:[%s4603_s1 + $0x680] ss:$16 sps:$4 sm:$0xff]   ;;  %v3359_v43 = vld [vmem:[%s4603_s1 + $0x688] ss:$16 sps:$4 sm:$0xff]  }
  0x98   :  { %1944 = vmatprep.subr.bf16.mxu0 %v3273_v44  ;;  %2149 = vmatprep.subr.bf16.mxu1 %v3276_v45  ;;  %v3364_v44 = vld [vmem:[%s4603_s1 + $0x6a4] ss:$16 sps:$4 sm:$0xff]   ;;  %v3367_v45 = vld [vmem:[%s4603_s1 + $0x6ac] ss:$16 sps:$4 sm:$0xff]  }
  0x9b   :  { %1945 = vmatpush1.bf16.msra.mxu0 %v3271_v46  ;;  %2150 = vmatpush1.bf16.msra.mxu1 %v3274_v47  ;;  %v3362_v46 = vld [vmem:[%s4603_s1 + $0x6a0] ss:$16 sps:$4 sm:$0xff]   ;;  %v3365_v47 = vld [vmem:[%s4603_s1 + $0x6a8] ss:$16 sps:$4 sm:$0xff]  }
  0x9c   :  { %1946 = vmatprep.subr.bf16.mxu0 %v3279_v48  ;;  %2151 = vmatprep.subr.bf16.mxu1 %v3282_v50  ;;  %v3370_v48 = vld [vmem:[%s4603_s1 + $0x6c4] ss:$16 sps:$4 sm:$0xff]   ;;  %v3373_v50 = vld [vmem:[%s4603_s1 + $0x6cc] ss:$16 sps:$4 sm:$0xff]  }
  0x9f   :  { %1947 = vmatpush1.bf16.msra.mxu0 %v3277_v51  ;;  %2152 = vmatpush1.bf16.msra.mxu1 %v3280_v53  ;;  %v3368_v51 = vld [vmem:[%s4603_s1 + $0x6c0] ss:$16 sps:$4 sm:$0xff]   ;;  %v3371_v53 = vld [vmem:[%s4603_s1 + $0x6c8] ss:$16 sps:$4 sm:$0xff]  }
  0xa0   :  { %1948 = vmatprep.subr.bf16.mxu0 %v3285_v54  ;;  %2153 = vmatprep.subr.bf16.mxu1 %v3288_v55  ;;  %v3376_v54 = vld [vmem:[%s4603_s1 + $0x6e4] ss:$16 sps:$4 sm:$0xff]   ;;  %v3379_v55 = vld [vmem:[%s4603_s1 + $0x6ec] ss:$16 sps:$4 sm:$0xff]  }
  0xa3   :  { %1949 = vmatpush1.bf16.msra.mxu0 %v3283_v56  ;;  %2154 = vmatpush1.bf16.msra.mxu1 %v3286_v57  ;;  %v3374_v56 = vld [vmem:[%s4603_s1 + $0x6e0] ss:$16 sps:$4 sm:$0xff]   ;;  %v3377_v57 = vld [vmem:[%s4603_s1 + $0x6e8] ss:$16 sps:$4 sm:$0xff]  }
  0xa4   :  { %1950 = vmatprep.subr.bf16.mxu0 %v3291_v58  ;;  %2155 = vmatprep.subr.bf16.mxu1 %v3294_v59  ;;  %v3382_v58 = vld [vmem:[%s4603_s1 + $0x704] ss:$16 sps:$4 sm:$0xff]   ;;  %v3385_v59 = vld [vmem:[%s4603_s1 + $0x70c] ss:$16 sps:$4 sm:$0xff]  }
  0xa7   :  { %1951 = vmatpush1.bf16.msra.mxu0 %v3289_v60  ;;  %2156 = vmatpush1.bf16.msra.mxu1 %v3292_v61 }
  0xa8   :  { %1952 = vmatprep.subr.bf16.mxu0 %v3297_v62  ;;  %2157 = vmatprep.subr.bf16.mxu1 %v3300_v63 }
  0xab   :  { %1953 = vmatpush1.bf16.msra.mxu0 %v3295_v0  ;;  %2158 = vmatpush1.bf16.msra.mxu1 %v3298_v1 }
  0xac   :  { %1954 = vmatprep.subr.bf16.mxu0 %v3303_v2  ;;  %2159 = vmatprep.subr.bf16.mxu1 %v3306_v3 }
  0xaf   :  { %1955 = vmatpush1.bf16.msra.mxu0 %v3301_v4  ;;  %2160 = vmatpush1.bf16.msra.mxu1 %v3304_v5 }
  0xb0   :  { %1956 = vmatprep.subr.bf16.mxu0 %v3309_v6  ;;  %2161 = vmatprep.subr.bf16.mxu1 %v3312_v7 }
  0xb3   :  { %1957 = vmatpush1.bf16.msra.mxu0 %v3307_v8  ;;  %2162 = vmatpush1.bf16.msra.mxu1 %v3310_v9 }
  0xb4   :  { %1958 = vmatprep.subr.bf16.mxu0 %v3315_v10  ;;  %2163 = vmatprep.subr.bf16.mxu1 %v3318_v11 }
  0xb7   :  { %1959 = vmatpush1.bf16.msra.mxu0 %v3313_v12  ;;  %2164 = vmatpush1.bf16.msra.mxu1 %v3316_v52 }
  0xb8   :  { %1960 = vmatprep.subr.bf16.mxu0 %v3321_v15  ;;  %2165 = vmatprep.subr.bf16.mxu1 %v3324_v16 }
  0xbb   :  { %1961 = vmatpush1.bf16.msra.mxu0 %v3319_v17  ;;  %2166 = vmatpush1.bf16.msra.mxu1 %v3322_v18 }
  0xbc   :  { %1962 = vmatprep.subr.bf16.mxu0 %v3327_v19  ;;  %2167 = vmatprep.subr.bf16.mxu1 %v3330_v20 }
  0xbf   :  { %1963 = vmatpush1.bf16.msra.mxu0 %v3325_v21  ;;  %2168 = vmatpush1.bf16.msra.mxu1 %v3328_v22 }
  0xc0   :  { %1973 = vmatprep.subr.bf16.mxu0 %v3334_v23  ;;  %2178 = vmatprep.subr.bf16.mxu1 %v3337_v24 }
  0xc2   :  { %1965 = vmatmul.mubr.bf16.vlgmr.msra.gmra.mrb[0].mxu0 %v4187_v13  ;;  %2170 = vmatmul.mubr.bf16.vlgmr.msra.gmra.mrb[0].mxu1 %v4187_v13 }
  0xc3   :  { %1974 = vmatpush1.bf16.msra.mxu0 %v3332_v26  ;;  %2179 = vmatpush1.bf16.msra.mxu1 %v3335_v27 }
  0xc4   :  { %1975 = vmatprep.subr.bf16.mxu0 %v3340_v28  ;;  %2180 = vmatprep.subr.bf16.mxu1 %v3343_v14 }
  0xc5   :  { %2005 = vmatprep.mubr.bf16.mxu0 %v386_v30  ;;  %2210 = vmatprep.mubr.bf16.mxu1 %v386_v30 }
  0xc7   :  { %1976 = vmatpush1.bf16.msra.mxu0 %v3338_v29  ;;  %2181 = vmatpush1.bf16.msra.mxu1 %v3341_v31 }
  0xc8   :  { %1977 = vmatprep.subr.bf16.mxu0 %v3346_v32  ;;  %2182 = vmatprep.subr.bf16.mxu1 %v3349_v25 }
  0xcb   :  { %1978 = vmatpush1.bf16.msra.mxu0 %v3344_v33  ;;  %2183 = vmatpush1.bf16.msra.mxu1 %v3347_v34 }
  0xcc   :  { %1979 = vmatprep.subr.bf16.mxu0 %v3352_v35  ;;  %2184 = vmatprep.subr.bf16.mxu1 %v3355_v36 }
  0xcf   :  { %1980 = vmatpush1.bf16.msra.mxu0 %v3350_v37  ;;  %2185 = vmatpush1.bf16.msra.mxu1 %v3353_v38 }
  0xd0   :  { %1981 = vmatprep.subr.bf16.mxu0 %v3358_v39  ;;  %2186 = vmatprep.subr.bf16.mxu1 %v3361_v40 }
  0xd3   :  { %1982 = vmatpush1.bf16.msra.mxu0 %v3356_v41  ;;  %2187 = vmatpush1.bf16.msra.mxu1 %v3359_v43 }
  0xd4   :  { %1983 = vmatprep.subr.bf16.mxu0 %v3364_v44  ;;  %2188 = vmatprep.subr.bf16.mxu1 %v3367_v45 }
  0xd7   :  { %1984 = vmatpush1.bf16.msra.mxu0 %v3362_v46  ;;  %2189 = vmatpush1.bf16.msra.mxu1 %v3365_v47 }
  0xd8   :  { %1985 = vmatprep.subr.bf16.mxu0 %v3370_v48  ;;  %2190 = vmatprep.subr.bf16.mxu1 %v3373_v50 }
  0xdb   :  { %1986 = vmatpush1.bf16.msra.mxu0 %v3368_v51  ;;  %2191 = vmatpush1.bf16.msra.mxu1 %v3371_v53 }
  0xdc   :  { %1987 = vmatprep.subr.bf16.mxu0 %v3376_v54  ;;  %2192 = vmatprep.subr.bf16.mxu1 %v3379_v55 }
  0xdd   :  { %12 = vsyncpa [#allocation3], 0  ;;  %v3380_v60 = vld [vmem:[%s4603_s1 + $0x700] ss:$16 sps:$4 sm:$0xff]   ;;  %v3383_v61 = vld [vmem:[%s4603_s1 + $0x708] ss:$16 sps:$4 sm:$0xff]   ;;  %v384_v29 = vcombine.high %v4187_v13, %v4187_v13 }
  0xde   :  { %v3388_v62 = vld [vmem:[%s4603_s1 + $0x724] ss:$16 sps:$4 sm:$0xff]   ;;  %v3391_v63 = vld [vmem:[%s4603_s1 + $0x72c] ss:$16 sps:$4 sm:$0xff]   ;;  %v3386_v0 = vld [vmem:[%s4603_s1 + $0x720] ss:$16 sps:$4 sm:$0xff]  }
  0xdf   :  { %1988 = vmatpush1.bf16.msra.mxu0 %v3374_v56  ;;  %2193 = vmatpush1.bf16.msra.mxu1 %v3377_v57  ;;  %v3389_v1 = vld [vmem:[%s4603_s1 + $0x728] ss:$16 sps:$4 sm:$0xff]   ;;  %v3394_v2 = vld [vmem:[%s4603_s1 + $0x744] ss:$16 sps:$4 sm:$0xff]   ;;  %v3397_v3 = vld [vmem:[%s4603_s1 + $0x74c] ss:$16 sps:$4 sm:$0xff]  }
  0xe0   :  { %1989 = vmatprep.subr.bf16.mxu0 %v3382_v58  ;;  %2194 = vmatprep.subr.bf16.mxu1 %v3385_v59  ;;  %v3392_v4 = vld [vmem:[%s4603_s1 + $0x740] ss:$16 sps:$4 sm:$0xff]   ;;  %v3395_v5 = vld [vmem:[%s4603_s1 + $0x748] ss:$16 sps:$4 sm:$0xff]   ;;  %v3400_v6 = vld [vmem:[%s4603_s1 + $0x764] ss:$16 sps:$4 sm:$0xff]  }
  0xe1   :  { %v3403_v7 = vld [vmem:[%s4603_s1 + $0x76c] ss:$16 sps:$4 sm:$0xff]   ;;  %v3398_v8 = vld [vmem:[%s4603_s1 + $0x760] ss:$16 sps:$4 sm:$0xff]   ;;  %v3401_v9 = vld [vmem:[%s4603_s1 + $0x768] ss:$16 sps:$4 sm:$0xff]  }
  0xe2   :  { %v3406_v10 = vld [vmem:[%s4603_s1 + $0x784] ss:$16 sps:$4 sm:$0xff]   ;;  %v3409_v11 = vld [vmem:[%s4603_s1 + $0x78c] ss:$16 sps:$4 sm:$0xff]   ;;  %v3404_v12 = vld [vmem:[%s4603_s1 + $0x780] ss:$16 sps:$4 sm:$0xff]  }
  0xe3   :  { %1990 = vmatpush1.bf16.msra.mxu0 %v3380_v60  ;;  %2195 = vmatpush1.bf16.msra.mxu1 %v3383_v61  ;;  %v3407_v52 = vld [vmem:[%s4603_s1 + $0x788] ss:$16 sps:$4 sm:$0xff]   ;;  %v3412_v15 = vld [vmem:[%s4603_s1 + $0x7a4] ss:$16 sps:$4 sm:$0xff]   ;;  %v3415_v16 = vld [vmem:[%s4603_s1 + $0x7ac] ss:$16 sps:$4 sm:$0xff]  }
  0xe4   :  { %1991 = vmatprep.subr.bf16.mxu0 %v3388_v62  ;;  %2196 = vmatprep.subr.bf16.mxu1 %v3391_v63  ;;  %v3410_v17 = vld [vmem:[%s4603_s1 + $0x7a0] ss:$16 sps:$4 sm:$0xff]   ;;  %v3413_v18 = vld [vmem:[%s4603_s1 + $0x7a8] ss:$16 sps:$4 sm:$0xff]   ;;  %v3418_v19 = vld [vmem:[%s4603_s1 + $0x7c4] ss:$16 sps:$4 sm:$0xff]  }
  0xe5   :  { %v3421_v20 = vld [vmem:[%s4603_s1 + $0x7cc] ss:$16 sps:$4 sm:$0xff]   ;;  %v3416_v21 = vld [vmem:[%s4603_s1 + $0x7c0] ss:$16 sps:$4 sm:$0xff]   ;;  %v3419_v22 = vld [vmem:[%s4603_s1 + $0x7c8] ss:$16 sps:$4 sm:$0xff]  }
  0xe6   :  { %v3424_v23 = vld [vmem:[%s4603_s1 + $0x7e4] ss:$16 sps:$4 sm:$0xff]   ;;  %v3427_v24 = vld [vmem:[%s4603_s1 + $0x7ec] ss:$16 sps:$4 sm:$0xff]   ;;  %v3422_v26 = vld [vmem:[%s4603_s1 + $0x7e0] ss:$16 sps:$4 sm:$0xff]  }
  0xe7   :  { %1992 = vmatpush1.bf16.msra.mxu0 %v3386_v0  ;;  %2197 = vmatpush1.bf16.msra.mxu1 %v3389_v1  ;;  %v3425_v27 = vld [vmem:[%s4603_s1 + $0x7e8] ss:$16 sps:$4 sm:$0xff]   ;;  %v3430_v28 = vld [vmem:[%s4603_s1 + $0x804] ss:$16 sps:$4 sm:$0xff]   ;;  %v3433_v14 = vld [vmem:[%s4603_s1 + $0x80c] ss:$16 sps:$4 sm:$0xff]  }
  0xe8   :  { %1993 = vmatprep.subr.bf16.mxu0 %v3394_v2  ;;  %2198 = vmatprep.subr.bf16.mxu1 %v3397_v3  ;;  %v3428_v30 = vld [vmem:[%s4603_s1 + $0x800] ss:$16 sps:$4 sm:$0xff]   ;;  %v3431_v31 = vld [vmem:[%s4603_s1 + $0x808] ss:$16 sps:$4 sm:$0xff]   ;;  %v3436_v32 = vld [vmem:[%s4603_s1 + $0x824] ss:$16 sps:$4 sm:$0xff]  }
  0xe9   :  { %v3439_v13 = vld [vmem:[%s4603_s1 + $0x82c] ss:$16 sps:$4 sm:$0xff]   ;;  %v3434_v25 = vld [vmem:[%s4603_s1 + $0x820] ss:$16 sps:$4 sm:$0xff]   ;;  %v3437_v33 = vld [vmem:[%s4603_s1 + $0x828] ss:$16 sps:$4 sm:$0xff]  }
  0xea   :  { %v3442_v34 = vld [vmem:[%s4603_s1 + $0x844] ss:$16 sps:$4 sm:$0xff]   ;;  %v3445_v35 = vld [vmem:[%s4603_s1 + $0x84c] ss:$16 sps:$4 sm:$0xff]   ;;  %v3533_v36 = vmov 0   ;;  %s3534_s13 = smov [#allocation2]  }
  0xeb   :  { %1994 = vmatpush1.bf16.msra.mxu0 %v3392_v4  ;;  %2199 = vmatpush1.bf16.msra.mxu1 %v3395_v5  ;;  %v3440_v37 = vld [vmem:[%s4603_s1 + $0x840] ss:$16 sps:$4 sm:$0xff]   ;;  %v3443_v38 = vld [vmem:[%s4603_s1 + $0x848] ss:$16 sps:$4 sm:$0xff]   ;;  %v3448_v39 = vld [vmem:[%s4603_s1 + $0x864] ss:$16 sps:$4 sm:$0xff]  }
  0xec   :  { %1995 = vmatprep.subr.bf16.mxu0 %v3400_v6  ;;  %2200 = vmatprep.subr.bf16.mxu1 %v3403_v7  ;;  %v3451_v40 = vld [vmem:[%s4603_s1 + $0x86c] ss:$16 sps:$4 sm:$0xff]   ;;  %v3446_v41 = vld [vmem:[%s4603_s1 + $0x860] ss:$16 sps:$4 sm:$0xff]   ;;  %v3449_v43 = vld [vmem:[%s4603_s1 + $0x868] ss:$16 sps:$4 sm:$0xff]  }
  0xed   :  { %v3454_v44 = vld [vmem:[%s4603_s1 + $0x884] ss:$16 sps:$4 sm:$0xff]   ;;  %v3457_v45 = vld [vmem:[%s4603_s1 + $0x88c] ss:$16 sps:$4 sm:$0xff]   ;;  %v3452_v46 = vld [vmem:[%s4603_s1 + $0x880] ss:$16 sps:$4 sm:$0xff]  }
  0xee   :  { %v3455_v47 = vld [vmem:[%s4603_s1 + $0x888] ss:$16 sps:$4 sm:$0xff]   ;;  %v3460_v48 = vld [vmem:[%s4603_s1 + $0x8a4] ss:$16 sps:$4 sm:$0xff]   ;;  %v3463_v50 = vld [vmem:[%s4603_s1 + $0x8ac] ss:$16 sps:$4 sm:$0xff]  }
  0xef   :  { %1996 = vmatpush1.bf16.msra.mxu0 %v3398_v8  ;;  %2201 = vmatpush1.bf16.msra.mxu1 %v3401_v9  ;;  %v3458_v51 = vld [vmem:[%s4603_s1 + $0x8a0] ss:$16 sps:$4 sm:$0xff]   ;;  %v3461_v53 = vld [vmem:[%s4603_s1 + $0x8a8] ss:$16 sps:$4 sm:$0xff]   ;;  %v3466_v54 = vld [vmem:[%s4603_s1 + $0x8c4] ss:$16 sps:$4 sm:$0xff]  }
  0xf0   :  { %1997 = vmatprep.subr.bf16.mxu0 %v3406_v10  ;;  %2202 = vmatprep.subr.bf16.mxu1 %v3409_v11  ;;  %v3469_v55 = vld [vmem:[%s4603_s1 + $0x8cc] ss:$16 sps:$4 sm:$0xff]   ;;  %v3464_v56 = vld [vmem:[%s4603_s1 + $0x8c0] ss:$16 sps:$4 sm:$0xff]   ;;  %v3467_v57 = vld [vmem:[%s4603_s1 + $0x8c8] ss:$16 sps:$4 sm:$0xff]  }
  0xf1   :  { %v3472_v58 = vld [vmem:[%s4603_s1 + $0x8e4] ss:$16 sps:$4 sm:$0xff]   ;;  %v3475_v59 = vld [vmem:[%s4603_s1 + $0x8ec] ss:$16 sps:$4 sm:$0xff]   ;;  %v3470_v60 = vld [vmem:[%s4603_s1 + $0x8e0] ss:$16 sps:$4 sm:$0xff]  }
  0xf2   :  { %v3473_v61 = vld [vmem:[%s4603_s1 + $0x8e8] ss:$16 sps:$4 sm:$0xff]   ;;  %v3476_v63 = vld [vmem:[%s4605_s3 + $0x40] sm:$0xff]   ;;  %v3484_v7 = vld [vmem:[%s4605_s3 + $0x50] sm:$0xff]   ;;  %s2625_s14 = sshll.u32 %s3534_s13, 4  ;;  %vm2611_vm0 = vcmask 91136   ;;  %s2626_s14 = int_to_ptr.vmem [resolvable:$true] %s2625_s14 }
  0xf3   :  { %1998 = vmatpush1.bf16.msra.mxu0 %v3404_v12  ;;  %2203 = vmatpush1.bf16.msra.mxu1 %v3407_v52  ;;  %v2637_v62 = vld.sshfl [vmem:[%s4602_s0 + $0x8] sm:$0x1 pattern:$0x75316420]  ;;  %v3477_v0 = vld [vmem:[%s4605_s3 + $0xc0] sm:$0xff]   ;;  %v3485_v8 = vld [vmem:[%s4605_s3 + $0xd0] sm:$0xff]   ;;  %p3513_p1 = scmp.lt.s32.totalorder %s2626_s14, %s2626_s14 }
  0xf4   :  { %1999 = vmatprep.subr.bf16.mxu0 %v3412_v15  ;;  %2204 = vmatprep.subr.bf16.mxu1 %v3415_v16  ;;  %v400_v1 = vrot.slane %v2637_v62, %v3706_v49  ;;  %v3478_v2 = vld [vmem:[%s4605_s3] sm:$0xff]   ;;  %v3480_v4 = vld [vmem:[%s4605_s3 + $0x48] sm:$0xff]   ;;  %v3486_v9 = vld [vmem:[%s4605_s3 + $0x10] sm:$0xff]   ;;  %s3535_s15 = smov 116   ;;  %s3508_s16 = scalar_lea.vmem %s2626_s14, 32 }
  0xf5   :  { %v3479_v3 = vld [vmem:[%s4605_s3 + $0x80] sm:$0xff]   ;;  %v3481_v49 = vld [vmem:[%s4605_s3 + $0xc8] sm:$0xff]   ;;  %v3487_v10 = vld [vmem:[%s4605_s3 + $0x90] sm:$0xff]   ;;  %p3509_p0 = scmp.ne.s32.totalorder %s2626_s14, %s3508_s16  ;;  %p3514_p2 = scmp.lt.s32.totalorder %s3508_s16, %s3508_s16 }
  0xf6   :  { %v3482_v5 = vld [vmem:[%s4605_s3 + $0x8] sm:$0xff]   ;;  %v3488_v11 = vld [vmem:[%s4605_s3 + $0x58] sm:$0xff]   ;;  %v3492_v16 = vld [vmem:[%s4605_s3 + $0x60] sm:$0xff]  }
  0xf7   :  { %2000 = vmatpush1.bf16.msra.mxu0 %v3410_v17  ;;  %2205 = vmatpush1.bf16.msra.mxu1 %v3413_v18  ;;  %v3483_v6 = vld [vmem:[%s4605_s3 + $0x88] sm:$0xff]   ;;  %v3489_v12 = vld [vmem:[%s4605_s3 + $0xd8] sm:$0xff]   ;;  %v3493_v17 = vld [vmem:[%s4605_s3 + $0xe0] sm:$0xff]   ;;  %p3515_p3 = por %p3514_p2, %p3513_p1 }
  0xf8   :  { %2001 = vmatprep.subr.bf16.mxu0 %v3418_v19  ;;  %2206 = vmatprep.subr.bf16.mxu1 %v3421_v20  ;;  %v3490_v52 = vld [vmem:[%s4605_s3 + $0x18] sm:$0xff]   ;;  %v3494_v18 = vld [vmem:[%s4605_s3 + $0x20] sm:$0xff]   ;;  %v3496_v20 = vld [vmem:[%s4605_s3 + $0x68] sm:$0xff]  }
  0xf9   :  { %v3491_v15 = vld [vmem:[%s4605_s3 + $0x98] sm:$0xff]   ;;  %v3495_v19 = vld [vmem:[%s4605_s3 + $0xa0] sm:$0xff]   ;;  %p3516_p4 = pnand %p3515_p3, %p3509_p0 }
  0xfb   :  { %2002 = vmatpush1.bf16.msra.mxu0 %v3416_v21  ;;  %2207 = vmatpush1.bf16.msra.mxu1 %v3419_v22  ;;  %v3497_v21 = vld [vmem:[%s4605_s3 + $0xe8] sm:$0xff]  }
  0xfc   :  { %2003 = vmatprep.subr.bf16.mxu0 %v3424_v23  ;;  %2208 = vmatprep.subr.bf16.mxu1 %v3427_v24  ;;  %v3498_v22 = vld [vmem:[%s4605_s3 + $0x28] sm:$0xff]   ;;  %v3500_v24 = vld [vmem:[%s4605_s3 + $0x70] sm:$0xff]  }
  0xfd   :  { %v3499_v23 = vld [vmem:[%s4605_s3 + $0xa8] sm:$0xff]  }
  0xff   :  { %2004 = vmatpush1.bf16.msra.mxu0 %v3422_v26  ;;  %2209 = vmatpush1.bf16.msra.mxu1 %v3425_v27  ;;  %v3501_v26 = vld [vmem:[%s4605_s3 + $0xf0] sm:$0xff]  }
 0x100   :  { %2014 = vmatprep.subr.bf16.mxu0 %v3430_v28  ;;  %2219 = vmatprep.subr.bf16.mxu1 %v3433_v14  ;;  %v3502_v27 = vld [vmem:[%s4605_s3 + $0x30] sm:$0xff]   ;;  %v3504_v14 = vld [vmem:[%s4605_s3 + $0x78] sm:$0xff]  }
 0x101   :  { %v3503_v28 = vld [vmem:[%s4605_s3 + $0xb0] sm:$0xff]  }
 0x102   :  { %2006 = vmatmul.mubr.bf16.vlgmr.msra.gmra.mrb[0].mxu0 %v384_v29  ;;  %2211 = vmatmul.mubr.bf16.vlgmr.msra.gmra.mrb[0].mxu1 %v384_v29  ;;  %v3505_v29 = vld [vmem:[%s4605_s3 + $0xf8] sm:$0xff]  }
 0x103   :  { %2015 = vmatpush1.bf16.msra.mxu0 %v3428_v30  ;;  %2220 = vmatpush1.bf16.msra.mxu1 %v3431_v31  ;;  %v3506_v30 = vld [vmem:[%s4605_s3 + $0x38] sm:$0xff]  }
 0x104   :  { %2016 = vmatprep.subr.bf16.mxu0 %v3436_v32  ;;  %2221 = vmatprep.subr.bf16.mxu1 %v3439_v13  ;;  %v3507_v31 = vld [vmem:[%s4605_s3 + $0xb8] sm:$0xff]   ;;  %v318_v32 = vsub.s32 0, %v3688_v42  ;;  %v326_v13 = vsub.s32 2, %v3688_v42 }
 0x105   :  { %2046 = vmatprep.mubr.bf16.mxu0 %v3533_v36  ;;  %2251 = vmatprep.mubr.bf16.mxu1 %v3533_v36 }
 0x107   :  { %2017 = vmatpush1.bf16.msra.mxu0 %v3434_v25  ;;  %2222 = vmatpush1.bf16.msra.mxu1 %v3437_v33  ;;  %v314_v25 = vld [vmem:[%s4604_s2] sm:$0xf]  ;;  %v322_v33 = vsub.s32 1, %v3688_v42 }
 0x108   :  { %2018 = vmatprep.subr.bf16.mxu0 %v3442_v34  ;;  %2223 = vmatprep.subr.bf16.mxu1 %v3445_v35  ;;  %v330_v34 = vsub.s32 3, %v3688_v42  ;;  %v319_v35 = vrot.slane %v314_v25, %v318_v32  ;;  %v327_v36 = vrot.slane %v314_v25, %v326_v13 }
 0x10b   :  { %2019 = vmatpush1.bf16.msra.mxu0 %v3440_v37  ;;  %2224 = vmatpush1.bf16.msra.mxu1 %v3443_v38  ;;  %v323_v37 = vrot.slane %v314_v25, %v322_v33  ;;  %v331_v38 = vrot.slane %v314_v25, %v330_v34 }
 0x10c   :  { %2020 = vmatprep.subr.bf16.mxu0 %v3448_v39  ;;  %2225 = vmatprep.subr.bf16.mxu1 %v3451_v40 }
 0x10f   :  { %2021 = vmatpush1.bf16.msra.mxu0 %v3446_v41  ;;  %2226 = vmatpush1.bf16.msra.mxu1 %v3449_v43 }
 0x110   :  { %2022 = vmatprep.subr.bf16.mxu0 %v3454_v44  ;;  %2227 = vmatprep.subr.bf16.mxu1 %v3457_v45 }
 0x113   :  { %2023 = vmatpush1.bf16.msra.mxu0 %v3452_v46  ;;  %2228 = vmatpush1.bf16.msra.mxu1 %v3455_v47 }
 0x114   :  { %2024 = vmatprep.subr.bf16.mxu0 %v3460_v48  ;;  %2229 = vmatprep.subr.bf16.mxu1 %v3463_v50 }
 0x117   :  { %2025 = vmatpush1.bf16.msra.mxu0 %v3458_v51  ;;  %2230 = vmatpush1.bf16.msra.mxu1 %v3461_v53 }
 0x118   :  { %2026 = vmatprep.subr.bf16.mxu0 %v3466_v54  ;;  %2231 = vmatprep.subr.bf16.mxu1 %v3469_v55 }
 0x11b   :  { %2027 = vmatpush1.bf16.msra.mxu0 %v3464_v56  ;;  %2232 = vmatpush1.bf16.msra.mxu1 %v3467_v57 }
 0x11c   :  { %2028 = vmatprep.subr.bf16.mxu0 %v3472_v58  ;;  %2233 = vmatprep.subr.bf16.mxu1 %v3475_v59 }
 0x11f   :  { %2029 = vmatpush1.bf16.msra.mxu0 %v3470_v60  ;;  %2234 = vmatpush1.bf16.msra.mxu1 %v3473_v61 }
 0x120   :  { %2959 = vmatprep.subr.bf16.mxu0 %v3476_v63  ;;  %2981 = vmatprep.subr.bf16.mxu1 %v3477_v0  ;;  %v2926_v63 = vld [vmem:[%s4606_s4] ss:$0 sm:$0xff] }
 0x122   :  { %2047 = vmatmul.mubr.bf16.vlgmr.msra.gmra.mrb[0].mxu0 %v400_v1  ;;  %2252 = vmatmul.mubr.bf16.vlgmr.msra.gmra.mrb[0].mxu1 %v400_v1 }
 0x123   :  { %2960 = vmatpush3.bf16.msra.mxu0 %v3478_v2  ;;  %2982 = vmatpush3.bf16.msra.mxu1 %v3479_v3 }
 0x124   :  { %2961 = vmatprep.subr.bf16.mxu0 %v3480_v4  ;;  %2983 = vmatprep.subr.bf16.mxu1 %v3481_v49 }
 0x127   :  { %2962 = vmatpush3.bf16.msra.mxu0 %v3482_v5  ;;  %2984 = vmatpush3.bf16.msra.mxu1 %v3483_v6 }
 0x128   :  { %2963 = vmatprep.subr.bf16.mxu0 %v3484_v7  ;;  %2985 = vmatprep.subr.bf16.mxu1 %v3485_v8 }
 0x12b   :  { %2964 = vmatpush3.bf16.msra.mxu0 %v3486_v9  ;;  %2986 = vmatpush3.bf16.msra.mxu1 %v3487_v10 }
 0x12c   :  { %2965 = vmatprep.subr.bf16.mxu0 %v3488_v11  ;;  %2987 = vmatprep.subr.bf16.mxu1 %v3489_v12 }
 0x12f   :  { %2966 = vmatpush3.bf16.msra.mxu0 %v3490_v52  ;;  %2988 = vmatpush3.bf16.msra.mxu1 %v3491_v15 }
 0x130   :  { %2967 = vmatprep.subr.bf16.mxu0 %v3492_v16  ;;  %2989 = vmatprep.subr.bf16.mxu1 %v3493_v17 }
 0x133   :  { %2968 = vmatpush3.bf16.msra.mxu0 %v3494_v18  ;;  %2990 = vmatpush3.bf16.msra.mxu1 %v3495_v19 }
 0x134   :  { %2969 = vmatprep.subr.bf16.mxu0 %v3496_v20  ;;  %2991 = vmatprep.subr.bf16.mxu1 %v3497_v21 }
 0x137   :  { %2970 = vmatpush3.bf16.msra.mxu0 %v3498_v22  ;;  %2992 = vmatpush3.bf16.msra.mxu1 %v3499_v23 }
 0x138   :  { %2971 = vmatprep.subr.bf16.mxu0 %v3500_v24  ;;  %2993 = vmatprep.subr.bf16.mxu1 %v3501_v26 }
 0x13b   :  { %2972 = vmatpush3.bf16.msra.mxu0 %v3502_v27  ;;  %2994 = vmatpush3.bf16.msra.mxu1 %v3503_v28 }
 0x13c   :  { %2973 = vmatprep.subr.bf16.mxu0 %v3504_v14  ;;  %2995 = vmatprep.subr.bf16.mxu1 %v3505_v29 }
 0x13f   :  { %2974 = vmatpush3.bf16.msra.mxu0 %v3506_v30  ;;  %2996 = vmatpush3.bf16.msra.mxu1 %v3507_v31 }
 0x1f5   :  { %v2048_v39 = vpop.f32.mrb[0].mxu0  ;;  %v2253_v40 = vpop.f32.mrb[0].mxu1 }
 0x1f6   :  { %v3003_v41 = vadd.f32 %v2048_v39, %v319_v35  ;;  %v3005_v43 = vadd.f32 %v2253_v40, %v327_v36  ;;  %v2050_v44 = vpop.f32.mrb[1].mxu0  ;;  %v2255_v45 = vpop.f32.mrb[1].mxu1 }
 0x1f7   :  { %v3004_v46 = vadd.f32 %v2050_v44, %v323_v37  ;;  %v3006_v47 = vadd.f32 %v2255_v45, %v331_v38  ;;  %v2052_v48 = vpop.f32.mrb[2].mxu0  ;;  %v2257_v50 = vpop.f32.mrb[2].mxu1 }
 0x1f8   :  { %v2260_v51 = vmax.f32 %v3003_v41, 0.0  ;;  %v2262_v53 = vmax.f32 %v3005_v43, 0.0  ;;  %v2053_v54 = vpop.f32.mrb[3].mxu0  ;;  %v2258_v55 = vpop.f32.mrb[3].mxu1 }
 0x1f9   :  { %v2261_v56 = vmax.f32 %v3004_v46, 0.0  ;;  %v2263_v42 = vmax.f32 %v3006_v47, 0.0 }
 0x1fa   :  { %v2264_v59 = vpack.c.bf16 %v2260_v51, %v2260_v51  ;;  %v2266_v60 = vpack.c.bf16 %v2262_v53, %v2262_v53 }
 0x1fb   :  { %v2265_v57 = vpack.c.bf16 %v2261_v56, %v2261_v56  ;;  %v2267_v58 = vpack.c.bf16 %v2263_v42, %v2263_v42 }
 0x1fd   :  { %2563 = vmatprep.mubr.bf16.mxu0 %v2265_v57  ;;  %2603 = vmatprep.mubr.bf16.mxu1 %v2267_v58 }
 0x1fe   :  { %2564 = vmatmul.mubr.bf16.vlgmr.msra.gmra.mrb[4].mxu0 %v2264_v59  ;;  %2604 = vmatmul.mubr.bf16.vlgmr.msra.gmra.mrb[4].mxu1 %v2266_v60 }
 0x2d1   :  { %v2975_v61 = vpop.f32.mrb[4].mxu0  ;;  %v2997_v62 = vpop.f32.mrb[4].mxu1 }
 0x2d2   :  { %v2976_v0 = vpop.f32.mrb[5].mxu0  ;;  %v2998_v1 = vpop.f32.mrb[5].mxu1 }
 0x2d3   :  { %v2977_v2 = vadd.f32 %v2976_v0, %v2975_v61  ;;  %v2999_v3 = vadd.f32 %v2998_v1, %v2997_v62  ;;  %v2978_v4 = vpop.f32.mrb[6].mxu0  ;;  %v3000_v49 = vpop.f32.mrb[6].mxu1 }
 0x2d4   :  { %v2979_v5 = vpop.f32.mrb[7].mxu0  ;;  %v3001_v6 = vpop.f32.mrb[7].mxu1 }
 0x2d5   :  { %v2566_v7 = vadd.f32 %v2977_v2, %v2926_v63 }
 0x2d7   :  { %v2606_v8 = vadd.f32 %v2999_v3, %v2566_v7 }
 0x2d9   :  { %2614 = vrot.lane.b32.xlu0 %v2606_v8, %s3535_s15  ;;  %2612 = vst.msk [vmem:[#allocation2] sm:$0x3] %vm2611_vm0, %v2606_v8 }
 0x2da   :  { %3519 = shalt.err (!%p3516_p4)
}
 0x2db   :  { %s3520_s18 = scalar_lea.hbm %s4607_s5, 32 }
 0x2dc   :  { %p3521_p5 = scmp.ne.s32.totalorder %s4607_s5, %s3520_s18  ;;  %p3524_p6 = scmp.lt.u32.totalorder %s3520_s18, %s4607_s5 }
 0x2de   :  { %p3526_p7 = pnand %p3524_p6, %p3521_p5 }
 0x2e0   :  { %3529 = shalt.err (!%p3526_p7)
}
 0x2e1   :  { %2628 = dma.vmem_to_hbm [thread:$0]  %s2626_s14, 32, %s4607_s5, [#allocation3]   ;;  %vm2617_vm1 = vcmask 1024  }
 0x34b   :  { %v2615_v9 = vpop.permute.xlu0 %2614 }
 0x34c   :  { %2618 = vst.msk [vmem:[%s4608_s6] sm:$0x3] %vm2617_vm1, %v2615_v9 }
 0x34d   :  { %3530 = dma.done.wait [#allocation3], 32  }
 0x34e   :  { %3531 = vsyncadd [#allocation3], 4294967264 }
 0x34f   :  { %2636 = vsyncpa [#allocation3], 1 }

</bundles_post_ra>
